<compile_context>
chip_gen: v5e
topology: v5e:2x2
jax: 0.10.0
libtpu: 0.0.40
codegen_flags: <defaults>
</compile_context>

<pallas_src>
import jax
import jax.numpy as jnp
from jax.experimental import pallas as pl
from jax.experimental.pallas import tpu as pltpu


def _round_up(x, m):
    return (x + m - 1) // m * m


# --------------------------------------------------------------------------
# Kernel
# --------------------------------------------------------------------------
def _decoder_kernel(emb_ref, hid_ref, enc_ref, eproj_ref, smask_ref, v_ref,
                    wah_ref, wih_e_ref, wih_w_ref, bih_ref, whh_ref, bhh_ref,
                    wfch_ref, wfcw_ref, wfce_ref, bo_ref,
                    pred_ref, hnew_ref, a_ref,
                    h_scr, w_scr):
    f32 = jnp.float32
    bf16 = jnp.bfloat16
    j = pl.program_id(0)

    # ---- attention + GRU: computed once, results cached in VMEM scratch ----
    @pl.when(j == 0)
    def _attention_and_gru():
        hid = hid_ref[...]                                    # [B, Hdp] f32
        hid_b = hid.astype(bf16)
        Hdp = hid.shape[1]

        # Bahdanau attention; enc @ Wae + b_a was hoisted to sequence prep.
        h_proj = jnp.dot(hid_b, wah_ref[...],
                         preferred_element_type=f32)          # [B, Hdp]
        energy = jnp.tanh(eproj_ref[...] + h_proj[:, None, :])  # [B, Sp, Hdp]
        # VPU multiply + XLU lane-reduce (padded Hd columns are zero in v).
        scores = jnp.sum(energy * v_ref[...].reshape(1, 1, Hdp), axis=-1)
        scores = scores + smask_ref[...]                      # mask padded S
        m = jnp.max(scores, axis=-1, keepdims=True)
        p = jnp.exp(scores - m)
        denom = jnp.sum(p, axis=-1, keepdims=True)
        a = p * pl.reciprocal(denom, approx=True)             # EUP slot
        a_ref[...] = a

        # weighted context: broadcast-mult + sublane reduce over S (f32).
        weighted = jnp.sum(a[:, :, None] * enc_ref[...].astype(f32), axis=1)
        weighted_b = weighted.astype(bf16)

        # single-step GRU (PyTorch gate order r, z, n); gate blocks were laid
        # out at Hdp-aligned column offsets in prepare_params, and the input
        # "concat" is two accumulated matmuls (no lane-dim concatenation).
        gi = (jnp.dot(emb_ref[...], wih_e_ref[...], preferred_element_type=f32)
              + jnp.dot(weighted_b, wih_w_ref[...], preferred_element_type=f32)
              + bih_ref[...])
        gh = jnp.dot(hid_b, whh_ref[...], preferred_element_type=f32) + bhh_ref[...]
        r = jax.nn.sigmoid(gi[:, :Hdp] + gh[:, :Hdp])
        z = jax.nn.sigmoid(gi[:, Hdp:2 * Hdp] + gh[:, Hdp:2 * Hdp])
        n = jnp.tanh(gi[:, 2 * Hdp:] + r * gh[:, 2 * Hdp:])
        h_new = (1.0 - z) * n + z * hid
        hnew_ref[...] = h_new
        h_scr[...] = h_new.astype(bf16)
        w_scr[...] = weighted_b

    # ---- fc_out vocab tile j: three accumulated MXU matmuls (no concat) ----
    pred_ref[...] = (
        jnp.dot(h_scr[...], wfch_ref[...], preferred_element_type=f32)
        + jnp.dot(w_scr[...], wfcw_ref[...], preferred_element_type=f32)
        + jnp.dot(emb_ref[...], wfce_ref[...], preferred_element_type=f32)
        + bo_ref[...])


# --------------------------------------------------------------------------
# Parameters
# --------------------------------------------------------------------------
def init_params(key, output_dim, emb_dim, enc_hid, dec_hid):
    """Deterministic synthetic parameters with PyTorch-native shapes."""
    E2 = 2 * enc_hid
    ks = jax.random.split(key, 10)

    def rnd(k, shape):
        return jax.random.normal(k, shape, jnp.float32) * 0.1

    return dict(
        embedding=rnd(ks[0], (output_dim, emb_dim)),            # nn.Embedding
        attn_w=rnd(ks[1], (dec_hid, dec_hid + E2)),             # attn Linear (cat(hidden, enc))
        attn_b=rnd(ks[2], (dec_hid,)),
        attn_v=rnd(ks[3], (1, dec_hid)),                        # v Linear (no bias)
        w_ih=rnd(ks[4], (3 * dec_hid, emb_dim + E2)),           # GRU weight_ih (cat(embedded, weighted))
        b_ih=rnd(ks[5], (3 * dec_hid,)),
        w_hh=rnd(ks[6], (3 * dec_hid, dec_hid)),                # GRU weight_hh
        b_hh=rnd(ks[7], (3 * dec_hid,)),
        fc_w=rnd(ks[8], (output_dim, dec_hid + E2 + emb_dim)),  # fc_out (cat(output, weighted, embedded))
        fc_b=rnd(ks[9], (output_dim,)),
    )


def prepare_params(params):
    """One-time weight prep: transpose, 128-pad, gate re-layout, bf16 cast.

    Hoisted out of the decode step so an autoregressive loop does not repay
    these HBM round-trips / relayouts every step.  All zero-padding is chosen
    so padded hidden columns stay exactly zero through the GRU recurrence.
    """
    f32, bf16 = jnp.float32, jnp.bfloat16
    emb_w = params['embedding']
    De = emb_w.shape[1]
    Hd = params['w_hh'].shape[1]
    E2 = params['attn_w'].shape[1] - Hd
    out_dim = params['fc_w'].shape[0]

    Hd_p = _round_up(Hd, 128)
    out_p = _round_up(out_dim, 128)

    def pad2(x, rows, cols):
        return jnp.pad(x, ((0, rows - x.shape[0]), (0, cols - x.shape[1])))

    # --- attention ---
    wah = pad2(params['attn_w'][:, :Hd].T, Hd_p, Hd_p).astype(bf16)   # [Hd_p, Hd_p]
    wae = pad2(params['attn_w'][:, Hd:].T, E2, Hd_p)                  # [E2, Hd_p] (prep-time only)
    ba = jnp.pad(params['attn_b'], (0, Hd_p - Hd)).reshape(1, Hd_p)   # folded into e_proj
    v = pad2(params['attn_v'], 1, Hd_p).astype(f32)                   # [1, Hd_p]

    # --- GRU: gate blocks (r, z, n) at Hd_p-aligned column offsets ---
    def gate_cols(w):        # [3Hd, K] -> [K, 3*Hd_p]
        blocks = [pad2(w[g * Hd:(g + 1) * Hd].T, w.shape[1], Hd_p) for g in range(3)]
        return jnp.concatenate(blocks, axis=1)

    w_ih_full = gate_cols(params['w_ih'])                 # [De+E2, 3Hd_p]
    w_ih_e = w_ih_full[:De].astype(bf16)                  # embedded segment
    w_ih_w = w_ih_full[De:].astype(bf16)                  # weighted segment
    w_hh = pad2(gate_cols(params['w_hh']), Hd_p, 3 * Hd_p).astype(bf16)

    def gate_bias(b):        # [3Hd] -> [1, 3Hd_p]
        segs = [jnp.pad(b[g * Hd:(g + 1) * Hd], (0, Hd_p - Hd)) for g in range(3)]
        return jnp.concatenate(segs).reshape(1, 3 * Hd_p).astype(f32)

    b_ih = gate_bias(params['b_ih'])
    b_hh = gate_bias(params['b_hh'])

    # --- fc_out split along (output, weighted, embedded) cat boundaries ---
    fct = params['fc_w'].T                                 # [Hd+E2+De, out]
    wfc_h = pad2(fct[:Hd], Hd_p, out_p).astype(bf16)
    wfc_w = pad2(fct[Hd:Hd + E2], E2, out_p).astype(bf16)
    wfc_e = pad2(fct[Hd + E2:], De, out_p).astype(bf16)
    fc_b = jnp.pad(params['fc_b'], (0, out_p - out_dim)).reshape(1, out_p).astype(f32)

    return dict(embedding=emb_w, wah=wah, wae=wae, ba=ba, v=v,
                w_ih_e=w_ih_e, w_ih_w=w_ih_w, b_ih=b_ih, w_hh=w_hh, b_hh=b_hh,
                wfc_h=wfc_h, wfc_w=wfc_w, wfc_e=wfc_e, fc_b=fc_b)


def prepare_encoder_outputs(encoder_outputs_seq_major, prepped, *, batch_pad=8):
    """Per-sequence prep (constant across decode steps).

    [S, B, E2] -> batch-major, padded to (B_p, S_p) and bf16, plus the hoisted
    encoder projection e_proj = enc @ Wae + b_a and a softmax mask for the
    padded sequence positions.  Returns (dict, seq_len).
    """
    S, B, E2 = encoder_outputs_seq_major.shape
    Hd_p = prepped['wah'].shape[0]
    S_p = _round_up(S, 128)
    B_p = _round_up(B, batch_pad)

    enc = jnp.transpose(encoder_outputs_seq_major, (1, 0, 2))        # [B, S, E2]
    enc = jnp.pad(enc, ((0, B_p - B), (0, S_p - S), (0, 0)))

    e_proj = (jnp.einsum('bse,eh->bsh', enc, prepped['wae'])
              + prepped['ba'].reshape(1, 1, Hd_p)).astype(jnp.float32)
    smask = jnp.where(jnp.arange(S_p) < S, 0.0, -1e30).reshape(1, S_p).astype(jnp.float32)

    return dict(enc=enc.astype(jnp.bfloat16), e_proj=e_proj, smask=smask), S


# --------------------------------------------------------------------------
# Per-step forward
# --------------------------------------------------------------------------
def decoder_forward(input_ids, hidden, enc_prep, prepped, *, seq_len):
    """input_ids [B] int32, hidden [B, Hd]; enc_prep from prepare_encoder_outputs."""
    f32, bf16 = jnp.float32, jnp.bfloat16
    enc, e_proj, smask = enc_prep['enc'], enc_prep['e_proj'], enc_prep['smask']

    B = input_ids.shape[0]
    Hd = hidden.shape[1]
    out_dim = prepped['embedding'].shape[0]

    B_p, S_p, E2 = enc.shape
    Hd_p = prepped['wah'].shape[0]
    out_p = prepped['wfc_h'].shape[1]
    # MXU-native vocab tile: 256 on v6e/v7x-sized vocabs, 128 otherwise (v5e MXU).
    TN = 256 if out_p % 256 == 0 else 128
    NJ = out_p // TN

    # Pad batch to the f32 sublane count and hidden to the padded width.
    ids_p = jnp.pad(input_ids, (0, B_p - B))
    hid_p = jnp.pad(hidden, ((0, B_p - B), (0, Hd_p - Hd)))
    # Embedding gather (dropout == identity in eval mode); bf16 matmul operand.
    emb = jnp.take(prepped['embedding'], ids_p, axis=0).astype(bf16)   # [B_p, De]
    De = emb.shape[1]

    const2 = lambda j: (0, 0)
    const3 = lambda j: (0, 0, 0)
    tile = lambda j: (0, j)

    grid_spec = pltpu.PrefetchScalarGridSpec(
        num_scalar_prefetch=0,
        grid=(NJ,),
        in_specs=[
            pl.BlockSpec((B_p, De), const2),            # emb
            pl.BlockSpec((B_p, Hd_p), const2),          # hidden (f32)
            pl.BlockSpec((B_p, S_p, E2), const3),       # enc (bf16)
            pl.BlockSpec((B_p, S_p, Hd_p), const3),     # e_proj (hoisted, f32)
            pl.BlockSpec((1, S_p), const2),             # softmax pad mask
            pl.BlockSpec((1, Hd_p), const2),            # v
            pl.BlockSpec((Hd_p, Hd_p), const2),         # W_a (hidden part)
            pl.BlockSpec((De, 3 * Hd_p), const2),       # GRU W_ih (embedded rows)
            pl.BlockSpec((E2, 3 * Hd_p), const2),       # GRU W_ih (weighted rows)
            pl.BlockSpec((1, 3 * Hd_p), const2),        # b_ih
            pl.BlockSpec((Hd_p, 3 * Hd_p), const2),     # GRU W_hh
            pl.BlockSpec((1, 3 * Hd_p), const2),        # b_hh
            pl.BlockSpec((Hd_p, TN), tile),             # fc_w (h_new rows), streamed
            pl.BlockSpec((E2, TN), tile),               # fc_w (weighted rows), streamed
            pl.BlockSpec((De, TN), tile),               # fc_w (embedded rows), streamed
            pl.BlockSpec((1, TN), tile),                # fc bias tile
        ],
        out_specs=(
            pl.BlockSpec((B_p, TN), tile),              # prediction tile (lane-dense)
            pl.BlockSpec((B_p, Hd_p), const2),          # new hidden
            pl.BlockSpec((B_p, S_p), const2),           # attention weights
        ),
        scratch_shapes=[
            pltpu.VMEM((B_p, Hd_p), bf16),              # h_new (bf16) for fc tiles
            pltpu.VMEM((B_p, E2), bf16),                # weighted (bf16) for fc tiles
        ],
    )

    pred_p, hnew_p, a_p = pl.pallas_call(
        _decoder_kernel,
        out_shape=(jax.ShapeDtypeStruct((B_p, out_p), f32),
                   jax.ShapeDtypeStruct((B_p, Hd_p), f32),
                   jax.ShapeDtypeStruct((B_p, S_p), f32)),
        grid_spec=grid_spec,
        compiler_params=pltpu.CompilerParams(
            # "arbitrary": the j==0 attention/GRU result is carried in scratch.
            dimension_semantics=("arbitrary",),
            # Explicit limit with headroom for v7x's 64 MiB physical VMEM.
            vmem_limit_bytes=48 * 1024 * 1024),
    )(emb, hid_p, enc, e_proj, smask,
      prepped['v'], prepped['wah'],
      prepped['w_ih_e'], prepped['w_ih_w'], prepped['b_ih'],
      prepped['w_hh'], prepped['b_hh'],
      prepped['wfc_h'], prepped['wfc_w'], prepped['wfc_e'], prepped['fc_b'])

    # Matches PyTorch return: (prediction, hidden.squeeze(0), a.squeeze(1))
    return pred_p[:B, :out_dim], hnew_p[:B, :Hd], a_p[:B, :seq_len]


decoder_forward_jit = jax.jit(decoder_forward, static_argnames=("seq_len",))


# --------------------------------------------------------------------------
# Pure-JAX reference (mirrors the PyTorch forward, seq-major enc input)
# --------------------------------------------------------------------------
def reference_forward(input_ids, hidden, encoder_outputs, params):
    Hd = hidden.shape[1]
    S = encoder_outputs.shape[0]
    embedded = params['embedding'][input_ids]                       # [B, De]
    enc = jnp.transpose(encoder_outputs, (1, 0, 2))                 # [B, S, E2]
    hid_rep = jnp.repeat(hidden[:, None, :], S, axis=1)             # [B, S, Hd]
    cat = jnp.concatenate([hid_rep, enc], axis=-1)
    energy = jnp.tanh(jnp.einsum('bsi,oi->bso', cat, params['attn_w'])
                      + params['attn_b'])
    scores = (energy @ params['attn_v'].T)[..., 0]                  # [B, S]
    a = jax.nn.softmax(scores, axis=1)
    weighted = jnp.einsum('bs,bse->be', a, enc)                     # [B, E2]
    x = jnp.concatenate([embedded, weighted], axis=1)
    gi = x @ params['w_ih'].T + params['b_ih']
    gh = hidden @ params['w_hh'].T + params['b_hh']
    r = jax.nn.sigmoid(gi[:, :Hd] + gh[:, :Hd])
    z = jax.nn.sigmoid(gi[:, Hd:2 * Hd] + gh[:, Hd:2 * Hd])
    n = jnp.tanh(gi[:, 2 * Hd:] + r * gh[:, 2 * Hd:])
    h_new = (1.0 - z) * n + z * hidden
    pred = (jnp.concatenate([h_new, weighted, embedded], axis=1)
            @ params['fc_w'].T + params['fc_b'])
    return pred, h_new, a


if __name__ == "__main__":
    B, S = 2, 8
    output_dim, emb_dim, enc_hid, dec_hid = 16, 8, 16, 32

    key = jax.random.PRNGKey(0)
    kp, ki, kh, ke = jax.random.split(key, 4)
    params = init_params(kp, output_dim, emb_dim, enc_hid, dec_hid)

    input_ids = jax.random.randint(ki, (B,), 0, output_dim)
    hidden = jax.random.normal(kh, (B, dec_hid), jnp.float32)
    encoder_outputs = jax.random.normal(ke, (S, B, 2 * enc_hid), jnp.float32)

    # One-time preparation (amortized across decode steps in a real loop).
    prepped = prepare_params(params)
    enc_prep, seq_len = prepare_encoder_outputs(encoder_outputs, prepped)

    pred, h_new, a = jax.block_until_ready(
        decoder_forward_jit(input_ids, hidden, enc_prep, prepped, seq_len=seq_len))

    rp, rh, ra = reference_forward(input_ids, hidden, encoder_outputs, params)
    assert pred.shape == (B, output_dim)
    assert h_new.shape == (B, dec_hid)
    assert a.shape == (B, S)
    # bf16 weights + approx softmax reciprocal => slightly looser tolerance.
    assert jnp.allclose(pred, rp, atol=2e-2, rtol=2e-2)
    assert jnp.allclose(h_new, rh, atol=2e-2, rtol=2e-2)
    assert jnp.allclose(a, ra, atol=2e-2, rtol=2e-2)

    print("KERNEL_OK")
</pallas_src>

<mosaic_0001>
module attributes {stable_mosaic.version = 11 : i64} {
  func.func @_decoder_kernel(%arg0: i32, %arg1: memref<8x8xbf16, #tpu.memory_space<vmem>>, %arg2: memref<8x128xf32, #tpu.memory_space<vmem>>, %arg3: memref<8x128x32xbf16, #tpu.memory_space<vmem>>, %arg4: memref<8x128x128xf32, #tpu.memory_space<vmem>>, %arg5: memref<1x128xf32, #tpu.memory_space<vmem>>, %arg6: memref<1x128xf32, #tpu.memory_space<vmem>>, %arg7: memref<128x128xbf16, #tpu.memory_space<vmem>>, %arg8: memref<8x384xbf16, #tpu.memory_space<vmem>>, %arg9: memref<32x384xbf16, #tpu.memory_space<vmem>>, %arg10: memref<1x384xf32, #tpu.memory_space<vmem>>, %arg11: memref<128x384xbf16, #tpu.memory_space<vmem>>, %arg12: memref<1x384xf32, #tpu.memory_space<vmem>>, %arg13: memref<128x128xbf16, #tpu.memory_space<vmem>>, %arg14: memref<32x128xbf16, #tpu.memory_space<vmem>>, %arg15: memref<8x128xbf16, #tpu.memory_space<vmem>>, %arg16: memref<1x128xf32, #tpu.memory_space<vmem>>, %arg17: memref<8x128xf32, #tpu.memory_space<vmem>>, %arg18: memref<8x128xf32, #tpu.memory_space<vmem>>, %arg19: memref<8x128xf32, #tpu.memory_space<vmem>>, %arg20: memref<8x128xbf16, #tpu.memory_space<vmem>>, %arg21: memref<8x32xbf16, #tpu.memory_space<vmem>>) attributes {dimension_semantics = [#tpu.dimension_semantics<arbitrary>], iteration_bounds = array<i64: 1>, scalar_prefetch = 0 : i64, scratch_operands = 2 : i64, tpu.core_type = #tpu.core_type<tc>, window_params = [{pipeline_mode = #tpu.pipeline_mode<synchronous>, transform_indices = @transform_0, window_bounds = array<i64: 8, 8>}, {pipeline_mode = #tpu.pipeline_mode<synchronous>, transform_indices = @transform_1, window_bounds = array<i64: 8, 128>}, {pipeline_mode = #tpu.pipeline_mode<synchronous>, transform_indices = @transform_2, window_bounds = array<i64: 8, 128, 32>}, {pipeline_mode = #tpu.pipeline_mode<synchronous>, transform_indices = @transform_3, window_bounds = array<i64: 8, 128, 128>}, {pipeline_mode = #tpu.pipeline_mode<synchronous>, transform_indices = @transform_4, window_bounds = array<i64: 1, 128>}, {pipeline_mode = #tpu.pipeline_mode<synchronous>, transform_indices = @transform_5, window_bounds = array<i64: 1, 128>}, {pipeline_mode = #tpu.pipeline_mode<synchronous>, transform_indices = @transform_6, window_bounds = array<i64: 128, 128>}, {pipeline_mode = #tpu.pipeline_mode<synchronous>, transform_indices = @transform_7, window_bounds = array<i64: 8, 384>}, {pipeline_mode = #tpu.pipeline_mode<synchronous>, transform_indices = @transform_8, window_bounds = array<i64: 32, 384>}, {pipeline_mode = #tpu.pipeline_mode<synchronous>, transform_indices = @transform_9, window_bounds = array<i64: 1, 384>}, {pipeline_mode = #tpu.pipeline_mode<synchronous>, transform_indices = @transform_10, window_bounds = array<i64: 128, 384>}, {pipeline_mode = #tpu.pipeline_mode<synchronous>, transform_indices = @transform_11, window_bounds = array<i64: 1, 384>}, {transform_indices = @transform_12, window_bounds = array<i64: 128, 128>}, {transform_indices = @transform_13, window_bounds = array<i64: 32, 128>}, {transform_indices = @transform_14, window_bounds = array<i64: 8, 128>}, {transform_indices = @transform_15, window_bounds = array<i64: 1, 128>}, {transform_indices = @transform_16, window_bounds = array<i64: 8, 128>}, {pipeline_mode = #tpu.pipeline_mode<synchronous>, transform_indices = @transform_17, window_bounds = array<i64: 8, 128>}, {pipeline_mode = #tpu.pipeline_mode<synchronous>, transform_indices = @transform_18, window_bounds = array<i64: 8, 128>}]} {
    %c0_i32 = arith.constant 0 : i32
    %0 = arith.cmpi eq, %arg0, %c0_i32 : i32
    %1 = arith.extui %0 : i1 to i32
    %c0_i32_0 = arith.constant 0 : i32
    %2 = arith.cmpi ne, %1, %c0_i32_0 : i32
    scf.if %2 {
      %c0_18 = arith.constant 0 : index
      %c0_19 = arith.constant 0 : index
      %18 = vector.load %arg2[%c0_18, %c0_19] : memref<8x128xf32, #tpu.memory_space<vmem>>, vector<8x128xf32>
      %19 = arith.truncf %18 : vector<8x128xf32> to vector<8x128xbf16>
      %c0_20 = arith.constant 0 : index
      %c0_21 = arith.constant 0 : index
      %20 = vector.load %arg7[%c0_20, %c0_21] : memref<128x128xbf16, #tpu.memory_space<vmem>>, vector<128x128xbf16>
      %cst_22 = arith.constant dense<0.000000e+00> : vector<8x128xf32>
      %21 = tpu.matmul %19, %20, %cst_22 {dimension_numbers = #tpu.dot_dimension_numbers<[1], [0], [0], [1], [0, 0, 1, 1], [], []>} : vector<8x128xbf16>, vector<128x128xbf16>, vector<8x128xf32> -> vector<8x128xf32>
      %c0_23 = arith.constant 0 : index
      %c0_24 = arith.constant 0 : index
      %c0_25 = arith.constant 0 : index
      %22 = vector.load %arg4[%c0_23, %c0_24, %c0_25] : memref<8x128x128xf32, #tpu.memory_space<vmem>>, vector<8x128x128xf32>
      %23 = vector.shape_cast %21 : vector<8x128xf32> to vector<8x1x128xf32>
      %24 = vector.broadcast %23 : vector<8x1x128xf32> to vector<8x128x128xf32>
      %25 = arith.addf %22, %24 : vector<8x128x128xf32>
      %26 = math.tanh %25 : vector<8x128x128xf32>
      %c0_26 = arith.constant 0 : index
      %c0_27 = arith.constant 0 : index
      %27 = vector.load %arg6[%c0_26, %c0_27] : memref<1x128xf32, #tpu.memory_space<vmem>>, vector<1x128xf32>
      %28 = vector.shape_cast %27 : vector<1x128xf32> to vector<1x1x128xf32>
      %29 = vector.broadcast %28 : vector<1x1x128xf32> to vector<8x128x128xf32>
      %30 = arith.mulf %26, %29 : vector<8x128x128xf32>
      %cst_28 = arith.constant dense<0.000000e+00> : vector<8x128xf32>
      %31 = vector.multi_reduction <add>, %30, %cst_28 [2] : vector<8x128x128xf32> to vector<8x128xf32>
      %c0_29 = arith.constant 0 : index
      %c0_30 = arith.constant 0 : index
      %32 = vector.load %arg5[%c0_29, %c0_30] : memref<1x128xf32, #tpu.memory_space<vmem>>, vector<1x128xf32>
      %33 = vector.broadcast %32 : vector<1x128xf32> to vector<8x128xf32>
      %34 = arith.addf %31, %33 : vector<8x128xf32>
      %cst_31 = arith.constant dense<0xFF800000> : vector<8xf32>
      %35 = vector.multi_reduction <maximumf>, %34, %cst_31 [1] : vector<8x128xf32> to vector<8xf32>
      %36 = vector.shape_cast %35 : vector<8xf32> to vector<8x1xf32>
      %37 = vector.broadcast %36 : vector<8x1xf32> to vector<8x128xf32>
      %38 = arith.subf %34, %37 : vector<8x128xf32>
      %39 = math.exp %38 : vector<8x128xf32>
      %cst_32 = arith.constant dense<0.000000e+00> : vector<8xf32>
      %40 = vector.multi_reduction <add>, %39, %cst_32 [1] : vector<8x128xf32> to vector<8xf32>
      %41 = vector.shape_cast %40 : vector<8xf32> to vector<8x1xf32>
      %42 = tpu.reciprocal %41 {approx = true} : vector<8x1xf32> -> vector<8x1xf32>
      %43 = vector.broadcast %42 : vector<8x1xf32> to vector<8x128xf32>
      %44 = arith.mulf %39, %43 : vector<8x128xf32>
      %c0_33 = arith.constant 0 : index
      %c0_34 = arith.constant 0 : index
      %45 = vector.load %arg19[%c0_33, %c0_34] : memref<8x128xf32, #tpu.memory_space<vmem>>, vector<8x128xf32>
      tpu.vector_store %arg19[%c0_33, %c0_34], %44 {strides = array<i32>} : memref<8x128xf32, #tpu.memory_space<vmem>>, vector<8x128xf32>,
      %46 = vector.shape_cast %44 : vector<8x128xf32> to vector<8x128x1xf32>
      %c0_35 = arith.constant 0 : index
      %c0_36 = arith.constant 0 : index
      %c0_37 = arith.constant 0 : index
      %47 = vector.load %arg3[%c0_35, %c0_36, %c0_37] : memref<8x128x32xbf16, #tpu.memory_space<vmem>>, vector<8x128x32xbf16>
      %48 = arith.extf %47 : vector<8x128x32xbf16> to vector<8x128x32xf32>
      %49 = vector.broadcast %46 : vector<8x128x1xf32> to vector<8x128x32xf32>
      %50 = arith.mulf %49, %48 : vector<8x128x32xf32>
      %cst_38 = arith.constant dense<0.000000e+00> : vector<8x32xf32>
      %51 = vector.multi_reduction <add>, %50, %cst_38 [1] : vector<8x128x32xf32> to vector<8x32xf32>
      %52 = arith.truncf %51 : vector<8x32xf32> to vector<8x32xbf16>
      %c0_39 = arith.constant 0 : index
      %c0_40 = arith.constant 0 : index
      %53 = vector.load %arg1[%c0_39, %c0_40] : memref<8x8xbf16, #tpu.memory_space<vmem>>, vector<8x8xbf16>
      %c0_41 = arith.constant 0 : index
      %c0_42 = arith.constant 0 : index
      %54 = vector.load %arg8[%c0_41, %c0_42] : memref<8x384xbf16, #tpu.memory_space<vmem>>, vector<8x384xbf16>
      %cst_43 = arith.constant dense<0.000000e+00> : vector<8x384xf32>
      %55 = tpu.matmul %53, %54, %cst_43 {dimension_numbers = #tpu.dot_dimension_numbers<[1], [0], [0], [1], [0, 0, 1, 1], [], []>} : vector<8x8xbf16>, vector<8x384xbf16>, vector<8x384xf32> -> vector<8x384xf32>
      %c0_44 = arith.constant 0 : index
      %c0_45 = arith.constant 0 : index
      %56 = vector.load %arg9[%c0_44, %c0_45] : memref<32x384xbf16, #tpu.memory_space<vmem>>, vector<32x384xbf16>
      %cst_46 = arith.constant dense<0.000000e+00> : vector<8x384xf32>
      %57 = tpu.matmul %52, %56, %cst_46 {dimension_numbers = #tpu.dot_dimension_numbers<[1], [0], [0], [1], [0, 0, 1, 1], [], []>} : vector<8x32xbf16>, vector<32x384xbf16>, vector<8x384xf32> -> vector<8x384xf32>
      %58 = arith.addf %55, %57 : vector<8x384xf32>
      %c0_47 = arith.constant 0 : index
      %c0_48 = arith.constant 0 : index
      %59 = vector.load %arg10[%c0_47, %c0_48] : memref<1x384xf32, #tpu.memory_space<vmem>>, vector<1x384xf32>
      %60 = vector.broadcast %59 : vector<1x384xf32> to vector<8x384xf32>
      %61 = arith.addf %58, %60 : vector<8x384xf32>
      %c0_49 = arith.constant 0 : index
      %c0_50 = arith.constant 0 : index
      %62 = vector.load %arg11[%c0_49, %c0_50] : memref<128x384xbf16, #tpu.memory_space<vmem>>, vector<128x384xbf16>
      %cst_51 = arith.constant dense<0.000000e+00> : vector<8x384xf32>
      %63 = tpu.matmul %19, %62, %cst_51 {dimension_numbers = #tpu.dot_dimension_numbers<[1], [0], [0], [1], [0, 0, 1, 1], [], []>} : vector<8x128xbf16>, vector<128x384xbf16>, vector<8x384xf32> -> vector<8x384xf32>
      %c0_52 = arith.constant 0 : index
      %c0_53 = arith.constant 0 : index
      %64 = vector.load %arg12[%c0_52, %c0_53] : memref<1x384xf32, #tpu.memory_space<vmem>>, vector<1x384xf32>
      %65 = vector.broadcast %64 : vector<1x384xf32> to vector<8x384xf32>
      %66 = arith.addf %63, %65 : vector<8x384xf32>
      %67 = vector.extract_strided_slice %61 {offsets = [0, 0], sizes = [8, 128], strides = [1, 1]} : vector<8x384xf32> to vector<8x128xf32>
      %68 = vector.extract_strided_slice %66 {offsets = [0, 0], sizes = [8, 128], strides = [1, 1]} : vector<8x384xf32> to vector<8x128xf32>
      %69 = arith.addf %67, %68 : vector<8x128xf32>
      %70 = arith.negf %69 : vector<8x128xf32>
      %71 = math.exp %70 : vector<8x128xf32>
      %cst_54 = arith.constant 1.000000e+00 : f32
      %72 = vector.broadcast %cst_54 : f32 to vector<8x128xf32>
      %73 = arith.addf %72, %71 : vector<8x128xf32>
      %74 = arith.divf %72, %73 : vector<8x128xf32>
      %75 = vector.extract_strided_slice %61 {offsets = [0, 128], sizes = [8, 128], strides = [1, 1]} : vector<8x384xf32> to vector<8x128xf32>
      %76 = vector.extract_strided_slice %66 {offsets = [0, 128], sizes = [8, 128], strides = [1, 1]} : vector<8x384xf32> to vector<8x128xf32>
      %77 = arith.addf %75, %76 : vector<8x128xf32>
      %78 = arith.negf %77 : vector<8x128xf32>
      %79 = math.exp %78 : vector<8x128xf32>
      %cst_55 = arith.constant 1.000000e+00 : f32
      %80 = vector.broadcast %cst_55 : f32 to vector<8x128xf32>
      %81 = arith.addf %80, %79 : vector<8x128xf32>
      %82 = arith.divf %80, %81 : vector<8x128xf32>
      %83 = vector.extract_strided_slice %61 {offsets = [0, 256], sizes = [8, 128], strides = [1, 1]} : vector<8x384xf32> to vector<8x128xf32>
      %84 = vector.extract_strided_slice %66 {offsets = [0, 256], sizes = [8, 128], strides = [1, 1]} : vector<8x384xf32> to vector<8x128xf32>
      %85 = arith.mulf %74, %84 : vector<8x128xf32>
      %86 = arith.addf %83, %85 : vector<8x128xf32>
      %87 = math.tanh %86 : vector<8x128xf32>
      %cst_56 = arith.constant 1.000000e+00 : f32
      %88 = vector.broadcast %cst_56 : f32 to vector<8x128xf32>
      %89 = arith.subf %88, %82 : vector<8x128xf32>
      %90 = arith.mulf %89, %87 : vector<8x128xf32>
      %91 = arith.mulf %82, %18 : vector<8x128xf32>
      %92 = arith.addf %90, %91 : vector<8x128xf32>
      %c0_57 = arith.constant 0 : index
      %c0_58 = arith.constant 0 : index
      %93 = vector.load %arg18[%c0_57, %c0_58] : memref<8x128xf32, #tpu.memory_space<vmem>>, vector<8x128xf32>
      tpu.vector_store %arg18[%c0_57, %c0_58], %92 {strides = array<i32>} : memref<8x128xf32, #tpu.memory_space<vmem>>, vector<8x128xf32>,
      %94 = arith.truncf %92 : vector<8x128xf32> to vector<8x128xbf16>
      %c0_59 = arith.constant 0 : index
      %c0_60 = arith.constant 0 : index
      %95 = vector.load %arg20[%c0_59, %c0_60] : memref<8x128xbf16, #tpu.memory_space<vmem>>, vector<8x128xbf16>
      tpu.vector_store %arg20[%c0_59, %c0_60], %94 {strides = array<i32>} : memref<8x128xbf16, #tpu.memory_space<vmem>>, vector<8x128xbf16>,
      %c0_61 = arith.constant 0 : index
      %c0_62 = arith.constant 0 : index
      %96 = vector.load %arg21[%c0_61, %c0_62] : memref<8x32xbf16, #tpu.memory_space<vmem>>, vector<8x32xbf16>
      tpu.vector_store %arg21[%c0_61, %c0_62], %52 {strides = array<i32>} : memref<8x32xbf16, #tpu.memory_space<vmem>>, vector<8x32xbf16>,
    } else {
    }
    %c0 = arith.constant 0 : index
    %c0_1 = arith.constant 0 : index
    %3 = vector.load %arg20[%c0, %c0_1] : memref<8x128xbf16, #tpu.memory_space<vmem>>, vector<8x128xbf16>
    %c0_2 = arith.constant 0 : index
    %c0_3 = arith.constant 0 : index
    %4 = vector.load %arg13[%c0_2, %c0_3] : memref<128x128xbf16, #tpu.memory_space<vmem>>, vector<128x128xbf16>
    %cst = arith.constant dense<0.000000e+00> : vector<8x128xf32>
    %5 = tpu.matmul %3, %4, %cst {dimension_numbers = #tpu.dot_dimension_numbers<[1], [0], [0], [1], [0, 0, 1, 1], [], []>} : vector<8x128xbf16>, vector<128x128xbf16>, vector<8x128xf32> -> vector<8x128xf32>
    %c0_4 = arith.constant 0 : index
    %c0_5 = arith.constant 0 : index
    %6 = vector.load %arg21[%c0_4, %c0_5] : memref<8x32xbf16, #tpu.memory_space<vmem>>, vector<8x32xbf16>
    %c0_6 = arith.constant 0 : index
    %c0_7 = arith.constant 0 : index
    %7 = vector.load %arg14[%c0_6, %c0_7] : memref<32x128xbf16, #tpu.memory_space<vmem>>, vector<32x128xbf16>
    %cst_8 = arith.constant dense<0.000000e+00> : vector<8x128xf32>
    %8 = tpu.matmul %6, %7, %cst_8 {dimension_numbers = #tpu.dot_dimension_numbers<[1], [0], [0], [1], [0, 0, 1, 1], [], []>} : vector<8x32xbf16>, vector<32x128xbf16>, vector<8x128xf32> -> vector<8x128xf32>
    %9 = arith.addf %5, %8 : vector<8x128xf32>
    %c0_9 = arith.constant 0 : index
    %c0_10 = arith.constant 0 : index
    %10 = vector.load %arg1[%c0_9, %c0_10] : memref<8x8xbf16, #tpu.memory_space<vmem>>, vector<8x8xbf16>
    %c0_11 = arith.constant 0 : index
    %c0_12 = arith.constant 0 : index
    %11 = vector.load %arg15[%c0_11, %c0_12] : memref<8x128xbf16, #tpu.memory_space<vmem>>, vector<8x128xbf16>
    %cst_13 = arith.constant dense<0.000000e+00> : vector<8x128xf32>
    %12 = tpu.matmul %10, %11, %cst_13 {dimension_numbers = #tpu.dot_dimension_numbers<[1], [0], [0], [1], [0, 0, 1, 1], [], []>} : vector<8x8xbf16>, vector<8x128xbf16>, vector<8x128xf32> -> vector<8x128xf32>
    %13 = arith.addf %9, %12 : vector<8x128xf32>
    %c0_14 = arith.constant 0 : index
    %c0_15 = arith.constant 0 : index
    %14 = vector.load %arg16[%c0_14, %c0_15] : memref<1x128xf32, #tpu.memory_space<vmem>>, vector<1x128xf32>
    %15 = vector.broadcast %14 : vector<1x128xf32> to vector<8x128xf32>
    %16 = arith.addf %13, %15 : vector<8x128xf32>
    %c0_16 = arith.constant 0 : index
    %c0_17 = arith.constant 0 : index
    %17 = vector.load %arg17[%c0_16, %c0_17] : memref<8x128xf32, #tpu.memory_space<vmem>>, vector<8x128xf32>
    tpu.vector_store %arg17[%c0_16, %c0_17], %16 {strides = array<i32>} : memref<8x128xf32, #tpu.memory_space<vmem>>, vector<8x128xf32>,
    return
  }
  func.func @transform_0(%arg0: i32) -> (i32, i32) {
    %c0_i32 = arith.constant 0 : i32
    %c0_i32_0 = arith.constant 0 : i32
    %c0_i32_1 = arith.constant 0 : i32
    return %c0_i32, %c0_i32_0 : i32, i32
  }
  func.func @transform_1(%arg0: i32) -> (i32, i32) {
    %c0_i32 = arith.constant 0 : i32
    %c0_i32_0 = arith.constant 0 : i32
    %c0_i32_1 = arith.constant 0 : i32
    return %c0_i32, %c0_i32_0 : i32, i32
  }
  func.func @transform_2(%arg0: i32) -> (i32, i32, i32) {
    %c0_i32 = arith.constant 0 : i32
    %c0_i32_0 = arith.constant 0 : i32
    %c0_i32_1 = arith.constant 0 : i32
    %c0_i32_2 = arith.constant 0 : i32
    return %c0_i32, %c0_i32_0, %c0_i32_1 : i32, i32, i32
  }
  func.func @transform_3(%arg0: i32) -> (i32, i32, i32) {
    %c0_i32 = arith.constant 0 : i32
    %c0_i32_0 = arith.constant 0 : i32
    %c0_i32_1 = arith.constant 0 : i32
    %c0_i32_2 = arith.constant 0 : i32
    return %c0_i32, %c0_i32_0, %c0_i32_1 : i32, i32, i32
  }
  func.func @transform_4(%arg0: i32) -> (i32, i32) {
    %c0_i32 = arith.constant 0 : i32
    %c0_i32_0 = arith.constant 0 : i32
    %c0_i32_1 = arith.constant 0 : i32
    return %c0_i32, %c0_i32_0 : i32, i32
  }
  func.func @transform_5(%arg0: i32) -> (i32, i32) {
    %c0_i32 = arith.constant 0 : i32
    %c0_i32_0 = arith.constant 0 : i32
    %c0_i32_1 = arith.constant 0 : i32
    return %c0_i32, %c0_i32_0 : i32, i32
  }
  func.func @transform_6(%arg0: i32) -> (i32, i32) {
    %c0_i32 = arith.constant 0 : i32
    %c0_i32_0 = arith.constant 0 : i32
    %c0_i32_1 = arith.constant 0 : i32
    return %c0_i32, %c0_i32_0 : i32, i32
  }
  func.func @transform_7(%arg0: i32) -> (i32, i32) {
    %c0_i32 = arith.constant 0 : i32
    %c0_i32_0 = arith.constant 0 : i32
    %c0_i32_1 = arith.constant 0 : i32
    return %c0_i32, %c0_i32_0 : i32, i32
  }
  func.func @transform_8(%arg0: i32) -> (i32, i32) {
    %c0_i32 = arith.constant 0 : i32
    %c0_i32_0 = arith.constant 0 : i32
    %c0_i32_1 = arith.constant 0 : i32
    return %c0_i32, %c0_i32_0 : i32, i32
  }
  func.func @transform_9(%arg0: i32) -> (i32, i32) {
    %c0_i32 = arith.constant 0 : i32
    %c0_i32_0 = arith.constant 0 : i32
    %c0_i32_1 = arith.constant 0 : i32
    return %c0_i32, %c0_i32_0 : i32, i32
  }
  func.func @transform_10(%arg0: i32) -> (i32, i32) {
    %c0_i32 = arith.constant 0 : i32
    %c0_i32_0 = arith.constant 0 : i32
    %c0_i32_1 = arith.constant 0 : i32
    return %c0_i32, %c0_i32_0 : i32, i32
  }
  func.func @transform_11(%arg0: i32) -> (i32, i32) {
    %c0_i32 = arith.constant 0 : i32
    %c0_i32_0 = arith.constant 0 : i32
    %c0_i32_1 = arith.constant 0 : i32
    return %c0_i32, %c0_i32_0 : i32, i32
  }
  func.func @transform_12(%arg0: i32) -> (i32, i32) {
    %c0_i32 = arith.constant 0 : i32
    %c0_i32_0 = arith.constant 0 : i32
    return %c0_i32, %arg0 : i32, i32
  }
  func.func @transform_13(%arg0: i32) -> (i32, i32) {
    %c0_i32 = arith.constant 0 : i32
    %c0_i32_0 = arith.constant 0 : i32
    return %c0_i32, %arg0 : i32, i32
  }
  func.func @transform_14(%arg0: i32) -> (i32, i32) {
    %c0_i32 = arith.constant 0 : i32
    %c0_i32_0 = arith.constant 0 : i32
    return %c0_i32, %arg0 : i32, i32
  }
  func.func @transform_15(%arg0: i32) -> (i32, i32) {
    %c0_i32 = arith.constant 0 : i32
    %c0_i32_0 = arith.constant 0 : i32
    return %c0_i32, %arg0 : i32, i32
  }
  func.func @transform_16(%arg0: i32) -> (i32, i32) {
    %c0_i32 = arith.constant 0 : i32
    %c0_i32_0 = arith.constant 0 : i32
    return %c0_i32, %arg0 : i32, i32
  }
  func.func @transform_17(%arg0: i32) -> (i32, i32) {
    %c0_i32 = arith.constant 0 : i32
    %c0_i32_0 = arith.constant 0 : i32
    %c0_i32_1 = arith.constant 0 : i32
    return %c0_i32, %c0_i32_0 : i32, i32
  }
  func.func @transform_18(%arg0: i32) -> (i32, i32) {
    %c0_i32 = arith.constant 0 : i32
    %c0_i32_0 = arith.constant 0 : i32
    %c0_i32_1 = arith.constant 0 : i32
    return %c0_i32, %c0_i32_0 : i32, i32
  }
}

</mosaic_0001>

<bundles_post_ra>
// kernel: decoder_forward.1
= control target key start
LH: loop header
LB: loop body
LE: loop exit
PB: predicated region body
PF: predicated region fallthrough
CT: control target
= control target key end

     0   :  { %s11692_s0 = inlined_call_operand.vmem [shape: bf16[8,8], index: 0, kind: input, shape index: {}]   ;;  %s11693_s1 = inlined_call_operand.vmem [shape: f32[8,128], index: 1, kind: input, shape index: {}]   ;;  %s11694_s2 = inlined_call_operand.vmem [shape: bf16[8,128,32], index: 2, kind: input, shape index: {}]   ;;  %s11695_s3 = inlined_call_operand.hbm [shape: f32[8,128,128], index: 3, kind: input, shape index: {}]   ;;  %s11696_s4 = inlined_call_operand.vmem [shape: f32[1,128], index: 4, kind: input, shape index: {}]   ;;  %s11697_s5 = inlined_call_operand.vmem [shape: f32[1,128], index: 5, kind: input, shape index: {}]   ;;  %s11698_s6 = inlined_call_operand.vmem [shape: bf16[128,128], index: 6, kind: input, shape index: {}]   ;;  %s11699_s7 = inlined_call_operand.vmem [shape: bf16[8,384], index: 7, kind: input, shape index: {}]   ;;  %s11700_s8 = inlined_call_operand.vmem [shape: bf16[32,384], index: 8, kind: input, shape index: {}]   ;;  %s11701_s9 = inlined_call_operand.vmem [shape: f32[1,384], index: 9, kind: input, shape index: {}]   ;;  %s11702_s10 = inlined_call_operand.vmem [shape: bf16[128,384], index: 10, kind: input, shape index: {}]   ;;  %s11703_s11 = inlined_call_operand.vmem [shape: f32[1,384], index: 11, kind: input, shape index: {}]   ;;  %s11704_s12 = inlined_call_operand.vmem [shape: bf16[128,128], index: 12, kind: input, shape index: {}]   ;;  %s11705_s13 = inlined_call_operand.vmem [shape: bf16[32,128], index: 13, kind: input, shape index: {}]   ;;  %s11706_s14 = inlined_call_operand.vmem [shape: bf16[8,128], index: 14, kind: input, shape index: {}]   ;;  %s11707_s15 = inlined_call_operand.vmem [shape: f32[1,128], index: 15, kind: input, shape index: {}]   ;;  %s11708_s16 = inlined_call_operand.vmem [shape: f32[8,128], index: 16, kind: output, shape index: {0}]   ;;  %s11709_s17 = inlined_call_operand.vmem [shape: f32[8,128], index: 17, kind: output, shape index: {1}]   ;;  %s11710_s18 = inlined_call_operand.vmem [shape: f32[8,128], index: 18, kind: output, shape index: {2}]  }
   0x1   :  { %11999 = sst [smem:[#allocation200_spill]] %s11692_s0 }
   0x2   :  { %12000 = sst [smem:[#allocation201_spill]] %s11693_s1 }
   0x3   :  { %12001 = sst [smem:[#allocation202_spill]] %s11694_s2 }
   0x4   :  { %24 = vsyncpa [#allocation5], 0  ;;  %s35_s29 = sshll.u32 %s11695_s3, 4  ;;  %s6674_s30 = smov [#allocation4]   ;;  %s36_s29 = int_to_ptr.hbm [resolvable:$true] %s35_s29 }
   0x5   :  { %s37_s0 = sshll.u32 %s6674_s30, 4  ;;  %s6675_s19 = smov 128   ;;  %s38_s0 = int_to_ptr.vmem [resolvable:$true] %s37_s0 }
   0x6   :  { %s6676_s1 = smov 8  }
   0x7   :  { %43 = dma.hbm_to_vmem [thread:$0]  %s36_s29, 16384, %s38_s0, [#allocation5], %s6675_s19, %s6675_s19, %s6676_s1  }
   0x8   :  { %6672 = dma.done.wait [#allocation5], 16384  }
   0x9   :  { %6673 = vsyncadd [#allocation5], 4294950912  ;;  %v5736_v0 = vld [vmem:[%s11698_s6 + $0x38] sm:$0xff]  ;;  %v5735_v1 = vld [vmem:[%s11698_s6 + $0x30] sm:$0xff]  ;;  %s12002_s22 = sld [smem:[#allocation201_spill]]  ;;  %vm1712_vm0 = vcmask 130112  }
   0xa   :  { %143 = vmatpush.bf16.msra.mxu0 %v5736_v0  ;;  %v5734_v2 = vld [vmem:[%s11698_s6 + $0x28] sm:$0xff]  ;;  %v5733_v3 = vld [vmem:[%s11698_s6 + $0x20] sm:$0xff]  ;;  %v5732_v4 = vld [vmem:[%s11698_s6 + $0x18] sm:$0xff]  ;;  %vm1716_vm1 = vcmask 195712   ;;  %vm1720_vm2 = vcmask 261312   ;;  %vm11996_vm3 = vcmask 326912  }
   0xb   :  { %v5731_v5 = vld [vmem:[%s11698_s6 + $0x10] sm:$0xff]  ;;  %v5730_v6 = vld [vmem:[%s11698_s6 + $0x8] sm:$0xff]  ;;  %v5729_v7 = vld [vmem:[%s11698_s6] sm:$0xff]  ;;  %vm11995_vm4 = vcmask 392512   ;;  %vm1732_vm5 = vcmask 458112   ;;  %vm1736_vm6 = vcmask 523712  }
   0xc   :  { %v160_v11 = vld [vmem:[#allocation4 + $0x20] sm:$0xff]  ;;  %v158_v13 = vld [vmem:[#allocation4 + $0x10] sm:$0xff]  ;;  %v161_v18 = vld [vmem:[#allocation4 + $0x28] sm:$0xff]  ;;  %vm1740_vm7 = vcmask 589312   ;;  %vm11850_vm8 = vcmask 654912   ;;  %vm11848_vm9 = vcmask 720512  }
   0xd   :  { %v156_v14 = vld [vmem:[#allocation4] sm:$0xff]  ;;  %v159_v19 = vld [vmem:[#allocation4 + $0x18] sm:$0xff]  ;;  %v157_v20 = vld [vmem:[#allocation4 + $0x8] sm:$0xff]  ;;  %vm11849_vm10 = vcmask 786112   ;;  %vm11852_vm11 = vcmask 851712   ;;  %vm1760_vm12 = vcmask 917312  }
   0xe   :  { %144 = vmatpush.bf16.msra.mxu0 %v5735_v1  ;;  %v6818_v23 = vld [vmem:[%s11697_s5] ss:$0 sm:$0xff]  ;;  %v164_v29 = vld [vmem:[#allocation4 + $0x40] sm:$0xff]  ;;  %v162_v34 = vld [vmem:[#allocation4 + $0x30] sm:$0xff]  ;;  %vm1764_vm13 = vcmask 982912   ;;  %vm1768_vm14 = vcmask 1048512  }
   0xf   :  { %v77_v8 = vld [vmem:[%s12002_s22] sm:$0xff]  ;;  %v166_v44 = vld [vmem:[#allocation4 + $0x50] sm:$0xff]  ;;  %v165_v46 = vld [vmem:[#allocation4 + $0x48] sm:$0xff]  ;;  %vm11847_vm15 = vcmask 1041409   ;;  %s12849_s26 = sld [smem:[#allocation202_spill]] }
  0x10   :  { %v6803_v9 = vpack.c.bf16 %v77_v8, %v77_v8  ;;  %v163_v32 = vld [vmem:[#allocation4 + $0x38] sm:$0xff]  ;;  %v170_v54 = vld [vmem:[#allocation4 + $0x70] sm:$0xff]  ;;  %v169_v56 = vld [vmem:[#allocation4 + $0x68] sm:$0xff]  ;;  %s13011_s27 = sld [smem:[#allocation200_spill]] }
  0x11   :  { %v167_v42 = vld [vmem:[#allocation4 + $0x58] sm:$0xff]  ;;  %v168_v58 = vld [vmem:[#allocation4 + $0x60] sm:$0xff] }
  0x12   :  { %145 = vmatpush.bf16.msra.mxu0 %v5734_v2  ;;  %12003 = vst [vmem:[#allocation7_spill] sm:$0xff] %v6803_v9  ;;  %v171_v8 = vld [vmem:[#allocation4 + $0x78] sm:$0xff] }
  0x16   :  { %146 = vmatpush.bf16.msra.mxu0 %v5733_v3 }
  0x1a   :  { %147 = vmatpush.bf16.msra.mxu0 %v5732_v4  ;;  %v173_v4 = vld [vmem:[#allocation4 + $0x88] sm:$0xff] }
  0x1e   :  { %148 = vmatpush.bf16.msra.mxu0 %v5731_v5 }
  0x22   :  { %149 = vmatpush.bf16.msra.mxu0 %v5730_v6  ;;  %v172_v6 = vld [vmem:[#allocation4 + $0x80] sm:$0xff] }
  0x26   :  { %150 = vmatpush.bf16.msra.mxu0 %v5729_v7 }
  0x29   :  { %151 = vmatmul.bf16.vlgmr.msra.gmra.mxu0 %v6803_v9 }
  0xa6   :  { %v6806_v10 = vpop.f32.mrf.mxu0 }
  0xa7   :  { %v6809_v12 = vperm.slane %v6806_v10, 0  ;;  %v285_v59 = vrot.slane %v6806_v10, 1 }
  0xa9   :  { %v312_v15 = vadd.f32 %v6809_v12, %v160_v11  ;;  %v310_v16 = vadd.f32 %v6809_v12, %v158_v13  ;;  %v308_v17 = vadd.f32 %v6809_v12, %v156_v14  ;;  %v313_v22 = vadd.f32 %v6809_v12, %v161_v18 }
  0xaa   :  { %v311_v24 = vadd.f32 %v6809_v12, %v159_v19  ;;  %v309_v25 = vadd.f32 %v6809_v12, %v157_v20  ;;  %v316_v35 = vadd.f32 %v6809_v12, %v164_v29  ;;  %v315_v36 = vadd.f32 %v6809_v12, %v163_v32  ;;  %v176_v19 = vld [vmem:[#allocation4 + $0xa0] sm:$0xff] }
  0xab   :  { %6122 = vtanh.f32 %v312_v15  ;;  %v314_v38 = vadd.f32 %v6809_v12, %v162_v34  ;;  %v319_v47 = vadd.f32 %v6809_v12, %v167_v42  ;;  %v318_v48 = vadd.f32 %v6809_v12, %v166_v44 }
  0xac   :  { %6124 = vtanh.f32 %v310_v16  ;;  %v317_v50 = vadd.f32 %v6809_v12, %v165_v46  ;;  %v322_v60 = vadd.f32 %v6809_v12, %v170_v54  ;;  %v321_v61 = vadd.f32 %v6809_v12, %v169_v56 }
  0xad   :  { %6126 = vtanh.f32 %v308_v17  ;;  %v320_v63 = vadd.f32 %v6809_v12, %v168_v58  ;;  %v6841_v2 = vperm.slane %v285_v59, 0  ;;  %v323_v15 = vadd.f32 %v6809_v12, %v171_v8  ;;  %v183_v59 = vld [vmem:[#allocation4 + $0xd8] sm:$0xff] }
  0xae   :  { %v154_v21 = vpop.f32.mrf.mxu0  ;;  %6128 = vtanh.f32 %v313_v22  ;;  %v187_v8 = vld [vmem:[#allocation4 + $0xf8] sm:$0xff] }
  0xaf   :  { %6130 = vtanh.f32 %v311_v24  ;;  %v325_v11 = vadd.f32 %v6841_v2, %v173_v4  ;;  %v324_v13 = vadd.f32 %v6841_v2, %v172_v6  ;;  %v175_v21 = vld [vmem:[#allocation4 + $0x98] sm:$0xff]  ;;  %v174_v24 = vld [vmem:[#allocation4 + $0x90] sm:$0xff]  ;;  %v188_v6 = vld [vmem:[#allocation4 + $0x100] sm:$0xff] }
  0xb0   :  { %6132 = vtanh.f32 %v309_v25  ;;  %v328_v25 = vadd.f32 %v6841_v2, %v176_v19  ;;  %v327_v12 = vadd.f32 %v6841_v2, %v175_v21  ;;  %v191_v21 = vld [vmem:[#allocation4 + $0x118] sm:$0xff] }
  0xb1   :  { %v6123_v26 = vpop.eup %6122  ;;  %6134 = vtanh.f32 %v316_v35  ;;  %v177_v35 = vld [vmem:[#allocation4 + $0xa8] sm:$0xff] }
  0xb2   :  { %v6125_v27 = vpop.eup %6124  ;;  %v572_v28 = vmul.f32 %v6123_v26, %v6818_v23  ;;  %6136 = vtanh.f32 %v315_v36 }
  0xb3   :  { %v6127_v30 = vpop.eup %6126  ;;  %v570_v31 = vmul.f32 %v6125_v27, %v6818_v23  ;;  %6138 = vtanh.f32 %v314_v38  ;;  %v326_v27 = vadd.f32 %v6841_v2, %v174_v24  ;;  %v190_v24 = vld [vmem:[#allocation4 + $0x110] sm:$0xff] }
  0xb4   :  { %704 = vadd.xlane.f32.xlu2 %v572_v28  ;;  %v568_v33 = vmul.f32 %v6127_v30, %v6818_v23  ;;  %v6129_v37 = vpop.eup %6128  ;;  %6140 = vtanh.f32 %v319_v47  ;;  %v180_v47 = vld [vmem:[#allocation4 + $0xc0] sm:$0xff] }
  0xb5   :  { %700 = vadd.xlane.f32.xlu1 %v570_v31  ;;  %v6131_v39 = vpop.eup %6130  ;;  %v573_v41 = vmul.f32 %v6129_v37, %v6818_v23  ;;  %6142 = vtanh.f32 %v318_v48  ;;  %v179_v31 = vld [vmem:[#allocation4 + $0xb8] sm:$0xff] }
  0xb6   :  { %696 = vadd.xlane.f32.xlu0 %v568_v33  ;;  %v6133_v40 = vpop.eup %6132  ;;  %v571_v43 = vmul.f32 %v6131_v39, %v6818_v23  ;;  %6144 = vtanh.f32 %v317_v50  ;;  %v178_v33 = vld [vmem:[#allocation4 + $0xb0] sm:$0xff]  ;;  %v331_v36 = vadd.f32 %v6841_v2, %v179_v31  ;;  %v329_v39 = vadd.f32 %v6841_v2, %v177_v35 }
  0xb7   :  { %v569_v45 = vmul.f32 %v6133_v40, %v6818_v23  ;;  %v6135_v49 = vpop.eup %6134  ;;  %6146 = vtanh.f32 %v322_v60  ;;  %v330_v37 = vadd.f32 %v6841_v2, %v178_v33  ;;  %v286_v60 = vrot.slane %v6806_v10, 2 }
  0xb8   :  { %v6137_v51 = vpop.eup %6136  ;;  %v576_v53 = vmul.f32 %v6135_v49, %v6818_v23  ;;  %6148 = vtanh.f32 %v321_v61 }
  0xb9   :  { %v6139_v52 = vpop.eup %6138  ;;  %v575_v55 = vmul.f32 %v6137_v51, %v6818_v23  ;;  %6150 = vtanh.f32 %v320_v63  ;;  %v332_v51 = vadd.f32 %v6841_v2, %v180_v47  ;;  %v6874_v4 = vperm.slane %v286_v60, 0  ;;  %v198_v60 = vld [vmem:[#allocation4 + $0x150] sm:$0xff] }
  0xba   :  { %v574_v57 = vmul.f32 %v6139_v52, %v6818_v23  ;;  %v6141_v62 = vpop.eup %6140  ;;  %6152 = vtanh.f32 %v325_v11 }
  0xbb   :  { %v6143_v0 = vpop.eup %6142  ;;  %v579_v3 = vmul.f32 %v6141_v62, %v6818_v23  ;;  %6154 = vtanh.f32 %v324_v13  ;;  %v186_v13 = vld [vmem:[#allocation4 + $0xf0] sm:$0xff] }
  0xbc   :  { %706 = vadd.xlane.f32.xlu2 %v573_v41  ;;  %v6145_v1 = vpop.eup %6144  ;;  %v578_v5 = vmul.f32 %v6143_v0, %v6818_v23  ;;  %6156 = vtanh.f32 %v323_v15  ;;  %v335_v0 = vadd.f32 %v6841_v2, %v183_v59  ;;  %v339_v15 = vadd.f32 %v6841_v2, %v187_v8  ;;  %v202_v8 = vld [vmem:[#allocation4 + $0x170] sm:$0xff] }
  0xbd   :  { %702 = vadd.xlane.f32.xlu1 %v571_v43  ;;  %v577_v7 = vmul.f32 %v6145_v1, %v6818_v23  ;;  %v6147_v14 = vpop.eup %6146  ;;  %6158 = vtanh.f32 %v328_v25  ;;  %v182_v43 = vld [vmem:[#allocation4 + $0xd0] sm:$0xff] }
  0xbe   :  { %698 = vadd.xlane.f32.xlu0 %v569_v45  ;;  %v6149_v16 = vpop.eup %6148  ;;  %v582_v18 = vmul.f32 %v6147_v14, %v6818_v23  ;;  %6160 = vtanh.f32 %v327_v12  ;;  %v181_v45 = vld [vmem:[#allocation4 + $0xc8] sm:$0xff]  ;;  %v334_v48 = vadd.f32 %v6841_v2, %v182_v43  ;;  %v340_v14 = vadd.f32 %v6874_v4, %v188_v6  ;;  %v203_v6 = vld [vmem:[#allocation4 + $0x178] sm:$0xff] }
  0xbf   :  { %v6151_v17 = vpop.eup %6150  ;;  %v581_v20 = vmul.f32 %v6149_v16, %v6818_v23  ;;  %6162 = vtanh.f32 %v326_v27  ;;  %v333_v49 = vadd.f32 %v6841_v2, %v181_v45  ;;  %v189_v12 = vld [vmem:[#allocation4 + $0x108] sm:$0xff] }
  0xc0   :  { %v580_v22 = vmul.f32 %v6151_v17, %v6818_v23  ;;  %v6153_v26 = vpop.eup %6152  ;;  %6164 = vtanh.f32 %v331_v36  ;;  %v338_v17 = vadd.f32 %v6841_v2, %v186_v13  ;;  %v192_v36 = vld [vmem:[#allocation4 + $0x120] sm:$0xff]  ;;  %v201_v13 = vld [vmem:[#allocation4 + $0x168] sm:$0xff] }
  0xc1   :  { %v6155_v28 = vpop.eup %6154  ;;  %v585_v30 = vmul.f32 %v6153_v26, %v6818_v23  ;;  %6166 = vtanh.f32 %v330_v37  ;;  %v343_v26 = vadd.f32 %v6874_v4, %v191_v21 }
  0xc2   :  { %v6157_v29 = vpop.eup %6156  ;;  %v584_v32 = vmul.f32 %v6155_v28, %v6818_v23  ;;  %6168 = vtanh.f32 %v329_v39  ;;  %v341_v28 = vadd.f32 %v6874_v4, %v189_v12  ;;  %v205_v12 = vld [vmem:[#allocation4 + $0x188] sm:$0xff] }
  0xc3   :  { %v583_v34 = vmul.f32 %v6157_v29, %v6818_v23  ;;  %v6159_v38 = vpop.eup %6158  ;;  %6170 = vtanh.f32 %v334_v48  ;;  %v195_v48 = vld [vmem:[#allocation4 + $0x138] sm:$0xff] }
  0xc4   :  { %712 = vadd.xlane.f32.xlu2 %v576_v53  ;;  %v6161_v40 = vpop.eup %6160  ;;  %v588_v42 = vmul.f32 %v6159_v38, %v6818_v23  ;;  %6172 = vtanh.f32 %v333_v49 }
  0xc5   :  { %710 = vadd.xlane.f32.xlu1 %v575_v55  ;;  %v6163_v41 = vpop.eup %6162  ;;  %v587_v44 = vmul.f32 %v6161_v40, %v6818_v23  ;;  %v185_v55 = vld [vmem:[#allocation4 + $0xe8] sm:$0xff]  ;;  %6174 = vtanh.f32 %v332_v51  ;;  %v344_v40 = vadd.f32 %v6874_v4, %v192_v36 }
  0xc6   :  { %708 = vadd.xlane.f32.xlu0 %v574_v57  ;;  %v586_v46 = vmul.f32 %v6163_v41, %v6818_v23  ;;  %v6165_v50 = vpop.eup %6164  ;;  %v184_v57 = vld [vmem:[#allocation4 + $0xe0] sm:$0xff]  ;;  %v337_v61 = vadd.f32 %v6841_v2, %v185_v55  ;;  %v209_v36 = vld [vmem:[#allocation4 + $0x1a8] sm:$0xff] }
  0xc7   :  { %v6167_v52 = vpop.eup %6166  ;;  %v591_v54 = vmul.f32 %v6165_v50, %v6818_v23  ;;  %v336_v62 = vadd.f32 %v6841_v2, %v184_v57  ;;  %v342_v2 = vadd.f32 %v6874_v4, %v190_v24  ;;  %v206_v24 = vld [vmem:[#allocation4 + $0x190] sm:$0xff] }
  0xc8   :  { %v6169_v53 = vpop.eup %6168  ;;  %v590_v56 = vmul.f32 %v6167_v52, %v6818_v23  ;;  %6176 = vtanh.f32 %v337_v61  ;;  %v347_v52 = vadd.f32 %v6874_v4, %v195_v48 }
  0xc9   :  { %v589_v58 = vmul.f32 %v6169_v53, %v6818_v23  ;;  %v6171_v63 = vpop.eup %6170  ;;  %6178 = vtanh.f32 %v336_v62 }
  0xca   :  { %v6173_v1 = vpop.eup %6172  ;;  %6180 = vtanh.f32 %v335_v0  ;;  %v350_v0 = vadd.f32 %v6874_v4, %v198_v60 }
  0xcb   :  { %6182 = vtanh.f32 %v340_v14  ;;  %v287_v14 = vrot.slane %v6806_v10, 3 }
  0xcc   :  { %718 = vadd.xlane.f32.xlu2 %v579_v3  ;;  %v6175_v3 = vpop.eup %6174  ;;  %6184 = vtanh.f32 %v339_v15  ;;  %v355_v15 = vadd.f32 %v6874_v4, %v203_v6  ;;  %v214_v6 = vld [vmem:[#allocation4 + $0x1d0] sm:$0xff] }
  0xcd   :  { %716 = vadd.xlane.f32.xlu1 %v578_v5  ;;  %v594_v5 = vmul.f32 %v6171_v63, %v6818_v23  ;;  %v592_v11 = vmul.f32 %v6175_v3, %v6818_v23  ;;  %6186 = vtanh.f32 %v338_v17  ;;  %v6913_v21 = vperm.slane %v287_v14, 0 }
  0xce   :  { %714 = vadd.xlane.f32.xlu0 %v577_v7  ;;  %v593_v7 = vmul.f32 %v6173_v1, %v6818_v23  ;;  %v6177_v16 = vpop.eup %6176  ;;  %6188 = vtanh.f32 %v343_v26 }
  0xcf   :  { %6190 = vtanh.f32 %v342_v2  ;;  %v204_v2 = vld [vmem:[#allocation4 + $0x180] sm:$0xff] }
  0xd0   :  { %6192 = vtanh.f32 %v341_v28 }
  0xd4   :  { %724 = vadd.xlane.f32.xlu2 %v582_v18  ;;  %v6179_v18 = vpop.eup %6178 }
  0xd5   :  { %722 = vadd.xlane.f32.xlu1 %v581_v20  ;;  %v6181_v19 = vpop.eup %6180  ;;  %v597_v20 = vmul.f32 %v6177_v16, %v6818_v23  ;;  %v354_v16 = vadd.f32 %v6874_v4, %v202_v8  ;;  %v213_v8 = vld [vmem:[#allocation4 + $0x1c8] sm:$0xff] }
  0xd6   :  { %720 = vadd.xlane.f32.xlu0 %v580_v22  ;;  %v596_v22 = vmul.f32 %v6179_v18, %v6818_v23  ;;  %v595_v25 = vmul.f32 %v6181_v19, %v6818_v23  ;;  %v6183_v27 = vpop.eup %6182  ;;  %v353_v18 = vadd.f32 %v6874_v4, %v201_v13  ;;  %v366_v13 = vadd.f32 %v6913_v21, %v214_v6 }
  0xd7   :  { %v6185_v29 = vpop.eup %6184  ;;  %v600_v31 = vmul.f32 %v6183_v27, %v6818_v23  ;;  %v357_v27 = vadd.f32 %v6913_v21, %v205_v12  ;;  %v217_v12 = vld [vmem:[#allocation4 + $0x1e8] sm:$0xff] }
  0xd8   :  { %v599_v33 = vmul.f32 %v6185_v29, %v6818_v23 }
  0xdc   :  { %730 = vadd.xlane.f32.xlu2 %v585_v30  ;;  %v6187_v30 = vpop.eup %6186 }
  0xdd   :  { %728 = vadd.xlane.f32.xlu1 %v584_v32  ;;  %v194_v32 = vld [vmem:[#allocation4 + $0x130] sm:$0xff]  ;;  %v598_v35 = vmul.f32 %v6187_v30, %v6818_v23  ;;  %v6189_v39 = vpop.eup %6188  ;;  %v356_v30 = vadd.f32 %v6913_v21, %v204_v2  ;;  %v216_v2 = vld [vmem:[#allocation4 + $0x1e0] sm:$0xff] }
  0xde   :  { %726 = vadd.xlane.f32.xlu0 %v583_v34  ;;  %v193_v34 = vld [vmem:[#allocation4 + $0x128] sm:$0xff]  ;;  %v346_v37 = vadd.f32 %v6874_v4, %v194_v32  ;;  %v6191_v41 = vpop.eup %6190  ;;  %v603_v43 = vmul.f32 %v6189_v39, %v6818_v23 }
  0xdf   :  { %v345_v38 = vadd.f32 %v6874_v4, %v193_v34  ;;  %v602_v45 = vmul.f32 %v6191_v41, %v6818_v23  ;;  %v361_v41 = vadd.f32 %v6913_v21, %v209_v36 }
  0xe0   :  { %6194 = vtanh.f32 %v346_v37 }
  0xe1   :  { %6196 = vtanh.f32 %v345_v38  ;;  %v208_v38 = vld [vmem:[#allocation4 + $0x1a0] sm:$0xff] }
  0xe2   :  { %6198 = vtanh.f32 %v344_v40  ;;  %v207_v40 = vld [vmem:[#allocation4 + $0x198] sm:$0xff] }
  0xe4   :  { %736 = vadd.xlane.f32.xlu2 %v588_v42  ;;  %v6193_v42 = vpop.eup %6192 }
  0xe5   :  { %734 = vadd.xlane.f32.xlu1 %v587_v44  ;;  %v197_v44 = vld [vmem:[#allocation4 + $0x148] sm:$0xff]  ;;  %v601_v47 = vmul.f32 %v6193_v42, %v6818_v23  ;;  %v360_v42 = vadd.f32 %v6913_v21, %v208_v38 }
  0xe6   :  { %732 = vadd.xlane.f32.xlu0 %v586_v46  ;;  %v196_v46 = vld [vmem:[#allocation4 + $0x140] sm:$0xff]  ;;  %v349_v49 = vadd.f32 %v6874_v4, %v197_v44  ;;  %v6195_v51 = vpop.eup %6194 }
  0xe7   :  { %v348_v50 = vadd.f32 %v6874_v4, %v196_v46  ;;  %v6197_v53 = vpop.eup %6196  ;;  %v606_v55 = vmul.f32 %v6195_v51, %v6818_v23  ;;  %v212_v51 = vld [vmem:[#allocation4 + $0x1c0] sm:$0xff] }
  0xe8   :  { %6200 = vtanh.f32 %v349_v49  ;;  %v605_v57 = vmul.f32 %v6197_v53, %v6818_v23  ;;  %v211_v53 = vld [vmem:[#allocation4 + $0x1b8] sm:$0xff] }
  0xe9   :  { %6202 = vtanh.f32 %v348_v50 }
  0xea   :  { %6204 = vtanh.f32 %v347_v52 }
  0xec   :  { %742 = vadd.xlane.f32.xlu2 %v591_v54  ;;  %v6199_v54 = vpop.eup %6198 }
  0xed   :  { %740 = vadd.xlane.f32.xlu1 %v590_v56  ;;  %v200_v56 = vld [vmem:[#allocation4 + $0x160] sm:$0xff]  ;;  %v604_v59 = vmul.f32 %v6199_v54, %v6818_v23 }
  0xee   :  { %738 = vadd.xlane.f32.xlu0 %v589_v58  ;;  %v199_v58 = vld [vmem:[#allocation4 + $0x158] sm:$0xff]  ;;  %v352_v61 = vadd.f32 %v6874_v4, %v200_v56  ;;  %v6201_v63 = vpop.eup %6200  ;;  %v364_v56 = vadd.f32 %v6913_v21, %v212_v51 }
  0xef   :  { %v351_v62 = vadd.f32 %v6874_v4, %v199_v58  ;;  %v6203_v1 = vpop.eup %6202  ;;  %v358_v4 = vadd.f32 %v6913_v21, %v206_v24  ;;  %v218_v24 = vld [vmem:[#allocation4 + $0x1f0] sm:$0xff] }
  0xf0   :  { %v6205_v3 = vpop.eup %6204  ;;  %6206 = vtanh.f32 %v352_v61 }
  0xf1   :  { %6208 = vtanh.f32 %v351_v62 }
  0xf2   :  { %6210 = vtanh.f32 %v350_v0 }
  0xf3   :  { %6212 = vtanh.f32 %v355_v15 }
  0xf4   :  { %748 = vadd.xlane.f32.xlu2 %v594_v5  ;;  %v609_v5 = vmul.f32 %v6201_v63, %v6818_v23  ;;  %6214 = vtanh.f32 %v354_v16  ;;  %v365_v16 = vadd.f32 %v6913_v21, %v213_v8 }
  0xf5   :  { %746 = vadd.xlane.f32.xlu1 %v593_v7  ;;  %v608_v7 = vmul.f32 %v6203_v1, %v6818_v23  ;;  %6216 = vtanh.f32 %v353_v18 }
  0xf6   :  { %744 = vadd.xlane.f32.xlu0 %v592_v11  ;;  %v607_v11 = vmul.f32 %v6205_v3, %v6818_v23  ;;  %v6207_v17 = vpop.eup %6206  ;;  %6218 = vtanh.f32 %v358_v4  ;;  %v215_v3 = vld [vmem:[#allocation4 + $0x1d8] sm:$0xff]  ;;  %v288_v4 = vrot.slane %v6806_v10, 4 }
  0xf7   :  { %v6209_v19 = vpop.eup %6208  ;;  %6220 = vtanh.f32 %v357_v27  ;;  %v370_v27 = vadd.f32 %v6913_v21, %v218_v24  ;;  %v226_v24 = vld [vmem:[#allocation4 + $0x230] sm:$0xff] }
  0xf8   :  { %6222 = vtanh.f32 %v356_v30  ;;  %v6974_v38 = vperm.slane %v288_v4, 0 }
  0xf9   :  { %6224 = vtanh.f32 %v361_v41  ;;  %v221_v41 = vld [vmem:[#allocation4 + $0x208] sm:$0xff] }
  0xfa   :  { %6226 = vtanh.f32 %v360_v42 }
  0xfc   :  { %754 = vadd.xlane.f32.xlu2 %v597_v20  ;;  %v6211_v20 = vpop.eup %6210 }
  0xfd   :  { %752 = vadd.xlane.f32.xlu1 %v596_v22  ;;  %v612_v22 = vmul.f32 %v6207_v17, %v6818_v23  ;;  %v610_v26 = vmul.f32 %v6211_v20, %v6818_v23  ;;  %v6213_v28 = vpop.eup %6212 }
  0xfe   :  { %750 = vadd.xlane.f32.xlu0 %v595_v25  ;;  %v611_v25 = vmul.f32 %v6209_v19, %v6818_v23 }
 0x104   :  { %760 = vadd.xlane.f32.xlu2 %v600_v31  ;;  %v6215_v31 = vpop.eup %6214 }
 0x105   :  { %758 = vadd.xlane.f32.xlu1 %v599_v33  ;;  %v6217_v33 = vpop.eup %6216  ;;  %v614_v37 = vmul.f32 %v6215_v31, %v6818_v23 }
 0x106   :  { %756 = vadd.xlane.f32.xlu0 %v598_v35  ;;  %v615_v35 = vmul.f32 %v6213_v28, %v6818_v23  ;;  %v613_v39 = vmul.f32 %v6217_v33, %v6818_v23  ;;  %v369_v28 = vadd.f32 %v6913_v21, %v217_v12  ;;  %v368_v33 = vadd.f32 %v6913_v21, %v216_v2  ;;  %v225_v12 = vld [vmem:[#allocation4 + $0x228] sm:$0xff] }
 0x107   :  { %v378_v2 = vadd.f32 %v6974_v38, %v226_v24 }
 0x10c   :  { %766 = vadd.xlane.f32.xlu2 %v603_v43  ;;  %v6219_v43 = vpop.eup %6218 }
 0x10d   :  { %764 = vadd.xlane.f32.xlu1 %v602_v45  ;;  %v359_v45 = vadd.f32 %v6913_v21, %v207_v40  ;;  %v6221_v46 = vpop.eup %6220  ;;  %v618_v50 = vmul.f32 %v6219_v43, %v6818_v23  ;;  %v220_v43 = vld [vmem:[#allocation4 + $0x200] sm:$0xff] }
 0x10e   :  { %762 = vadd.xlane.f32.xlu0 %v601_v47  ;;  %v6223_v48 = vpop.eup %6222  ;;  %v617_v52 = vmul.f32 %v6221_v46, %v6818_v23  ;;  %v219_v46 = vld [vmem:[#allocation4 + $0x1f8] sm:$0xff] }
 0x10f   :  { %6228 = vtanh.f32 %v359_v45  ;;  %v616_v54 = vmul.f32 %v6223_v48, %v6818_v23  ;;  %v6225_v58 = vpop.eup %6224  ;;  %v373_v48 = vadd.f32 %v6974_v38, %v221_v41  ;;  %v230_v41 = vld [vmem:[#allocation4 + $0x250] sm:$0xff] }
 0x110   :  { %v6227_v61 = vpop.eup %6226  ;;  %6230 = vtanh.f32 %v364_v56  ;;  %v621_v1 = vmul.f32 %v6225_v58, %v6818_v23 }
 0x114   :  { %772 = vadd.xlane.f32.xlu2 %v606_v55  ;;  %v210_v55 = vld [vmem:[#allocation4 + $0x1b0] sm:$0xff] }
 0x115   :  { %770 = vadd.xlane.f32.xlu1 %v605_v57  ;;  %v363_v57 = vadd.f32 %v6913_v21, %v211_v53  ;;  %v362_v60 = vadd.f32 %v6913_v21, %v210_v55  ;;  %v6229_v63 = vpop.eup %6228  ;;  %v371_v53 = vadd.f32 %v6913_v21, %v219_v46  ;;  %v228_v46 = vld [vmem:[#allocation4 + $0x240] sm:$0xff] }
 0x116   :  { %768 = vadd.xlane.f32.xlu0 %v604_v59  ;;  %v6231_v14 = vpop.eup %6230 }
 0x117   :  { %6232 = vtanh.f32 %v363_v57 }
 0x118   :  { %6234 = vtanh.f32 %v362_v60  ;;  %v224_v60 = vld [vmem:[#allocation4 + $0x220] sm:$0xff] }
 0x11c   :  { %778 = vadd.xlane.f32.xlu2 %v609_v5  ;;  %v620_v5 = vmul.f32 %v6227_v61, %v6818_v23 }
 0x11d   :  { %776 = vadd.xlane.f32.xlu1 %v608_v7  ;;  %v619_v7 = vmul.f32 %v6229_v63, %v6818_v23  ;;  %v6233_v17 = vpop.eup %6232  ;;  %v223_v63 = vld [vmem:[#allocation4 + $0x218] sm:$0xff] }
 0x11e   :  { %774 = vadd.xlane.f32.xlu0 %v607_v11  ;;  %v367_v11 = vadd.f32 %v6913_v21, %v215_v3  ;;  %v6235_v19 = vpop.eup %6234  ;;  %v222_v3 = vld [vmem:[#allocation4 + $0x210] sm:$0xff]  ;;  %v376_v21 = vadd.f32 %v6974_v38, %v224_v60 }
 0x11f   :  { %v374_v8 = vadd.f32 %v6974_v38, %v222_v3 }
 0x120   :  { %6236 = vtanh.f32 %v367_v11 }
 0x121   :  { %6238 = vtanh.f32 %v366_v13 }
 0x122   :  { %6240 = vtanh.f32 %v365_v16 }
 0x123   :  { %6242 = vtanh.f32 %v370_v27 }
 0x124   :  { %784 = vadd.xlane.f32.xlu2 %v612_v22  ;;  %v624_v22 = vmul.f32 %v6231_v14, %v6818_v23  ;;  %6244 = vtanh.f32 %v369_v28  ;;  %v377_v28 = vadd.f32 %v6974_v38, %v225_v12 }
 0x125   :  { %782 = vadd.xlane.f32.xlu1 %v611_v25  ;;  %v623_v25 = vmul.f32 %v6233_v17, %v6818_v23  ;;  %6246 = vtanh.f32 %v368_v33 }
 0x126   :  { %780 = vadd.xlane.f32.xlu0 %v610_v26  ;;  %v622_v26 = vmul.f32 %v6235_v19, %v6818_v23  ;;  %v6237_v30 = vpop.eup %6236  ;;  %6248 = vtanh.f32 %v373_v48  ;;  %v227_v19 = vld [vmem:[#allocation4 + $0x238] sm:$0xff]  ;;  %v382_v48 = vadd.f32 %v6974_v38, %v230_v41  ;;  %v234_v41 = vld [vmem:[#allocation4 + $0x270] sm:$0xff] }
 0x127   :  { %v6920_v29 = vpop.xlane.xlu2 %704  ;;  %v627_v40 = vmul.f32 %v6237_v30, %v6818_v23 }
 0x128   :  { %v6923_v32 = vpop.xlane.xlu1 %700 }
 0x129   :  { %v6925_v34 = vpop.xlane.xlu0 %696 }
 0x12c   :  { %790 = vadd.xlane.f32.xlu2 %v615_v35  ;;  %v6239_v35 = vpop.eup %6238 }
 0x12d   :  { %788 = vadd.xlane.f32.xlu1 %v614_v37  ;;  %v6241_v37 = vpop.eup %6240  ;;  %v626_v42 = vmul.f32 %v6239_v35, %v6818_v23 }
 0x12e   :  { %786 = vadd.xlane.f32.xlu0 %v613_v39  ;;  %v625_v45 = vmul.f32 %v6241_v37, %v6818_v23  ;;  %v6243_v51 = vpop.eup %6242 }
 0x12f   :  { %v6932_v44 = vpop.xlane.xlu2 %706  ;;  %v630_v58 = vmul.f32 %v6243_v51, %v6818_v23 }
 0x130   :  { %v6935_v47 = vpop.xlane.xlu1 %702 }
 0x131   :  { %v6937_v49 = vpop.xlane.xlu0 %698 }
 0x134   :  { %796 = vadd.xlane.f32.xlu2 %v618_v50  ;;  %v372_v50 = vadd.f32 %v6974_v38, %v220_v43  ;;  %v229_v43 = vld [vmem:[#allocation4 + $0x248] sm:$0xff] }
 0x135   :  { %794 = vadd.xlane.f32.xlu1 %v617_v52 }
 0x136   :  { %792 = vadd.xlane.f32.xlu0 %v616_v54  ;;  %v6245_v54 = vpop.eup %6244  ;;  %6250 = vtanh.f32 %v372_v50  ;;  %v381_v50 = vadd.f32 %v6974_v38, %v229_v43 }
 0x137   :  { %v6944_v59 = vpop.xlane.xlu2 %712  ;;  %v6247_v56 = vpop.eup %6246  ;;  %v629_v61 = vmul.f32 %v6245_v54, %v6818_v23  ;;  %6252 = vtanh.f32 %v371_v53  ;;  %v380_v54 = vadd.f32 %v6974_v38, %v228_v46 }
 0x138   :  { %v6947_v62 = vpop.xlane.xlu1 %710  ;;  %v6249_v6 = vpop.eup %6248  ;;  %6254 = vtanh.f32 %v376_v21  ;;  %v232_v21 = vld [vmem:[#allocation4 + $0x260] sm:$0xff] }
 0x139   :  { %v6949_v0 = vpop.xlane.xlu0 %708  ;;  %v633_v17 = vmul.f32 %v6249_v6, %v6818_v23  ;;  %v231_v6 = vld [vmem:[#allocation4 + $0x258] sm:$0xff] }
 0x13c   :  { %802 = vadd.xlane.f32.xlu2 %v621_v1  ;;  %v628_v1 = vmul.f32 %v6247_v56, %v6818_v23  ;;  %v6251_v11 = vpop.eup %6250 }
 0x13d   :  { %800 = vadd.xlane.f32.xlu1 %v620_v5  ;;  %v375_v5 = vadd.f32 %v6974_v38, %v223_v63  ;;  %v6253_v14 = vpop.eup %6252 }
 0x13e   :  { %798 = vadd.xlane.f32.xlu0 %v619_v7  ;;  %v6255_v4 = vpop.eup %6254 }
 0x13f   :  { %v6956_v15 = vpop.xlane.xlu2 %718  ;;  %6256 = vtanh.f32 %v375_v5 }
 0x140   :  { %v6959_v18 = vpop.xlane.xlu1 %716  ;;  %6258 = vtanh.f32 %v374_v8  ;;  %v289_v8 = vrot.slane %v6806_v10, 5 }
 0x141   :  { %v6961_v20 = vpop.xlane.xlu0 %714 }
 0x144   :  { %808 = vadd.xlane.f32.xlu2 %v624_v22  ;;  %v632_v22 = vmul.f32 %v6251_v11, %v6818_v23 }
 0x145   :  { %806 = vadd.xlane.f32.xlu1 %v623_v25  ;;  %v631_v25 = vmul.f32 %v6253_v14, %v6818_v23  ;;  %v6257_v30 = vpop.eup %6256  ;;  %v384_v14 = vadd.f32 %v6974_v38, %v232_v21 }
 0x146   :  { %804 = vadd.xlane.f32.xlu0 %v622_v26  ;;  %v379_v26 = vadd.f32 %v6974_v38, %v227_v19  ;;  %v6259_v35 = vpop.eup %6258 }
 0x147   :  { %v6969_v31 = vpop.xlane.xlu2 %724 }
 0x148   :  { %v6972_v36 = vpop.xlane.xlu1 %722  ;;  %6260 = vtanh.f32 %v379_v26  ;;  %v7037_v26 = vperm.slane %v289_v8, 0 }
 0x149   :  { %v6976_v39 = vpop.xlane.xlu0 %720  ;;  %6262 = vtanh.f32 %v378_v2 }
 0x14a   :  { %6264 = vtanh.f32 %v377_v28  ;;  %v236_v28 = vld [vmem:[#allocation4 + $0x280] sm:$0xff] }
 0x14b   :  { %6266 = vtanh.f32 %v382_v48  ;;  %v386_v48 = vadd.f32 %v6974_v38, %v234_v41  ;;  %v240_v41 = vld [vmem:[#allocation4 + $0x2a0] sm:$0xff] }
 0x14c   :  { %814 = vadd.xlane.f32.xlu2 %v627_v40  ;;  %v636_v40 = vmul.f32 %v6255_v4, %v6818_v23  ;;  %6268 = vtanh.f32 %v381_v50 }
 0x14d   :  { %812 = vadd.xlane.f32.xlu1 %v626_v42  ;;  %v635_v42 = vmul.f32 %v6257_v30, %v6818_v23  ;;  %6270 = vtanh.f32 %v380_v54 }
 0x14e   :  { %810 = vadd.xlane.f32.xlu0 %v625_v45  ;;  %v634_v45 = vmul.f32 %v6259_v35, %v6818_v23  ;;  %v6261_v51 = vpop.eup %6260  ;;  %v235_v35 = vld [vmem:[#allocation4 + $0x278] sm:$0xff] }
 0x14f   :  { %v6983_v52 = vpop.xlane.xlu2 %730  ;;  %v6263_v56 = vpop.eup %6262  ;;  %v639_v63 = vmul.f32 %v6261_v51, %v6818_v23  ;;  %v387_v43 = vadd.f32 %v6974_v38, %v235_v35  ;;  %v241_v35 = vld [vmem:[#allocation4 + $0x2a8] sm:$0xff] }
 0x150   :  { %v6986_v55 = vpop.xlane.xlu1 %728  ;;  %v6265_v60 = vpop.eup %6264  ;;  %v638_v3 = vmul.f32 %v6263_v56, %v6818_v23 }
 0x151   :  { %v6988_v57 = vpop.xlane.xlu0 %726  ;;  %v637_v5 = vmul.f32 %v6265_v60, %v6818_v23 }
 0x154   :  { %820 = vadd.xlane.f32.xlu2 %v630_v58 }
 0x155   :  { %818 = vadd.xlane.f32.xlu1 %v629_v61 }
 0x156   :  { %816 = vadd.xlane.f32.xlu0 %v628_v1  ;;  %v233_v1 = vld [vmem:[#allocation4 + $0x268] sm:$0xff] }
 0x157   :  { %v6995_v7 = vpop.xlane.xlu2 %736  ;;  %v385_v11 = vadd.f32 %v6974_v38, %v233_v1 }
 0x158   :  { %v6998_v13 = vpop.xlane.xlu1 %734 }
 0x159   :  { %v7000_v16 = vpop.xlane.xlu0 %732  ;;  %6272 = vtanh.f32 %v385_v11 }
 0x15a   :  { %6274 = vtanh.f32 %v384_v14 }
 0x15c   :  { %826 = vadd.xlane.f32.xlu2 %v633_v17  ;;  %v6267_v17 = vpop.eup %6266 }
 0x15d   :  { %824 = vadd.xlane.f32.xlu1 %v632_v22  ;;  %v383_v22 = vadd.f32 %v6974_v38, %v231_v6  ;;  %v6269_v24 = vpop.eup %6268  ;;  %v642_v4 = vmul.f32 %v6267_v17, %v6818_v23 }
 0x15e   :  { %822 = vadd.xlane.f32.xlu0 %v631_v25  ;;  %v6271_v12 = vpop.eup %6270  ;;  %v641_v30 = vmul.f32 %v6269_v24, %v6818_v23 }
 0x15f   :  { %v7007_v27 = vpop.xlane.xlu2 %742  ;;  %6276 = vtanh.f32 %v383_v22 }
 0x160   :  { %v7010_v33 = vpop.xlane.xlu1 %740 }
 0x161   :  { %v7012_v37 = vpop.xlane.xlu0 %738 }
 0x164   :  { %832 = vadd.xlane.f32.xlu2 %v636_v40  ;;  %v640_v40 = vmul.f32 %v6271_v12, %v6818_v23 }
 0x165   :  { %830 = vadd.xlane.f32.xlu1 %v635_v42  ;;  %v388_v42 = vadd.f32 %v7037_v26, %v236_v28  ;;  %v242_v28 = vld [vmem:[#allocation4 + $0x2b0] sm:$0xff] }
 0x166   :  { %828 = vadd.xlane.f32.xlu0 %v634_v45  ;;  %v6273_v45 = vpop.eup %6272 }
 0x167   :  { %v7019_v53 = vpop.xlane.xlu2 %748  ;;  %v6275_v50 = vpop.eup %6274  ;;  %6278 = vtanh.f32 %v388_v42  ;;  %v645_v60 = vmul.f32 %v6273_v45, %v6818_v23  ;;  %v394_v42 = vadd.f32 %v7037_v26, %v242_v28 }
 0x168   :  { %v7022_v58 = vpop.xlane.xlu1 %746  ;;  %v6277_v54 = vpop.eup %6276  ;;  %6280 = vtanh.f32 %v387_v43  ;;  %v644_v1 = vmul.f32 %v6275_v50, %v6818_v23  ;;  %v393_v43 = vadd.f32 %v7037_v26, %v241_v35  ;;  %v392_v50 = vadd.f32 %v7037_v26, %v240_v41 }
 0x169   :  { %v7024_v61 = vpop.xlane.xlu0 %744  ;;  %6282 = vtanh.f32 %v386_v48  ;;  %v643_v21 = vmul.f32 %v6277_v54, %v6818_v23  ;;  %v7068_v23 = vld [vmem:[%s11697_s5] ss:$0 sm:$0xff] }
 0x16c   :  { %838 = vadd.xlane.f32.xlu2 %v639_v63  ;;  %v239_v63 = vld [vmem:[#allocation4 + $0x298] sm:$0xff] }
 0x16d   :  { %836 = vadd.xlane.f32.xlu1 %v638_v3  ;;  %v238_v3 = vld [vmem:[#allocation4 + $0x290] sm:$0xff]  ;;  %v391_v38 = vadd.f32 %v7037_v26, %v239_v63  ;;  %v6279_v8 = vpop.eup %6278 }
 0x16e   :  { %834 = vadd.xlane.f32.xlu0 %v637_v5  ;;  %v237_v5 = vld [vmem:[#allocation4 + $0x288] sm:$0xff]  ;;  %v390_v6 = vadd.f32 %v7037_v26, %v238_v3  ;;  %v6281_v17 = vpop.eup %6280 }
 0x16f   :  { %v7032_v19 = vpop.xlane.xlu2 %754  ;;  %v389_v14 = vadd.f32 %v7037_v26, %v237_v5  ;;  %v6283_v24 = vpop.eup %6282  ;;  %6284 = vtanh.f32 %v391_v38  ;;  %v244_v38 = vld [vmem:[#allocation4 + $0x2c0] sm:$0xff] }
 0x170   :  { %v7035_v25 = vpop.xlane.xlu1 %752  ;;  %6286 = vtanh.f32 %v390_v6 }
 0x171   :  { %v7039_v2 = vpop.xlane.xlu0 %750  ;;  %6288 = vtanh.f32 %v389_v14 }
 0x172   :  { %6290 = vtanh.f32 %v394_v42 }
 0x173   :  { %6292 = vtanh.f32 %v393_v43  ;;  %v248_v43 = vld [vmem:[#allocation4 + $0x2e0] sm:$0xff] }
 0x174   :  { %844 = vadd.xlane.f32.xlu2 %v642_v4  ;;  %v648_v4 = vmul.f32 %v7068_v23, %v6279_v8  ;;  %6294 = vtanh.f32 %v392_v50  ;;  %v243_v8 = vld [vmem:[#allocation4 + $0x2b8] sm:$0xff] }
 0x175   :  { %842 = vadd.xlane.f32.xlu1 %v641_v30  ;;  %v647_v30 = vmul.f32 %v7068_v23, %v6281_v17  ;;  %v6285_v45 = vpop.eup %6284  ;;  %v396_v17 = vadd.f32 %v7037_v26, %v244_v38  ;;  %v395_v28 = vadd.f32 %v7037_v26, %v243_v8  ;;  %v247_v50 = vld [vmem:[#allocation4 + $0x2d8] sm:$0xff] }
 0x176   :  { %840 = vadd.xlane.f32.xlu0 %v640_v40  ;;  %v646_v40 = vmul.f32 %v7068_v23, %v6283_v24  ;;  %v6287_v54 = vpop.eup %6286  ;;  %v651_v3 = vmul.f32 %v7068_v23, %v6285_v45 }
 0x177   :  { %v7046_v46 = vpop.xlane.xlu2 %760  ;;  %v6289_v63 = vpop.eup %6288  ;;  %v650_v5 = vmul.f32 %v7068_v23, %v6287_v54 }
 0x178   :  { %v7049_v51 = vpop.xlane.xlu1 %758  ;;  %v649_v6 = vmul.f32 %v7068_v23, %v6289_v63  ;;  %v6291_v24 = vpop.eup %6290  ;;  %v246_v63 = vld [vmem:[#allocation4 + $0x2d0] sm:$0xff] }
 0x179   :  { %v7051_v56 = vpop.xlane.xlu0 %756  ;;  %v654_v42 = vmul.f32 %v7068_v23, %v6291_v24 }
 0x17c   :  { %850 = vadd.xlane.f32.xlu2 %v645_v60 }
 0x17d   :  { %848 = vadd.xlane.f32.xlu1 %v644_v1 }
 0x17e   :  { %846 = vadd.xlane.f32.xlu0 %v643_v21  ;;  %v245_v21 = vld [vmem:[#allocation4 + $0x2c8] sm:$0xff] }
 0x17f   :  { %v7058_v11 = vpop.xlane.xlu2 %766  ;;  %v397_v14 = vadd.f32 %v7037_v26, %v245_v21  ;;  %v399_v21 = vadd.f32 %v7037_v26, %v247_v50  ;;  %v290_v50 = vrot.slane %v6806_v10, 6 }
 0x180   :  { %v7061_v22 = vpop.xlane.xlu1 %764 }
 0x181   :  { %v7063_v12 = vpop.xlane.xlu0 %762  ;;  %6296 = vtanh.f32 %v397_v14 }
 0x182   :  { %6298 = vtanh.f32 %v396_v17 }
 0x183   :  { %6300 = vtanh.f32 %v395_v28 }
 0x184   :  { %856 = vadd.xlane.f32.xlu2 %v648_v4 }
 0x185   :  { %854 = vadd.xlane.f32.xlu1 %v647_v30  ;;  %v6293_v30 = vpop.eup %6292 }
 0x186   :  { %852 = vadd.xlane.f32.xlu0 %v646_v40  ;;  %v6295_v40 = vpop.eup %6294  ;;  %v653_v45 = vmul.f32 %v7068_v23, %v6293_v30  ;;  %v251_v30 = vld [vmem:[#allocation4 + $0x2f8] sm:$0xff] }
 0x187   :  { %v7075_v48 = vpop.xlane.xlu2 %772  ;;  %v652_v54 = vmul.f32 %v7068_v23, %v6295_v40 }
 0x188   :  { %v7078_v60 = vpop.xlane.xlu1 %770 }
 0x189   :  { %v7080_v1 = vpop.xlane.xlu0 %768 }
 0x18c   :  { %862 = vadd.xlane.f32.xlu2 %v651_v3  ;;  %v400_v3 = vadd.f32 %v7037_v26, %v248_v43 }
 0x18d   :  { %860 = vadd.xlane.f32.xlu1 %v650_v5  ;;  %v6297_v5 = vpop.eup %6296 }
 0x18e   :  { %858 = vadd.xlane.f32.xlu0 %v649_v6  ;;  %v398_v6 = vadd.f32 %v7037_v26, %v246_v63  ;;  %v6299_v8 = vpop.eup %6298  ;;  %6302 = vtanh.f32 %v400_v3  ;;  %v657_v28 = vmul.f32 %v7068_v23, %v6297_v5 }
 0x18f   :  { %v7087_v4 = vpop.xlane.xlu2 %778  ;;  %v6301_v17 = vpop.eup %6300  ;;  %6304 = vtanh.f32 %v399_v21  ;;  %v656_v40 = vmul.f32 %v7068_v23, %v6299_v8 }
 0x190   :  { %v7090_v35 = vpop.xlane.xlu1 %776  ;;  %6306 = vtanh.f32 %v398_v6  ;;  %v655_v43 = vmul.f32 %v7068_v23, %v6301_v17  ;;  %v7117_v17 = vperm.slane %v290_v50, 0 }
 0x191   :  { %v7092_v41 = vpop.xlane.xlu0 %774 }
 0x194   :  { %868 = vadd.xlane.f32.xlu2 %v654_v42  ;;  %v250_v42 = vld [vmem:[#allocation4 + $0x2f0] sm:$0xff]  ;;  %v6303_v3 = vpop.eup %6302 }
 0x195   :  { %866 = vadd.xlane.f32.xlu1 %v653_v45  ;;  %v249_v45 = vld [vmem:[#allocation4 + $0x2e8] sm:$0xff]  ;;  %v402_v63 = vadd.f32 %v7037_v26, %v250_v42  ;;  %v6305_v8 = vpop.eup %6304 }
 0x196   :  { %864 = vadd.xlane.f32.xlu0 %v652_v54  ;;  %v403_v54 = vadd.f32 %v7037_v26, %v251_v30  ;;  %v401_v21 = vadd.f32 %v7037_v26, %v249_v45  ;;  %v6307_v9 = vpop.eup %6306  ;;  %v254_v30 = vld [vmem:[#allocation4 + $0x310] sm:$0xff]  ;;  %v659_v42 = vmul.f32 %v7068_v23, %v6305_v8  ;;  %v252_v26 = vld [vmem:[#allocation4 + $0x300] sm:$0xff] }
 0x197   :  { %v7099_v38 = vpop.xlane.xlu2 %784  ;;  %v406_v45 = vadd.f32 %v7117_v17, %v254_v30  ;;  %v256_v30 = vld [vmem:[#allocation4 + $0x320] sm:$0xff] }
 0x198   :  { %v7102_v14 = vpop.xlane.xlu1 %782  ;;  %6308 = vtanh.f32 %v403_v54 }
 0x199   :  { %v7104_v24 = vpop.xlane.xlu0 %780  ;;  %6310 = vtanh.f32 %v402_v63  ;;  %v404_v63 = vadd.f32 %v7117_v17, %v252_v26 }
 0x19a   :  { %12004 = vst [vmem:[#allocation8_spill] sm:$0xff] %v7104_v24  ;;  %6312 = vtanh.f32 %v401_v21  ;;  %v658_v24 = vmul.f32 %v7068_v23, %v6307_v9 }
 0x19b   :  { %6314 = vtanh.f32 %v406_v45 }
 0x19c   :  { %874 = vadd.xlane.f32.xlu2 %v657_v28 }
 0x19d   :  { %872 = vadd.xlane.f32.xlu1 %v656_v40  ;;  %v660_v40 = vmul.f32 %v7068_v23, %v6303_v3 }
 0x19e   :  { %870 = vadd.xlane.f32.xlu0 %v655_v43  ;;  %v253_v43 = vld [vmem:[#allocation4 + $0x308] sm:$0xff] }
 0x19f   :  { %v7112_v5 = vpop.xlane.xlu2 %790  ;;  %v405_v50 = vadd.f32 %v7117_v17, %v253_v43  ;;  %v255_v43 = vld [vmem:[#allocation4 + $0x318] sm:$0xff] }
 0x1a0   :  { %12005 = vst [vmem:[#allocation9_spill] sm:$0xff] %v7112_v5  ;;  %v7115_v6 = vpop.xlane.xlu1 %788 }
 0x1a1   :  { %v7119_v28 = vpop.xlane.xlu0 %786  ;;  %6316 = vtanh.f32 %v405_v50 }
 0x1a2   :  { %12006 = vst [vmem:[#allocation10_spill] sm:$0xff] %v7119_v28  ;;  %v6309_v28 = vpop.eup %6308  ;;  %6318 = vtanh.f32 %v404_v63 }
 0x1a3   :  { %v6311_v3 = vpop.eup %6310  ;;  %v663_v9 = vmul.f32 %v7068_v23, %v6309_v28  ;;  %v407_v28 = vadd.f32 %v7117_v17, %v255_v43 }
 0x1a4   :  { %880 = vadd.xlane.f32.xlu2 %v660_v40  ;;  %v6313_v21 = vpop.eup %6312  ;;  %v257_v40 = vld [vmem:[#allocation4 + $0x328] sm:$0xff] }
 0x1a5   :  { %878 = vadd.xlane.f32.xlu1 %v659_v42  ;;  %v661_v42 = vmul.f32 %v7068_v23, %v6313_v21  ;;  %v409_v26 = vadd.f32 %v7117_v17, %v257_v40 }
 0x1a6   :  { %876 = vadd.xlane.f32.xlu0 %v658_v24  ;;  %v662_v24 = vmul.f32 %v7068_v23, %v6311_v3 }
 0x1a7   :  { %v7126_v54 = vpop.xlane.xlu2 %796  ;;  %6320 = vtanh.f32 %v409_v26 }
 0x1a8   :  { %12007 = vst [vmem:[#allocation11_spill] sm:$0xff] %v7126_v54  ;;  %v7129_v5 = vpop.xlane.xlu1 %794  ;;  %v408_v54 = vadd.f32 %v7117_v17, %v256_v30 }
 0x1a9   :  { %12008 = vst [vmem:[#allocation12_spill] sm:$0xff] %v7129_v5  ;;  %v7131_v8 = vpop.xlane.xlu0 %792 }
 0x1aa   :  { %12009 = vst [vmem:[#allocation13_spill] sm:$0xff] %v7131_v8  ;;  %v6315_v8 = vpop.eup %6314  ;;  %6322 = vtanh.f32 %v408_v54 }
 0x1ab   :  { %v6317_v50 = vpop.eup %6316  ;;  %v666_v21 = vmul.f32 %v7068_v23, %v6315_v8  ;;  %6324 = vtanh.f32 %v407_v28 }
 0x1ac   :  { %886 = vadd.xlane.f32.xlu2 %v663_v9  ;;  %v6319_v63 = vpop.eup %6318  ;;  %v260_v9 = vld [vmem:[#allocation4 + $0x340] sm:$0xff]  ;;  %v665_v40 = vmul.f32 %v7068_v23, %v6317_v50 }
 0x1ad   :  { %884 = vadd.xlane.f32.xlu1 %v662_v24  ;;  %v259_v24 = vld [vmem:[#allocation4 + $0x338] sm:$0xff]  ;;  %v664_v30 = vmul.f32 %v7068_v23, %v6319_v63  ;;  %v412_v43 = vadd.f32 %v7117_v17, %v260_v9 }
 0x1ae   :  { %882 = vadd.xlane.f32.xlu0 %v661_v42  ;;  %v258_v42 = vld [vmem:[#allocation4 + $0x330] sm:$0xff] }
 0x1af   :  { %v7138_v45 = vpop.xlane.xlu2 %802  ;;  %v410_v54 = vadd.f32 %v7117_v17, %v258_v42  ;;  %6326 = vtanh.f32 %v412_v43 }
 0x1b0   :  { %12010 = vst [vmem:[#allocation14_spill] sm:$0xff] %v7138_v45  ;;  %v7141_v5 = vpop.xlane.xlu1 %800  ;;  %v411_v45 = vadd.f32 %v7117_v17, %v259_v24 }
 0x1b1   :  { %12011 = vst [vmem:[#allocation15_spill] sm:$0xff] %v7141_v5  ;;  %v7143_v3 = vpop.xlane.xlu0 %798 }
 0x1b2   :  { %12012 = vst [vmem:[#allocation16_spill] sm:$0xff] %v7143_v3  ;;  %v6321_v3 = vpop.eup %6320  ;;  %6328 = vtanh.f32 %v411_v45 }
 0x1b3   :  { %v6323_v8 = vpop.eup %6322  ;;  %v669_v63 = vmul.f32 %v7068_v23, %v6321_v3  ;;  %6330 = vtanh.f32 %v410_v54 }
 0x1b4   :  { %892 = vadd.xlane.f32.xlu2 %v666_v21  ;;  %v6325_v28 = vpop.eup %6324  ;;  %v263_v21 = vld [vmem:[#allocation4 + $0x358] sm:$0xff]  ;;  %v668_v9 = vmul.f32 %v7068_v23, %v6323_v8 }
 0x1b5   :  { %890 = vadd.xlane.f32.xlu1 %v665_v40  ;;  %v262_v40 = vld [vmem:[#allocation4 + $0x350] sm:$0xff]  ;;  %v667_v24 = vmul.f32 %v7068_v23, %v6325_v28  ;;  %v415_v42 = vadd.f32 %v7117_v17, %v263_v21 }
 0x1b6   :  { %888 = vadd.xlane.f32.xlu0 %v664_v30  ;;  %v261_v30 = vld [vmem:[#allocation4 + $0x348] sm:$0xff] }
 0x1b7   :  { %v7150_v26 = vpop.xlane.xlu2 %808  ;;  %v413_v45 = vadd.f32 %v7117_v17, %v261_v30  ;;  %6332 = vtanh.f32 %v415_v42  ;;  %v291_v30 = vrot.slane %v6806_v10, 7 }
 0x1b8   :  { %12013 = vst [vmem:[#allocation17_spill] sm:$0xff] %v7150_v26  ;;  %v7153_v5 = vpop.xlane.xlu1 %806  ;;  %v414_v26 = vadd.f32 %v7117_v17, %v262_v40 }
 0x1b9   :  { %12014 = vst [vmem:[#allocation18_spill] sm:$0xff] %v7153_v5  ;;  %v7155_v50 = vpop.xlane.xlu0 %804 }
 0x1ba   :  { %12015 = vst [vmem:[#allocation19_spill] sm:$0xff] %v7155_v50  ;;  %v6327_v50 = vpop.eup %6326  ;;  %6334 = vtanh.f32 %v414_v26 }
 0x1bb   :  { %v6329_v3 = vpop.eup %6328  ;;  %v672_v28 = vmul.f32 %v7068_v23, %v6327_v50  ;;  %6336 = vtanh.f32 %v413_v45 }
 0x1bc   :  { %898 = vadd.xlane.f32.xlu2 %v669_v63  ;;  %v6331_v54 = vpop.eup %6330  ;;  %v266_v63 = vld [vmem:[#allocation4 + $0x370] sm:$0xff]  ;;  %v671_v21 = vmul.f32 %v7068_v23, %v6329_v3 }
 0x1bd   :  { %896 = vadd.xlane.f32.xlu1 %v668_v9  ;;  %v265_v9 = vld [vmem:[#allocation4 + $0x368] sm:$0xff]  ;;  %v670_v40 = vmul.f32 %v7068_v23, %v6331_v54  ;;  %v7180_v54 = vperm.slane %v291_v30, 0 }
 0x1be   :  { %894 = vadd.xlane.f32.xlu0 %v667_v24  ;;  %v264_v24 = vld [vmem:[#allocation4 + $0x360] sm:$0xff]  ;;  %v417_v42 = vadd.f32 %v7117_v17, %v265_v9 }
 0x1bf   :  { %v7162_v43 = vpop.xlane.xlu2 %814  ;;  %v416_v26 = vadd.f32 %v7117_v17, %v264_v24  ;;  %v268_v9 = vld [vmem:[#allocation4 + $0x380] sm:$0xff]  ;;  %v267_v24 = vld [vmem:[#allocation4 + $0x378] sm:$0xff] }
 0x1c0   :  { %12016 = vst [vmem:[#allocation20_spill] sm:$0xff] %v7162_v43  ;;  %v7165_v5 = vpop.xlane.xlu1 %812  ;;  %v418_v43 = vadd.f32 %v7117_v17, %v266_v63  ;;  %v269_v63 = vld [vmem:[#allocation4 + $0x388] sm:$0xff]  ;;  %v420_v30 = vadd.f32 %v7180_v54, %v268_v9 }
 0x1c1   :  { %12017 = vst [vmem:[#allocation21_spill] sm:$0xff] %v7165_v5  ;;  %v7167_v8 = vpop.xlane.xlu0 %810 }
 0x1c2   :  { %12018 = vst [vmem:[#allocation22_spill] sm:$0xff] %v7167_v8  ;;  %v6333_v8 = vpop.eup %6332  ;;  %6338 = vtanh.f32 %v418_v43 }
 0x1c3   :  { %v6335_v3 = vpop.eup %6334  ;;  %v675_v10 = vmul.f32 %v7068_v23, %v6333_v8  ;;  %6340 = vtanh.f32 %v417_v42  ;;  %v419_v8 = vadd.f32 %v7117_v17, %v267_v24 }
 0x1c4   :  { %904 = vadd.xlane.f32.xlu2 %v672_v28  ;;  %v6337_v5 = vpop.eup %6336  ;;  %6342 = vtanh.f32 %v416_v26 }
 0x1c5   :  { %902 = vadd.xlane.f32.xlu1 %v671_v21  ;;  %v674_v21 = vmul.f32 %v7068_v23, %v6335_v3 }
 0x1c6   :  { %900 = vadd.xlane.f32.xlu0 %v670_v40  ;;  %v673_v40 = vmul.f32 %v7068_v23, %v6337_v5 }
 0x1c7   :  { %v7175_v50 = vpop.xlane.xlu2 %820 }
 0x1c8   :  { %12019 = vst [vmem:[#allocation23_spill] sm:$0xff] %v7175_v50  ;;  %v7178_v45 = vpop.xlane.xlu1 %818  ;;  %v421_v50 = vadd.f32 %v7180_v54, %v269_v63 }
 0x1c9   :  { %12020 = vst [vmem:[#allocation24_spill] sm:$0xff] %v7178_v45  ;;  %v7182_v28 = vpop.xlane.xlu0 %816 }
 0x1ca   :  { %12021 = vst [vmem:[#allocation25_spill] sm:$0xff] %v7182_v28  ;;  %v6339_v28 = vpop.eup %6338  ;;  %6344 = vtanh.f32 %v421_v50 }
 0x1cb   :  { %v6341_v42 = vpop.eup %6340  ;;  %v678_v5 = vmul.f32 %v7068_v23, %v6339_v28  ;;  %6346 = vtanh.f32 %v420_v30 }
 0x1cc   :  { %910 = vadd.xlane.f32.xlu2 %v675_v10  ;;  %v6343_v26 = vpop.eup %6342  ;;  %v272_v10 = vld [vmem:[#allocation4 + $0x3a0] sm:$0xff]  ;;  %v677_v63 = vmul.f32 %v7068_v23, %v6341_v42  ;;  %6348 = vtanh.f32 %v419_v8 }
 0x1cd   :  { %908 = vadd.xlane.f32.xlu1 %v674_v21  ;;  %v271_v21 = vld [vmem:[#allocation4 + $0x398] sm:$0xff]  ;;  %v676_v9 = vmul.f32 %v7068_v23, %v6343_v26  ;;  %v424_v17 = vadd.f32 %v7180_v54, %v272_v10 }
 0x1ce   :  { %906 = vadd.xlane.f32.xlu0 %v673_v40  ;;  %v270_v40 = vld [vmem:[#allocation4 + $0x390] sm:$0xff]  ;;  %v423_v24 = vadd.f32 %v7180_v54, %v271_v21 }
 0x1cf   :  { %v7189_v43 = vpop.xlane.xlu2 %826  ;;  %v422_v28 = vadd.f32 %v7180_v54, %v270_v40  ;;  %6350 = vtanh.f32 %v424_v17 }
 0x1d0   :  { %12022 = vst [vmem:[#allocation26_spill] sm:$0xff] %v7189_v43  ;;  %v7192_v45 = vpop.xlane.xlu1 %824  ;;  %6352 = vtanh.f32 %v423_v24 }
 0x1d1   :  { %v7194_v3 = vpop.xlane.xlu0 %822  ;;  %6354 = vtanh.f32 %v422_v28 }
 0x1d2   :  { %12023 = vst [vmem:[#allocation27_spill] sm:$0xff] %v7194_v3  ;;  %v6345_v3 = vpop.eup %6344 }
 0x1d3   :  { %v6347_v30 = vpop.eup %6346  ;;  %v681_v26 = vmul.f32 %v7068_v23, %v6345_v3 }
 0x1d4   :  { %916 = vadd.xlane.f32.xlu2 %v678_v5  ;;  %v6349_v8 = vpop.eup %6348  ;;  %v275_v5 = vld [vmem:[#allocation4 + $0x3b8] sm:$0xff]  ;;  %v680_v10 = vmul.f32 %v7068_v23, %v6347_v30 }
 0x1d5   :  { %914 = vadd.xlane.f32.xlu1 %v677_v63  ;;  %v274_v63 = vld [vmem:[#allocation4 + $0x3b0] sm:$0xff]  ;;  %v679_v21 = vmul.f32 %v7068_v23, %v6349_v8  ;;  %v427_v40 = vadd.f32 %v7180_v54, %v275_v5 }
 0x1d6   :  { %912 = vadd.xlane.f32.xlu0 %v676_v9  ;;  %v273_v9 = vld [vmem:[#allocation4 + $0x3a8] sm:$0xff] }
 0x1d7   :  { %v7201_v50 = vpop.xlane.xlu2 %832  ;;  %v425_v3 = vadd.f32 %v7180_v54, %v273_v9  ;;  %6356 = vtanh.f32 %v427_v40 }
 0x1d8   :  { %12024 = vst [vmem:[#allocation28_spill] sm:$0xff] %v7201_v50  ;;  %v7204_v43 = vpop.xlane.xlu1 %830  ;;  %v426_v50 = vadd.f32 %v7180_v54, %v274_v63 }
 0x1d9   :  { %12025 = vst [vmem:[#allocation29_spill] sm:$0xff] %v7204_v43  ;;  %v7206_v42 = vpop.xlane.xlu0 %828 }
 0x1da   :  { %12026 = vst [vmem:[#allocation30_spill] sm:$0xff] %v7206_v42  ;;  %v6351_v42 = vpop.eup %6350  ;;  %6358 = vtanh.f32 %v426_v50 }
 0x1db   :  { %v6353_v24 = vpop.eup %6352  ;;  %v684_v8 = vmul.f32 %v7068_v23, %v6351_v42  ;;  %6360 = vtanh.f32 %v425_v3 }
 0x1dc   :  { %922 = vadd.xlane.f32.xlu2 %v681_v26  ;;  %v6355_v28 = vpop.eup %6354  ;;  %v278_v26 = vld [vmem:[#allocation4 + $0x3d0] sm:$0xff]  ;;  %v683_v5 = vmul.f32 %v7068_v23, %v6353_v24 }
 0x1dd   :  { %920 = vadd.xlane.f32.xlu1 %v680_v10  ;;  %v277_v10 = vld [vmem:[#allocation4 + $0x3c8] sm:$0xff]  ;;  %v682_v63 = vmul.f32 %v7068_v23, %v6355_v28  ;;  %v430_v9 = vadd.f32 %v7180_v54, %v278_v26  ;;  %v11716_v28 = vlaneseq }
 0x1de   :  { %918 = vadd.xlane.f32.xlu0 %v679_v21  ;;  %v276_v21 = vld [vmem:[#allocation4 + $0x3c0] sm:$0xff]  ;;  %v281_v26 = vld [vmem:[#allocation4 + $0x3e8] sm:$0xff] }
 0x1df   :  { %v7213_v17 = vpop.xlane.xlu2 %838  ;;  %v428_v50 = vadd.f32 %v7180_v54, %v276_v21  ;;  %6362 = vtanh.f32 %v430_v9 }
 0x1e0   :  { %12027 = vst [vmem:[#allocation31_spill] sm:$0xff] %v7213_v17  ;;  %v7216_v43 = vpop.xlane.xlu1 %836  ;;  %v429_v17 = vadd.f32 %v7180_v54, %v277_v10  ;;  %v280_v10 = vld [vmem:[#allocation4 + $0x3e0] sm:$0xff] }
 0x1e1   :  { %12028 = vst [vmem:[#allocation32_spill] sm:$0xff] %v7216_v43  ;;  %v7218_v30 = vpop.xlane.xlu0 %834 }
 0x1e2   :  { %12029 = vst [vmem:[#allocation33_spill] sm:$0xff] %v7218_v30  ;;  %v6357_v30 = vpop.eup %6356  ;;  %6364 = vtanh.f32 %v429_v17  ;;  %v432_v17 = vadd.f32 %v7180_v54, %v280_v10  ;;  %v283_v10 = vld [vmem:[#allocation4 + $0x3f8] sm:$0xff] }
 0x1e3   :  { %v6359_v42 = vpop.eup %6358  ;;  %6366 = vtanh.f32 %v428_v50 }
 0x1e4   :  { %928 = vadd.xlane.f32.xlu2 %v684_v8  ;;  %v6361_v3 = vpop.eup %6360  ;;  %v687_v8 = vmul.f32 %v7068_v23, %v6357_v30 }
 0x1e5   :  { %926 = vadd.xlane.f32.xlu1 %v683_v5  ;;  %v686_v5 = vmul.f32 %v7068_v23, %v6359_v42  ;;  %v685_v21 = vmul.f32 %v7068_v23, %v6361_v3  ;;  %v6363_v30 = vpop.eup %6362 }
 0x1e6   :  { %924 = vadd.xlane.f32.xlu0 %v682_v63  ;;  %v7235_v63 = vshrl.u32 %v11716_v28, 7 }
 0x1e7   :  { %v7225_v40 = vpop.xlane.xlu2 %844 }
 0x1e8   :  { %12030 = vst [vmem:[#allocation34_spill] sm:$0xff] %v7225_v40  ;;  %v7228_v43 = vpop.xlane.xlu1 %842  ;;  %v279_v40 = vld [vmem:[#allocation4 + $0x3d8] sm:$0xff]  ;;  %6100 = vset.pattern.permute.xlu2 %v7235_v63  ;;  %v6365_v42 = vpop.eup %6364 }
 0x1e9   :  { %12031 = vst [vmem:[#allocation35_spill] sm:$0xff] %v7228_v43  ;;  %v7230_v24 = vpop.xlane.xlu0 %840  ;;  %v431_v50 = vadd.f32 %v7180_v54, %v279_v40  ;;  %v6367_v43 = vpop.eup %6366  ;;  %v282_v40 = vld [vmem:[#allocation4 + $0x3f0] sm:$0xff] }
 0x1ea   :  { %12032 = vst [vmem:[#allocation36_spill] sm:$0xff] %v7230_v24  ;;  %v433_v24 = vadd.f32 %v7180_v54, %v281_v26  ;;  %v690_v26 = vmul.f32 %v7068_v23, %v6363_v30 }
 0x1ec   :  { %934 = vadd.xlane.f32.xlu2 %v687_v8  ;;  %6368 = vtanh.f32 %v433_v24  ;;  %v963_v8 = vadd.s32 8, %v7235_v63  ;;  %v435_v24 = vadd.f32 %v7180_v54, %v283_v10 }
 0x1ed   :  { %932 = vadd.xlane.f32.xlu1 %v686_v5  ;;  %6370 = vtanh.f32 %v432_v17  ;;  %v689_v5 = vmul.f32 %v7068_v23, %v6365_v42  ;;  %v434_v17 = vadd.f32 %v7180_v54, %v282_v40 }
 0x1ee   :  { %930 = vadd.xlane.f32.xlu0 %v685_v21  ;;  %6372 = vtanh.f32 %v431_v50  ;;  %v688_v21 = vmul.f32 %v7068_v23, %v6367_v43 }
 0x1ef   :  { %v7241_v9 = vpop.xlane.xlu2 %850  ;;  %6101 = vset.pattern.permute.xlu0 %v963_v8  ;;  %6374 = vtanh.f32 %v435_v24 }
 0x1f0   :  { %12033 = vst [vmem:[#allocation37_spill] sm:$0xff] %v7241_v9  ;;  %v7244_v28 = vpop.xlane.xlu1 %848  ;;  %v969_v9 = vadd.s32 16, %v7235_v63  ;;  %6376 = vtanh.f32 %v434_v17 }
 0x1f1   :  { %12034 = vst [vmem:[#allocation38_spill] sm:$0xff] %v7244_v28  ;;  %v7246_v3 = vpop.xlane.xlu0 %846 }
 0x1f2   :  { %12035 = vst [vmem:[#allocation39_spill] sm:$0xff] %v7246_v3  ;;  %6102 = vset.pattern.permute.xlu1 %v969_v9  ;;  %v6369_v3 = vpop.eup %6368 }
 0x1f3   :  { %v6371_v30 = vpop.eup %6370  ;;  %v693_v43 = vmul.f32 %v7068_v23, %v6369_v3 }
 0x1f4   :  { %940 = vadd.xlane.f32.xlu2 %v690_v26  ;;  %v6373_v42 = vpop.eup %6372  ;;  %v692_v26 = vmul.f32 %v7068_v23, %v6371_v30 }
 0x1f5   :  { %938 = vadd.xlane.f32.xlu1 %v689_v5  ;;  %v691_v5 = vmul.f32 %v7068_v23, %v6373_v42  ;;  %v6375_v54 = vpop.eup %6374 }
 0x1f6   :  { %936 = vadd.xlane.f32.xlu0 %v688_v21  ;;  %v6377_v21 = vpop.eup %6376 }
 0x1f7   :  { %v7254_v28 = vpop.xlane.xlu2 %856  ;;  %v694_v3 = vmul.f32 %v7068_v23, %v6377_v21 }
 0x1f8   :  { %v7257_v50 = vpop.xlane.xlu1 %854 }
 0x1f9   :  { %v7259_v8 = vpop.xlane.xlu0 %852 }
 0x1fa   :  { %12036 = vst [vmem:[#allocation40_spill] sm:$0xff] %v7259_v8  ;;  %v695_v8 = vmul.f32 %v7068_v23, %v6375_v54  ;;  %v975_v54 = vadd.s32 24, %v7235_v63 }
 0x1fc   :  { %946 = vadd.xlane.f32.xlu2 %v693_v43 }
 0x1fd   :  { %944 = vadd.xlane.f32.xlu1 %v692_v26  ;;  %v7285_v26 = vld [vmem:[%s11696_s4] ss:$0 sm:$0xff] }
 0x1fe   :  { %942 = vadd.xlane.f32.xlu0 %v691_v5 }
 0x1ff   :  { %v7264_v9 = vpop.xlane.xlu2 %862 }
 0x200   :  { %v7266_v10 = vpop.xlane.xlu1 %860 }
 0x201   :  { %v7268_v40 = vpop.xlane.xlu0 %858 }
 0x202   :  { %12037 = vst [vmem:[#allocation41_spill] sm:$0xff] %v7268_v40 }
 0x205   :  { %950 = vadd.xlane.f32.xlu1 %v695_v8 }
 0x206   :  { %948 = vadd.xlane.f32.xlu0 %v694_v3  ;;  %v1005_v3 = vadd.s32 64, %v7235_v63 }
 0x207   :  { %v7272_v24 = vpop.xlane.xlu2 %868 }
 0x208   :  { %v7274_v17 = vpop.xlane.xlu1 %866 }
 0x209   :  { %v7276_v30 = vpop.xlane.xlu0 %864 }
 0x20a   :  { %12038 = vst [vmem:[#allocation42_spill] sm:$0xff] %v7276_v30 }
 0x20f   :  { %v7278_v42 = vpop.xlane.xlu2 %874 }
 0x210   :  { %12039 = vst [vmem:[#allocation43_spill] sm:$0xff] %v7278_v42  ;;  %v7280_v43 = vpop.xlane.xlu1 %872 }
 0x211   :  { %12040 = vst [vmem:[#allocation44_spill] sm:$0xff] %v7280_v43  ;;  %v7287_v5 = vpop.xlane.xlu0 %870 }
 0x212   :  { %12041 = vst [vmem:[#allocation45_spill] sm:$0xff] %v7287_v5 }
 0x214   :  { %959 = vperm.xlu2 %6100, %v7285_v26  }
 0x217   :  { %v7290_v23 = vpop.xlane.xlu2 %880 }
 0x218   :  { %12042 = vst [vmem:[#allocation46_spill] sm:$0xff] %v7290_v23  ;;  %v7292_v8 = vpop.xlane.xlu1 %878  ;;  %v987_v23 = vadd.s32 40, %v7235_v63 }
 0x219   :  { %12043 = vst [vmem:[#allocation47_spill] sm:$0xff] %v7292_v8  ;;  %v7295_v21 = vpop.xlane.xlu0 %876 }
 0x21a   :  { %12044 = vst [vmem:[#allocation48_spill] sm:$0xff] %v7295_v21  ;;  %965 = vperm.xlu0 %6101, %v7285_v26  }
 0x21c   :  { %6103 = vset.pattern.permute.xlu2 %v975_v54  ;;  %v981_v54 = vadd.s32 32, %v7235_v63 }
 0x21e   :  { %971 = vperm.xlu1 %6102, %v7285_v26  }
 0x21f   :  { %v7300_v30 = vpop.xlane.xlu2 %886 }
 0x220   :  { %12045 = vst [vmem:[#allocation49_spill] sm:$0xff] %v7300_v30  ;;  %v7302_v5 = vpop.xlane.xlu1 %884 }
 0x221   :  { %12046 = vst [vmem:[#allocation50_spill] sm:$0xff] %v7302_v5  ;;  %v7304_v42 = vpop.xlane.xlu0 %882 }
 0x222   :  { %12047 = vst [vmem:[#allocation51_spill] sm:$0xff] %v7304_v42  ;;  %6108 = vset.pattern.permute.xlu0 %v1005_v3  ;;  %v1035_v3 = vadd.s32 104, %v7235_v63 }
 0x224   :  { %977 = vperm.xlu2 %6103, %v7285_v26  }
 0x226   :  { %6105 = vset.pattern.permute.xlu1 %v987_v23 }
 0x227   :  { %v7308_v21 = vpop.xlane.xlu2 %892 }
 0x228   :  { %12048 = vst [vmem:[#allocation52_spill] sm:$0xff] %v7308_v21  ;;  %v7310_v8 = vpop.xlane.xlu1 %890  ;;  %v999_v21 = vadd.s32 56, %v7235_v63 }
 0x229   :  { %12049 = vst [vmem:[#allocation53_spill] sm:$0xff] %v7310_v8  ;;  %v7313_v40 = vpop.xlane.xlu0 %888 }
 0x22a   :  { %12050 = vst [vmem:[#allocation54_spill] sm:$0xff] %v7313_v40  ;;  %1007 = vperm.xlu0 %6108, %v7285_v26  }
 0x22c   :  { %6104 = vset.pattern.permute.xlu2 %v981_v54  ;;  %v993_v54 = vadd.s32 48, %v7235_v63 }
 0x22e   :  { %989 = vperm.xlu1 %6105, %v7285_v26  }
 0x22f   :  { %v7318_v42 = vpop.xlane.xlu2 %898 }
 0x230   :  { %12051 = vst [vmem:[#allocation55_spill] sm:$0xff] %v7318_v42  ;;  %v7320_v30 = vpop.xlane.xlu1 %896 }
 0x231   :  { %12052 = vst [vmem:[#allocation56_spill] sm:$0xff] %v7320_v30  ;;  %v7322_v23 = vpop.xlane.xlu0 %894  ;;  %v6677_v30 = vmov 0  }
 0x232   :  { %12053 = vst [vmem:[#allocation57_spill] sm:$0xff] %v7322_v23  ;;  %6113 = vset.pattern.permute.xlu0 %v1035_v3 }
 0x234   :  { %983 = vperm.xlu2 %6104, %v7285_v26  }
 0x236   :  { %6107 = vset.pattern.permute.xlu1 %v999_v21  ;;  %v1017_v21 = vadd.s32 80, %v7235_v63 }
 0x237   :  { %v7326_v40 = vpop.xlane.xlu2 %904 }
 0x238   :  { %12054 = vst [vmem:[#allocation58_spill] sm:$0xff] %v7326_v40  ;;  %v7328_v8 = vpop.xlane.xlu1 %902 }
 0x239   :  { %12055 = vst [vmem:[#allocation59_spill] sm:$0xff] %v7328_v8  ;;  %v7331_v5 = vpop.xlane.xlu0 %900 }
 0x23a   :  { %12056 = vst [vmem:[#allocation60_spill] sm:$0xff] %v7331_v5  ;;  %1037 = vperm.xlu0 %6113, %v7285_v26   ;;  %v1011_v5 = vadd.s32 72, %v7235_v63 }
 0x23c   :  { %6106 = vset.pattern.permute.xlu2 %v993_v54 }
 0x23e   :  { %1001 = vperm.xlu1 %6107, %v7285_v26  }
 0x23f   :  { %v7335_v23 = vpop.xlane.xlu2 %910 }
 0x240   :  { %12057 = vst [vmem:[#allocation61_spill] sm:$0xff] %v7335_v23  ;;  %v7339_v42 = vpop.xlane.xlu1 %908 }
 0x241   :  { %v7337_v3 = vpop.xlane.xlu0 %906  ;;  %12059 = vst [vmem:[#allocation63_spill] sm:$0xff] %v7339_v42  ;;  %v1029_v42 = vadd.s32 96, %v7235_v63 }
 0x242   :  { %12058 = vst [vmem:[#allocation62_spill] sm:$0xff] %v7337_v3  ;;  %6118 = vset.pattern.permute.xlu0 %v6677_v30 }
 0x244   :  { %995 = vperm.xlu2 %6106, %v7285_v26  }
 0x246   :  { %6110 = vset.pattern.permute.xlu1 %v1017_v21 }
 0x247   :  { %v7343_v40 = vpop.xlane.xlu2 %916 }
 0x248   :  { %12060 = vst [vmem:[#allocation64_spill] sm:$0xff] %v7343_v40  ;;  %v7348_v54 = vpop.xlane.xlu1 %914 }
 0x249   :  { %v7346_v8 = vpop.xlane.xlu0 %912  ;;  %12062 = vst [vmem:[#allocation66_spill] sm:$0xff] %v7348_v54  ;;  %v1047_v54 = vadd.s32 120, %v7235_v63 }
 0x24a   :  { %12061 = vst [vmem:[#allocation65_spill] sm:$0xff] %v7346_v8  ;;  %v1023_v8 = vadd.s32 88, %v7235_v63 }
 0x24c   :  { %6109 = vset.pattern.permute.xlu2 %v1011_v5 }
 0x24e   :  { %1019 = vperm.xlu1 %6110, %v7285_v26  }
 0x24f   :  { %v7351_v23 = vpop.xlane.xlu2 %922 }
 0x250   :  { %12063 = vst [vmem:[#allocation67_spill] sm:$0xff] %v7351_v23  ;;  %v7357_v21 = vpop.xlane.xlu1 %920 }
 0x251   :  { %v7353_v3 = vpop.xlane.xlu0 %918  ;;  %12065 = vst [vmem:[#allocation69_spill] sm:$0xff] %v7357_v21  ;;  %v1041_v21 = vadd.s32 112, %v7235_v63 }
 0x252   :  { %12064 = vst [vmem:[#allocation68_spill] sm:$0xff] %v7353_v3 }
 0x254   :  { %1013 = vperm.xlu2 %6109, %v7285_v26  }
 0x256   :  { %6112 = vset.pattern.permute.xlu1 %v1029_v42 }
 0x257   :  { %v7359_v40 = vpop.xlane.xlu2 %928 }
 0x258   :  { %12066 = vst [vmem:[#allocation70_spill] sm:$0xff] %v7359_v40  ;;  %v7367_v3 = vpop.xlane.xlu1 %926 }
 0x259   :  { %v7362_v5 = vpop.xlane.xlu0 %924 }
 0x25a   :  { %12067 = vst [vmem:[#allocation71_spill] sm:$0xff] %v7362_v5 }
 0x25c   :  { %6111 = vset.pattern.permute.xlu2 %v1023_v8 }
 0x25e   :  { %1031 = vperm.xlu1 %6112, %v7285_v26  }
 0x25f   :  { %v7365_v23 = vpop.xlane.xlu2 %934 }
 0x260   :  { %12068 = vst [vmem:[#allocation72_spill] sm:$0xff] %v7365_v23  ;;  %v7376_v43 = vpop.xlane.xlu1 %932 }
 0x261   :  { %v7371_v42 = vpop.xlane.xlu0 %930 }
 0x262   :  { %12069 = vst [vmem:[#allocation73_spill] sm:$0xff] %v7371_v42 }
 0x264   :  { %1025 = vperm.xlu2 %6111, %v7285_v26  }
 0x266   :  { %6115 = vset.pattern.permute.xlu1 %v1047_v54 }
 0x267   :  { %v7373_v40 = vpop.xlane.xlu2 %940 }
 0x268   :  { %12070 = vst [vmem:[#allocation74_spill] sm:$0xff] %v7373_v40  ;;  %v7383_v23 = vpop.xlane.xlu1 %938 }
 0x269   :  { %v7381_v5 = vpop.xlane.xlu0 %936 }
 0x26a   :  { %12072 = vst [vmem:[#allocation76_spill] sm:$0xff] %v7381_v5 }
 0x26c   :  { %6114 = vset.pattern.permute.xlu2 %v1041_v21 }
 0x26e   :  { %1049 = vperm.xlu1 %6115, %v7285_v26  }
 0x26f   :  { %v7379_v8 = vpop.xlane.xlu2 %946 }
 0x270   :  { %12071 = vst [vmem:[#allocation75_spill] sm:$0xff] %v7379_v8  ;;  %v7395_v21 = vpop.xlane.xlu1 %944 }
 0x271   :  { %v7388_v54 = vpop.xlane.xlu0 %942 }
 0x272   :  { %12073 = vst [vmem:[#allocation77_spill] sm:$0xff] %v7388_v54 }
 0x274   :  { %1043 = vperm.xlu2 %6114, %v7285_v26  }
 0x276   :  { %6117 = vset.pattern.permute.xlu1 %v6677_v30 }
 0x277   :  { %v7386_v42 = vpop.permute.xlu2 %959 }
 0x278   :  { %v7392_v63 = vadd.f32 %v7386_v42, %v6925_v34  ;;  %v7406_v54 = vpop.xlane.xlu1 %950 }
 0x279   :  { %v7403_v26 = vpop.xlane.xlu0 %948 }
 0x27a   :  { %12074 = vst [vmem:[#allocation78_spill] sm:$0xff] %v7392_v63 }
 0x27b   :  { %12076 = vst [vmem:[#allocation80_spill] sm:$0xff] %v7403_v26 }
 0x27c   :  { %6116 = vset.pattern.permute.xlu2 %v6677_v30 }
 0x27d   :  { %1324 = vperm.xlu2 %6116, %v7392_v63  }
 0x27f   :  { %v7397_v8 = vpop.permute.xlu2 %977 }
 0x280   :  { %v7401_v5 = vadd.f32 %v7397_v8, %v6935_v47 }
 0x282   :  { %12075 = vst [vmem:[#allocation79_spill] sm:$0xff] %v7401_v5 }
 0x285   :  { %1333 = vperm.xlu2 %6116, %v7401_v5  }
 0x28c   :  { %v7408_v40 = vpop.permute.xlu0 %965 }
 0x28d   :  { %v7412_v34 = vadd.f32 %v7408_v40, %v6937_v49 }
 0x28e   :  { %v7421_v63 = vpop.permute.xlu2 %983 }
 0x28f   :  { %12077 = vst [vmem:[#allocation81_spill] sm:$0xff] %v7412_v34  ;;  %1327 = vperm.xlu1 %6117, %v7412_v34   ;;  %v7426_v5 = vadd.f32 %v7421_v63, %v6920_v29 }
 0x290   :  { %v7415_v30 = vpop.permute.xlu1 %971 }
 0x291   :  { %v7419_v47 = vadd.f32 %v7415_v30, %v6923_v32  ;;  %12079 = vst [vmem:[#allocation83_spill] sm:$0xff] %v7426_v5 }
 0x293   :  { %12078 = vst [vmem:[#allocation82_spill] sm:$0xff] %v7419_v47  ;;  %1330 = vperm.xlu0 %6118, %v7419_v47  }
 0x297   :  { %1336 = vperm.xlu1 %6117, %v7426_v5  }
 0x29c   :  { %v7443_v29 = vpop.permute.xlu0 %1007 }
 0x29d   :  { %v7447_v5 = vadd.f32 %v7443_v29, %v6944_v59 }
 0x29e   :  { %v7429_v49 = vpop.permute.xlu2 %995 }
 0x29f   :  { %v7433_v34 = vadd.f32 %v7429_v49, %v6949_v0  ;;  %12082 = vst [vmem:[#allocation86_spill] sm:$0xff] %v7447_v5 }
 0x2a0   :  { %v7435_v26 = vpop.permute.xlu1 %989 }
 0x2a1   :  { %12080 = vst [vmem:[#allocation84_spill] sm:$0xff] %v7433_v34  ;;  %1342 = vperm.xlu1 %6117, %v7433_v34   ;;  %v7440_v32 = vadd.f32 %v7435_v26, %v6932_v44 }
 0x2a3   :  { %12081 = vst [vmem:[#allocation85_spill] sm:$0xff] %v7440_v32  ;;  %1339 = vperm.xlu2 %6116, %v7440_v32  }
 0x2ab   :  { %1348 = vperm.xlu2 %6116, %v7447_v5  }
 0x2ae   :  { %v7450_v0 = vpop.permute.xlu2 %1013 }
 0x2af   :  { %v7454_v47 = vadd.f32 %v7450_v0, %v6961_v20 }
 0x2b0   :  { %v7456_v34 = vpop.permute.xlu1 %1001 }
 0x2b1   :  { %12083 = vst [vmem:[#allocation87_spill] sm:$0xff] %v7454_v47  ;;  %1351 = vperm.xlu1 %6117, %v7454_v47   ;;  %v7461_v44 = vadd.f32 %v7456_v34, %v6947_v62  ;;  %v7478_v62 = vpop.permute.xlu0 %1037 }
 0x2b2   :  { %v7482_v47 = vadd.f32 %v7478_v62, %v6972_v36 }
 0x2b3   :  { %12084 = vst [vmem:[#allocation88_spill] sm:$0xff] %v7461_v44  ;;  %1345 = vperm.xlu0 %6118, %v7461_v44  }
 0x2b4   :  { %12087 = vst [vmem:[#allocation91_spill] sm:$0xff] %v7482_v47 }
 0x2be   :  { %v7464_v59 = vpop.permute.xlu2 %1025 }
 0x2bf   :  { %v7468_v5 = vadd.f32 %v7464_v59, %v6956_v15 }
 0x2c0   :  { %v7470_v32 = vpop.permute.xlu1 %1019 }
 0x2c1   :  { %12085 = vst [vmem:[#allocation89_spill] sm:$0xff] %v7468_v5  ;;  %1357 = vperm.xlu2 %6116, %v7468_v5   ;;  %v7475_v20 = vadd.f32 %v7470_v32, %v6959_v18  ;;  %v7496_v18 = vadd.f32 %v7386_v42, %v6986_v55 }
 0x2c3   :  { %12086 = vst [vmem:[#allocation90_spill] sm:$0xff] %v7475_v20  ;;  %1354 = vperm.xlu0 %6118, %v7475_v20   ;;  %v12163_v20 = vld [vmem:[#allocation25_spill] sm:$0xff] }
 0x2c4   :  { %12089 = vst [vmem:[#allocation93_spill] sm:$0xff] %v7496_v18 }
 0x2cb   :  { %1363 = vperm.xlu0 %6118, %v7482_v47   ;;  %v7511_v47 = vadd.f32 %v7397_v8, %v6998_v13  ;;  %v7538_v13 = vadd.f32 %v7450_v0, %v7022_v58  ;;  %v7557_v58 = vadd.f32 %v7435_v26, %v7012_v37 }
 0x2cd   :  { %12092 = vst [vmem:[#allocation96_spill] sm:$0xff] %v7511_v47 }
 0x2ce   :  { %v7485_v15 = vpop.permute.xlu2 %1043  ;;  %12097 = vst [vmem:[#allocation101_spill] sm:$0xff] %v7538_v13 }
 0x2cf   :  { %v7489_v44 = vadd.f32 %v7485_v15, %v6969_v31  ;;  %v7506_v31 = vadd.f32 %v7408_v40, %v6983_v52  ;;  %v7523_v52 = vadd.f32 %v7429_v49, %v7010_v33  ;;  %v7542_v33 = vadd.f32 %v7415_v30, %v7000_v16  ;;  %12101 = vst [vmem:[#allocation105_spill] sm:$0xff] %v7557_v58 }
 0x2d0   :  { %v7491_v5 = vpop.permute.xlu1 %1031  ;;  %v7563_v16 = vadd.f32 %v7478_v62, %v7032_v19  ;;  %v7580_v19 = vadd.f32 %v7386_v42, %v7046_v46 }
 0x2d1   :  { %12088 = vst [vmem:[#allocation92_spill] sm:$0xff] %v7489_v44  ;;  %1366 = vperm.xlu2 %6116, %v7489_v44   ;;  %v7500_v36 = vadd.f32 %v7491_v5, %v6976_v39  ;;  %v7516_v39 = vadd.f32 %v7421_v63, %v6995_v7  ;;  %v7533_v7 = vadd.f32 %v7456_v34, %v7007_v27 }
 0x2d2   :  { %12091 = vst [vmem:[#allocation95_spill] sm:$0xff] %v7506_v31  ;;  %v7553_v27 = vadd.f32 %v7491_v5, %v7035_v25  ;;  %v7572_v25 = vadd.f32 %v7443_v29, %v7024_v61  ;;  %v7589_v61 = vadd.f32 %v7464_v59, %v7039_v2  ;;  %v7606_v2 = vadd.f32 %v7485_v15, %v7051_v56 }
 0x2d3   :  { %12090 = vst [vmem:[#allocation94_spill] sm:$0xff] %v7500_v36  ;;  %1372 = vperm.xlu0 %6118, %v7496_v18   ;;  %1360 = vperm.xlu1 %6117, %v7500_v36   ;;  %v7623_v56 = vadd.f32 %v7408_v40, %v7063_v12 }
 0x2d4   :  { %12093 = vst [vmem:[#allocation97_spill] sm:$0xff] %v7516_v39 }
 0x2d5   :  { %12094 = vst [vmem:[#allocation98_spill] sm:$0xff] %v7523_v52 }
 0x2d6   :  { %12096 = vst [vmem:[#allocation100_spill] sm:$0xff] %v7533_v7 }
 0x2d7   :  { %12098 = vst [vmem:[#allocation102_spill] sm:$0xff] %v7542_v33  ;;  %v7576_v37 = vpop.permute.xlu2 %1324 }
 0x2d8   :  { %12100 = vst [vmem:[#allocation104_spill] sm:$0xff] %v7553_v27 }
 0x2d9   :  { %1375 = vperm.xlu2 %6116, %v7506_v31   ;;  %12102 = vst [vmem:[#allocation106_spill] sm:$0xff] %v7563_v16 }
 0x2da   :  { %12104 = vst [vmem:[#allocation108_spill] sm:$0xff] %v7572_v25 }
 0x2db   :  { %1381 = vperm.xlu0 %6118, %v7511_v47   ;;  %12105 = vst [vmem:[#allocation109_spill] sm:$0xff] %v7580_v19 }
 0x2dc   :  { %12107 = vst [vmem:[#allocation111_spill] sm:$0xff] %v7589_v61 }
 0x2dd   :  { %12110 = vst [vmem:[#allocation114_spill] sm:$0xff] %v7606_v2 }
 0x2de   :  { %12113 = vst [vmem:[#allocation117_spill] sm:$0xff] %v7623_v56 }
 0x2df   :  { %v7597_v46 = vpop.permute.xlu2 %1333 }
 0x2e0   :  { %v7518_v55 = vpop.permute.xlu1 %1049 }
 0x2e1   :  { %1384 = vperm.xlu2 %6116, %v7516_v39   ;;  %v7527_v31 = vadd.f32 %v7518_v55, %v6988_v57  ;;  %v7548_v57 = vadd.f32 %v7470_v32, %v7019_v53  ;;  %v7568_v53 = vadd.f32 %v7518_v55, %v7049_v51  ;;  %v7585_v51 = vadd.f32 %v7415_v30, %v7061_v22 }
 0x2e2   :  { %v7602_v22 = vadd.f32 %v7435_v26, %v7078_v60  ;;  %v7619_v60 = vadd.f32 %v7443_v29, %v7090_v35  ;;  %v7638_v35 = vadd.f32 %v7421_v63, %v7080_v1  ;;  %v7655_v1 = vadd.f32 %v7456_v34, %v7092_v41  ;;  %v12124_v41 = vld [vmem:[#allocation8_spill] sm:$0xff] }
 0x2e3   :  { %12095 = vst [vmem:[#allocation99_spill] sm:$0xff] %v7527_v31  ;;  %1390 = vperm.xlu0 %6118, %v7523_v52   ;;  %1369 = vperm.xlu1 %6117, %v7527_v31   ;;  %v12140_v52 = vld [vmem:[#allocation17_spill] sm:$0xff]  ;;  %v12150_v31 = vld [vmem:[#allocation19_spill] sm:$0xff] }
 0x2e4   :  { %12099 = vst [vmem:[#allocation103_spill] sm:$0xff] %v7548_v57 }
 0x2e5   :  { %12103 = vst [vmem:[#allocation107_spill] sm:$0xff] %v7568_v53 }
 0x2e6   :  { %12106 = vst [vmem:[#allocation110_spill] sm:$0xff] %v7585_v51 }
 0x2e7   :  { %12109 = vst [vmem:[#allocation113_spill] sm:$0xff] %v7602_v22 }
 0x2e8   :  { %12112 = vst [vmem:[#allocation116_spill] sm:$0xff] %v7619_v60 }
 0x2e9   :  { %1393 = vperm.xlu2 %6116, %v7533_v7   ;;  %12116 = vst [vmem:[#allocation120_spill] sm:$0xff] %v7638_v35  ;;  %v12133_v7 = vld [vmem:[#allocation14_spill] sm:$0xff] }
 0x2ea   :  { %12119 = vst [vmem:[#allocation123_spill] sm:$0xff] %v7655_v1 }
 0x2eb   :  { %1399 = vperm.xlu0 %6118, %v7538_v13   ;;  %1378 = vperm.xlu1 %6117, %v7542_v33   ;;  %v12137_v13 = vld [vmem:[#allocation13_spill] sm:$0xff]  ;;  %v12176_v33 = vld [vmem:[#allocation30_spill] sm:$0xff] }
 0x2f1   :  { %1402 = vperm.xlu2 %6116, %v7548_v57  }
 0x2f3   :  { %1408 = vperm.xlu0 %6118, %v7553_v27   ;;  %1387 = vperm.xlu1 %6117, %v7557_v58   ;;  %v12172_v58 = vld [vmem:[#allocation31_spill] sm:$0xff] }
 0x2f9   :  { %1411 = vperm.xlu2 %6116, %v7563_v16   ;;  %v7595_v16 = vadd.f32 %v7397_v8, %v7058_v11  ;;  %v7612_v11 = vadd.f32 %v7429_v49, %v7075_v48  ;;  %v7629_v48 = vadd.f32 %v7450_v0, %v7087_v4  ;;  %v7646_v4 = vadd.f32 %v7491_v5, %v7099_v38  ;;  %v12120_v38 = vld [vmem:[#allocation9_spill] sm:$0xff] }
 0x2fb   :  { %1417 = vperm.xlu0 %6118, %v7568_v53   ;;  %1396 = vperm.xlu1 %6117, %v7572_v25   ;;  %12108 = vst [vmem:[#allocation112_spill] sm:$0xff] %v7595_v16  ;;  %v12131_v53 = vld [vmem:[#allocation10_spill] sm:$0xff] }
 0x2fc   :  { %12111 = vst [vmem:[#allocation115_spill] sm:$0xff] %v7612_v11  ;;  %v7695_v57 = vadd.f32 %v7478_v62, %v12131_v53 }
 0x2fd   :  { %12114 = vst [vmem:[#allocation118_spill] sm:$0xff] %v7629_v48 }
 0x2fe   :  { %12117 = vst [vmem:[#allocation121_spill] sm:$0xff] %v7646_v4 }
 0x2ff   :  { %12132 = vst [vmem:[#allocation10_spill] sm:$0xff] %v7695_v57 }
 0x301   :  { %1420 = vperm.xlu2 %6116, %v7580_v19   ;;  %v7614_v19 = vpop.permute.xlu2 %1339 }
 0x303   :  { %1426 = vperm.xlu0 %6118, %v7585_v51   ;;  %1405 = vperm.xlu1 %6117, %v7589_v61   ;;  %v12127_v51 = vld [vmem:[#allocation11_spill] sm:$0xff] }
 0x304   :  { %v12169_v61 = vld [vmem:[#allocation27_spill] sm:$0xff] }
 0x309   :  { %1429 = vperm.xlu2 %6116, %v7595_v16   ;;  %v7640_v12 = vpop.permute.xlu2 %1348  ;;  %v7674_v16 = vadd.f32 %v7470_v32, %v12124_v41 }
 0x30b   :  { %1435 = vperm.xlu0 %6118, %v7602_v22   ;;  %1414 = vperm.xlu1 %6117, %v7606_v2   ;;  %12125 = vst [vmem:[#allocation8_spill] sm:$0xff] %v7674_v16  ;;  %v7676_v22 = vpop.permute.xlu1 %1327  ;;  %v12165_v2 = vld [vmem:[#allocation28_spill] sm:$0xff] }
 0x311   :  { %1438 = vperm.xlu2 %6116, %v7612_v11   ;;  %v7634_v11 = vadd.f32 %v7464_v59, %v7102_v14  ;;  %v7651_v14 = vadd.f32 %v7485_v15, %v7115_v6  ;;  %v12122_v6 = vld [vmem:[#allocation12_spill] sm:$0xff] }
 0x313   :  { %1444 = vperm.xlu0 %6118, %v7619_v60   ;;  %1423 = vperm.xlu1 %6117, %v7623_v56   ;;  %12115 = vst [vmem:[#allocation119_spill] sm:$0xff] %v7634_v11  ;;  %v7665_v60 = vadd.f32 %v7518_v55, %v12120_v38  ;;  %v7701_v27 = vpop.permute.xlu1 %1336  ;;  %v12159_v56 = vld [vmem:[#allocation26_spill] sm:$0xff] }
 0x314   :  { %12118 = vst [vmem:[#allocation122_spill] sm:$0xff] %v7651_v14 }
 0x315   :  { %12121 = vst [vmem:[#allocation9_spill] sm:$0xff] %v7665_v60 }
 0x319   :  { %1447 = vperm.xlu2 %6116, %v7629_v48  }
 0x31b   :  { %1453 = vperm.xlu0 %6118, %v7634_v11   ;;  %1432 = vperm.xlu1 %6117, %v7638_v35   ;;  %v7657_v48 = vpop.permute.xlu2 %1357  ;;  %v7661_v11 = vpop.permute.xlu0 %1330  ;;  %v12152_v35 = vld [vmem:[#allocation23_spill] sm:$0xff] }
 0x31c   :  { %v7722_v39 = vpop.permute.xlu1 %1342 }
 0x321   :  { %1456 = vperm.xlu2 %6116, %v7646_v4   ;;  %v7670_v4 = vadd.f32 %v7408_v40, %v12122_v6  ;;  %v12129_v6 = vld [vmem:[#allocation15_spill] sm:$0xff] }
 0x322   :  { %v7691_v41 = vadd.f32 %v7421_v63, %v12129_v6  ;;  %v12135_v6 = vld [vmem:[#allocation18_spill] sm:$0xff] }
 0x323   :  { %1462 = vperm.xlu0 %6118, %v7651_v14   ;;  %1441 = vperm.xlu1 %6117, %v7655_v1   ;;  %12123 = vst [vmem:[#allocation12_spill] sm:$0xff] %v7670_v4  ;;  %v7712_v53 = vadd.f32 %v7456_v34, %v12135_v6  ;;  %v12142_v6 = vld [vmem:[#allocation21_spill] sm:$0xff]  ;;  %v12146_v1 = vld [vmem:[#allocation20_spill] sm:$0xff] }
 0x324   :  { %12130 = vst [vmem:[#allocation15_spill] sm:$0xff] %v7691_v41  ;;  %v7743_v47 = vpop.permute.xlu1 %1351 }
 0x325   :  { %v7682_v38 = vpop.permute.xlu0 %1345  ;;  %12136 = vst [vmem:[#allocation18_spill] sm:$0xff] %v7712_v53 }
 0x329   :  { %1465 = vperm.xlu2 %6116, %v7665_v60   ;;  %v7686_v60 = vadd.f32 %v7415_v30, %v12127_v51 }
 0x32b   :  { %1471 = vperm.xlu0 %6118, %v7670_v4   ;;  %1450 = vperm.xlu1 %6117, %v7674_v16   ;;  %v7680_v14 = vpop.permute.xlu2 %1366  ;;  %12128 = vst [vmem:[#allocation11_spill] sm:$0xff] %v7686_v60  ;;  %v12144_v16 = vld [vmem:[#allocation16_spill] sm:$0xff] }
 0x32c   :  { %12126 = vst [vmem:[#allocation124_spill] sm:$0xff] %v7680_v14 }
 0x331   :  { %1474 = vperm.xlu2 %6116, %v7686_v60   ;;  %v7707_v60 = vadd.f32 %v7435_v26, %v12133_v7 }
 0x333   :  { %1480 = vperm.xlu0 %6118, %v7691_v41   ;;  %1459 = vperm.xlu1 %6117, %v7695_v57   ;;  %v7699_v4 = vpop.permute.xlu2 %1375  ;;  %12134 = vst [vmem:[#allocation14_spill] sm:$0xff] %v7707_v60  ;;  %v7716_v41 = vadd.f32 %v7386_v42, %v12137_v13  ;;  %v7733_v13 = vadd.f32 %v7470_v32, %v12142_v6  ;;  %v12148_v6 = vld [vmem:[#allocation24_spill] sm:$0xff] }
 0x335   :  { %v7703_v51 = vpop.permute.xlu0 %1354  ;;  %12138 = vst [vmem:[#allocation13_spill] sm:$0xff] %v7716_v41 }
 0x336   :  { %12143 = vst [vmem:[#allocation21_spill] sm:$0xff] %v7733_v13 }
 0x339   :  { %1483 = vperm.xlu2 %6116, %v7707_v60   ;;  %v7728_v60 = vadd.f32 %v7443_v29, %v12140_v52 }
 0x33b   :  { %1489 = vperm.xlu0 %6118, %v7712_v53   ;;  %1468 = vperm.xlu1 %6117, %v7716_v41   ;;  %v7720_v57 = vpop.permute.xlu2 %1384  ;;  %12141 = vst [vmem:[#allocation17_spill] sm:$0xff] %v7728_v60  ;;  %v7737_v53 = vadd.f32 %v7397_v8, %v12144_v16  ;;  %v7754_v16 = vadd.f32 %v7478_v62, %v12148_v6  ;;  %v12155_v6 = vld [vmem:[#allocation22_spill] sm:$0xff] }
 0x33d   :  { %v7724_v7 = vpop.permute.xlu0 %1363  ;;  %12145 = vst [vmem:[#allocation16_spill] sm:$0xff] %v7737_v53 }
 0x33e   :  { %12139 = vst [vmem:[#allocation125_spill] sm:$0xff] %v7724_v7  ;;  %v12183_v7 = vld [vmem:[#allocation33_spill] sm:$0xff] }
 0x33f   :  { %12149 = vst [vmem:[#allocation24_spill] sm:$0xff] %v7754_v16 }
 0x341   :  { %1492 = vperm.xlu2 %6116, %v7728_v60   ;;  %v7749_v60 = vadd.f32 %v7464_v59, %v12146_v1 }
 0x343   :  { %1498 = vperm.xlu0 %6118, %v7733_v13   ;;  %1477 = vperm.xlu1 %6117, %v7737_v53   ;;  %v7741_v41 = vpop.permute.xlu2 %1393  ;;  %12147 = vst [vmem:[#allocation20_spill] sm:$0xff] %v7749_v60  ;;  %v7758_v13 = vadd.f32 %v7429_v49, %v12150_v31  ;;  %v7775_v31 = vadd.f32 %v7386_v42, %v7192_v45  ;;  %v12161_v45 = vld [vmem:[#allocation29_spill] sm:$0xff] }
 0x345   :  { %v7745_v52 = vpop.permute.xlu0 %1372  ;;  %12151 = vst [vmem:[#allocation19_spill] sm:$0xff] %v7758_v13  ;;  %v7764_v18 = vpop.permute.xlu1 %1360 }
 0x346   :  { %12154 = vst [vmem:[#allocation126_spill] sm:$0xff] %v7775_v31 }
 0x349   :  { %1501 = vperm.xlu2 %6116, %v7749_v60   ;;  %v7770_v60 = vadd.f32 %v7485_v15, %v12152_v35 }
 0x34b   :  { %1507 = vperm.xlu0 %6118, %v7754_v16   ;;  %1486 = vperm.xlu1 %6117, %v7758_v13   ;;  %v7762_v53 = vpop.permute.xlu2 %1402  ;;  %12153 = vst [vmem:[#allocation23_spill] sm:$0xff] %v7770_v60  ;;  %v7779_v16 = vadd.f32 %v7450_v0, %v12155_v6  ;;  %v7796_v6 = vadd.f32 %v7397_v8, %v12161_v45  ;;  %v12167_v45 = vld [vmem:[#allocation32_spill] sm:$0xff] }
 0x34d   :  { %v7766_v1 = vpop.permute.xlu0 %1381  ;;  %12156 = vst [vmem:[#allocation22_spill] sm:$0xff] %v7779_v16 }
 0x34e   :  { %12162 = vst [vmem:[#allocation29_spill] sm:$0xff] %v7796_v6 }
 0x351   :  { %1510 = vperm.xlu2 %6116, %v7770_v60   ;;  %v7791_v60 = vadd.f32 %v7408_v40, %v12159_v56 }
 0x353   :  { %1516 = vperm.xlu0 %6118, %v7775_v31   ;;  %1495 = vperm.xlu1 %6117, %v7779_v16   ;;  %v7783_v13 = vpop.permute.xlu2 %1411  ;;  %12160 = vst [vmem:[#allocation26_spill] sm:$0xff] %v7791_v60  ;;  %v7800_v31 = vadd.f32 %v7491_v5, %v12163_v20  ;;  %v7817_v20 = vadd.f32 %v7429_v49, %v12167_v45  ;;  %v12174_v45 = vld [vmem:[#allocation35_spill] sm:$0xff] }
 0x354   :  { %12157 = vst [vmem:[#allocation127_spill] sm:$0xff] %v7783_v13  ;;  %v12186_v13 = vld [vmem:[#allocation37_spill] sm:$0xff] }
 0x355   :  { %v7785_v44 = vpop.permute.xlu0 %1390  ;;  %v7787_v35 = vpop.permute.xlu1 %1369  ;;  %12164 = vst [vmem:[#allocation25_spill] sm:$0xff] %v7800_v31 }
 0x356   :  { %12158 = vst [vmem:[#allocation128_spill] sm:$0xff] %v7787_v35  ;;  %v12179_v35 = vld [vmem:[#allocation34_spill] sm:$0xff] }
 0x357   :  { %12168 = vst [vmem:[#allocation32_spill] sm:$0xff] %v7817_v20 }
 0x359   :  { %1519 = vperm.xlu2 %6116, %v7791_v60   ;;  %v7812_v60 = vadd.f32 %v7421_v63, %v12165_v2 }
 0x35b   :  { %1525 = vperm.xlu0 %6118, %v7796_v6   ;;  %1504 = vperm.xlu1 %6117, %v7800_v31   ;;  %v7804_v16 = vpop.permute.xlu2 %1420  ;;  %12166 = vst [vmem:[#allocation28_spill] sm:$0xff] %v7812_v60  ;;  %v7821_v6 = vadd.f32 %v7518_v55, %v12169_v61  ;;  %v7838_v61 = vadd.f32 %v7450_v0, %v12174_v45  ;;  %v12181_v45 = vld [vmem:[#allocation38_spill] sm:$0xff] }
 0x35d   :  { %v7806_v36 = vpop.permute.xlu0 %1399  ;;  %v7808_v56 = vpop.permute.xlu1 %1378  ;;  %12170 = vst [vmem:[#allocation27_spill] sm:$0xff] %v7821_v6 }
 0x35e   :  { %12175 = vst [vmem:[#allocation35_spill] sm:$0xff] %v7838_v61 }
 0x361   :  { %1528 = vperm.xlu2 %6116, %v7812_v60   ;;  %v7833_v60 = vadd.f32 %v7456_v34, %v12172_v58 }
 0x363   :  { %1534 = vperm.xlu0 %6118, %v7817_v20   ;;  %1513 = vperm.xlu1 %6117, %v7821_v6   ;;  %v7825_v31 = vpop.permute.xlu2 %1429  ;;  %12173 = vst [vmem:[#allocation31_spill] sm:$0xff] %v7833_v60  ;;  %v7842_v20 = vadd.f32 %v7415_v30, %v12176_v33  ;;  %v7859_v33 = vadd.f32 %v7491_v5, %v12181_v45  ;;  %v12189_v45 = vld [vmem:[#allocation36_spill] sm:$0xff] }
 0x365   :  { %v7827_v25 = vpop.permute.xlu0 %1408  ;;  %v7829_v2 = vpop.permute.xlu1 %1387  ;;  %12177 = vst [vmem:[#allocation30_spill] sm:$0xff] %v7842_v20 }
 0x366   :  { %12171 = vst [vmem:[#allocation129_spill] sm:$0xff] %v7827_v25  ;;  %v12225_v25 = vld [vmem:[#allocation45_spill] sm:$0xff] }
 0x367   :  { %12182 = vst [vmem:[#allocation38_spill] sm:$0xff] %v7859_v33 }
 0x369   :  { %1537 = vperm.xlu2 %6116, %v7833_v60   ;;  %v7854_v60 = vadd.f32 %v7470_v32, %v12179_v35 }
 0x36b   :  { %1543 = vperm.xlu0 %6118, %v7838_v61   ;;  %1522 = vperm.xlu1 %6117, %v7842_v20   ;;  %v7846_v6 = vpop.permute.xlu2 %1438  ;;  %12180 = vst [vmem:[#allocation34_spill] sm:$0xff] %v7854_v60  ;;  %v7863_v61 = vadd.f32 %v7435_v26, %v12183_v7  ;;  %v7880_v7 = vadd.f32 %v7518_v55, %v7257_v50 }
 0x36c   :  { %v7901_v50 = vadd.f32 %v7415_v30, %v7266_v10  ;;  %v7922_v10 = vadd.f32 %v7435_v26, %v7274_v17  ;;  %v12206_v17 = vld [vmem:[#allocation44_spill] sm:$0xff] }
 0x36d   :  { %v7848_v14 = vpop.permute.xlu0 %1417  ;;  %v7850_v58 = vpop.permute.xlu1 %1396  ;;  %12184 = vst [vmem:[#allocation33_spill] sm:$0xff] %v7863_v61 }
 0x36e   :  { %12178 = vst [vmem:[#allocation130_spill] sm:$0xff] %v7848_v14 }
 0x36f   :  { %12188 = vst [vmem:[#allocation132_spill] sm:$0xff] %v7880_v7 }
 0x370   :  { %12194 = vst [vmem:[#allocation136_spill] sm:$0xff] %v7901_v50 }
 0x371   :  { %1546 = vperm.xlu2 %6116, %v7854_v60   ;;  %v7875_v60 = vadd.f32 %v7478_v62, %v12186_v13  ;;  %12200 = vst [vmem:[#allocation140_spill] sm:$0xff] %v7922_v10 }
 0x373   :  { %1552 = vperm.xlu0 %6118, %v7859_v33   ;;  %1531 = vperm.xlu1 %6117, %v7863_v61   ;;  %v7867_v20 = vpop.permute.xlu2 %1447  ;;  %12187 = vst [vmem:[#allocation37_spill] sm:$0xff] %v7875_v60  ;;  %v7884_v33 = vadd.f32 %v7443_v29, %v12189_v45  ;;  %v12195_v45 = vld [vmem:[#allocation39_spill] sm:$0xff] }
 0x374   :  { %12185 = vst [vmem:[#allocation131_spill] sm:$0xff] %v7867_v20 }
 0x375   :  { %v7869_v14 = vpop.permute.xlu0 %1426  ;;  %v7871_v35 = vpop.permute.xlu1 %1405  ;;  %12190 = vst [vmem:[#allocation36_spill] sm:$0xff] %v7884_v33 }
 0x379   :  { %1555 = vperm.xlu2 %6116, %v7875_v60   ;;  %v7896_v60 = vadd.f32 %v7386_v42, %v7254_v28 }
 0x37b   :  { %1561 = vperm.xlu0 %6118, %v7880_v7   ;;  %1540 = vperm.xlu1 %6117, %v7884_v33   ;;  %v7888_v61 = vpop.permute.xlu2 %1456  ;;  %12193 = vst [vmem:[#allocation135_spill] sm:$0xff] %v7896_v60  ;;  %v7905_v7 = vadd.f32 %v7464_v59, %v12195_v45  ;;  %v12201_v45 = vld [vmem:[#allocation40_spill] sm:$0xff] }
 0x37c   :  { %12191 = vst [vmem:[#allocation133_spill] sm:$0xff] %v7888_v61 }
 0x37d   :  { %v7890_v20 = vpop.permute.xlu0 %1435  ;;  %v7892_v13 = vpop.permute.xlu1 %1414  ;;  %12196 = vst [vmem:[#allocation39_spill] sm:$0xff] %v7905_v7 }
 0x37e   :  { %12192 = vst [vmem:[#allocation134_spill] sm:$0xff] %v7892_v13  ;;  %v12216_v13 = vld [vmem:[#allocation42_spill] sm:$0xff] }
 0x381   :  { %1564 = vperm.xlu2 %6116, %v7896_v60   ;;  %v7917_v60 = vadd.f32 %v7397_v8, %v7264_v9 }
 0x383   :  { %1570 = vperm.xlu0 %6118, %v7901_v50   ;;  %1549 = vperm.xlu1 %6117, %v7905_v7   ;;  %v7909_v33 = vpop.permute.xlu2 %1465  ;;  %12199 = vst [vmem:[#allocation139_spill] sm:$0xff] %v7917_v60  ;;  %v7926_v50 = vadd.f32 %v7485_v15, %v12201_v45  ;;  %v7943_v45 = vadd.f32 %v7443_v29, %v12206_v17  ;;  %v12214_v17 = vld [vmem:[#allocation47_spill] sm:$0xff] }
 0x384   :  { %12197 = vst [vmem:[#allocation137_spill] sm:$0xff] %v7909_v33 }
 0x385   :  { %v7911_v61 = vpop.permute.xlu0 %1444  ;;  %v7913_v28 = vpop.permute.xlu1 %1423  ;;  %12202 = vst [vmem:[#allocation40_spill] sm:$0xff] %v7926_v50 }
 0x386   :  { %12198 = vst [vmem:[#allocation138_spill] sm:$0xff] %v7911_v61  ;;  %v12208_v61 = vld [vmem:[#allocation41_spill] sm:$0xff] }
 0x387   :  { %12207 = vst [vmem:[#allocation44_spill] sm:$0xff] %v7943_v45 }
 0x389   :  { %1573 = vperm.xlu2 %6116, %v7917_v60   ;;  %v7938_v60 = vadd.f32 %v7429_v49, %v7272_v24 }
 0x38b   :  { %1579 = vperm.xlu0 %6118, %v7922_v10   ;;  %1558 = vperm.xlu1 %6117, %v7926_v50   ;;  %v7930_v7 = vpop.permute.xlu2 %1474  ;;  %12205 = vst [vmem:[#allocation143_spill] sm:$0xff] %v7938_v60  ;;  %v7947_v10 = vadd.f32 %v7408_v40, %v12208_v61  ;;  %v7964_v61 = vadd.f32 %v7464_v59, %v12214_v17  ;;  %v12223_v17 = vld [vmem:[#allocation50_spill] sm:$0xff] }
 0x38c   :  { %12203 = vst [vmem:[#allocation141_spill] sm:$0xff] %v7930_v7 }
 0x38d   :  { %v7932_v33 = vpop.permute.xlu0 %1453  ;;  %v7934_v9 = vpop.permute.xlu1 %1432  ;;  %12209 = vst [vmem:[#allocation41_spill] sm:$0xff] %v7947_v10 }
 0x38e   :  { %12204 = vst [vmem:[#allocation142_spill] sm:$0xff] %v7932_v33  ;;  %v12212_v33 = vld [vmem:[#allocation43_spill] sm:$0xff] }
 0x38f   :  { %12215 = vst [vmem:[#allocation47_spill] sm:$0xff] %v7964_v61 }
 0x391   :  { %1582 = vperm.xlu2 %6116, %v7938_v60   ;;  %v7959_v60 = vadd.f32 %v7450_v0, %v12212_v33 }
 0x393   :  { %1588 = vperm.xlu0 %6118, %v7943_v45   ;;  %1567 = vperm.xlu1 %6117, %v7947_v10   ;;  %v7951_v50 = vpop.permute.xlu2 %1483  ;;  %12213 = vst [vmem:[#allocation43_spill] sm:$0xff] %v7959_v60  ;;  %v7968_v45 = vadd.f32 %v7421_v63, %v12216_v13  ;;  %v7985_v13 = vadd.f32 %v7485_v15, %v12223_v17  ;;  %v12232_v17 = vld [vmem:[#allocation53_spill] sm:$0xff] }
 0x394   :  { %12210 = vst [vmem:[#allocation144_spill] sm:$0xff] %v7951_v50  ;;  %v12221_v50 = vld [vmem:[#allocation46_spill] sm:$0xff] }
 0x395   :  { %v7953_v7 = vpop.permute.xlu0 %1462  ;;  %v7955_v24 = vpop.permute.xlu1 %1441  ;;  %12217 = vst [vmem:[#allocation42_spill] sm:$0xff] %v7968_v45 }
 0x396   :  { %12211 = vst [vmem:[#allocation145_spill] sm:$0xff] %v7953_v7 }
 0x397   :  { %12224 = vst [vmem:[#allocation50_spill] sm:$0xff] %v7985_v13 }
 0x399   :  { %1591 = vperm.xlu2 %6116, %v7959_v60   ;;  %v7980_v60 = vadd.f32 %v7491_v5, %v12221_v50 }
 0x39b   :  { %1597 = vperm.xlu0 %6118, %v7964_v61   ;;  %1576 = vperm.xlu1 %6117, %v7968_v45   ;;  %v7972_v10 = vpop.permute.xlu2 %1492  ;;  %12222 = vst [vmem:[#allocation46_spill] sm:$0xff] %v7980_v60  ;;  %v7989_v61 = vadd.f32 %v7456_v34, %v12225_v25  ;;  %v8006_v25 = vadd.f32 %v7408_v40, %v12232_v17  ;;  %v12241_v17 = vld [vmem:[#allocation56_spill] sm:$0xff] }
 0x39c   :  { %12218 = vst [vmem:[#allocation146_spill] sm:$0xff] %v7972_v10 }
 0x39d   :  { %v7974_v7 = vpop.permute.xlu0 %1471  ;;  %v7976_v33 = vpop.permute.xlu1 %1450  ;;  %12226 = vst [vmem:[#allocation45_spill] sm:$0xff] %v7989_v61 }
 0x39e   :  { %12219 = vst [vmem:[#allocation147_spill] sm:$0xff] %v7974_v7  ;;  %v12230_v7 = vld [vmem:[#allocation49_spill] sm:$0xff] }
 0x39f   :  { %12220 = vst [vmem:[#allocation148_spill] sm:$0xff] %v7976_v33  ;;  %v12234_v33 = vld [vmem:[#allocation48_spill] sm:$0xff] }
 0x3a0   :  { %12233 = vst [vmem:[#allocation53_spill] sm:$0xff] %v8006_v25 }
 0x3a1   :  { %1600 = vperm.xlu2 %6116, %v7980_v60   ;;  %v8001_v60 = vadd.f32 %v7518_v55, %v12230_v7 }
 0x3a3   :  { %1606 = vperm.xlu0 %6118, %v7985_v13   ;;  %1585 = vperm.xlu1 %6117, %v7989_v61   ;;  %v7993_v45 = vpop.permute.xlu2 %1501  ;;  %12231 = vst [vmem:[#allocation49_spill] sm:$0xff] %v8001_v60  ;;  %v8010_v13 = vadd.f32 %v7470_v32, %v12234_v33  ;;  %v8027_v33 = vadd.f32 %v7421_v63, %v12241_v17  ;;  %v12250_v17 = vld [vmem:[#allocation59_spill] sm:$0xff] }
 0x3a4   :  { %12227 = vst [vmem:[#allocation149_spill] sm:$0xff] %v7993_v45 }
 0x3a5   :  { %v7995_v10 = vpop.permute.xlu0 %1480  ;;  %v7997_v50 = vpop.permute.xlu1 %1459  ;;  %12235 = vst [vmem:[#allocation48_spill] sm:$0xff] %v8010_v13 }
 0x3a6   :  { %12228 = vst [vmem:[#allocation150_spill] sm:$0xff] %v7995_v10  ;;  %v12239_v10 = vld [vmem:[#allocation52_spill] sm:$0xff] }
 0x3a7   :  { %12229 = vst [vmem:[#allocation151_spill] sm:$0xff] %v7997_v50  ;;  %v12243_v50 = vld [vmem:[#allocation51_spill] sm:$0xff] }
 0x3a8   :  { %12242 = vst [vmem:[#allocation56_spill] sm:$0xff] %v8027_v33 }
 0x3a9   :  { %1609 = vperm.xlu2 %6116, %v8001_v60   ;;  %v8022_v60 = vadd.f32 %v7415_v30, %v12239_v10 }
 0x3ab   :  { %1615 = vperm.xlu0 %6118, %v8006_v25   ;;  %1594 = vperm.xlu1 %6117, %v8010_v13   ;;  %v8014_v61 = vpop.permute.xlu2 %1510  ;;  %12240 = vst [vmem:[#allocation52_spill] sm:$0xff] %v8022_v60  ;;  %v8031_v25 = vadd.f32 %v7478_v62, %v12243_v50  ;;  %v8048_v50 = vadd.f32 %v7456_v34, %v12250_v17  ;;  %v12259_v17 = vld [vmem:[#allocation63_spill] sm:$0xff] }
 0x3ac   :  { %12236 = vst [vmem:[#allocation152_spill] sm:$0xff] %v8014_v61 }
 0x3ad   :  { %v8016_v45 = vpop.permute.xlu0 %1489  ;;  %v8018_v7 = vpop.permute.xlu1 %1468  ;;  %12244 = vst [vmem:[#allocation51_spill] sm:$0xff] %v8031_v25 }
 0x3ae   :  { %12237 = vst [vmem:[#allocation153_spill] sm:$0xff] %v8016_v45  ;;  %v12248_v45 = vld [vmem:[#allocation55_spill] sm:$0xff] }
 0x3af   :  { %12238 = vst [vmem:[#allocation154_spill] sm:$0xff] %v8018_v7  ;;  %v12252_v7 = vld [vmem:[#allocation54_spill] sm:$0xff] }
 0x3b0   :  { %12251 = vst [vmem:[#allocation59_spill] sm:$0xff] %v8048_v50 }
 0x3b1   :  { %1618 = vperm.xlu2 %6116, %v8022_v60   ;;  %v8043_v60 = vadd.f32 %v7435_v26, %v12248_v45 }
 0x3b3   :  { %1624 = vperm.xlu0 %6118, %v8027_v33   ;;  %1603 = vperm.xlu1 %6117, %v8031_v25   ;;  %v8035_v13 = vpop.permute.xlu2 %1519  ;;  %12249 = vst [vmem:[#allocation55_spill] sm:$0xff] %v8043_v60  ;;  %v8052_v33 = vadd.f32 %v7386_v42, %v12252_v7  ;;  %v8069_v7 = vadd.f32 %v7470_v32, %v12259_v17  ;;  %v12268_v17 = vld [vmem:[#allocation66_spill] sm:$0xff] }
 0x3b4   :  { %12245 = vst [vmem:[#allocation155_spill] sm:$0xff] %v8035_v13  ;;  %v12257_v13 = vld [vmem:[#allocation58_spill] sm:$0xff] }
 0x3b5   :  { %v8037_v61 = vpop.permute.xlu0 %1498  ;;  %v8039_v10 = vpop.permute.xlu1 %1477  ;;  %12253 = vst [vmem:[#allocation54_spill] sm:$0xff] %v8052_v33 }
 0x3b6   :  { %12246 = vst [vmem:[#allocation156_spill] sm:$0xff] %v8037_v61 }
 0x3b7   :  { %12247 = vst [vmem:[#allocation157_spill] sm:$0xff] %v8039_v10  ;;  %v12261_v10 = vld [vmem:[#allocation57_spill] sm:$0xff] }
 0x3b8   :  { %12260 = vst [vmem:[#allocation63_spill] sm:$0xff] %v8069_v7 }
 0x3b9   :  { %1627 = vperm.xlu2 %6116, %v8043_v60   ;;  %v8064_v60 = vadd.f32 %v7443_v29, %v12257_v13 }
 0x3bb   :  { %1633 = vperm.xlu0 %6118, %v8048_v50   ;;  %1612 = vperm.xlu1 %6117, %v8052_v33   ;;  %v8056_v25 = vpop.permute.xlu2 %1528  ;;  %12258 = vst [vmem:[#allocation58_spill] sm:$0xff] %v8064_v60  ;;  %v8073_v50 = vadd.f32 %v7397_v8, %v12261_v10  ;;  %v8090_v10 = vadd.f32 %v7478_v62, %v12268_v17  ;;  %v12276_v17 = vld [vmem:[#allocation69_spill] sm:$0xff] }
 0x3bc   :  { %12254 = vst [vmem:[#allocation158_spill] sm:$0xff] %v8056_v25  ;;  %v12266_v25 = vld [vmem:[#allocation61_spill] sm:$0xff] }
 0x3bd   :  { %v8058_v61 = vpop.permute.xlu0 %1507  ;;  %v8060_v45 = vpop.permute.xlu1 %1486  ;;  %12262 = vst [vmem:[#allocation57_spill] sm:$0xff] %v8073_v50 }
 0x3be   :  { %12255 = vst [vmem:[#allocation159_spill] sm:$0xff] %v8058_v61 }
 0x3bf   :  { %12256 = vst [vmem:[#allocation160_spill] sm:$0xff] %v8060_v45  ;;  %v12270_v45 = vld [vmem:[#allocation60_spill] sm:$0xff] }
 0x3c0   :  { %12269 = vst [vmem:[#allocation66_spill] sm:$0xff] %v8090_v10 }
 0x3c1   :  { %1636 = vperm.xlu2 %6116, %v8064_v60   ;;  %v8085_v60 = vadd.f32 %v7464_v59, %v12266_v25  ;;  %v12273_v25 = vld [vmem:[#allocation64_spill] sm:$0xff] }
 0x3c3   :  { %1642 = vperm.xlu0 %6118, %v8069_v7   ;;  %1621 = vperm.xlu1 %6117, %v8073_v50   ;;  %v8081_v13 = vpop.permute.xlu2 %1537  ;;  %12267 = vst [vmem:[#allocation61_spill] sm:$0xff] %v8085_v60  ;;  %v8094_v7 = vadd.f32 %v7429_v49, %v12270_v45  ;;  %v8111_v45 = vadd.f32 %v7386_v42, %v12276_v17 }
 0x3c4   :  { %12265 = vst [vmem:[#allocation163_spill] sm:$0xff] %v8081_v13  ;;  %v8130_v42 = vadd.f32 %v7397_v8, %v7367_v3  ;;  %v8151_v3 = vadd.f32 %v7429_v49, %v7376_v43  ;;  %v12291_v8 = vld [vmem:[#allocation68_spill] sm:$0xff]  ;;  %v8172_v43 = vadd.f32 %v7450_v0, %v7383_v23  ;;  %v12297_v49 = vld [vmem:[#allocation71_spill] sm:$0xff]  ;;  %v8193_v23 = vadd.f32 %v7491_v5, %v7395_v21 }
 0x3c5   :  { %v8077_v33 = vpop.permute.xlu0 %1516  ;;  %v8079_v61 = vpop.permute.xlu1 %1495  ;;  %12271 = vst [vmem:[#allocation60_spill] sm:$0xff] %v8094_v7  ;;  %v12309_v21 = vld [vmem:[#allocation76_spill] sm:$0xff] }
 0x3c6   :  { %12263 = vst [vmem:[#allocation161_spill] sm:$0xff] %v8077_v33  ;;  %v12278_v33 = vld [vmem:[#allocation62_spill] sm:$0xff] }
 0x3c7   :  { %12264 = vst [vmem:[#allocation162_spill] sm:$0xff] %v8079_v61  ;;  %v8104_v61 = vadd.f32 %v7485_v15, %v12273_v25 }
 0x3c8   :  { %12277 = vst [vmem:[#allocation69_spill] sm:$0xff] %v8111_v45 }
 0x3c9   :  { %1645 = vperm.xlu2 %6116, %v8085_v60   ;;  %12274 = vst [vmem:[#allocation64_spill] sm:$0xff] %v8104_v61 }
 0x3ca   :  { %12283 = vst [vmem:[#allocation167_spill] sm:$0xff] %v8130_v42 }
 0x3cb   :  { %1651 = vperm.xlu0 %6118, %v8090_v10   ;;  %1630 = vperm.xlu1 %6117, %v8094_v7   ;;  %v8106_v60 = vpop.permute.xlu2 %1546  ;;  %v8115_v10 = vadd.f32 %v7450_v0, %v12278_v33  ;;  %v12284_v33 = vld [vmem:[#allocation65_spill] sm:$0xff]  ;;  %12290 = vst [vmem:[#allocation170_spill] sm:$0xff] %v8151_v3 }
 0x3cc   :  { %12275 = vst [vmem:[#allocation165_spill] sm:$0xff] %v8106_v60  ;;  %v8134_v17 = vadd.f32 %v7491_v5, %v12284_v33  ;;  %v8155_v33 = vadd.f32 %v7518_v55, %v12291_v8  ;;  %v8176_v8 = vadd.f32 %v7415_v30, %v12297_v49  ;;  %v12303_v30 = vld [vmem:[#allocation73_spill] sm:$0xff]  ;;  %v8214_v5 = vadd.f32 %v7518_v55, %v7406_v54  ;;  %v12316_v55 = vld [vmem:[#allocation80_spill] sm:$0xff] }
 0x3cd   :  { %v8098_v50 = vpop.permute.xlu0 %1525  ;;  %v8100_v13 = vpop.permute.xlu1 %1504  ;;  %12279 = vst [vmem:[#allocation62_spill] sm:$0xff] %v8115_v10  ;;  %v8197_v0 = vadd.f32 %v7435_v26, %v12303_v30  ;;  %v8218_v26 = vadd.f32 %v7443_v29, %v12309_v21  ;;  %v8239_v21 = vadd.f32 %v7485_v15, %v12316_v55 }
 0x3ce   :  { %12272 = vst [vmem:[#allocation164_spill] sm:$0xff] %v8100_v13  ;;  %v12281_v13 = vld [vmem:[#allocation67_spill] sm:$0xff] }
 0x3cf   :  { %v8125_v60 = vadd.f32 %v7408_v40, %v12281_v13  ;;  %12285 = vst [vmem:[#allocation65_spill] sm:$0xff] %v8134_v17  ;;  %v12288_v13 = vld [vmem:[#allocation70_spill] sm:$0xff] }
 0x3d0   :  { %12292 = vst [vmem:[#allocation68_spill] sm:$0xff] %v8155_v33 }
 0x3d1   :  { %1654 = vperm.xlu2 %6116, %v8104_v61   ;;  %12282 = vst [vmem:[#allocation67_spill] sm:$0xff] %v8125_v60 }
 0x3d2   :  { %12296 = vst [vmem:[#allocation172_spill] sm:$0xff] %v8172_v43 }
 0x3d3   :  { %1660 = vperm.xlu0 %6118, %v8111_v45   ;;  %1639 = vperm.xlu1 %6117, %v8115_v10   ;;  %v8136_v61 = vpop.permute.xlu2 %1555  ;;  %12298 = vst [vmem:[#allocation71_spill] sm:$0xff] %v8176_v8 }
 0x3d4   :  { %12286 = vst [vmem:[#allocation168_spill] sm:$0xff] %v8136_v61 }
 0x3d5   :  { %v8119_v7 = vpop.permute.xlu0 %1534  ;;  %v8121_v25 = vpop.permute.xlu1 %1513  ;;  %12302 = vst [vmem:[#allocation174_spill] sm:$0xff] %v8193_v23 }
 0x3d6   :  { %12280 = vst [vmem:[#allocation166_spill] sm:$0xff] %v8121_v25  ;;  %v12324_v25 = vlaneseq }
 0x3d7   :  { %12304 = vst [vmem:[#allocation73_spill] sm:$0xff] %v8197_v0 }
 0x3d8   :  { %12308 = vst [vmem:[#allocation176_spill] sm:$0xff] %v8214_v5 }
 0x3d9   :  { %1663 = vperm.xlu2 %6116, %v8125_v60   ;;  %v8146_v60 = vadd.f32 %v7421_v63, %v12288_v13  ;;  %v12294_v13 = vld [vmem:[#allocation72_spill] sm:$0xff]  ;;  %12310 = vst [vmem:[#allocation76_spill] sm:$0xff] %v8218_v26 }
 0x3da   :  { %12317 = vst [vmem:[#allocation80_spill] sm:$0xff] %v8239_v21 }
 0x3db   :  { %1669 = vperm.xlu0 %6118, %v8130_v42   ;;  %1648 = vperm.xlu1 %6117, %v8134_v17   ;;  %12289 = vst [vmem:[#allocation70_spill] sm:$0xff] %v8146_v60  ;;  %v8159_v42 = vpop.permute.xlu2 %1564 }
 0x3dd   :  { %v8140_v45 = vpop.permute.xlu0 %1543  ;;  %v8142_v40 = vpop.permute.xlu1 %1522 }
 0x3de   :  { %12287 = vst [vmem:[#allocation169_spill] sm:$0xff] %v8140_v45 }
 0x3e1   :  { %1672 = vperm.xlu2 %6116, %v8146_v60   ;;  %v8167_v60 = vadd.f32 %v7456_v34, %v12294_v13  ;;  %v12300_v13 = vld [vmem:[#allocation74_spill] sm:$0xff] }
 0x3e3   :  { %1678 = vperm.xlu0 %6118, %v8151_v3   ;;  %1657 = vperm.xlu1 %6117, %v8155_v33   ;;  %12295 = vst [vmem:[#allocation72_spill] sm:$0xff] %v8167_v60  ;;  %v8184_v34 = vpop.permute.xlu2 %1573 }
 0x3e5   :  { %v8161_v17 = vpop.permute.xlu0 %1552  ;;  %v8163_v63 = vpop.permute.xlu1 %1531 }
 0x3e6   :  { %12293 = vst [vmem:[#allocation171_spill] sm:$0xff] %v8161_v17 }
 0x3e9   :  { %1681 = vperm.xlu2 %6116, %v8167_v60   ;;  %v8188_v60 = vadd.f32 %v7470_v32, %v12300_v13  ;;  %v12306_v32 = vld [vmem:[#allocation75_spill] sm:$0xff] }
 0x3ea   :  { %v8207_v13 = vadd.f32 %v7478_v62, %v12306_v32  ;;  %v12312_v32 = vld [vmem:[#allocation77_spill] sm:$0xff] }
 0x3eb   :  { %1687 = vperm.xlu0 %6118, %v8172_v43   ;;  %1666 = vperm.xlu1 %6117, %v8176_v8   ;;  %12301 = vst [vmem:[#allocation74_spill] sm:$0xff] %v8188_v60 }
 0x3ec   :  { %12307 = vst [vmem:[#allocation75_spill] sm:$0xff] %v8207_v13 }
 0x3ed   :  { %v8180_v3 = vpop.permute.xlu0 %1561  ;;  %v8182_v33 = vpop.permute.xlu1 %1540 }
 0x3ee   :  { %12299 = vst [vmem:[#allocation173_spill] sm:$0xff] %v8180_v3 }
 0x3f1   :  { %1690 = vperm.xlu2 %6116, %v8188_v60   ;;  %v8209_v60 = vpop.permute.xlu2 %1582 }
 0x3f3   :  { %1696 = vperm.xlu0 %6118, %v8193_v23   ;;  %1675 = vperm.xlu1 %6117, %v8197_v0   ;;  %v8228_v23 = vadd.f32 %v7464_v59, %v12312_v32 }
 0x3f5   :  { %v8201_v49 = vpop.permute.xlu0 %1570  ;;  %v8203_v43 = vpop.permute.xlu1 %1549  ;;  %12313 = vst [vmem:[#allocation77_spill] sm:$0xff] %v8228_v23 }
 0x3f6   :  { %12305 = vst [vmem:[#allocation175_spill] sm:$0xff] %v8203_v43 }
 0x3f9   :  { %1699 = vperm.xlu2 %6116, %v8207_v13   ;;  %v8230_v13 = vpop.permute.xlu2 %1591 }
 0x3fa   :  { %12314 = vst [vmem:[#allocation178_spill] sm:$0xff] %v8230_v13 }
 0x3fb   :  { %1705 = vperm.xlu0 %6118, %v8214_v5   ;;  %1684 = vperm.xlu1 %6117, %v8218_v26  }
 0x3fd   :  { %v8222_v30 = vpop.permute.xlu0 %1579  ;;  %v8224_v62 = vpop.permute.xlu1 %1558 }
 0x3fe   :  { %12311 = vst [vmem:[#allocation177_spill] sm:$0xff] %v8224_v62  ;;  %v8267_v62 = vand.u32 127, %v12324_v25 }
 0x400   :  { %v1770_v17 = vperm.slane %v7745_v52, %v8267_v62  ;;  %v1709_v13 = vperm.slane %v7576_v37, %v8267_v62 }
 0x401   :  { %v8242_v5 = vpop.permute.xlu2 %1600 }
 0x402   :  { %12318 = vst [vmem:[#allocation180_spill] sm:$0xff] %v8242_v5  ;;  %v8277_v5 = vadd.s32 4294967280, %v8267_v62 }
 0x403   :  { %1693 = vperm.xlu1 %6117, %v8228_v23  }
 0x404   :  { %v1715_v43 = vperm.slane %v7661_v11, %v8277_v5  ;;  %v8304_v11 = vadd.s32 4294967256, %v8267_v62 }
 0x405   :  { %v8233_v54 = vpop.permute.xlu0 %1588  ;;  %v8235_v29 = vpop.permute.xlu1 %1567 }
 0x406   :  { %12315 = vst [vmem:[#allocation179_spill] sm:$0xff] %v8233_v54 }
 0x409   :  { %v8252_v23 = vpop.permute.xlu2 %1609 }
 0x40a   :  { %12321 = vst [vmem:[#allocation183_spill] sm:$0xff] %v8252_v23  ;;  %v8274_v23 = vadd.s32 4294967288, %v8267_v62 }
 0x40b   :  { %1702 = vperm.xlu1 %6117, %v8239_v21  }
 0x40c   :  { %v1711_v25 = vperm.slane %v7676_v22, %v8274_v23  ;;  %v8298_v22 = vadd.s32 4294967264, %v8267_v62 }
 0x40d   :  { %v8244_v26 = vpop.permute.xlu0 %1597  ;;  %v8246_v59 = vpop.permute.xlu1 %1576 }
 0x40e   :  { %12319 = vst [vmem:[#allocation181_spill] sm:$0xff] %v8244_v26  ;;  %v1771_v26 = vperm.slane %v7699_v4, %v8274_v23  ;;  %v1713_v37 = vsel %vm1712_vm0, %v1711_v25, %v1709_v13  ;;  %v8320_v13 = vadd.s32 4294967248, %v8267_v62  ;;  %v8326_v25 = vadd.s32 4294967240, %v8267_v62 }
 0x410   :  { %v1772_v52 = vsel %vm1712_vm0, %v1771_v26, %v1770_v17  ;;  %v1717_v17 = vsel %vm1716_vm1, %v1715_v43, %v1713_v37  ;;  %v1731_v37 = vperm.slane %v7722_v39, %v8320_v13 }
 0x411   :  { %v8258_v15 = vpop.permute.xlu2 %1618 }
 0x415   :  { %v8248_v32 = vpop.permute.xlu0 %1606  ;;  %v8250_v0 = vpop.permute.xlu1 %1585 }
 0x416   :  { %12320 = vst [vmem:[#allocation182_spill] sm:$0xff] %v8248_v32 }
 0x419   :  { %v8264_v3 = vpop.permute.xlu2 %1627 }
 0x41d   :  { %v8254_v8 = vpop.permute.xlu0 %1615  ;;  %v8256_v10 = vpop.permute.xlu1 %1594 }
 0x41e   :  { %12322 = vst [vmem:[#allocation184_spill] sm:$0xff] %v8256_v10  ;;  %v8292_v10 = vadd.s32 4294967272, %v8267_v62 }
 0x420   :  { %v1719_v26 = vperm.slane %v7597_v46, %v8292_v10  ;;  %v1802_v46 = vperm.slane %v7913_v28, %v8274_v23 }
 0x422   :  { %v1721_v43 = vsel %vm1720_vm2, %v1719_v26, %v1717_v17  ;;  %v1781_v17 = vperm.slane %v7785_v44, %v8320_v13  ;;  %v1727_v26 = vperm.slane %v7614_v19, %v8304_v11  ;;  %v1804_v44 = vperm.slane %v7869_v14, %v8277_v5 }
 0x423   :  { %v8358_v19 = vadd.s32 4294967224, %v8267_v62 }
 0x425   :  { %v8260_v55 = vpop.permute.xlu0 %1624  ;;  %v8262_v21 = vpop.permute.xlu1 %1603 }
 0x426   :  { %12323 = vst [vmem:[#allocation185_spill] sm:$0xff] %v8262_v21  ;;  %v1773_v21 = vperm.slane %v7808_v56, %v8277_v5  ;;  %v8295_v56 = vpop.permute.xlu2 %1636 }
 0x427   :  { %12326 = vst [vmem:[#allocation187_spill] sm:$0xff] %v8295_v56  ;;  %v1723_v56 = vperm.slane %v7701_v27, %v8298_v22  ;;  %v1801_v27 = vperm.slane %v7804_v16, %v8267_v62  ;;  %v1735_v16 = vperm.slane %v7682_v38, %v8326_v25  ;;  %v1783_v38 = vperm.slane %v7741_v41, %v8326_v25 }
 0x428   :  { %v1774_v4 = vsel %vm1716_vm1, %v1773_v21, %v1772_v52  ;;  %v1779_v52 = vperm.slane %v7829_v2, %v8304_v11 }
 0x42d   :  { %v8269_v32 = vpop.permute.xlu0 %1633  ;;  %v8271_v61 = vpop.permute.xlu1 %1612 }
 0x42e   :  { %12325 = vst [vmem:[#allocation186_spill] sm:$0xff] %v8269_v32  ;;  %v1775_v32 = vperm.slane %v7766_v1, %v8292_v10  ;;  %v1777_v1 = vperm.slane %v7720_v57, %v8298_v22  ;;  %v1725_v57 = vsel %vm11996_vm3, %v1723_v56, %v1721_v43 }
 0x430   :  { %v1776_v21 = vsel %vm1720_vm2, %v1775_v32, %v1774_v4  ;;  %v8335_v4 = vadd.s32 4294967232, %v8267_v62 }
 0x431   :  { %v1778_v2 = vsel %vm11996_vm3, %v1777_v1, %v1776_v21  ;;  %v1803_v21 = vsel %vm1712_vm0, %v1802_v46, %v1801_v27  ;;  %v1729_v1 = vsel %vm11995_vm4, %v1727_v26, %v1725_v57  ;;  %v8370_v27 = vadd.s32 4294967216, %v8267_v62 }
 0x432   :  { %v1780_v32 = vsel %vm11995_vm4, %v1779_v52, %v1778_v2  ;;  %v8349_v52 = vpop.permute.xlu2 %1645  ;;  %v1785_v39 = vperm.slane %v7850_v58, %v8335_v4  ;;  %v1733_v46 = vsel %vm1732_vm5, %v1731_v37, %v1729_v1  ;;  %v1805_v2 = vsel %vm1716_vm1, %v1804_v44, %v1803_v21 }
 0x433   :  { %v1782_v56 = vsel %vm1732_vm5, %v1781_v17, %v1780_v32  ;;  %v1808_v58 = vperm.slane %v7934_v9, %v8298_v22  ;;  %v1737_v14 = vsel %vm1736_vm6, %v1735_v16, %v1733_v46  ;;  %v1806_v32 = vperm.slane %v7825_v31, %v8292_v10 }
 0x434   :  { %v1784_v41 = vsel %vm1736_vm6, %v1783_v38, %v1782_v56  ;;  %v1739_v57 = vperm.slane %v7640_v12, %v8335_v4  ;;  %v8379_v17 = vadd.s32 4294967208, %v8267_v62  ;;  %v1787_v9 = vperm.slane %v7806_v36, %v8358_v19 }
 0x435   :  { %v8301_v45 = vpop.permute.xlu1 %1621  ;;  %v8309_v54 = vpop.permute.xlu0 %1642  ;;  %v1786_v37 = vsel %vm1740_vm7, %v1785_v39, %v1784_v41  ;;  %v1807_v26 = vsel %vm1720_vm2, %v1806_v32, %v1805_v2  ;;  %v8386_v31 = vadd.s32 4294967200, %v8267_v62  ;;  %v1747_v12 = vperm.slane %v7703_v51, %v8370_v27 }
 0x436   :  { %v1741_v16 = vsel %vm1740_vm7, %v1739_v57, %v1737_v14  ;;  %v1809_v21 = vsel %vm11996_vm3, %v1808_v58, %v1807_v26  ;;  %v1788_v39 = vsel %vm11850_vm8, %v1787_v9, %v1786_v37  ;;  %v1791_v36 = vperm.slane %v7871_v35, %v8379_v17 }
 0x437   :  { %v1810_v44 = vperm.slane %v7890_v20, %v8304_v11  ;;  %v1743_v1 = vperm.slane %v7743_v47, %v8358_v19  ;;  %v1789_v38 = vperm.slane %v7762_v53, %v8370_v27  ;;  %v8403_v46 = vadd.s32 4294967184, %v8267_v62 }
 0x438   :  { %v1814_v2 = vperm.slane %v7955_v24, %v8326_v25  ;;  %v1812_v47 = vperm.slane %v7846_v6, %v8320_v13  ;;  %v1751_v53 = vperm.slane %v7657_v48, %v8379_v17  ;;  %v1755_v32 = vperm.slane %v7764_v18, %v8386_v31  ;;  %v12329_v6 = vld [vmem:[#allocation129_spill] sm:$0xff]  ;;  %v12330_v18 = vld [vmem:[#allocation134_spill] sm:$0xff] }
 0x439   :  { %12327 = vst [vmem:[#allocation188_spill] sm:$0xff] %v8403_v46  ;;  %v1811_v51 = vsel %vm11995_vm4, %v1810_v44, %v1809_v21  ;;  %v1745_v35 = vsel %vm11850_vm8, %v1743_v1, %v1741_v16  ;;  %v1790_v20 = vsel %vm11848_vm9, %v1789_v38, %v1788_v39  ;;  %v8423_v57 = vadd.s32 4294967192, %v8267_v62  ;;  %v12332_v1 = vld [vmem:[#allocation127_spill] sm:$0xff] }
 0x43a   :  { %v8408_v58 = vpop.permute.xlu2 %1654  ;;  %v1749_v14 = vsel %vm11848_vm9, %v1747_v12, %v1745_v35  ;;  %v1792_v24 = vsel %vm11849_vm10, %v1791_v36, %v1790_v20  ;;  %v1793_v37 = vperm.slane %v12329_v6, %v8386_v31  ;;  %v1813_v9 = vsel %vm1732_vm5, %v1812_v47, %v1811_v51  ;;  %v12331_v12 = vld [vmem:[#allocation138_spill] sm:$0xff]  ;;  %v12335_v20 = vld [vmem:[#allocation148_spill] sm:$0xff] }
 0x43b   :  { %12328 = vst [vmem:[#allocation189_spill] sm:$0xff] %v8408_v58  ;;  %v1815_v48 = vsel %vm1736_vm6, %v1814_v2, %v1813_v9  ;;  %v1753_v26 = vsel %vm11849_vm10, %v1751_v53, %v1749_v14  ;;  %v1797_v21 = vperm.slane %v12330_v18, %v8403_v46  ;;  %v1816_v39 = vperm.slane %v12331_v12, %v8335_v4  ;;  %v12334_v2 = vld [vmem:[#allocation125_spill] sm:$0xff]  ;;  %v12336_v14 = vld [vmem:[#allocation131_spill] sm:$0xff]  ;;  %v12337_v6 = vld [vmem:[#allocation154_spill] sm:$0xff] }
 0x43c   :  { %v1794_v16 = vsel %vm11852_vm11, %v1793_v37, %v1792_v24  ;;  %v1757_v44 = vsel %vm11852_vm11, %v1755_v32, %v1753_v26  ;;  %v1795_v38 = vperm.slane %v12332_v1, %v8423_v57  ;;  %v8441_v51 = vadd.s32 4294967176, %v8267_v62  ;;  %v12338_v18 = vld [vmem:[#allocation128_spill] sm:$0xff]  ;;  %v12340_v1 = vld [vmem:[#allocation147_spill] sm:$0xff] }
 0x43d   :  { %v8342_v28 = vpop.permute.xlu1 %1630  ;;  %v8362_v43 = vpop.permute.xlu0 %1651  ;;  %v1759_v35 = vperm.slane %v12334_v2, %v8423_v57  ;;  %v1817_v47 = vsel %vm1740_vm7, %v1816_v39, %v1815_v48  ;;  %v1820_v53 = vperm.slane %v12335_v20, %v8370_v27  ;;  %v1818_v24 = vperm.slane %v12336_v14, %v8358_v19  ;;  %v12339_v48 = vld [vmem:[#allocation130_spill] sm:$0xff] }
 0x43e   :  { %12333 = vst [vmem:[#allocation129_spill] sm:$0xff] %v8441_v51  ;;  %v1796_v32 = vsel %vm1760_vm12, %v1795_v38, %v1794_v16  ;;  %v1832_v37 = vperm.slane %v12337_v6, %v8267_v62  ;;  %v1767_v12 = vperm.slane %v12338_v18, %v8441_v51  ;;  %v1799_v39 = vperm.slane %v12339_v48, %v8441_v51  ;;  %v12341_v16 = vld [vmem:[#allocation124_spill] sm:$0xff]  ;;  %v12343_v18 = vld [vmem:[#allocation157_spill] sm:$0xff] }
 0x43f   :  { %v1761_v9 = vsel %vm1760_vm12, %v1759_v35, %v1757_v44  ;;  %v1798_v26 = vsel %vm1764_vm13, %v1797_v21, %v1796_v32  ;;  %v1833_v2 = vperm.slane %v12340_v1, %v8274_v23  ;;  %v1819_v20 = vsel %vm11850_vm8, %v1818_v24, %v1817_v47  ;;  %v12342_v35 = vld [vmem:[#allocation142_spill] sm:$0xff]  ;;  %v12344_v1 = vld [vmem:[#allocation141_spill] sm:$0xff] }
 0x440   :  { %v1763_v38 = vperm.slane %v12341_v16, %v8403_v46  ;;  %v1821_v21 = vsel %vm11848_vm9, %v1820_v53, %v1819_v20  ;;  %v1800_v44 = vsel %vm1768_vm14, %v1799_v39, %v1798_v26  ;;  %v1822_v32 = vperm.slane %v12342_v35, %v8379_v17  ;;  %v12345_v39 = vld [vmem:[#allocation151_spill] sm:$0xff] }
 0x441   :  { %v1834_v6 = vsel %vm1712_vm0, %v1833_v2, %v1832_v37  ;;  %v1837_v48 = vperm.slane %v12343_v18, %v8292_v10  ;;  %v1835_v16 = vperm.slane %v12344_v1, %v8277_v5  ;;  %v1826_v20 = vperm.slane %v12345_v39, %v8423_v57  ;;  %v12346_v2 = vld [vmem:[#allocation133_spill] sm:$0xff]  ;;  %v12350_v39 = vld [vmem:[#allocation144_spill] sm:$0xff] }
 0x442   :  { %v8462_v14 = vpop.permute.xlu2 %1663  ;;  %v1765_v24 = vsel %vm1764_vm13, %v1763_v38, %v1761_v9  ;;  %v1823_v26 = vsel %vm11849_vm10, %v1822_v32, %v1821_v21  ;;  %v1895_v37 = vperm.slane %v8235_v29, %v8274_v23  ;;  %v1824_v35 = vperm.slane %v12346_v2, %v8386_v31  ;;  %v12348_v18 = vld [vmem:[#allocation161_spill] sm:$0xff]  ;;  %v12352_v2 = vld [vmem:[#allocation155_spill] sm:$0xff] }
 0x443   :  { %v1769_v53 = vsel %vm1768_vm14, %v1767_v12, %v1765_v24  ;;  %v1836_v38 = vsel %vm1716_vm1, %v1835_v16, %v1834_v6  ;;  %v1863_v1 = vperm.slane %v12348_v18, %v8267_v62  ;;  %v12349_v12 = vld [vmem:[#allocation137_spill] sm:$0xff]  ;;  %v1894_v24 = vperm.slane %v8159_v42, %v8267_v62 }
 0x444   :  { %v8489_v9 = vsel %vm11847_vm15, %v1800_v44, %v1769_v53  ;;  %v1830_v21 = vperm.slane %v12349_v12, %v8441_v51  ;;  %v1838_v32 = vsel %vm1720_vm2, %v1837_v48, %v1836_v38  ;;  %v1866_v29 = vperm.slane %v8142_v40, %v8277_v5  ;;  %v12351_v53 = vld [vmem:[#allocation150_spill] sm:$0xff]  ;;  %v12353_v12 = vld [vmem:[#allocation145_spill] sm:$0xff] }
 0x445   :  { %v8389_v56 = vpop.permute.xlu1 %1639  ;;  %v8420_v41 = vpop.permute.xlu0 %1660  ;;  %12347 = vst [vmem:[#allocation134_spill] sm:$0xff] %v8489_v9  ;;  %v1841_v44 = vperm.slane %v12350_v39, %v8304_v11  ;;  %v1839_v6 = vperm.slane %v12351_v53, %v8298_v22  ;;  %v1825_v16 = vsel %vm11852_vm11, %v1824_v35, %v1823_v26  ;;  %v1864_v18 = vperm.slane %v12352_v2, %v8274_v23  ;;  %v12354_v39 = vld [vmem:[#allocation146_spill] sm:$0xff]  ;;  %v12355_v2 = vld [vmem:[#allocation149_spill] sm:$0xff] }
 0x446   :  { %v1828_v48 = vperm.slane %v12353_v12, %v8403_v46  ;;  %v1827_v38 = vsel %vm1760_vm12, %v1826_v20, %v1825_v16  ;;  %v1896_v42 = vsel %vm1712_vm0, %v1895_v37, %v1894_v24  ;;  %v1925_v40 = vperm.slane %v8271_v61, %v8267_v62  ;;  %v12356_v20 = vld [vmem:[#allocation160_spill] sm:$0xff] }
 0x447   :  { %v1847_v9 = vperm.slane %v12354_v39, %v8335_v4  ;;  %v1840_v53 = vsel %vm11996_vm3, %v1839_v6, %v1838_v32  ;;  %v1865_v26 = vsel %vm1712_vm0, %v1864_v18, %v1863_v1  ;;  %v1897_v35 = vperm.slane %v8201_v49, %v8277_v5  ;;  %v12364_v39 = vld [vmem:[#allocation169_spill] sm:$0xff] }
 0x448   :  { %v1853_v12 = vperm.slane %v12355_v2, %v8379_v17  ;;  %v1843_v16 = vperm.slane %v12356_v20, %v8320_v13  ;;  %v1867_v37 = vsel %vm1716_vm1, %v1866_v29, %v1865_v26  ;;  %v1926_v61 = vperm.slane %v8254_v8, %v8274_v23 }
 0x449   :  { %v1829_v32 = vsel %vm1764_vm13, %v1828_v48, %v1827_v38  ;;  %v1868_v1 = vperm.slane %v8098_v50, %v8292_v10  ;;  %v1898_v49 = vsel %vm1716_vm1, %v1897_v35, %v1896_v42  ;;  %v1901_v6 = vperm.slane %v8246_v59, %v8298_v22  ;;  %v12358_v35 = vld [vmem:[#allocation153_spill] sm:$0xff] }
 0x44a   :  { %v8527_v24 = vpop.permute.xlu2 %1672  ;;  %v1842_v20 = vsel %vm11995_vm4, %v1841_v44, %v1840_v53  ;;  %v1899_v29 = vperm.slane %v8184_v34, %v8292_v10  ;;  %v1927_v8 = vsel %vm1712_vm0, %v1926_v61, %v1925_v40  ;;  %v1930_v26 = vperm.slane %v8301_v45, %v8292_v10  ;;  %v12357_v34 = vld [vmem:[#allocation158_spill] sm:$0xff] }
 0x44b   :  { %v1869_v50 = vsel %vm1720_vm2, %v1868_v1, %v1867_v37  ;;  %v1872_v38 = vperm.slane %v8163_v63, %v8304_v11  ;;  %v1928_v59 = vperm.slane %v8258_v15, %v8277_v5  ;;  %v1956_v44 = vperm.slane %v8420_v41, %v8267_v62 }
 0x44c   :  { %v1870_v42 = vperm.slane %v12357_v34, %v8298_v22  ;;  %v1844_v40 = vsel %vm1732_vm5, %v1843_v16, %v1842_v20  ;;  %v1900_v45 = vsel %vm1720_vm2, %v1899_v29, %v1898_v49  ;;  %v1845_v37 = vperm.slane %v12358_v35, %v8326_v25 }
 0x44d   :  { %v8435_v36 = vpop.permute.xlu1 %1648  ;;  %v8473_v47 = vpop.permute.xlu0 %1669  ;;  %v1902_v63 = vsel %vm11996_vm3, %v1901_v6, %v1900_v45  ;;  %v1957_v15 = vperm.slane %v8462_v14, %v8274_v23  ;;  %v1929_v61 = vsel %vm1716_vm1, %v1928_v59, %v1927_v8  ;;  %v8562_v41 = vsel %vm1768_vm14, %v1830_v21, %v1829_v32 }
 0x44e   :  { %v1871_v1 = vsel %vm11996_vm3, %v1870_v42, %v1869_v50  ;;  %v1903_v16 = vperm.slane %v8222_v30, %v8304_v11  ;;  %v1931_v49 = vsel %vm1720_vm2, %v1930_v26, %v1929_v61  ;;  %v1932_v6 = vperm.slane %v8260_v55, %v8298_v22  ;;  %v12360_v42 = vld [vmem:[#allocation163_spill] sm:$0xff] }
 0x44f   :  { %v1873_v20 = vsel %vm11995_vm4, %v1872_v38, %v1871_v1  ;;  %v1958_v14 = vsel %vm1712_vm0, %v1957_v15, %v1956_v44  ;;  %v1874_v21 = vperm.slane %v8119_v7, %v8320_v13  ;;  %v1907_v29 = vperm.slane %v8250_v0, %v8326_v25  ;;  %v12359_v7 = vld [vmem:[#allocation162_spill] sm:$0xff]  ;;  %v12362_v1 = vld [vmem:[#allocation179_spill] sm:$0xff] }
 0x450   :  { %v1904_v32 = vsel %vm11995_vm4, %v1903_v16, %v1902_v63  ;;  %v1905_v8 = vperm.slane %v8209_v60, %v8320_v13  ;;  %v1933_v26 = vsel %vm11996_vm3, %v1932_v6, %v1931_v49  ;;  %v1936_v55 = vperm.slane %v8342_v28, %v8320_v13 }
 0x451   :  { %v1961_v50 = vperm.slane %v8473_v47, %v8292_v10  ;;  %v1849_v59 = vperm.slane %v12359_v7, %v8358_v19  ;;  %v1875_v44 = vsel %vm1732_vm5, %v1874_v21, %v1873_v20  ;;  %v1878_v0 = vperm.slane %v8182_v33, %v8335_v4 }
 0x452   :  { %v1934_v60 = vperm.slane %v8264_v3, %v8304_v11  ;;  %v1682_v34 = vpop.permute.xlu2 %1681  ;;  %v1906_v28 = vsel %vm1732_vm5, %v1905_v8, %v1904_v32  ;;  %v1963_v33 = vperm.slane %v8527_v24, %v8298_v22  ;;  %v1909_v16 = vperm.slane %v12362_v1, %v8335_v4  ;;  %v12363_v24 = vld [vmem:[#allocation186_spill] sm:$0xff] }
 0x453   :  { %v1880_v32 = vperm.slane %v12364_v39, %v8358_v19  ;;  %v12366_v8 = vld [vmem:[#allocation178_spill] sm:$0xff]  ;;  %v12373_v39 = vld [vmem:[#allocation171_spill] sm:$0xff]  ;;  %vm11851_vm15 = vcmask 1042434  }
 0x454   :  { %v1935_v3 = vsel %vm11995_vm4, %v1934_v60, %v1933_v26  ;;  %v1911_v26 = vperm.slane %v12366_v8, %v8358_v19  ;;  %v12368_v60 = vld [vmem:[#allocation187_spill] sm:$0xff]  ;;  %v1886_v2 = vperm.slane %v12373_v39, %v8386_v31 }
 0x455   :  { %v8478_v58 = vpop.permute.xlu1 %1657  ;;  %v8541_v48 = vpop.permute.xlu0 %1678  ;;  %v1937_v49 = vsel %vm1732_vm5, %v1936_v55, %v1935_v3 }
 0x456   :  { %v1954_v39 = vperm.slane %v8478_v58, %v8441_v51 }
 0x45d   :  { %v1667_v18 = vpop.permute.xlu1 %1666  ;;  %v1688_v63 = vpop.permute.xlu0 %1687 }
 0x45e   :  { %v1959_v53 = vperm.slane %v1667_v18, %v8277_v5  ;;  %v1846_v18 = vsel %vm1736_vm6, %v1845_v37, %v1844_v40  ;;  %v1876_v40 = vperm.slane %v12360_v42, %v8326_v25  ;;  %v1908_v37 = vsel %vm1736_vm6, %v1907_v29, %v1906_v28  ;;  %v12369_v28 = vld [vmem:[#allocation175_spill] sm:$0xff] }
 0x45f   :  { %v1848_v15 = vsel %vm1740_vm7, %v1847_v9, %v1846_v18  ;;  %v1910_v9 = vsel %vm1740_vm7, %v1909_v16, %v1908_v37  ;;  %v12365_v18 = vld [vmem:[#allocation184_spill] sm:$0xff]  ;;  %v1940_v42 = vperm.slane %v12368_v60, %v8335_v4  ;;  %v12372_v16 = vld [vmem:[#allocation181_spill] sm:$0xff] }
 0x460   :  { %v1960_v30 = vsel %vm1716_vm1, %v1959_v53, %v1958_v14  ;;  %v12361_v53 = vld [vmem:[#allocation156_spill] sm:$0xff]  ;;  %v1877_v61 = vsel %vm1736_vm6, %v1876_v40, %v1875_v44  ;;  %v1850_v20 = vsel %vm11850_vm8, %v1849_v59, %v1848_v15  ;;  %v1938_v14 = vperm.slane %v12363_v24, %v8326_v25  ;;  %v12371_v15 = vld [vmem:[#allocation159_spill] sm:$0xff] }
 0x461   :  { %v1962_v47 = vsel %vm1720_vm2, %v1961_v50, %v1960_v30  ;;  %v1851_v35 = vperm.slane %v12361_v53, %v8370_v27  ;;  %v1879_v6 = vsel %vm1740_vm7, %v1878_v0, %v1877_v61  ;;  %v1913_v29 = vperm.slane %v12365_v18, %v8370_v27  ;;  %v12367_v59 = vld [vmem:[#allocation164_spill] sm:$0xff]  ;;  %v12370_v53 = vld [vmem:[#allocation165_spill] sm:$0xff] }
 0x462   :  { %v1964_v21 = vsel %vm11996_vm3, %v1963_v33, %v1962_v47  ;;  %v1939_v55 = vsel %vm1736_vm6, %v1938_v14, %v1937_v49  ;;  %v1942_v50 = vperm.slane %v8389_v56, %v8358_v19  ;;  %v1855_v44 = vperm.slane %v12367_v59, %v8386_v31 }
 0x463   :  { %v1852_v7 = vsel %vm11848_vm9, %v1851_v35, %v1850_v20  ;;  %v1881_v0 = vsel %vm11850_vm8, %v1880_v32, %v1879_v6  ;;  %v1884_v47 = vperm.slane %v12369_v28, %v8379_v17  ;;  %v1882_v35 = vperm.slane %v12370_v53, %v8370_v27  ;;  %v1691_v6 = vpop.permute.xlu2 %1690 }
 0x464   :  { %v1969_v33 = vperm.slane %v1682_v34, %v8326_v25  ;;  %v1941_v3 = vsel %vm1740_vm7, %v1940_v42, %v1939_v55  ;;  %v1857_v61 = vperm.slane %v12371_v15, %v8423_v57  ;;  %v1854_v1 = vsel %vm11849_vm10, %v1853_v12, %v1852_v7  ;;  %v12375_v55 = vld [vmem:[#allocation152_spill] sm:$0xff] }
 0x465   :  { %v1676_v38 = vpop.permute.xlu1 %1675  ;;  %v1915_v49 = vperm.slane %v12372_v16, %v8379_v17  ;;  %v1943_v20 = vsel %vm11850_vm8, %v1942_v50, %v1941_v3  ;;  %v1856_v24 = vsel %vm11852_vm11, %v1855_v44, %v1854_v1  ;;  %v1883_v34 = vsel %vm11848_vm9, %v1882_v35, %v1881_v0  ;;  %v12376_v7 = vld [vmem:[#allocation180_spill] sm:$0xff]  ;;  %v12380_v3 = vld [vmem:[#allocation182_spill] sm:$0xff] }
 0x466   :  { %v1965_v45 = vperm.slane %v1676_v38, %v8304_v11  ;;  %v1967_v38 = vperm.slane %v8541_v48, %v8320_v13  ;;  %v1944_v14 = vperm.slane %v8309_v54, %v8370_v27  ;;  %v1885_v12 = vsel %vm11849_vm10, %v1884_v47, %v1883_v34  ;;  %v12377_v0 = vld [vmem:[#allocation168_spill] sm:$0xff] }
 0x467   :  { %v1948_v54 = vperm.slane %v8435_v36, %v8386_v31  ;;  %v1859_v50 = vperm.slane %v12375_v55, %v8403_v46  ;;  %v1917_v59 = vperm.slane %v12376_v7, %v8386_v31  ;;  %v1946_v44 = vperm.slane %v8349_v52, %v8379_v17  ;;  %v12378_v36 = vld [vmem:[#allocation177_spill] sm:$0xff]  ;;  %v12379_v52 = vld [vmem:[#allocation166_spill] sm:$0xff] }
 0x468   :  { %v1966_v30 = vsel %vm11995_vm4, %v1965_v45, %v1964_v21  ;;  %v1912_v45 = vsel %vm11850_vm8, %v1911_v26, %v1910_v9  ;;  %v1697_v9 = vpop.permute.xlu0 %1696  ;;  %v1945_v8 = vsel %vm11848_vm9, %v1944_v14, %v1943_v20  ;;  %v1973_v26 = vperm.slane %v1688_v63, %v8358_v19 }
 0x469   :  { %v1968_v56 = vsel %vm1732_vm5, %v1967_v38, %v1966_v30  ;;  %v1914_v37 = vsel %vm11848_vm9, %v1913_v29, %v1912_v45  ;;  %v12374_v29 = vld [vmem:[#allocation185_spill] sm:$0xff]  ;;  %v1858_v38 = vsel %vm1760_vm12, %v1857_v61, %v1856_v24  ;;  %v1888_v60 = vperm.slane %v12377_v0, %v8423_v57 }
 0x46a   :  { %v1970_v21 = vsel %vm1736_vm6, %v1969_v33, %v1968_v56  ;;  %v1916_v32 = vsel %vm11849_vm10, %v1915_v49, %v1914_v37  ;;  %v1919_v30 = vperm.slane %v12374_v29, %v8423_v57  ;;  %v1887_v42 = vsel %vm11852_vm11, %v1886_v2, %v1885_v12  ;;  %v12381_v49 = vld [vmem:[#allocation173_spill] sm:$0xff]  ;;  %v12382_v12 = vld [vmem:[#allocation183_spill] sm:$0xff] }
 0x46b   :  { %v1918_v47 = vsel %vm11852_vm11, %v1917_v59, %v1916_v32  ;;  %v1975_v45 = vperm.slane %v1691_v6, %v8370_v27  ;;  %v1947_v56 = vsel %vm11849_vm10, %v1946_v44, %v1945_v8  ;;  %v1861_v53 = vperm.slane %v12379_v52, %v8441_v51 }
 0x46c   :  { %v1920_v35 = vsel %vm1760_vm12, %v1919_v30, %v1918_v47  ;;  %v1949_v37 = vsel %vm11852_vm11, %v1948_v54, %v1947_v56  ;;  %v1889_v33 = vsel %vm1760_vm12, %v1888_v60, %v1887_v42  ;;  %v1921_v15 = vperm.slane %v12380_v3, %v8403_v46  ;;  %v12384_v30 = vld [vmem:[#allocation134_spill] sm:$0xff] }
 0x46d   :  { %v1685_v40 = vpop.permute.xlu1 %1684  ;;  %v1950_v61 = vperm.slane %v8362_v43, %v8423_v57  ;;  %v1860_v16 = vsel %vm1764_vm13, %v1859_v50, %v1858_v38  ;;  %v1892_v20 = vperm.slane %v12381_v49, %v8441_v51  ;;  %v1979_v43 = vperm.slane %v1697_v9, %v8386_v31  ;;  %v12389_v49 = vld [vmem:[#allocation79_spill] sm:$0xff] }
 0x46e   :  { %v1971_v48 = vperm.slane %v1685_v40, %v8335_v4  ;;  %v1890_v40 = vperm.slane %v12378_v36, %v8403_v46  ;;  %v1922_v34 = vsel %vm1764_vm13, %v1921_v15, %v1920_v35  ;;  %v1862_v2 = vsel %vm1768_vm14, %v1861_v53, %v1860_v16  ;;  %v12386_v53 = vld [vmem:[#allocation81_spill] sm:$0xff] }
 0x46f   :  { %v1951_v14 = vsel %vm1760_vm12, %v1950_v61, %v1949_v37  ;;  %v1923_v32 = vperm.slane %v12382_v12, %v8441_v51  ;;  %v1990_v8 = vsel %vm11851_vm15, %v8562_v41, %v12384_v30  ;;  %vm11993_vm15 = vcmask 1046534   ;;  %v12387_v37 = vld [vmem:[#allocation78_spill] sm:$0xff]  ;;  %v12394_v12 = vld [vmem:[#allocation105_spill] sm:$0xff]  ;;  %v12396_v30 = vld [vmem:[#allocation83_spill] sm:$0xff] }
 0x470   :  { %v1972_v18 = vsel %vm1740_vm7, %v1971_v48, %v1970_v21  ;;  %v1891_v6 = vsel %vm1764_vm13, %v1890_v40, %v1889_v33  ;;  %v1700_v21 = vpop.permute.xlu2 %1699 }
 0x471   :  { %v1974_v63 = vsel %vm11850_vm8, %v1973_v26, %v1972_v18  ;;  %v12383_v18 = vld [vmem:[#allocation189_spill] sm:$0xff]  ;;  %v1893_v54 = vsel %vm1768_vm14, %v1892_v20, %v1891_v6  ;;  %v1706_v26 = vpop.permute.xlu0 %1705  ;;  %v1981_v9 = vperm.slane %v1700_v21, %v8423_v57  ;;  %v1924_v50 = vsel %vm1768_vm14, %v1923_v32, %v1922_v34  ;;  %v12390_v6 = vld [vmem:[#allocation82_spill] sm:$0xff] }
 0x472   :  { %v1976_v1 = vsel %vm11848_vm9, %v1975_v45, %v1974_v63  ;;  %vm1991_vm9 = vcmask 1043459   ;;  %v1952_v29 = vperm.slane %v12383_v18, %v8403_v46  ;;  %vm11994_vm8 = vcmask 1045509   ;;  %v12395_v18 = vld [vmem:[#allocation85_spill] sm:$0xff] }
 0x473   :  { %v1992_v7 = vsel %vm1991_vm9, %v1862_v2, %v1990_v8  ;;  %v1985_v44 = vperm.slane %v1706_v26, %v8441_v51 }
 0x474   :  { %v1953_v38 = vsel %vm1764_vm13, %v1952_v29, %v1951_v14 }
 0x475   :  { %v1694_v28 = vpop.permute.xlu1 %1693  ;;  %v1955_v41 = vsel %vm1768_vm14, %v1954_v39, %v1953_v38  ;;  %v12400_v38 = vld [vmem:[#allocation108_spill] sm:$0xff] }
 0x476   :  { %v1977_v48 = vperm.slane %v1694_v28, %v8379_v17 }
 0x478   :  { %v1978_v24 = vsel %vm11849_vm10, %v1977_v48, %v1976_v1  ;;  %vm1993_vm10 = vcmask 1044484   ;;  %v12385_v48 = vld [vmem:[#allocation89_spill] sm:$0xff]  ;;  %v12388_v1 = vld [vmem:[#allocation102_spill] sm:$0xff] }
 0x479   :  { %v1980_v58 = vsel %vm11852_vm11, %v1979_v43, %v1978_v24  ;;  %v1994_v60 = vsel %vm1993_vm10, %v1893_v54, %v1992_v7  ;;  %vm11992_vm11 = vcmask 1047559  }
 0x47a   :  { %v1982_v0 = vsel %vm1760_vm12, %v1981_v9, %v1980_v58  ;;  %v1996_v36 = vsel %vm11994_vm8, %v1924_v50, %v1994_v60 }
 0x47b   :  { %v1998_v63 = vsel %vm11993_vm15, %v1955_v41, %v1996_v36  ;;  %vm12703_vm15 = vcmask 720512  }
 0x47d   :  { %v1703_v55 = vpop.permute.xlu1 %1702 }
 0x47e   :  { %v1983_v59 = vperm.slane %v1703_v55, %v8403_v46 }
 0x480   :  { %v1984_v42 = vsel %vm1764_vm13, %v1983_v59, %v1982_v0  ;;  %v12401_v59 = vld [vmem:[#allocation88_spill] sm:$0xff] }
 0x481   :  { %v1986_v40 = vsel %vm1768_vm14, %v1985_v44, %v1984_v42  ;;  %v12402_v44 = vld [vmem:[#allocation84_spill] sm:$0xff] }
 0x482   :  { %v2000_v28 = vsel %vm11992_vm11, %v1986_v40, %v1998_v63  ;;  %vm12702_vm11 = vcmask 654912  }
 0x483   :  { %2002 = vmax.xlane.f32.xlu2 %v2000_v28  ;;  %vm12705_vm8 = vmmov %vm12702_vm11 }
 0x4f6   :  { %v8732_v47 = vpop.xlane.xlu2 %2002 }
 0x4f7   :  { %v8735_v45 = vperm.slane %v8732_v47, 0  ;;  %v8738_v56 = vperm.slane %v8732_v47, 1 }
 0x4f9   :  { %v2032_v52 = vsub.f32 %v12385_v48, %v8735_v45  ;;  %v2022_v35 = vsub.f32 %v12386_v53, %v8735_v45  ;;  %v2021_v33 = vsub.f32 %v12387_v37, %v8735_v45  ;;  %v2039_v16 = vsub.f32 %v12388_v1, %v8738_v56  ;;  %v12406_v48 = vld [vmem:[#allocation111_spill] sm:$0xff]  ;;  %v12408_v37 = vld [vmem:[#allocation86_spill] sm:$0xff] }
 0x4fa   :  { %v2024_v20 = vsub.f32 %v12389_v49, %v8735_v45  ;;  %v2023_v24 = vsub.f32 %v12390_v6, %v8735_v45  ;;  %v2042_v32 = vsub.f32 %v12394_v12, %v8738_v56  ;;  %v2026_v29 = vsub.f32 %v12395_v18, %v8735_v45  ;;  %v12407_v53 = vld [vmem:[#allocation87_spill] sm:$0xff] }
 0x4fb   :  { %v2171_v3 = vmul.f32 1.442695, %v2032_v52  ;;  %v2151_v15 = vmul.f32 1.442695, %v2022_v35  ;;  %v2149_v61 = vmul.f32 1.442695, %v2021_v33  ;;  %v2025_v8 = vsub.f32 %v12396_v30, %v8735_v45 }
 0x4fc   :  { %v2185_v34 = vmul.f32 1.442695, %v2039_v16  ;;  %v2155_v14 = vmul.f32 1.442695, %v2024_v20  ;;  %v2153_v39 = vmul.f32 1.442695, %v2023_v24  ;;  %v2045_v7 = vsub.f32 %v12400_v38, %v8738_v56 }
 0x4fd   :  { %6378 = vpow2.f32 %v2171_v3  ;;  %v2191_v54 = vmul.f32 1.442695, %v2042_v32  ;;  %v2159_v26 = vmul.f32 1.442695, %v2026_v29  ;;  %v2157_v9 = vmul.f32 1.442695, %v2025_v8 }
 0x4fe   :  { %6380 = vpow2.f32 %v2151_v15  ;;  %v2028_v41 = vsub.f32 %v12401_v59, %v8735_v45  ;;  %v2027_v0 = vsub.f32 %v12402_v44, %v8735_v45  ;;  %v2197_v60 = vmul.f32 1.442695, %v2045_v7  ;;  %v12412_v20 = vld [vmem:[#allocation114_spill] sm:$0xff]  ;;  %v12419_v38 = vld [vmem:[#allocation92_spill] sm:$0xff]  ;;  %v12420_v59 = vld [vmem:[#allocation91_spill] sm:$0xff] }
 0x4ff   :  { %6382 = vpow2.f32 %v2149_v61  ;;  %v2048_v52 = vsub.f32 %v12406_v48, %v8738_v56  ;;  %v2030_v35 = vsub.f32 %v12407_v53, %v8735_v45  ;;  %v2029_v33 = vsub.f32 %v12408_v37, %v8735_v45  ;;  %v12413_v24 = vld [vmem:[#allocation94_spill] sm:$0xff] }
 0x500   :  { %6384 = vpow2.f32 %v2185_v34  ;;  %v2163_v42 = vmul.f32 1.442695, %v2028_v41  ;;  %v2161_v40 = vmul.f32 1.442695, %v2027_v0  ;;  %v2051_v6 = vsub.f32 %v12412_v20, %v8738_v56 }
 0x501   :  { %6386 = vpow2.f32 %v2155_v14  ;;  %v2203_v3 = vmul.f32 1.442695, %v2048_v52  ;;  %v2167_v15 = vmul.f32 1.442695, %v2030_v35  ;;  %v2165_v1 = vmul.f32 1.442695, %v2029_v33 }
 0x502   :  { %6388 = vpow2.f32 %v2153_v39  ;;  %v2033_v34 = vsub.f32 %v12413_v24, %v8735_v45  ;;  %v12414_v14 = vld [vmem:[#allocation90_spill] sm:$0xff]  ;;  %v8813_v12 = vperm.slane %v8732_v47, 2  ;;  %v2209_v32 = vmul.f32 1.442695, %v2051_v6  ;;  %v12424_v52 = vld [vmem:[#allocation120_spill] sm:$0xff]  ;;  %v12425_v35 = vld [vmem:[#allocation93_spill] sm:$0xff] }
 0x503   :  { %v8752_v21 = vpop.eup %6378  ;;  %6390 = vpow2.f32 %v2191_v54  ;;  %v2031_v39 = vsub.f32 %v12414_v14, %v8735_v45  ;;  %v2035_v7 = vsub.f32 %v12419_v38, %v8735_v45  ;;  %v2034_v41 = vsub.f32 %v12420_v59, %v8735_v45  ;;  %v12426_v33 = vld [vmem:[#allocation99_spill] sm:$0xff] }
 0x504   :  { %12391 = vst [vmem:[#allocation138_spill] sm:$0xff] %v8752_v21  ;;  %v8754_v43 = vpop.eup %6380  ;;  %2567 = vperm.xlu2 %6116, %v8752_v21   ;;  %6392 = vpow2.f32 %v2159_v26  ;;  %v2173_v18 = vmul.f32 1.442695, %v2033_v34  ;;  %v12418_v26 = vld [vmem:[#allocation117_spill] sm:$0xff]  ;;  %v2057_v53 = vsub.f32 %v12424_v52, %v8813_v12  ;;  %v2037_v37 = vsub.f32 %v12425_v35, %v8738_v56  ;;  %v12430_v14 = vld [vmem:[#allocation123_spill] sm:$0xff] }
 0x505   :  { %12392 = vst [vmem:[#allocation127_spill] sm:$0xff] %v8754_v43  ;;  %v8757_v2 = vpop.eup %6382  ;;  %2537 = vperm.xlu0 %6118, %v8754_v43   ;;  %6394 = vpow2.f32 %v2157_v9  ;;  %v2169_v30 = vmul.f32 1.442695, %v2031_v39  ;;  %v2054_v9 = vsub.f32 %v12418_v26, %v8813_v12  ;;  %v2177_v0 = vmul.f32 1.442695, %v2035_v7 }
 0x506   :  { %12393 = vst [vmem:[#allocation125_spill] sm:$0xff] %v8757_v2  ;;  %2534 = vperm.xlu1 %6117, %v8757_v2   ;;  %v8767_v58 = vpop.eup %6384  ;;  %6396 = vpow2.f32 %v2197_v60  ;;  %v2060_v39 = vsub.f32 %v12430_v14, %v8813_v12  ;;  %v12442_v14 = vld [vmem:[#allocation10_spill] sm:$0xff] }
 0x507   :  { %12397 = vst [vmem:[#allocation148_spill] sm:$0xff] %v8767_v58  ;;  %v8769_v55 = vpop.eup %6386  ;;  %6398 = vpow2.f32 %v2163_v42  ;;  %v2215_v44 = vmul.f32 1.442695, %v2054_v9  ;;  %v2175_v42 = vmul.f32 1.442695, %v2034_v41 }
 0x508   :  { %12398 = vst [vmem:[#allocation131_spill] sm:$0xff] %v8769_v55  ;;  %v8772_v50 = vpop.eup %6388  ;;  %6400 = vpow2.f32 %v2161_v40  ;;  %v2227_v26 = vmul.f32 1.442695, %v2060_v39  ;;  %v2066_v39 = vsub.f32 %v12442_v14, %v8813_v12 }
 0x509   :  { %12399 = vst [vmem:[#allocation154_spill] sm:$0xff] %v8772_v50  ;;  %v8782_v36 = vpop.eup %6390  ;;  %6402 = vpow2.f32 %v2203_v3  ;;  %v2036_v3 = vsub.f32 %v12426_v33, %v8735_v45  ;;  %v12431_v45 = vld [vmem:[#allocation96_spill] sm:$0xff] }
 0x50a   :  { %12403 = vst [vmem:[#allocation128_spill] sm:$0xff] %v8782_v36  ;;  %v8784_v63 = vpop.eup %6392  ;;  %6404 = vpow2.f32 %v2167_v15  ;;  %v2221_v15 = vmul.f32 1.442695, %v2057_v53  ;;  %v12438_v53 = vld [vmem:[#allocation97_spill] sm:$0xff] }
 0x50b   :  { %12404 = vst [vmem:[#allocation130_spill] sm:$0xff] %v8784_v63  ;;  %v8787_v28 = vpop.eup %6394  ;;  %6406 = vpow2.f32 %v2165_v1  ;;  %v2181_v1 = vmul.f32 1.442695, %v2037_v37  ;;  %v2179_v6 = vmul.f32 1.442695, %v2036_v3  ;;  %v2041_v35 = vsub.f32 %v12438_v53, %v8738_v56  ;;  %v12448_v53 = vld [vmem:[#allocation13_spill] sm:$0xff] }
 0x50c   :  { %2588 = vperm.xlu2 %6116, %v8767_v58   ;;  %12405 = vst [vmem:[#allocation147_spill] sm:$0xff] %v8787_v28  ;;  %v8797_v61 = vpop.eup %6396  ;;  %6408 = vpow2.f32 %v2209_v32  ;;  %v2040_v32 = vsub.f32 %v12431_v45, %v8738_v56  ;;  %v12443_v45 = vld [vmem:[#allocation101_spill] sm:$0xff] }
 0x50d   :  { %2543 = vperm.xlu0 %6118, %v8769_v55   ;;  %12409 = vst [vmem:[#allocation124_spill] sm:$0xff] %v8797_v61  ;;  %v8799_v16 = vpop.eup %6398  ;;  %6410 = vpow2.f32 %v2173_v18  ;;  %v12432_v18 = vld [vmem:[#allocation95_spill] sm:$0xff] }
 0x50e   :  { %2540 = vperm.xlu1 %6117, %v8772_v50   ;;  %12410 = vst [vmem:[#allocation142_spill] sm:$0xff] %v8799_v16  ;;  %v8802_v49 = vpop.eup %6400  ;;  %6412 = vpow2.f32 %v2169_v30  ;;  %v2038_v30 = vsub.f32 %v12432_v18, %v8738_v56  ;;  %v2187_v9 = vmul.f32 1.442695, %v2040_v32  ;;  %v2046_v32 = vsub.f32 %v12443_v45, %v8738_v56  ;;  %v12444_v18 = vld [vmem:[#allocation100_spill] sm:$0xff] }
 0x50f   :  { %12411 = vst [vmem:[#allocation157_spill] sm:$0xff] %v8802_v49  ;;  %v8815_v29 = vpop.eup %6402  ;;  %6414 = vpow2.f32 %v2215_v44  ;;  %v12436_v44 = vld [vmem:[#allocation8_spill] sm:$0xff] }
 0x510   :  { %12415 = vst [vmem:[#allocation141_spill] sm:$0xff] %v8815_v29  ;;  %v8817_v8 = vpop.eup %6404  ;;  %6416 = vpow2.f32 %v2177_v0  ;;  %v2183_v7 = vmul.f32 1.442695, %v2038_v30  ;;  %v2063_v0 = vsub.f32 %v12436_v44, %v8813_v12  ;;  %v2044_v30 = vsub.f32 %v12444_v18, %v8738_v56 }
 0x511   :  { %12416 = vst [vmem:[#allocation151_spill] sm:$0xff] %v8817_v8  ;;  %v8820_v54 = vpop.eup %6406  ;;  %6418 = vpow2.f32 %v2175_v42  ;;  %v12437_v42 = vld [vmem:[#allocation98_spill] sm:$0xff] }
 0x512   :  { %12417 = vst [vmem:[#allocation133_spill] sm:$0xff] %v8820_v54  ;;  %v8830_v60 = vpop.eup %6408  ;;  %6420 = vpow2.f32 %v2221_v15  ;;  %v2043_v52 = vsub.f32 %v12437_v42, %v8738_v56  ;;  %v2233_v37 = vmul.f32 1.442695, %v2063_v0  ;;  %v2189_v15 = vmul.f32 1.442695, %v2041_v35 }
 0x513   :  { %12421 = vst [vmem:[#allocation161_spill] sm:$0xff] %v8830_v60  ;;  %v8832_v40 = vpop.eup %6410  ;;  %6422 = vpow2.f32 %v2181_v1  ;;  %v2195_v0 = vmul.f32 1.442695, %v2044_v30 }
 0x514   :  { %2597 = vperm.xlu2 %6116, %v8782_v36   ;;  %12422 = vst [vmem:[#allocation137_spill] sm:$0xff] %v8832_v40  ;;  %v8835_v48 = vpop.eup %6412  ;;  %6424 = vpow2.f32 %v2179_v6  ;;  %v2193_v33 = vmul.f32 1.442695, %v2043_v52 }
 0x515   :  { %2549 = vperm.xlu0 %6118, %v8784_v63   ;;  %12423 = vst [vmem:[#allocation144_spill] sm:$0xff] %v8835_v48  ;;  %v8845_v20 = vpop.eup %6414  ;;  %6426 = vpow2.f32 %v2227_v26  ;;  %v8891_v26 = vperm.slane %v8732_v47, 3 }
 0x516   :  { %2546 = vperm.xlu1 %6117, %v8787_v28   ;;  %12427 = vst [vmem:[#allocation150_spill] sm:$0xff] %v8845_v20  ;;  %v8847_v24 = vpop.eup %6416  ;;  %6428 = vpow2.f32 %v2187_v9  ;;  %v2239_v9 = vmul.f32 1.442695, %v2066_v39 }
 0x517   :  { %12428 = vst [vmem:[#allocation155_spill] sm:$0xff] %v8847_v24  ;;  %v8850_v34 = vpop.eup %6418  ;;  %6430 = vpow2.f32 %v2183_v7  ;;  %v2199_v7 = vmul.f32 1.442695, %v2046_v32  ;;  %v2069_v35 = vsub.f32 %v12448_v53, %v8891_v26  ;;  %v12455_v53 = vld [vmem:[#allocation107_spill] sm:$0xff] }
 0x518   :  { %12429 = vst [vmem:[#allocation145_spill] sm:$0xff] %v8850_v34  ;;  %v8860_v38 = vpop.eup %6420  ;;  %6432 = vpow2.f32 %v2233_v37  ;;  %v12449_v37 = vld [vmem:[#allocation104_spill] sm:$0xff] }
 0x519   :  { %12433 = vst [vmem:[#allocation146_spill] sm:$0xff] %v8860_v38  ;;  %v8862_v59 = vpop.eup %6422  ;;  %6434 = vpow2.f32 %v2193_v33  ;;  %v2049_v33 = vsub.f32 %v12449_v37, %v8738_v56  ;;  %v2245_v39 = vmul.f32 1.442695, %v2069_v35  ;;  %v2052_v35 = vsub.f32 %v12455_v53, %v8738_v56  ;;  %v12456_v37 = vld [vmem:[#allocation106_spill] sm:$0xff] }
 0x51a   :  { %12434 = vst [vmem:[#allocation149_spill] sm:$0xff] %v8862_v59  ;;  %v8865_v41 = vpop.eup %6424  ;;  %6436 = vpow2.f32 %v2189_v15  ;;  %v12450_v15 = vld [vmem:[#allocation103_spill] sm:$0xff] }
 0x51b   :  { %12435 = vst [vmem:[#allocation160_spill] sm:$0xff] %v8865_v41  ;;  %v8875_v3 = vpop.eup %6426  ;;  %6438 = vpow2.f32 %v2239_v9  ;;  %v2047_v14 = vsub.f32 %v12450_v15, %v8738_v56  ;;  %v2205_v45 = vmul.f32 1.442695, %v2049_v33  ;;  %v2050_v33 = vsub.f32 %v12456_v37, %v8738_v56  ;;  %v12461_v56 = vld [vmem:[#allocation110_spill] sm:$0xff] }
 0x51c   :  { %2606 = vperm.xlu2 %6116, %v8797_v61   ;;  %12439 = vst [vmem:[#allocation158_spill] sm:$0xff] %v8875_v3  ;;  %v8877_v1 = vpop.eup %6428  ;;  %6440 = vpow2.f32 %v2199_v7  ;;  %v12454_v7 = vld [vmem:[#allocation16_spill] sm:$0xff] }
 0x51d   :  { %2555 = vperm.xlu0 %6118, %v8799_v16   ;;  %12440 = vst [vmem:[#allocation153_spill] sm:$0xff] %v8877_v1  ;;  %v8880_v6 = vpop.eup %6430  ;;  %6442 = vpow2.f32 %v2195_v0  ;;  %v2201_v18 = vmul.f32 1.442695, %v2047_v14  ;;  %v2072_v0 = vsub.f32 %v12454_v7, %v8891_v26  ;;  %v2211_v14 = vmul.f32 1.442695, %v2052_v35 }
 0x51e   :  { %2552 = vperm.xlu1 %6117, %v8802_v49   ;;  %12441 = vst [vmem:[#allocation162_spill] sm:$0xff] %v8880_v6  ;;  %v8893_v44 = vpop.eup %6432  ;;  %6444 = vpow2.f32 %v2245_v39  ;;  %v2055_v7 = vsub.f32 %v12461_v56, %v8813_v12 }
 0x51f   :  { %12445 = vst [vmem:[#allocation163_spill] sm:$0xff] %v8893_v44  ;;  %v8895_v42 = vpop.eup %6434  ;;  %6446 = vpow2.f32 %v2205_v45  ;;  %v2251_v15 = vmul.f32 1.442695, %v2072_v0  ;;  %v12460_v45 = vld [vmem:[#allocation19_spill] sm:$0xff]  ;;  %v12462_v0 = vld [vmem:[#allocation109_spill] sm:$0xff] }
 0x520   :  { %12446 = vst [vmem:[#allocation156_spill] sm:$0xff] %v8895_v42  ;;  %v8898_v52 = vpop.eup %6436  ;;  %6448 = vpow2.f32 %v2201_v18  ;;  %v2075_v18 = vsub.f32 %v12460_v45, %v8891_v26  ;;  %v2053_v53 = vsub.f32 %v12462_v0, %v8813_v12  ;;  %v2217_v37 = vmul.f32 1.442695, %v2055_v7  ;;  %v12468_v7 = vld [vmem:[#allocation112_spill] sm:$0xff] }
 0x521   :  { %12447 = vst [vmem:[#allocation179_spill] sm:$0xff] %v8898_v52  ;;  %v8908_v32 = vpop.eup %6438  ;;  %6450 = vpow2.f32 %v2251_v15  ;;  %v2056_v0 = vsub.f32 %v12468_v7, %v8813_v12 }
 0x522   :  { %12451 = vst [vmem:[#allocation186_spill] sm:$0xff] %v8908_v32  ;;  %v8910_v30 = vpop.eup %6440  ;;  %6452 = vpow2.f32 %v2211_v14  ;;  %v2257_v35 = vmul.f32 1.442695, %v2075_v18  ;;  %v12467_v18 = vld [vmem:[#allocation113_spill] sm:$0xff] }
 0x523   :  { %12452 = vst [vmem:[#allocation169_spill] sm:$0xff] %v8910_v30  ;;  %v8913_v9 = vpop.eup %6442  ;;  %v2058_v56 = vsub.f32 %v12467_v18, %v8813_v12 }
 0x524   :  { %2615 = vperm.xlu2 %6116, %v8815_v29   ;;  %12453 = vst [vmem:[#allocation184_spill] sm:$0xff] %v8913_v9 }
 0x525   :  { %2561 = vperm.xlu0 %6118, %v8817_v8  }
 0x526   :  { %2558 = vperm.xlu1 %6117, %v8820_v54  }
 0x52c   :  { %2624 = vperm.xlu2 %6116, %v8830_v60  }
 0x52d   :  { %2570 = vperm.xlu0 %6118, %v8832_v40  }
 0x52e   :  { %2564 = vperm.xlu1 %6117, %v8835_v48  }
 0x534   :  { %2633 = vperm.xlu2 %6116, %v8845_v20  }
 0x535   :  { %2576 = vperm.xlu0 %6118, %v8847_v24  }
 0x536   :  { %2573 = vperm.xlu1 %6117, %v8850_v34  }
 0x53c   :  { %2642 = vperm.xlu2 %6116, %v8860_v38  }
 0x53d   :  { %2582 = vperm.xlu0 %6118, %v8862_v59  }
 0x53e   :  { %2579 = vperm.xlu1 %6117, %v8865_v41  }
 0x544   :  { %2651 = vperm.xlu2 %6116, %v8875_v3  }
 0x545   :  { %2591 = vperm.xlu0 %6118, %v8877_v1  }
 0x546   :  { %2585 = vperm.xlu1 %6117, %v8880_v6  }
 0x54c   :  { %2660 = vperm.xlu2 %6116, %v8893_v44  }
 0x54d   :  { %2600 = vperm.xlu0 %6118, %v8895_v42  }
 0x54e   :  { %2594 = vperm.xlu1 %6117, %v8898_v52   ;;  %v2207_v52 = vmul.f32 1.442695, %v2050_v33 }
 0x550   :  { %6454 = vpow2.f32 %v2207_v52  ;;  %v12466_v52 = vld [vmem:[#allocation22_spill] sm:$0xff] }
 0x551   :  { %6456 = vpow2.f32 %v2257_v35  ;;  %v2078_v14 = vsub.f32 %v12466_v52, %v8891_v26  ;;  %v12473_v52 = vld [vmem:[#allocation116_spill] sm:$0xff] }
 0x552   :  { %6458 = vpow2.f32 %v2217_v37  ;;  %v12472_v37 = vld [vmem:[#allocation25_spill] sm:$0xff] }
 0x554   :  { %2669 = vperm.xlu2 %6116, %v8908_v32   ;;  %v8923_v32 = vpop.eup %6444 }
 0x555   :  { %2609 = vperm.xlu0 %6118, %v8910_v30   ;;  %12457 = vst [vmem:[#allocation178_spill] sm:$0xff] %v8923_v32  ;;  %v8925_v30 = vpop.eup %6446 }
 0x556   :  { %2603 = vperm.xlu1 %6117, %v8913_v9   ;;  %12458 = vst [vmem:[#allocation164_spill] sm:$0xff] %v8925_v30  ;;  %v8928_v39 = vpop.eup %6448  ;;  %v2219_v9 = vmul.f32 1.442695, %v2056_v0 }
 0x557   :  { %12459 = vst [vmem:[#allocation187_spill] sm:$0xff] %v8928_v39  ;;  %v8938_v33 = vpop.eup %6450 }
 0x558   :  { %12463 = vst [vmem:[#allocation175_spill] sm:$0xff] %v8938_v33 }
 0x55c   :  { %2678 = vperm.xlu2 %6116, %v8923_v32   ;;  %v2213_v32 = vmul.f32 1.442695, %v2053_v53  ;;  %v2263_v53 = vmul.f32 1.442695, %v2078_v14  ;;  %v2061_v14 = vsub.f32 %v12473_v52, %v8813_v12 }
 0x55d   :  { %2618 = vperm.xlu0 %6118, %v8925_v30   ;;  %v8940_v30 = vpop.eup %6452 }
 0x55e   :  { %2612 = vperm.xlu1 %6117, %v8928_v39   ;;  %12464 = vst [vmem:[#allocation165_spill] sm:$0xff] %v8940_v30  ;;  %v8943_v15 = vpop.eup %6454  ;;  %v8945_v45 = vpop.permute.xlu2 %2567  ;;  %6460 = vpow2.f32 %v2213_v32  ;;  %v2081_v32 = vsub.f32 %v12472_v37, %v8891_v26 }
 0x55f   :  { %12465 = vst [vmem:[#allocation159_spill] sm:$0xff] %v8943_v15  ;;  %v8955_v39 = vpop.eup %6456  ;;  %6462 = vpow2.f32 %v2263_v53 }
 0x560   :  { %12469 = vst [vmem:[#allocation181_spill] sm:$0xff] %v8955_v39  ;;  %v2269_v0 = vmul.f32 1.442695, %v2081_v32  ;;  %v12479_v32 = vld [vmem:[#allocation119_spill] sm:$0xff] }
 0x561   :  { %v2064_v52 = vsub.f32 %v12479_v32, %v8813_v12  ;;  %v12484_v32 = vld [vmem:[#allocation30_spill] sm:$0xff] }
 0x564   :  { %2687 = vperm.xlu2 %6116, %v8938_v33   ;;  %v2223_v33 = vmul.f32 1.442695, %v2058_v56  ;;  %v12474_v56 = vld [vmem:[#allocation115_spill] sm:$0xff] }
 0x565   :  { %2627 = vperm.xlu0 %6118, %v8940_v30   ;;  %v8957_v30 = vpop.eup %6458  ;;  %v2059_v7 = vsub.f32 %v12474_v56, %v8813_v12  ;;  %v12480_v56 = vld [vmem:[#allocation118_spill] sm:$0xff] }
 0x566   :  { %2621 = vperm.xlu1 %6117, %v8943_v15   ;;  %12470 = vst [vmem:[#allocation171_spill] sm:$0xff] %v8957_v30  ;;  %v8960_v35 = vpop.eup %6460  ;;  %6464 = vpow2.f32 %v2223_v33  ;;  %v8968_v18 = vpop.permute.xlu2 %2588  ;;  %v12478_v33 = vld [vmem:[#allocation27_spill] sm:$0xff] }
 0x567   :  { %12471 = vst [vmem:[#allocation185_spill] sm:$0xff] %v8960_v35  ;;  %6466 = vpow2.f32 %v2219_v9  ;;  %v8972_v15 = vpop.eup %6462  ;;  %v2225_v53 = vmul.f32 1.442695, %v2059_v7  ;;  %v2084_v9 = vsub.f32 %v12478_v33, %v8891_v26  ;;  %v2062_v7 = vsub.f32 %v12480_v56, %v8813_v12 }
 0x568   :  { %12475 = vst [vmem:[#allocation152_spill] sm:$0xff] %v8972_v15  ;;  %6468 = vpow2.f32 %v2269_v0 }
 0x569   :  { %v2275_v33 = vmul.f32 1.442695, %v2084_v9  ;;  %v12485_v9 = vld [vmem:[#allocation122_spill] sm:$0xff] }
 0x56c   :  { %2696 = vperm.xlu2 %6116, %v8955_v39   ;;  %v2229_v39 = vmul.f32 1.442695, %v2061_v14 }
 0x56d   :  { %2636 = vperm.xlu0 %6118, %v8957_v30   ;;  %v8974_v30 = vpop.eup %6464 }
 0x56e   :  { %2630 = vperm.xlu1 %6117, %v8960_v35   ;;  %12476 = vst [vmem:[#allocation180_spill] sm:$0xff] %v8974_v30  ;;  %v8977_v37 = vpop.eup %6466  ;;  %6470 = vpow2.f32 %v2229_v39  ;;  %v8994_v0 = vpop.permute.xlu2 %2597  ;;  %v2235_v35 = vmul.f32 1.442695, %v2064_v52  ;;  %v2231_v39 = vmul.f32 1.442695, %v2062_v7  ;;  %v2067_v52 = vsub.f32 %v12485_v9, %v8813_v12  ;;  %v12486_v7 = vld [vmem:[#allocation121_spill] sm:$0xff] }
 0x56f   :  { %12477 = vst [vmem:[#allocation168_spill] sm:$0xff] %v8977_v37  ;;  %6472 = vpow2.f32 %v2225_v53 }
 0x570   :  { %6474 = vpow2.f32 %v2275_v33 }
 0x571   :  { %6476 = vpow2.f32 %v2235_v35 }
 0x572   :  { %6478 = vpow2.f32 %v2231_v39  ;;  %v12490_v39 = vld [vmem:[#allocation33_spill] sm:$0xff] }
 0x574   :  { %2705 = vperm.xlu2 %6116, %v8972_v15  }
 0x575   :  { %2645 = vperm.xlu0 %6118, %v8974_v30   ;;  %v8992_v30 = vperm.slane %v8732_v47, 4 }
 0x576   :  { %2639 = vperm.xlu1 %6117, %v8977_v37   ;;  %v8996_v37 = vpop.eup %6468  ;;  %v9017_v3 = vpop.permute.xlu2 %2606 }
 0x577   :  { %v8985_v14 = vpop.permute.xlu0 %2537  ;;  %12481 = vst [vmem:[#allocation177_spill] sm:$0xff] %v8996_v37  ;;  %v8998_v42 = vpop.eup %6470  ;;  %v2087_v56 = vsub.f32 %v12484_v32, %v8992_v30  ;;  %v2090_v9 = vsub.f32 %v12490_v39, %v8992_v30 }
 0x578   :  { %v8989_v15 = vpop.permute.xlu1 %2534  ;;  %12482 = vst [vmem:[#allocation166_spill] sm:$0xff] %v8998_v42  ;;  %v9001_v53 = vpop.eup %6472 }
 0x579   :  { %12483 = vst [vmem:[#allocation182_spill] sm:$0xff] %v9001_v53  ;;  %v2281_v1 = vmul.f32 1.442695, %v2087_v56  ;;  %v9015_v33 = vpop.eup %6474  ;;  %v12491_v56 = vld [vmem:[#allocation12_spill] sm:$0xff]  ;;  %v2287_v59 = vmul.f32 1.442695, %v2090_v9 }
 0x57a   :  { %12487 = vst [vmem:[#allocation173_spill] sm:$0xff] %v9015_v33  ;;  %v12497_v9 = vld [vmem:[#allocation15_spill] sm:$0xff] }
 0x57b   :  { %6480 = vpow2.f32 %v2281_v1 }
 0x57c   :  { %2714 = vperm.xlu2 %6116, %v8996_v37   ;;  %v2065_v37 = vsub.f32 %v12486_v7, %v8813_v12 }
 0x57d   :  { %2654 = vperm.xlu0 %6118, %v8998_v42   ;;  %v2241_v42 = vmul.f32 1.442695, %v2067_v52  ;;  %v2070_v52 = vsub.f32 %v12491_v56, %v8891_v26 }
 0x57e   :  { %2648 = vperm.xlu1 %6117, %v9001_v53   ;;  %v2237_v32 = vmul.f32 1.442695, %v2065_v37  ;;  %v9019_v53 = vpop.eup %6476  ;;  %v12492_v37 = vld [vmem:[#allocation9_spill] sm:$0xff]  ;;  %v9043_v56 = vpop.permute.xlu2 %2615 }
 0x57f   :  { %v9009_v44 = vpop.permute.xlu0 %2543  ;;  %12488 = vst [vmem:[#allocation183_spill] sm:$0xff] %v9019_v53  ;;  %v9022_v35 = vpop.eup %6478  ;;  %6482 = vpow2.f32 %v2241_v42 }
 0x580   :  { %v9013_v6 = vpop.permute.xlu1 %2540  ;;  %12489 = vst [vmem:[#allocation189_spill] sm:$0xff] %v9022_v35  ;;  %6484 = vpow2.f32 %v2237_v32 }
 0x581   :  { %v9036_v1 = vpop.eup %6480  ;;  %6486 = vpow2.f32 %v2287_v59 }
 0x582   :  { %12493 = vst [vmem:[#allocation134_spill] sm:$0xff] %v9036_v1 }
 0x584   :  { %2723 = vperm.xlu2 %6116, %v9015_v33   ;;  %v2068_v33 = vsub.f32 %v12492_v37, %v8813_v12  ;;  %v12496_v12 = vld [vmem:[#allocation36_spill] sm:$0xff]  ;;  %v12498_v37 = vld [vmem:[#allocation11_spill] sm:$0xff] }
 0x585   :  { %2663 = vperm.xlu0 %6118, %v9019_v53   ;;  %v2247_v53 = vmul.f32 1.442695, %v2070_v52  ;;  %v9038_v39 = vpop.eup %6482  ;;  %v2093_v32 = vsub.f32 %v12496_v12, %v8992_v30 }
 0x586   :  { %2657 = vperm.xlu1 %6117, %v9022_v35   ;;  %v2243_v38 = vmul.f32 1.442695, %v2068_v33  ;;  %12494 = vst [vmem:[#allocation89_spill] sm:$0xff] %v9038_v39  ;;  %v9041_v42 = vpop.eup %6484  ;;  %v2073_v33 = vsub.f32 %v12497_v9, %v8891_v26 }
 0x587   :  { %v9030_v7 = vpop.permute.xlu0 %2549  ;;  %12495 = vst [vmem:[#allocation81_spill] sm:$0xff] %v9041_v42  ;;  %6488 = vpow2.f32 %v2247_v53  ;;  %v2293_v34 = vmul.f32 1.442695, %v2093_v32  ;;  %v9057_v59 = vpop.eup %6486  ;;  %v12503_v32 = vld [vmem:[#allocation18_spill] sm:$0xff] }
 0x588   :  { %v9034_v41 = vpop.permute.xlu1 %2546  ;;  %6490 = vpow2.f32 %v2243_v38  ;;  %12499 = vst [vmem:[#allocation78_spill] sm:$0xff] %v9057_v59  ;;  %v12502_v38 = vld [vmem:[#allocation39_spill] sm:$0xff] }
 0x589   :  { %6492 = vpow2.f32 %v2293_v34  ;;  %v2096_v9 = vsub.f32 %v12502_v38, %v8992_v30 }
 0x58b   :  { %v2299_v34 = vmul.f32 1.442695, %v2096_v9 }
 0x58c   :  { %2732 = vperm.xlu2 %6116, %v9036_v1   ;;  %v2071_v1 = vsub.f32 %v12498_v37, %v8891_v26  ;;  %v9070_v37 = vpop.permute.xlu2 %2624 }
 0x58d   :  { %2672 = vperm.xlu0 %6118, %v9038_v39   ;;  %v2253_v39 = vmul.f32 1.442695, %v2073_v33  ;;  %v9059_v12 = vpop.eup %6488  ;;  %v2076_v33 = vsub.f32 %v12503_v32, %v8891_v26  ;;  %12504 = vst [vmem:[#allocation82_spill] sm:$0xff] %v9070_v37 }
 0x58e   :  { %2666 = vperm.xlu1 %6117, %v9041_v42   ;;  %v2249_v24 = vmul.f32 1.442695, %v2071_v1  ;;  %12500 = vst [vmem:[#allocation102_spill] sm:$0xff] %v9059_v12  ;;  %v9062_v53 = vpop.eup %6490 }
 0x58f   :  { %v9051_v52 = vpop.permute.xlu0 %2555  ;;  %12501 = vst [vmem:[#allocation79_spill] sm:$0xff] %v9062_v53  ;;  %6494 = vpow2.f32 %v2253_v39  ;;  %v9078_v48 = vpop.eup %6492 }
 0x590   :  { %v9055_v35 = vpop.permute.xlu1 %2552  ;;  %6496 = vpow2.f32 %v2249_v24  ;;  %12506 = vst [vmem:[#allocation105_spill] sm:$0xff] %v9078_v48  ;;  %v12509_v24 = vld [vmem:[#allocation40_spill] sm:$0xff] }
 0x591   :  { %6498 = vpow2.f32 %v2299_v34  ;;  %v2099_v32 = vsub.f32 %v12509_v24, %v8992_v30 }
 0x593   :  { %v2305_v24 = vmul.f32 1.442695, %v2099_v32  ;;  %v12517_v32 = vld [vmem:[#allocation24_spill] sm:$0xff] }
 0x594   :  { %2741 = vperm.xlu2 %6116, %v9057_v59   ;;  %v12505_v59 = vld [vmem:[#allocation14_spill] sm:$0xff]  ;;  %v9100_v34 = vpop.permute.xlu2 %2633 }
 0x595   :  { %2681 = vperm.xlu0 %6118, %v9059_v12   ;;  %v2074_v42 = vsub.f32 %v12505_v59, %v8891_v26  ;;  %v2259_v12 = vmul.f32 1.442695, %v2076_v33  ;;  %v12510_v59 = vld [vmem:[#allocation21_spill] sm:$0xff] }
 0x596   :  { %2675 = vperm.xlu1 %6117, %v9062_v53   ;;  %v9080_v53 = vpop.eup %6494  ;;  %v2079_v9 = vsub.f32 %v12510_v59, %v8891_v26  ;;  %v12516_v59 = vld [vmem:[#allocation41_spill] sm:$0xff] }
 0x597   :  { %v9072_v1 = vpop.permute.xlu0 %2561  ;;  %v2255_v38 = vmul.f32 1.442695, %v2074_v42  ;;  %12507 = vst [vmem:[#allocation85_spill] sm:$0xff] %v9080_v53  ;;  %v9083_v39 = vpop.eup %6496  ;;  %6500 = vpow2.f32 %v2259_v12  ;;  %v12512_v42 = vld [vmem:[#allocation17_spill] sm:$0xff] }
 0x598   :  { %v9076_v20 = vpop.permute.xlu1 %2558  ;;  %12508 = vst [vmem:[#allocation83_spill] sm:$0xff] %v9083_v39  ;;  %v2265_v60 = vmul.f32 1.442695, %v2079_v9  ;;  %v2082_v9 = vsub.f32 %v12517_v32, %v8891_v26 }
 0x599   :  { %6502 = vpow2.f32 %v2255_v38 }
 0x59a   :  { %6504 = vpow2.f32 %v2305_v24 }
 0x59b   :  { %6506 = vpow2.f32 %v2265_v60 }
 0x59c   :  { %2750 = vperm.xlu2 %6116, %v9078_v48   ;;  %v2077_v48 = vsub.f32 %v12512_v42, %v8891_v26  ;;  %v9123_v16 = vpop.permute.xlu2 %2642 }
 0x59d   :  { %2690 = vperm.xlu0 %6118, %v9080_v53   ;;  %v9098_v53 = vperm.slane %v8732_v47, 5 }
 0x59e   :  { %2684 = vperm.xlu1 %6117, %v9083_v39   ;;  %v9102_v39 = vpop.eup %6498  ;;  %v2261_v12 = vmul.f32 1.442695, %v2077_v48  ;;  %v12519_v48 = vld [vmem:[#allocation20_spill] sm:$0xff] }
 0x59f   :  { %v9091_v33 = vpop.permute.xlu0 %2570  ;;  %12513 = vst [vmem:[#allocation88_spill] sm:$0xff] %v9102_v39  ;;  %v9104_v54 = vpop.eup %6500  ;;  %v2102_v42 = vsub.f32 %v12516_v59, %v9098_v53 }
 0x5a0   :  { %12511 = vst [vmem:[#allocation108_spill] sm:$0xff] %v9091_v33  ;;  %v9095_v40 = vpop.permute.xlu1 %2564  ;;  %v9107_v38 = vpop.eup %6502  ;;  %6508 = vpow2.f32 %v2261_v12  ;;  %v12523_v12 = vld [vmem:[#allocation42_spill] sm:$0xff] }
 0x5a1   :  { %12514 = vst [vmem:[#allocation84_spill] sm:$0xff] %v9104_v54  ;;  %v2311_v49 = vmul.f32 1.442695, %v2102_v42  ;;  %v9121_v24 = vpop.eup %6504  ;;  %v2105_v32 = vsub.f32 %v12523_v12, %v9098_v53  ;;  %v12524_v42 = vld [vmem:[#allocation126_spill] sm:$0xff] }
 0x5a2   :  { %12515 = vst [vmem:[#allocation111_spill] sm:$0xff] %v9107_v38 }
 0x5a3   :  { %12520 = vst [vmem:[#allocation86_spill] sm:$0xff] %v9121_v24  ;;  %6510 = vpow2.f32 %v2311_v49  ;;  %v2317_v28 = vmul.f32 1.442695, %v2105_v32  ;;  %v12532_v32 = vld [vmem:[#allocation29_spill] sm:$0xff] }
 0x5a4   :  { %2759 = vperm.xlu2 %6116, %v9102_v39   ;;  %v2080_v39 = vsub.f32 %v12519_v48, %v8891_v26 }
 0x5a5   :  { %2699 = vperm.xlu0 %6118, %v9104_v54   ;;  %v2271_v54 = vmul.f32 1.442695, %v2082_v9  ;;  %v2085_v9 = vsub.f32 %v12524_v42, %v8992_v30  ;;  %v9149_v42 = vpop.permute.xlu2 %2651 }
 0x5a6   :  { %2693 = vperm.xlu1 %6117, %v9107_v38   ;;  %v2267_v59 = vmul.f32 1.442695, %v2080_v39  ;;  %v9125_v38 = vpop.eup %6506  ;;  %v12525_v39 = vld [vmem:[#allocation23_spill] sm:$0xff]  ;;  %12530 = vst [vmem:[#allocation120_spill] sm:$0xff] %v9149_v42 }
 0x5a7   :  { %v9115_v8 = vpop.permute.xlu0 %2576  ;;  %12521 = vst [vmem:[#allocation114_spill] sm:$0xff] %v9125_v38  ;;  %v9128_v60 = vpop.eup %6508  ;;  %6512 = vpow2.f32 %v2271_v54 }
 0x5a8   :  { %12518 = vst [vmem:[#allocation87_spill] sm:$0xff] %v9115_v8  ;;  %v9119_v29 = vpop.permute.xlu1 %2573  ;;  %6514 = vpow2.f32 %v2267_v59 }
 0x5a9   :  { %12522 = vst [vmem:[#allocation94_spill] sm:$0xff] %v9128_v60  ;;  %v9142_v49 = vpop.eup %6510  ;;  %6516 = vpow2.f32 %v2317_v28 }
 0x5aa   :  { %12527 = vst [vmem:[#allocation117_spill] sm:$0xff] %v9142_v49 }
 0x5ac   :  { %2768 = vperm.xlu2 %6116, %v9121_v24   ;;  %v2083_v24 = vsub.f32 %v12525_v39, %v8891_v26  ;;  %v12531_v26 = vld [vmem:[#allocation45_spill] sm:$0xff]  ;;  %v12533_v39 = vld [vmem:[#allocation26_spill] sm:$0xff] }
 0x5ad   :  { %2708 = vperm.xlu0 %6118, %v9125_v38   ;;  %v2277_v38 = vmul.f32 1.442695, %v2085_v9  ;;  %v9144_v12 = vpop.eup %6512  ;;  %v2108_v59 = vsub.f32 %v12531_v26, %v9098_v53 }
 0x5ae   :  { %2702 = vperm.xlu1 %6117, %v9128_v60   ;;  %v2273_v63 = vmul.f32 1.442695, %v2083_v24  ;;  %12528 = vst [vmem:[#allocation92_spill] sm:$0xff] %v9144_v12  ;;  %v9147_v54 = vpop.eup %6514  ;;  %v2088_v24 = vsub.f32 %v12532_v32, %v8992_v30  ;;  %v2086_v60 = vsub.f32 %v12533_v39, %v8992_v30  ;;  %v9176_v39 = vpop.permute.xlu2 %2660 }
 0x5af   :  { %v9136_v48 = vpop.permute.xlu0 %2582  ;;  %12529 = vst [vmem:[#allocation91_spill] sm:$0xff] %v9147_v54  ;;  %6518 = vpow2.f32 %v2277_v38  ;;  %v2323_v36 = vmul.f32 1.442695, %v2108_v59  ;;  %v9163_v28 = vpop.eup %6516  ;;  %v12538_v59 = vld [vmem:[#allocation32_spill] sm:$0xff] }
 0x5b0   :  { %v9140_v61 = vpop.permute.xlu1 %2579  ;;  %6520 = vpow2.f32 %v2273_v63  ;;  %12534 = vst [vmem:[#allocation93_spill] sm:$0xff] %v9163_v28  ;;  %v2279_v50 = vmul.f32 1.442695, %v2086_v60  ;;  %v12537_v63 = vld [vmem:[#allocation48_spill] sm:$0xff] }
 0x5b1   :  { %12526 = vst [vmem:[#allocation90_spill] sm:$0xff] %v9140_v61  ;;  %6522 = vpow2.f32 %v2323_v36  ;;  %v2111_v32 = vsub.f32 %v12537_v63, %v9098_v53 }
 0x5b2   :  { %12539 = vst [vmem:[#allocation96_spill] sm:$0xff] %v9176_v39 }
 0x5b3   :  { %v2329_v36 = vmul.f32 1.442695, %v2111_v32 }
 0x5b4   :  { %2777 = vperm.xlu2 %6116, %v9142_v49  }
 0x5b5   :  { %2717 = vperm.xlu0 %6118, %v9144_v12   ;;  %v2283_v12 = vmul.f32 1.442695, %v2088_v24  ;;  %v9165_v26 = vpop.eup %6518  ;;  %v2091_v24 = vsub.f32 %v12538_v59, %v8992_v30 }
 0x5b6   :  { %2711 = vperm.xlu1 %6117, %v9147_v54   ;;  %12535 = vst [vmem:[#allocation99_spill] sm:$0xff] %v9165_v26  ;;  %v9168_v38 = vpop.eup %6520  ;;  %v12540_v54 = vld [vmem:[#allocation28_spill] sm:$0xff] }
 0x5b7   :  { %v9157_v9 = vpop.permute.xlu0 %2591  ;;  %12536 = vst [vmem:[#allocation123_spill] sm:$0xff] %v9168_v38  ;;  %6524 = vpow2.f32 %v2283_v12  ;;  %v9184_v58 = vpop.eup %6522 }
 0x5b8   :  { %v9161_v49 = vpop.permute.xlu1 %2585  ;;  %6526 = vpow2.f32 %v2279_v50  ;;  %12541 = vst [vmem:[#allocation95_spill] sm:$0xff] %v9184_v58  ;;  %v12544_v50 = vld [vmem:[#allocation51_spill] sm:$0xff] }
 0x5b9   :  { %6528 = vpow2.f32 %v2329_v36  ;;  %v2114_v59 = vsub.f32 %v12544_v50, %v9098_v53  ;;  %v9206_v36 = vpop.permute.xlu2 %2669 }
 0x5ba   :  { %12547 = vst [vmem:[#allocation97_spill] sm:$0xff] %v9206_v36 }
 0x5bb   :  { %v2335_v50 = vmul.f32 1.442695, %v2114_v59  ;;  %v12552_v59 = vld [vmem:[#allocation38_spill] sm:$0xff] }
 0x5bc   :  { %2786 = vperm.xlu2 %6116, %v9163_v28   ;;  %v2089_v28 = vsub.f32 %v12540_v54, %v8992_v30  ;;  %v12545_v54 = vld [vmem:[#allocation35_spill] sm:$0xff] }
 0x5bd   :  { %2726 = vperm.xlu0 %6118, %v9165_v26   ;;  %v2289_v26 = vmul.f32 1.442695, %v2091_v24  ;;  %v2094_v32 = vsub.f32 %v12545_v54, %v8992_v30  ;;  %v12551_v54 = vld [vmem:[#allocation54_spill] sm:$0xff] }
 0x5be   :  { %2720 = vperm.xlu1 %6117, %v9168_v38   ;;  %v2285_v63 = vmul.f32 1.442695, %v2089_v28  ;;  %v9186_v38 = vpop.eup %6524  ;;  %v12546_v28 = vld [vmem:[#allocation31_spill] sm:$0xff] }
 0x5bf   :  { %v9178_v60 = vpop.permute.xlu0 %2600  ;;  %12542 = vst [vmem:[#allocation8_spill] sm:$0xff] %v9186_v38  ;;  %v9189_v12 = vpop.eup %6526  ;;  %6530 = vpow2.f32 %v2289_v26  ;;  %v2295_v43 = vmul.f32 1.442695, %v2094_v32  ;;  %v2097_v32 = vsub.f32 %v12552_v59, %v8992_v30 }
 0x5c0   :  { %v9182_v55 = vpop.permute.xlu1 %2594  ;;  %12543 = vst [vmem:[#allocation98_spill] sm:$0xff] %v9189_v12  ;;  %6532 = vpow2.f32 %v2285_v63 }
 0x5c1   :  { %6534 = vpow2.f32 %v2335_v50  ;;  %v9229_v61 = vpop.permute.xlu2 %2678 }
 0x5c2   :  { %6536 = vpow2.f32 %v2295_v43  ;;  %12556 = vst [vmem:[#allocation103_spill] sm:$0xff] %v9229_v61 }
 0x5c4   :  { %2795 = vperm.xlu2 %6116, %v9184_v58   ;;  %v2092_v58 = vsub.f32 %v12546_v28, %v8992_v30 }
 0x5c5   :  { %2735 = vperm.xlu0 %6118, %v9186_v38   ;;  %v9204_v38 = vperm.slane %v8732_v47, 6 }
 0x5c6   :  { %2729 = vperm.xlu1 %6117, %v9189_v12   ;;  %v9208_v12 = vpop.eup %6528  ;;  %v2291_v26 = vmul.f32 1.442695, %v2092_v58  ;;  %v12554_v58 = vld [vmem:[#allocation34_spill] sm:$0xff] }
 0x5c7   :  { %v9197_v24 = vpop.permute.xlu0 %2609  ;;  %12548 = vst [vmem:[#allocation10_spill] sm:$0xff] %v9208_v12  ;;  %v9210_v21 = vpop.eup %6530  ;;  %v2117_v28 = vsub.f32 %v12551_v54, %v9204_v38 }
 0x5c8   :  { %v9201_v2 = vpop.permute.xlu1 %2603  ;;  %12549 = vst [vmem:[#allocation101_spill] sm:$0xff] %v9210_v21  ;;  %v9213_v63 = vpop.eup %6532  ;;  %6538 = vpow2.f32 %v2291_v26  ;;  %v12559_v26 = vld [vmem:[#allocation57_spill] sm:$0xff] }
 0x5c9   :  { %12550 = vst [vmem:[#allocation100_spill] sm:$0xff] %v9213_v63  ;;  %v2341_v37 = vmul.f32 1.442695, %v2117_v28  ;;  %v9227_v50 = vpop.eup %6534  ;;  %v2120_v59 = vsub.f32 %v12559_v26, %v9204_v38  ;;  %v12560_v28 = vld [vmem:[#allocation132_spill] sm:$0xff] }
 0x5ca   :  { %12555 = vst [vmem:[#allocation104_spill] sm:$0xff] %v9227_v50 }
 0x5cb   :  { %6540 = vpow2.f32 %v2341_v37  ;;  %v2347_v51 = vmul.f32 1.442695, %v2120_v59  ;;  %v12569_v59 = vld [vmem:[#allocation136_spill] sm:$0xff] }
 0x5cc   :  { %2804 = vperm.xlu2 %6116, %v9208_v12   ;;  %v2095_v12 = vsub.f32 %v12554_v58, %v8992_v30 }
 0x5cd   :  { %2744 = vperm.xlu0 %6118, %v9210_v21   ;;  %v2301_v21 = vmul.f32 1.442695, %v2097_v32  ;;  %v2100_v32 = vsub.f32 %v12560_v28, %v8992_v30  ;;  %v9255_v28 = vpop.permute.xlu2 %2687 }
 0x5ce   :  { %2738 = vperm.xlu1 %6117, %v9213_v63   ;;  %v2297_v54 = vmul.f32 1.442695, %v2095_v12  ;;  %v9231_v63 = vpop.eup %6536  ;;  %v12562_v12 = vld [vmem:[#allocation37_spill] sm:$0xff]  ;;  %12567 = vst [vmem:[#allocation113_spill] sm:$0xff] %v9255_v28 }
 0x5cf   :  { %v9221_v36 = vpop.permute.xlu0 %2618  ;;  %12557 = vst [vmem:[#allocation16_spill] sm:$0xff] %v9231_v63  ;;  %v9234_v43 = vpop.eup %6538  ;;  %6542 = vpow2.f32 %v2301_v21 }
 0x5d0   :  { %12553 = vst [vmem:[#allocation13_spill] sm:$0xff] %v9221_v36  ;;  %v9225_v39 = vpop.permute.xlu1 %2612  ;;  %6544 = vpow2.f32 %v2297_v54 }
 0x5d1   :  { %12558 = vst [vmem:[#allocation107_spill] sm:$0xff] %v9234_v43  ;;  %v9248_v37 = vpop.eup %6540  ;;  %6546 = vpow2.f32 %v2347_v51 }
 0x5d2   :  { %12564 = vst [vmem:[#allocation110_spill] sm:$0xff] %v9248_v37 }
 0x5d4   :  { %2813 = vperm.xlu2 %6116, %v9227_v50   ;;  %v2098_v50 = vsub.f32 %v12562_v12, %v8992_v30  ;;  %v12568_v30 = vld [vmem:[#allocation60_spill] sm:$0xff]  ;;  %v12570_v12 = vld [vmem:[#allocation135_spill] sm:$0xff] }
 0x5d5   :  { %2753 = vperm.xlu0 %6118, %v9231_v63   ;;  %v2307_v63 = vmul.f32 1.442695, %v2100_v32  ;;  %v9250_v26 = vpop.eup %6542  ;;  %v2123_v54 = vsub.f32 %v12568_v30, %v9204_v38 }
 0x5d6   :  { %2747 = vperm.xlu1 %6117, %v9234_v43   ;;  %v2303_v36 = vmul.f32 1.442695, %v2098_v50  ;;  %12565 = vst [vmem:[#allocation109_spill] sm:$0xff] %v9250_v26  ;;  %v9253_v21 = vpop.eup %6544  ;;  %v2103_v50 = vsub.f32 %v12569_v59, %v9098_v53  ;;  %v2101_v43 = vsub.f32 %v12570_v12, %v9098_v53  ;;  %v9282_v12 = vpop.permute.xlu2 %2696 }
 0x5d7   :  { %v9242_v58 = vpop.permute.xlu0 %2627  ;;  %12566 = vst [vmem:[#allocation22_spill] sm:$0xff] %v9253_v21  ;;  %6548 = vpow2.f32 %v2307_v63  ;;  %v9269_v51 = vpop.eup %6546 }
 0x5d8   :  { %12561 = vst [vmem:[#allocation106_spill] sm:$0xff] %v9242_v58  ;;  %v9246_v61 = vpop.permute.xlu1 %2621  ;;  %6550 = vpow2.f32 %v2303_v36  ;;  %v2353_v58 = vmul.f32 1.442695, %v2123_v54  ;;  %v2309_v28 = vmul.f32 1.442695, %v2101_v43  ;;  %v12574_v36 = vld [vmem:[#allocation62_spill] sm:$0xff] }
 0x5d9   :  { %12563 = vst [vmem:[#allocation19_spill] sm:$0xff] %v9246_v61  ;;  %v2126_v59 = vsub.f32 %v12574_v36, %v9204_v38  ;;  %v12575_v54 = vld [vmem:[#allocation140_spill] sm:$0xff] }
 0x5da   :  { %12571 = vst [vmem:[#allocation112_spill] sm:$0xff] %v9269_v51  ;;  %6552 = vpow2.f32 %v2353_v58 }
 0x5db   :  { %12576 = vst [vmem:[#allocation115_spill] sm:$0xff] %v9282_v12  ;;  %v2359_v58 = vmul.f32 1.442695, %v2126_v59 }
 0x5dc   :  { %2822 = vperm.xlu2 %6116, %v9248_v37  }
 0x5dd   :  { %2762 = vperm.xlu0 %6118, %v9250_v26   ;;  %v2313_v26 = vmul.f32 1.442695, %v2103_v50  ;;  %v9271_v30 = vpop.eup %6548  ;;  %v2106_v50 = vsub.f32 %v12575_v54, %v9098_v53 }
 0x5de   :  { %2756 = vperm.xlu1 %6117, %v9253_v21   ;;  %12572 = vst [vmem:[#allocation25_spill] sm:$0xff] %v9271_v30  ;;  %v9274_v63 = vpop.eup %6550  ;;  %v12577_v21 = vld [vmem:[#allocation139_spill] sm:$0xff]  ;;  %v9309_v61 = vpop.permute.xlu2 %2705 }
 0x5df   :  { %v9263_v32 = vpop.permute.xlu0 %2636  ;;  %12573 = vst [vmem:[#allocation116_spill] sm:$0xff] %v9274_v63  ;;  %6554 = vpow2.f32 %v2313_v26 }
 0x5e0   :  { %v9267_v37 = vpop.permute.xlu1 %2630  ;;  %6556 = vpow2.f32 %v2309_v28  ;;  %v9290_v46 = vpop.eup %6552  ;;  %v12581_v28 = vld [vmem:[#allocation65_spill] sm:$0xff]  ;;  %12585 = vst [vmem:[#allocation122_spill] sm:$0xff] %v9309_v61 }
 0x5e1   :  { %12578 = vst [vmem:[#allocation27_spill] sm:$0xff] %v9290_v46  ;;  %6558 = vpow2.f32 %v2359_v58  ;;  %v2129_v54 = vsub.f32 %v12581_v28, %v9204_v38 }
 0x5e3   :  { %v2365_v58 = vmul.f32 1.442695, %v2129_v54  ;;  %v12590_v54 = vld [vmem:[#allocation47_spill] sm:$0xff] }
 0x5e4   :  { %2831 = vperm.xlu2 %6116, %v9269_v51   ;;  %v2104_v51 = vsub.f32 %v12577_v21, %v9098_v53  ;;  %v12582_v21 = vld [vmem:[#allocation44_spill] sm:$0xff] }
 0x5e5   :  { %2771 = vperm.xlu0 %6118, %v9271_v30   ;;  %v2319_v30 = vmul.f32 1.442695, %v2106_v50  ;;  %v2109_v59 = vsub.f32 %v12582_v21, %v9098_v53 }
 0x5e6   :  { %2765 = vperm.xlu1 %6117, %v9274_v63   ;;  %v2315_v36 = vmul.f32 1.442695, %v2104_v51  ;;  %v9292_v63 = vpop.eup %6554  ;;  %v12584_v51 = vld [vmem:[#allocation143_spill] sm:$0xff] }
 0x5e7   :  { %v9284_v43 = vpop.permute.xlu0 %2645  ;;  %12579 = vst [vmem:[#allocation119_spill] sm:$0xff] %v9292_v63  ;;  %v9295_v26 = vpop.eup %6556  ;;  %6560 = vpow2.f32 %v2319_v30 }
 0x5e8   :  { %v9288_v8 = vpop.permute.xlu1 %2639  ;;  %12580 = vst [vmem:[#allocation118_spill] sm:$0xff] %v9295_v26  ;;  %6562 = vpow2.f32 %v2315_v36  ;;  %v9311_v42 = vpop.eup %6558  ;;  %v12589_v36 = vld [vmem:[#allocation68_spill] sm:$0xff] }
 0x5e9   :  { %12586 = vst [vmem:[#allocation121_spill] sm:$0xff] %v9311_v42  ;;  %6564 = vpow2.f32 %v2365_v58  ;;  %v2132_v21 = vsub.f32 %v12589_v36, %v9204_v38 }
 0x5eb   :  { %v2371_v58 = vmul.f32 1.442695, %v2132_v21  ;;  %v12599_v21 = vld [vmem:[#allocation50_spill] sm:$0xff] }
 0x5ec   :  { %2840 = vperm.xlu2 %6116, %v9290_v46   ;;  %v2107_v46 = vsub.f32 %v12584_v51, %v9098_v53 }
 0x5ed   :  { %2780 = vperm.xlu0 %6118, %v9292_v63   ;;  %v2325_v63 = vmul.f32 1.442695, %v2109_v59  ;;  %v2112_v59 = vsub.f32 %v12590_v54, %v9098_v53  ;;  %v12598_v54 = vld [vmem:[#allocation71_spill] sm:$0xff] }
 0x5ee   :  { %2774 = vperm.xlu1 %6117, %v9295_v26   ;;  %v2321_v28 = vmul.f32 1.442695, %v2107_v46  ;;  %v9313_v26 = vpop.eup %6560  ;;  %v12592_v46 = vld [vmem:[#allocation43_spill] sm:$0xff] }
 0x5ef   :  { %v9303_v50 = vpop.permute.xlu0 %2654  ;;  %12587 = vst [vmem:[#allocation33_spill] sm:$0xff] %v9313_v26  ;;  %v9316_v30 = vpop.eup %6562  ;;  %6566 = vpow2.f32 %v2325_v63 }
 0x5f0   :  { %12583 = vst [vmem:[#allocation30_spill] sm:$0xff] %v9303_v50  ;;  %v9307_v12 = vpop.permute.xlu1 %2648  ;;  %6568 = vpow2.f32 %v2321_v28  ;;  %v2331_v50 = vmul.f32 1.442695, %v2112_v59  ;;  %v9333_v36 = vpop.eup %6564  ;;  %v2115_v59 = vsub.f32 %v12599_v21, %v9098_v53 }
 0x5f1   :  { %12588 = vst [vmem:[#allocation12_spill] sm:$0xff] %v9316_v30  ;;  %6570 = vpow2.f32 %v2371_v58 }
 0x5f2   :  { %12594 = vst [vmem:[#allocation15_spill] sm:$0xff] %v9333_v36  ;;  %6572 = vpow2.f32 %v2331_v50 }
 0x5f4   :  { %2849 = vperm.xlu2 %6116, %v9311_v42   ;;  %v2110_v42 = vsub.f32 %v12592_v46, %v9098_v53 }
 0x5f5   :  { %2789 = vperm.xlu0 %6118, %v9313_v26   ;;  %v9331_v26 = vperm.slane %v8732_v47, 7  ;;  %v9337_v33 = vpop.eup %6566 }
 0x5f6   :  { %2783 = vperm.xlu1 %6117, %v9316_v30   ;;  %v9335_v30 = vpop.permute.xlu2 %2714  ;;  %v2327_v63 = vmul.f32 1.442695, %v2110_v42  ;;  %12596 = vst [vmem:[#allocation39_spill] sm:$0xff] %v9337_v33  ;;  %v9340_v28 = vpop.eup %6568  ;;  %v12601_v42 = vld [vmem:[#allocation46_spill] sm:$0xff] }
 0x5f7   :  { %v9324_v51 = vpop.permute.xlu0 %2663  ;;  %12595 = vst [vmem:[#allocation11_spill] sm:$0xff] %v9335_v30  ;;  %v2135_v47 = vsub.f32 %v12598_v54, %v9331_v26  ;;  %v9354_v58 = vpop.eup %6570 }
 0x5f8   :  { %12591 = vst [vmem:[#allocation9_spill] sm:$0xff] %v9324_v51  ;;  %v9328_v61 = vpop.permute.xlu1 %2657  ;;  %6574 = vpow2.f32 %v2327_v63  ;;  %v9356_v54 = vpop.eup %6572  ;;  %v12607_v63 = vld [vmem:[#allocation73_spill] sm:$0xff] }
 0x5f9   :  { %12593 = vst [vmem:[#allocation36_spill] sm:$0xff] %v9328_v61  ;;  %v2377_v30 = vmul.f32 1.442695, %v2135_v47  ;;  %v12608_v47 = vld [vmem:[#allocation53_spill] sm:$0xff] }
 0x5fa   :  { %12597 = vst [vmem:[#allocation18_spill] sm:$0xff] %v9340_v28 }
 0x5fb   :  { %12603 = vst [vmem:[#allocation21_spill] sm:$0xff] %v9354_v58  ;;  %6576 = vpow2.f32 %v2377_v30 }
 0x5fc   :  { %2858 = vperm.xlu2 %6116, %v9333_v36   ;;  %v2113_v36 = vsub.f32 %v12601_v42, %v9098_v53  ;;  %12604 = vst [vmem:[#allocation17_spill] sm:$0xff] %v9356_v54  ;;  %v2138_v42 = vsub.f32 %v12607_v63, %v9331_v26 }
 0x5fd   :  { %2798 = vperm.xlu0 %6118, %v9337_v33   ;;  %v2337_v33 = vmul.f32 1.442695, %v2115_v59 }
 0x5fe   :  { %2792 = vperm.xlu1 %6117, %v9340_v28   ;;  %v2333_v61 = vmul.f32 1.442695, %v2113_v36  ;;  %v9359_v50 = vpop.eup %6574  ;;  %v9361_v21 = vpop.permute.xlu2 %2723  ;;  %v2118_v36 = vsub.f32 %v12608_v47, %v9204_v38 }
 0x5ff   :  { %v9348_v46 = vpop.permute.xlu0 %2672  ;;  %12605 = vst [vmem:[#allocation41_spill] sm:$0xff] %v9359_v50  ;;  %6578 = vpow2.f32 %v2337_v33 }
 0x600   :  { %12600 = vst [vmem:[#allocation14_spill] sm:$0xff] %v9348_v46  ;;  %v9352_v51 = vpop.permute.xlu1 %2666  ;;  %6580 = vpow2.f32 %v2333_v61  ;;  %v12614_v61 = vld [vmem:[#allocation76_spill] sm:$0xff] }
 0x601   :  { %12602 = vst [vmem:[#allocation40_spill] sm:$0xff] %v9352_v51  ;;  %v2383_v51 = vmul.f32 1.442695, %v2138_v42  ;;  %v9375_v30 = vpop.eup %6576  ;;  %v2141_v47 = vsub.f32 %v12614_v61, %v9331_v26 }
 0x602   :  { %12606 = vst [vmem:[#allocation24_spill] sm:$0xff] %v9361_v21 }
 0x603   :  { %12611 = vst [vmem:[#allocation42_spill] sm:$0xff] %v9375_v30  ;;  %6582 = vpow2.f32 %v2383_v51  ;;  %v2389_v51 = vmul.f32 1.442695, %v2141_v47  ;;  %v12624_v47 = vld [vmem:[#allocation59_spill] sm:$0xff] }
 0x604   :  { %2867 = vperm.xlu2 %6116, %v9354_v58   ;;  %v12609_v58 = vld [vmem:[#allocation49_spill] sm:$0xff] }
 0x605   :  { %2807 = vperm.xlu0 %6118, %v9356_v54   ;;  %v2116_v28 = vsub.f32 %v12609_v58, %v9098_v53  ;;  %v2343_v54 = vmul.f32 1.442695, %v2118_v36  ;;  %v9377_v63 = vpop.eup %6578  ;;  %v12615_v53 = vld [vmem:[#allocation56_spill] sm:$0xff] }
 0x606   :  { %2801 = vperm.xlu1 %6117, %v9359_v50   ;;  %12612 = vst [vmem:[#allocation126_spill] sm:$0xff] %v9377_v63  ;;  %v9380_v33 = vpop.eup %6580  ;;  %v2121_v58 = vsub.f32 %v12615_v53, %v9204_v38  ;;  %v9388_v42 = vpop.permute.xlu2 %2732  ;;  %v12618_v36 = vld [vmem:[#allocation52_spill] sm:$0xff] }
 0x607   :  { %v9369_v59 = vpop.permute.xlu0 %2681  ;;  %v2339_v21 = vmul.f32 1.442695, %v2116_v28  ;;  %12613 = vst [vmem:[#allocation23_spill] sm:$0xff] %v9380_v33  ;;  %6584 = vpow2.f32 %v2343_v54  ;;  %v2119_v50 = vsub.f32 %v12618_v36, %v9204_v38 }
 0x608   :  { %v9373_v46 = vpop.permute.xlu1 %2675  ;;  %12616 = vst [vmem:[#allocation45_spill] sm:$0xff] %v9388_v42 }
 0x609   :  { %12610 = vst [vmem:[#allocation20_spill] sm:$0xff] %v9373_v46  ;;  %6586 = vpow2.f32 %v2339_v21  ;;  %v9396_v46 = vpop.eup %6582  ;;  %v2345_v61 = vmul.f32 1.442695, %v2119_v50  ;;  %v12623_v21 = vld [vmem:[#allocation77_spill] sm:$0xff]  ;;  %v12626_v50 = vld [vmem:[#allocation55_spill] sm:$0xff] }
 0x60a   :  { %12620 = vst [vmem:[#allocation48_spill] sm:$0xff] %v9396_v46  ;;  %6588 = vpow2.f32 %v2389_v51  ;;  %v2144_v53 = vsub.f32 %v12623_v21, %v9331_v26 }
 0x60c   :  { %2876 = vperm.xlu2 %6116, %v9375_v30   ;;  %v2395_v51 = vmul.f32 1.442695, %v2144_v53  ;;  %v12633_v53 = vld [vmem:[#allocation63_spill] sm:$0xff] }
 0x60d   :  { %2816 = vperm.xlu0 %6118, %v9377_v63   ;;  %v2349_v63 = vmul.f32 1.442695, %v2121_v58  ;;  %v2124_v58 = vsub.f32 %v12624_v47, %v9204_v38 }
 0x60e   :  { %2810 = vperm.xlu1 %6117, %v9380_v33   ;;  %v9398_v33 = vpop.eup %6584  ;;  %v9415_v42 = vpop.permute.xlu2 %2741 }
 0x60f   :  { %v9390_v28 = vpop.permute.xlu0 %2690  ;;  %12621 = vst [vmem:[#allocation32_spill] sm:$0xff] %v9398_v33  ;;  %v9401_v54 = vpop.eup %6586  ;;  %6590 = vpow2.f32 %v2349_v63 }
 0x610   :  { %12617 = vst [vmem:[#allocation29_spill] sm:$0xff] %v9390_v28  ;;  %v9394_v30 = vpop.permute.xlu1 %2684  ;;  %6592 = vpow2.f32 %v2345_v61  ;;  %v12632_v61 = vld [vmem:[#allocation80_spill] sm:$0xff] }
 0x611   :  { %12619 = vst [vmem:[#allocation26_spill] sm:$0xff] %v9394_v30  ;;  %v9417_v30 = vpop.eup %6588  ;;  %6594 = vpow2.f32 %v2395_v51  ;;  %v2147_v47 = vsub.f32 %v12632_v61, %v9331_v26 }
 0x612   :  { %12622 = vst [vmem:[#allocation28_spill] sm:$0xff] %v9401_v54 }
 0x613   :  { %12628 = vst [vmem:[#allocation31_spill] sm:$0xff] %v9415_v42 }
 0x614   :  { %2885 = vperm.xlu2 %6116, %v9396_v46   ;;  %v2122_v46 = vsub.f32 %v12626_v50, %v9204_v38  ;;  %12629 = vst [vmem:[#allocation54_spill] sm:$0xff] %v9417_v30 }
 0x615   :  { %2825 = vperm.xlu0 %6118, %v9398_v33   ;;  %v2355_v33 = vmul.f32 1.442695, %v2124_v58  ;;  %v2127_v58 = vsub.f32 %v12633_v53, %v9204_v38 }
 0x616   :  { %2819 = vperm.xlu1 %6117, %v9401_v54   ;;  %v2351_v21 = vmul.f32 1.442695, %v2122_v46  ;;  %v9419_v54 = vpop.eup %6590  ;;  %v12635_v46 = vld [vmem:[#allocation58_spill] sm:$0xff]  ;;  %v9438_v42 = vpop.permute.xlu2 %2750 }
 0x617   :  { %v9409_v36 = vpop.permute.xlu0 %2699  ;;  %12630 = vst [vmem:[#allocation38_spill] sm:$0xff] %v9419_v54  ;;  %v9422_v63 = vpop.eup %6592  ;;  %6596 = vpow2.f32 %v2355_v33 }
 0x618   :  { %12625 = vst [vmem:[#allocation51_spill] sm:$0xff] %v9409_v36  ;;  %v9413_v28 = vpop.permute.xlu1 %2693  ;;  %6598 = vpow2.f32 %v2351_v21  ;;  %v9436_v51 = vpop.eup %6594  ;;  %v12641_v21 = vld [vmem:[#allocation66_spill] sm:$0xff] }
 0x619   :  { %12627 = vst [vmem:[#allocation35_spill] sm:$0xff] %v9413_v28  ;;  %v2401_v28 = vmul.f32 1.442695, %v2147_v47  ;;  %v2130_v47 = vsub.f32 %v12641_v21, %v9204_v38 }
 0x61a   :  { %12631 = vst [vmem:[#allocation34_spill] sm:$0xff] %v9422_v63 }
 0x61b   :  { %12637 = vst [vmem:[#allocation37_spill] sm:$0xff] %v9436_v51  ;;  %6600 = vpow2.f32 %v2401_v28 }
 0x61c   :  { %2894 = vperm.xlu2 %6116, %v9417_v30   ;;  %v2125_v30 = vsub.f32 %v12635_v46, %v9204_v38  ;;  %12638 = vst [vmem:[#allocation60_spill] sm:$0xff] %v9438_v42 }
 0x61d   :  { %2834 = vperm.xlu0 %6118, %v9419_v54   ;;  %v2361_v54 = vmul.f32 1.442695, %v2127_v58 }
 0x61e   :  { %2828 = vperm.xlu1 %6117, %v9422_v63   ;;  %v2357_v61 = vmul.f32 1.442695, %v2125_v30  ;;  %v9440_v63 = vpop.eup %6596  ;;  %v12643_v30 = vld [vmem:[#allocation61_spill] sm:$0xff] }
 0x61f   :  { %v9430_v50 = vpop.permute.xlu0 %2708  ;;  %12639 = vst [vmem:[#allocation136_spill] sm:$0xff] %v9440_v63  ;;  %v9443_v33 = vpop.eup %6598  ;;  %6602 = vpow2.f32 %v2361_v54  ;;  %v2128_v58 = vsub.f32 %v12643_v30, %v9204_v38  ;;  %v12650_v30 = vld [vmem:[#allocation64_spill] sm:$0xff] }
 0x620   :  { %12634 = vst [vmem:[#allocation57_spill] sm:$0xff] %v9430_v50  ;;  %v9434_v36 = vpop.permute.xlu1 %2702  ;;  %6604 = vpow2.f32 %v2357_v61  ;;  %v9462_v54 = vpop.permute.xlu2 %2759  ;;  %v12649_v61 = vld [vmem:[#allocation69_spill] sm:$0xff] }
 0x621   :  { %12636 = vst [vmem:[#allocation132_spill] sm:$0xff] %v9434_v36  ;;  %v9455_v50 = vpop.eup %6600  ;;  %v2363_v36 = vmul.f32 1.442695, %v2128_v58  ;;  %v2133_v21 = vsub.f32 %v12649_v61, %v9331_v26  ;;  %v2131_v58 = vsub.f32 %v12650_v30, %v9204_v38  ;;  %v12657_v38 = vld [vmem:[#allocation67_spill] sm:$0xff] }
 0x622   :  { %12640 = vst [vmem:[#allocation135_spill] sm:$0xff] %v9443_v33 }
 0x623   :  { %12645 = vst [vmem:[#allocation139_spill] sm:$0xff] %v9455_v50 }
 0x624   :  { %2903 = vperm.xlu2 %6116, %v9436_v51   ;;  %v2367_v51 = vmul.f32 1.442695, %v2130_v47  ;;  %12648 = vst [vmem:[#allocation143_spill] sm:$0xff] %v9462_v54 }
 0x625   :  { %2843 = vperm.xlu0 %6118, %v9440_v63   ;;  %v9457_v63 = vpop.eup %6602 }
 0x626   :  { %2837 = vperm.xlu1 %6117, %v9443_v33   ;;  %12646 = vst [vmem:[#allocation65_spill] sm:$0xff] %v9457_v63  ;;  %v9460_v28 = vpop.eup %6604  ;;  %6606 = vpow2.f32 %v2367_v51  ;;  %v12654_v51 = vld [vmem:[#allocation167_spill] sm:$0xff] }
 0x627   :  { %v9449_v53 = vpop.permute.xlu0 %2717  ;;  %12647 = vst [vmem:[#allocation44_spill] sm:$0xff] %v9460_v28  ;;  %6608 = vpow2.f32 %v2363_v36  ;;  %v2136_v61 = vsub.f32 %v12654_v51, %v9331_v26 }
 0x628   :  { %12642 = vst [vmem:[#allocation62_spill] sm:$0xff] %v9449_v53  ;;  %v9453_v46 = vpop.permute.xlu1 %2711  ;;  %v2369_v53 = vmul.f32 1.442695, %v2131_v58  ;;  %v9482_v36 = vpop.permute.xlu2 %2768 }
 0x629   :  { %12644 = vst [vmem:[#allocation140_spill] sm:$0xff] %v9453_v46  ;;  %v2379_v58 = vmul.f32 1.442695, %v2136_v61 }
 0x62a   :  { %12655 = vst [vmem:[#allocation71_spill] sm:$0xff] %v9482_v36 }
 0x62c   :  { %2912 = vperm.xlu2 %6116, %v9455_v50   ;;  %v2373_v50 = vmul.f32 1.442695, %v2133_v21  ;;  %v9474_v46 = vpop.eup %6606  ;;  %v2134_v21 = vsub.f32 %v12657_v38, %v9331_v26  ;;  %v12662_v38 = vld [vmem:[#allocation70_spill] sm:$0xff] }
 0x62d   :  { %2852 = vperm.xlu0 %6118, %v9457_v63   ;;  %12652 = vst [vmem:[#allocation47_spill] sm:$0xff] %v9474_v46  ;;  %v9476_v54 = vpop.eup %6608 }
 0x62e   :  { %2846 = vperm.xlu1 %6117, %v9460_v28   ;;  %12653 = vst [vmem:[#allocation43_spill] sm:$0xff] %v9476_v54  ;;  %6610 = vpow2.f32 %v2373_v50  ;;  %v2375_v28 = vmul.f32 1.442695, %v2134_v21  ;;  %v12660_v50 = vld [vmem:[#allocation170_spill] sm:$0xff] }
 0x62f   :  { %v9468_v47 = vpop.permute.xlu0 %2726  ;;  %6612 = vpow2.f32 %v2369_v53  ;;  %v2139_v51 = vsub.f32 %v12660_v50, %v9331_v26 }
 0x630   :  { %v9472_v33 = vpop.permute.xlu1 %2720  ;;  %6614 = vpow2.f32 %v2379_v58  ;;  %v9504_v21 = vpop.permute.xlu2 %2777 }
 0x631   :  { %12651 = vst [vmem:[#allocation68_spill] sm:$0xff] %v9472_v33  ;;  %6616 = vpow2.f32 %v2375_v28  ;;  %v2385_v36 = vmul.f32 1.442695, %v2139_v51  ;;  %v12667_v28 = vld [vmem:[#allocation172_spill] sm:$0xff] }
 0x632   :  { %12664 = vst [vmem:[#allocation76_spill] sm:$0xff] %v9504_v21  ;;  %v2142_v58 = vsub.f32 %v12667_v28, %v9331_v26 }
 0x633   :  { %6618 = vpow2.f32 %v2385_v36 }
 0x634   :  { %v9490_v33 = vpop.eup %6610 }
 0x635   :  { %2861 = vperm.xlu0 %6118, %v9474_v46   ;;  %12658 = vst [vmem:[#allocation46_spill] sm:$0xff] %v9490_v33  ;;  %v9492_v46 = vpop.eup %6612 }
 0x636   :  { %2855 = vperm.xlu1 %6117, %v9476_v54   ;;  %12659 = vst [vmem:[#allocation73_spill] sm:$0xff] %v9492_v46  ;;  %v2137_v54 = vsub.f32 %v12662_v38, %v9331_v26  ;;  %v9506_v42 = vpop.eup %6614  ;;  %v12669_v38 = vld [vmem:[#allocation72_spill] sm:$0xff] }
 0x637   :  { %v9484_v63 = vpop.permute.xlu0 %2735  ;;  %12665 = vst [vmem:[#allocation56_spill] sm:$0xff] %v9506_v42 }
 0x638   :  { %12656 = vst [vmem:[#allocation50_spill] sm:$0xff] %v9484_v63  ;;  %v9488_v30 = vpop.permute.xlu1 %2729  ;;  %v2381_v63 = vmul.f32 1.442695, %v2137_v54  ;;  %v2391_v54 = vmul.f32 1.442695, %v2142_v58  ;;  %v12676_v58 = vld [vmem:[#allocation74_spill] sm:$0xff] }
 0x63a   :  { %6620 = vpow2.f32 %v2381_v63  ;;  %v12674_v63 = vld [vmem:[#allocation174_spill] sm:$0xff] }
 0x63b   :  { %6622 = vpow2.f32 %v2391_v54  ;;  %v2145_v36 = vsub.f32 %v12674_v63, %v9331_v26 }
 0x63d   :  { %2870 = vperm.xlu0 %6118, %v9490_v33   ;;  %v9508_v33 = vpop.eup %6616 }
 0x63e   :  { %2864 = vperm.xlu1 %6117, %v9492_v46   ;;  %12666 = vst [vmem:[#allocation52_spill] sm:$0xff] %v9508_v33  ;;  %v2140_v46 = vsub.f32 %v12669_v38, %v9331_v26  ;;  %v9522_v21 = vpop.eup %6618  ;;  %v2143_v38 = vsub.f32 %v12676_v58, %v9331_v26 }
 0x63f   :  { %v9498_v53 = vpop.permute.xlu0 %2744  ;;  %12672 = vst [vmem:[#allocation80_spill] sm:$0xff] %v9522_v21 }
 0x640   :  { %12661 = vst [vmem:[#allocation53_spill] sm:$0xff] %v9498_v53  ;;  %v9502_v61 = vpop.permute.xlu1 %2738  ;;  %v9520_v53 = vpop.permute.xlu2 %2786 }
 0x641   :  { %12663 = vst [vmem:[#allocation49_spill] sm:$0xff] %v9502_v61  ;;  %v2387_v61 = vmul.f32 1.442695, %v2140_v46  ;;  %v2397_v46 = vmul.f32 1.442695, %v2145_v36  ;;  %v12683_v36 = vld [vmem:[#allocation75_spill] sm:$0xff] }
 0x642   :  { %12671 = vst [vmem:[#allocation55_spill] sm:$0xff] %v9520_v53  ;;  %v2146_v58 = vsub.f32 %v12683_v36, %v9331_v26 }
 0x643   :  { %6624 = vpow2.f32 %v2387_v61  ;;  %v12681_v61 = vld [vmem:[#allocation176_spill] sm:$0xff] }
 0x644   :  { %6626 = vpow2.f32 %v2397_v46  ;;  %v2148_v54 = vsub.f32 %v12681_v61, %v9331_v26 }
 0x645   :  { %2879 = vperm.xlu0 %6118, %v9506_v42   ;;  %v9524_v42 = vpop.eup %6620 }
 0x646   :  { %2873 = vperm.xlu1 %6117, %v9508_v33   ;;  %12673 = vst [vmem:[#allocation63_spill] sm:$0xff] %v9524_v42 }
 0x647   :  { %v9514_v50 = vpop.permute.xlu0 %2753 }
 0x648   :  { %12668 = vst [vmem:[#allocation77_spill] sm:$0xff] %v9514_v50  ;;  %v9518_v51 = vpop.permute.xlu1 %2747  ;;  %v2393_v50 = vmul.f32 1.442695, %v2143_v38 }
 0x649   :  { %12670 = vst [vmem:[#allocation59_spill] sm:$0xff] %v9518_v51  ;;  %v9536_v51 = vpop.eup %6622 }
 0x64a   :  { %12678 = vst [vmem:[#allocation61_spill] sm:$0xff] %v9536_v51  ;;  %v9538_v53 = vpop.eup %6624  ;;  %6628 = vpow2.f32 %v2393_v50 }
 0x64b   :  { %12679 = vst [vmem:[#allocation69_spill] sm:$0xff] %v9538_v53 }
 0x64d   :  { %2888 = vperm.xlu0 %6118, %v9522_v21   ;;  %v9540_v21 = vpop.permute.xlu2 %2795 }
 0x64e   :  { %2882 = vperm.xlu1 %6117, %v9524_v42   ;;  %12680 = vst [vmem:[#allocation64_spill] sm:$0xff] %v9540_v21  ;;  %v2403_v42 = vmul.f32 1.442695, %v2148_v54 }
 0x64f   :  { %v9530_v28 = vpop.permute.xlu0 %2762 }
 0x650   :  { %12675 = vst [vmem:[#allocation58_spill] sm:$0xff] %v9530_v28  ;;  %v9534_v33 = vpop.permute.xlu1 %2756  ;;  %v2399_v28 = vmul.f32 1.442695, %v2146_v58  ;;  %6630 = vpow2.f32 %v2403_v42 }
 0x651   :  { %12677 = vst [vmem:[#allocation66_spill] sm:$0xff] %v9534_v33  ;;  %v9552_v33 = vpop.eup %6626 }
 0x652   :  { %12685 = vst [vmem:[#allocation170_spill] sm:$0xff] %v9552_v33  ;;  %v9554_v21 = vpop.eup %6628  ;;  %6632 = vpow2.f32 %v2399_v28 }
 0x653   :  { %12686 = vst [vmem:[#allocation70_spill] sm:$0xff] %v9554_v21 }
 0x655   :  { %2897 = vperm.xlu0 %6118, %v9536_v51   ;;  %v9558_v46 = vpop.permute.xlu2 %2804 }
 0x656   :  { %2891 = vperm.xlu1 %6117, %v9538_v53   ;;  %12687 = vst [vmem:[#allocation172_spill] sm:$0xff] %v9558_v46  ;;  %v9564_v26 = vpop.eup %6630 }
 0x657   :  { %v9546_v63 = vpop.permute.xlu0 %2771  ;;  %12688 = vst [vmem:[#allocation72_spill] sm:$0xff] %v9564_v26 }
 0x658   :  { %12682 = vst [vmem:[#allocation167_spill] sm:$0xff] %v9546_v63  ;;  %v9550_v38 = vpop.permute.xlu1 %2765  ;;  %v9566_v54 = vpop.eup %6632 }
 0x659   :  { %12684 = vst [vmem:[#allocation67_spill] sm:$0xff] %v9550_v38 }
 0x65a   :  { %12689 = vst [vmem:[#allocation174_spill] sm:$0xff] %v9566_v54 }
 0x65d   :  { %2906 = vperm.xlu0 %6118, %v9552_v33   ;;  %v9574_v42 = vpop.permute.xlu2 %2813 }
 0x65e   :  { %2900 = vperm.xlu1 %6117, %v9554_v21   ;;  %12691 = vst [vmem:[#allocation176_spill] sm:$0xff] %v9574_v42 }
 0x65f   :  { %v9560_v61 = vpop.permute.xlu0 %2780 }
 0x660   :  { %v9562_v50 = vpop.permute.xlu1 %2774 }
 0x665   :  { %2915 = vperm.xlu0 %6118, %v9564_v26   ;;  %v9580_v28 = vpop.permute.xlu2 %2822 }
 0x666   :  { %2909 = vperm.xlu1 %6117, %v9566_v54  }
 0x667   :  { %v9570_v36 = vpop.permute.xlu0 %2789 }
 0x668   :  { %12690 = vst [vmem:[#allocation74_spill] sm:$0xff] %v9570_v36  ;;  %v9572_v58 = vpop.permute.xlu1 %2783 }
 0x66d   :  { %v9586_v63 = vpop.permute.xlu2 %2831 }
 0x66f   :  { %v9576_v33 = vpop.permute.xlu0 %2798 }
 0x670   :  { %12692 = vst [vmem:[#allocation75_spill] sm:$0xff] %v9576_v33  ;;  %v9578_v21 = vpop.permute.xlu1 %2792  ;;  %v2949_v33 = vperm.slane %v9161_v49, %v8274_v23 }
 0x671   :  { %12693 = vst [vmem:[#allocation190_spill] sm:$0xff] %v9578_v21 }
 0x675   :  { %v9592_v38 = vpop.permute.xlu2 %2840 }
 0x676   :  { %12698 = vst [vmem:[#allocation195_spill] sm:$0xff] %v9592_v38 }
 0x677   :  { %v9582_v51 = vpop.permute.xlu0 %2807 }
 0x678   :  { %12694 = vst [vmem:[#allocation191_spill] sm:$0xff] %v9582_v51  ;;  %v9584_v53 = vpop.permute.xlu1 %2801  ;;  %v2918_v51 = vperm.slane %v8985_v14, %v8274_v23  ;;  %v2951_v14 = vperm.slane %v8968_v18, %v8277_v5  ;;  %v2926_v18 = vperm.slane %v9030_v7, %v8304_v11  ;;  %v2979_v7 = vperm.slane %v9267_v37, %v8267_v62 }
 0x679   :  { %12695 = vst [vmem:[#allocation192_spill] sm:$0xff] %v9584_v53  ;;  %v2917_v53 = vperm.slane %v8989_v15, %v8267_v62  ;;  %v2922_v15 = vperm.slane %v9009_v44, %v8292_v10  ;;  %v2932_v37 = vperm.slane %v9076_v20, %v8335_v4 }
 0x67b   :  { %v2919_v21 = vsel %vm1712_vm0, %v2918_v51, %v2917_v53 }
 0x67f   :  { %v9588_v26 = vpop.permute.xlu0 %2816 }
 0x680   :  { %12696 = vst [vmem:[#allocation193_spill] sm:$0xff] %v9588_v26  ;;  %v9590_v54 = vpop.permute.xlu1 %2810  ;;  %v2920_v26 = vperm.slane %v9013_v6, %v8277_v5  ;;  %v2924_v6 = vperm.slane %v9034_v41, %v8298_v22 }
 0x681   :  { %12697 = vst [vmem:[#allocation194_spill] sm:$0xff] %v9590_v54  ;;  %v2948_v54 = vperm.slane %v9136_v48, %v8267_v62 }
 0x683   :  { %v2950_v49 = vsel %vm1712_vm0, %v2949_v33, %v2948_v54  ;;  %v2953_v33 = vperm.slane %v9157_v9, %v8292_v10  ;;  %v2957_v9 = vperm.slane %v8994_v0, %v8304_v11 }
 0x684   :  { %v2952_v48 = vsel %vm1716_vm1, %v2951_v14, %v2950_v49  ;;  %v2980_v49 = vperm.slane %v9100_v34, %v8274_v23  ;;  %v2930_v14 = vperm.slane %v9051_v52, %v8326_v25  ;;  %v2984_v52 = vperm.slane %v9288_v8, %v8292_v10 }
 0x685   :  { %v2936_v8 = vperm.slane %v9095_v40, %v8370_v27 }
 0x686   :  { %v2981_v34 = vsel %vm1712_vm0, %v2980_v49, %v2979_v7 }
 0x687   :  { %v9594_v46 = vpop.permute.xlu0 %2825 }
 0x688   :  { %v9596_v42 = vpop.permute.xlu1 %2819 }
 0x689   :  { %12699 = vst [vmem:[#allocation196_spill] sm:$0xff] %v9596_v42  ;;  %v9612_v42 = vpop.permute.xlu2 %2849 }
 0x68a   :  { %12701 = vst [vmem:[#allocation198_spill] sm:$0xff] %v9612_v42  ;;  %v2955_v42 = vperm.slane %v9182_v55, %v8298_v22 }
 0x68f   :  { %v9604_v36 = vpop.permute.xlu0 %2834 }
 0x690   :  { %12700 = vst [vmem:[#allocation197_spill] sm:$0xff] %v9604_v36  ;;  %v9610_v38 = vpop.permute.xlu1 %2828  ;;  %v2921_v36 = vsel %vm1716_vm1, %v2920_v26, %v2919_v21  ;;  %v2954_v21 = vsel %vm1720_vm2, %v2953_v33, %v2952_v48  ;;  %v2928_v26 = vperm.slane %v9055_v35, %v8320_v13 }
 0x691   :  { %v2923_v53 = vsel %vm1720_vm2, %v2922_v15, %v2921_v36  ;;  %v2956_v55 = vsel %vm11996_vm3, %v2955_v42, %v2954_v21  ;;  %v9645_v36 = vpop.permute.xlu2 %2858  ;;  %v2961_v42 = vperm.slane %v9201_v2, %v8326_v25  ;;  %v2959_v15 = vperm.slane %v9178_v60, %v8320_v13 }
 0x692   :  { %v2925_v44 = vsel %vm11996_vm3, %v2924_v6, %v2923_v53  ;;  %v2958_v35 = vsel %vm11995_vm4, %v2957_v9, %v2956_v55  ;;  %v2982_v6 = vperm.slane %v9263_v32, %v8277_v5  ;;  %v2934_v2 = vperm.slane %v9072_v1, %v8358_v19 }
 0x693   :  { %v2927_v54 = vsel %vm11995_vm4, %v2926_v18, %v2925_v44  ;;  %v2960_v48 = vsel %vm1732_vm5, %v2959_v15, %v2958_v35  ;;  %v2963_v32 = vperm.slane %v9017_v3, %v8335_v4  ;;  %v2986_v1 = vperm.slane %v9123_v16, %v8298_v22  ;;  %v12708_v15 = vld [vmem:[#allocation108_spill] sm:$0xff] }
 0x694   :  { %v2929_v0 = vsel %vm1732_vm5, %v2928_v26, %v2927_v54  ;;  %v2962_v18 = vsel %vm1736_vm6, %v2961_v42, %v2960_v48  ;;  %v2983_v44 = vsel %vm1716_vm1, %v2982_v6, %v2981_v34  ;;  %v2967_v55 = vperm.slane %v9225_v39, %v8370_v27  ;;  %v12709_v34 = vld [vmem:[#allocation120_spill] sm:$0xff] }
 0x695   :  { %v2931_v20 = vsel %vm1736_vm6, %v2930_v14, %v2929_v0  ;;  %v2985_v21 = vsel %vm1720_vm2, %v2984_v52, %v2983_v44  ;;  %v2964_v26 = vsel %vm1740_vm7, %v2963_v32, %v2962_v18  ;;  %v2965_v3 = vperm.slane %v9197_v24, %v8358_v19  ;;  %v12713_v18 = vld [vmem:[#allocation87_spill] sm:$0xff] }
 0x696   :  { %v2933_v53 = vsel %vm1740_vm7, %v2932_v37, %v2931_v20  ;;  %v2987_v40 = vsel %vm11996_vm3, %v2986_v1, %v2985_v21  ;;  %v2990_v54 = vperm.slane %v9307_v12, %v8320_v13  ;;  %v2938_v16 = vperm.slane %v8945_v45, %v8379_v17  ;;  %v12712_v20 = vld [vmem:[#allocation188_spill] sm:$0xff]  ;;  %v12716_v21 = vld [vmem:[#allocation129_spill] sm:$0xff]  ;;  %v12717_v1 = vld [vmem:[#allocation90_spill] sm:$0xff] }
 0x697   :  { %v9631_v51 = vpop.permute.xlu0 %2843  ;;  %v2935_v9 = vsel %vm12702_vm11, %v2934_v2, %v2933_v53  ;;  %v2966_v14 = vsel %vm12705_vm8, %v2965_v3, %v2964_v26  ;;  %v2988_v39 = vperm.slane %v9284_v43, %v8304_v11  ;;  %vm12706_vm11 = vmmov %vm12703_vm15  ;;  %v2969_v42 = vperm.slane %v9043_v56, %v8379_v17  ;;  %v12711_v56 = vld [vmem:[#allocation19_spill] sm:$0xff]  ;;  %v12715_v53 = vld [vmem:[#allocation13_spill] sm:$0xff] }
 0x698   :  { %v9635_v41 = vpop.permute.xlu1 %2837  ;;  %v2937_v7 = vsel %vm12703_vm15, %v2936_v8, %v2935_v9  ;;  %v2968_v35 = vsel %vm12706_vm11, %v2967_v55, %v2966_v14  ;;  %vm12707_vm15 = vcmask 786112   ;;  %v2942_v12 = vperm.slane %v9119_v29, %v8423_v57  ;;  %v12718_v9 = vld [vmem:[#allocation36_spill] sm:$0xff]  ;;  %v12721_v14 = vld [vmem:[#allocation82_spill] sm:$0xff] }
 0x699   :  { %v9692_v49 = vpop.permute.xlu2 %2867  ;;  %v2939_v0 = vsel %vm12707_vm15, %v2938_v16, %v2937_v7  ;;  %v2989_v37 = vsel %vm11995_vm4, %v2988_v39, %v2987_v40  ;;  %v2940_v6 = vperm.slane %v12708_v15, %v8386_v31  ;;  %v2992_v52 = vperm.slane %v12709_v34, %v8326_v25  ;;  %vm12710_vm8 = vmmov %vm12707_vm15  ;;  %v12720_v40 = vld [vmem:[#allocation30_spill] sm:$0xff] }
 0x69a   :  { %12704 = vst [vmem:[#allocation199_spill] sm:$0xff] %v9692_v49  ;;  %v2991_v43 = vsel %vm1732_vm5, %v2990_v54, %v2989_v37  ;;  %v2970_v48 = vsel %vm12710_vm8, %v2969_v42, %v2968_v35  ;;  %v2973_v2 = vperm.slane %v12711_v56, %v8423_v57  ;;  %v2944_v29 = vperm.slane %v12713_v18, %v12712_v20  ;;  %v12722_v37 = vld [vmem:[#allocation96_spill] sm:$0xff]  ;;  %v12725_v56 = vld [vmem:[#allocation103_spill] sm:$0xff]  ;;  %v12726_v18 = vld [vmem:[#allocation113_spill] sm:$0xff] }
 0x69b   :  { %vm12714_vm11 = vcmask 851712   ;;  %v2971_v8 = vperm.slane %v12715_v53, %v8386_v31  ;;  %v2946_v26 = vperm.slane %v12717_v1, %v12716_v21  ;;  %v2993_v55 = vsel %vm1736_vm6, %v2992_v52, %v2991_v43  ;;  %v12728_v1 = vld [vmem:[#allocation122_spill] sm:$0xff] }
 0x69c   :  { %v2941_v32 = vsel %vm12714_vm11, %v2940_v6, %v2939_v0  ;;  %v2996_v3 = vperm.slane %v12718_v9, %v8358_v19  ;;  %vm12719_vm15 = vmmov %vm12714_vm11  ;;  %v2994_v54 = vperm.slane %v12720_v40, %v8335_v4  ;;  %v2975_v39 = vperm.slane %v12721_v14, %v12712_v20  ;;  %v12723_v6 = vld [vmem:[#allocation97_spill] sm:$0xff] }
 0x69d   :  { %v2943_v44 = vsel %vm1760_vm12, %v2942_v12, %v2941_v32  ;;  %v2972_v7 = vsel %vm12719_vm15, %v2971_v8, %v2970_v48  ;;  %v2998_v15 = vperm.slane %v12722_v37, %v8370_v27  ;;  %v3004_v43 = vperm.slane %v12723_v6, %v8423_v57  ;;  %v12727_v8 = vld [vmem:[#allocation115_spill] sm:$0xff]  ;;  %v12734_v37 = vld [vmem:[#allocation45_spill] sm:$0xff] }
 0x69e   :  { %v2974_v16 = vsel %vm1760_vm12, %v2973_v2, %v2972_v7  ;;  %v2945_v35 = vsel %vm1764_vm13, %v2944_v29, %v2943_v44  ;;  %v2995_v42 = vsel %vm1740_vm7, %v2994_v54, %v2993_v55  ;;  %vm12724_vm8 = vcmask 654912   ;;  %v12729_v55 = vld [vmem:[#allocation106_spill] sm:$0xff]  ;;  %v12730_v7 = vld [vmem:[#allocation11_spill] sm:$0xff]  ;;  %v12735_v6 = vld [vmem:[#allocation9_spill] sm:$0xff] }
 0x69f   :  { %v9665_v33 = vpop.permute.xlu0 %2852  ;;  %v9746_v34 = vsel %vm1768_vm14, %v2946_v26, %v2945_v35  ;;  %v2997_v52 = vsel %vm12724_vm8, %v2996_v3, %v2995_v42  ;;  %v3010_v2 = vperm.slane %v12725_v56, %v8267_v62  ;;  %v3015_v29 = vperm.slane %v12726_v18, %v8292_v10  ;;  %v12733_v35 = vld [vmem:[#allocation24_spill] sm:$0xff] }
 0x6a0   :  { %v9671_v60 = vpop.permute.xlu1 %2846  ;;  %v2976_v32 = vsel %vm1764_vm13, %v2975_v39, %v2974_v16  ;;  %v3042_v53 = vperm.slane %v9488_v30, %v8274_v23  ;;  %v2977_v9 = vperm.slane %v12729_v55, %v12716_v21  ;;  %v3011_v3 = vperm.slane %v9369_v59, %v8274_v23  ;;  %v12732_v16 = vld [vmem:[#allocation26_spill] sm:$0xff]  ;;  %v12737_v18 = vld [vmem:[#allocation40_spill] sm:$0xff] }
 0x6a1   :  { %v9737_v0 = vpop.permute.xlu2 %2876  ;;  %vm12731_vm11 = vcmask 720512   ;;  %v3013_v30 = vperm.slane %v12732_v16, %v8277_v5  ;;  %v3041_v14 = vperm.slane %v9468_v47, %v8267_v62  ;;  %v3044_v59 = vperm.slane %v12734_v37, %v8277_v5 }
 0x6a2   :  { %v2999_v54 = vsel %vm12731_vm11, %v2998_v15, %v2997_v52  ;;  %v9774_v39 = vsel %vm1768_vm14, %v2977_v9, %v2976_v32  ;;  %v3000_v56 = vperm.slane %v12735_v6, %v8379_v17  ;;  %v12736_v15 = vld [vmem:[#allocation31_spill] sm:$0xff]  ;;  %v3002_v55 = vperm.slane %v12737_v18, %v8386_v31  ;;  %v12738_v9 = vld [vmem:[#allocation60_spill] sm:$0xff] }
 0x6a3   :  { %v3050_v52 = vperm.slane %v12736_v15, %v8304_v11  ;;  %v3043_v47 = vsel %vm1712_vm0, %v3042_v53, %v3041_v14  ;;  %v3072_v32 = vperm.slane %v9562_v50, %v8267_v62  ;;  %vm12739_vm15 = vcmask 786112   ;;  %v12740_v15 = vld [vmem:[#allocation143_spill] sm:$0xff]  ;;  %v12741_v18 = vld [vmem:[#allocation76_spill] sm:$0xff] }
 0x6a4   :  { %v3001_v42 = vsel %vm12739_vm15, %v3000_v56, %v2999_v54  ;;  %v3012_v37 = vsel %vm1712_vm0, %v3011_v3, %v3010_v2  ;;  %v3104_v6 = vperm.slane %v9594_v46, %v8274_v23  ;;  %v3073_v26 = vperm.slane %v12741_v18, %v8274_v23  ;;  %v12742_v46 = vld [vmem:[#allocation49_spill] sm:$0xff] }
 0x6a5   :  { %v3014_v53 = vsel %vm1716_vm1, %v3013_v30, %v3012_v37  ;;  %v3106_v50 = vperm.slane %v9610_v38, %v8277_v5  ;;  %v3103_v54 = vperm.slane %v9580_v28, %v8267_v62  ;;  %v3045_v2 = vsel %vm1716_vm1, %v3044_v59, %v3043_v47  ;;  %v12744_v30 = vld [vmem:[#allocation50_spill] sm:$0xff] }
 0x6a6   :  { %v3048_v3 = vperm.slane %v12742_v46, %v8298_v22  ;;  %v3075_v56 = vperm.slane %v9560_v61, %v8277_v5  ;;  %vm12743_vm8 = vcmask 851712   ;;  %v3046_v37 = vperm.slane %v12744_v30, %v8292_v10  ;;  %v12745_v59 = vld [vmem:[#allocation14_spill] sm:$0xff]  ;;  %v12746_v61 = vld [vmem:[#allocation35_spill] sm:$0xff] }
 0x6a7   :  { %v9700_v24 = vpop.permute.xlu0 %2861  ;;  %v3003_v18 = vsel %vm12743_vm8, %v3002_v55, %v3001_v42  ;;  %v3074_v38 = vsel %vm1712_vm0, %v3073_v26, %v3072_v32  ;;  %v3077_v16 = vperm.slane %v9572_v58, %v8292_v10  ;;  %v3006_v47 = vperm.slane %v12745_v59, %v12712_v20  ;;  %v12747_v55 = vld [vmem:[#allocation29_spill] sm:$0xff] }
 0x6a8   :  { %v9708_v45 = vpop.permute.xlu1 %2855  ;;  %v3016_v46 = vsel %vm1720_vm2, %v3015_v29, %v3014_v53  ;;  %v3019_v44 = vperm.slane %v12746_v61, %v8304_v11  ;;  %v3105_v42 = vsel %vm1712_vm0, %v3104_v6, %v3103_v54  ;;  %v3017_v30 = vperm.slane %v12747_v55, %v8298_v22  ;;  %v12748_v6 = vld [vmem:[#allocation55_spill] sm:$0xff] }
 0x6a9   :  { %v9817_v28 = vpop.permute.xlu2 %2885  ;;  %v3047_v26 = vsel %vm1720_vm2, %v3046_v37, %v3045_v2  ;;  %v3107_v32 = vsel %vm1716_vm1, %v3106_v50, %v3105_v42  ;;  %v9831_v49 = vsel %vm1760_vm12, %v3004_v43, %v3003_v18  ;;  %v3108_v29 = vperm.slane %v9586_v63, %v8292_v10  ;;  %v12749_v43 = vld [vmem:[#allocation51_spill] sm:$0xff] }
 0x6aa   :  { %v3049_v53 = vsel %vm11996_vm3, %v3048_v3, %v3047_v26  ;;  %v3076_v61 = vsel %vm1716_vm1, %v3075_v56, %v3074_v38  ;;  %v3079_v54 = vperm.slane %v12748_v6, %v8298_v22  ;;  %v3018_v55 = vsel %vm11996_vm3, %v3017_v30, %v3016_v46  ;;  %v12750_v37 = vld [vmem:[#allocation59_spill] sm:$0xff]  ;;  %v12752_v30 = vld [vmem:[#allocation53_spill] sm:$0xff] }
 0x6ab   :  { %v3078_v2 = vsel %vm1720_vm2, %v3077_v16, %v3076_v61  ;;  %v3023_v50 = vperm.slane %v12749_v43, %v8326_v25  ;;  %v3020_v18 = vsel %vm11995_vm4, %v3019_v44, %v3018_v55  ;;  %v3109_v63 = vsel %vm1720_vm2, %v3108_v29, %v3107_v32  ;;  %v12751_v16 = vld [vmem:[#allocation197_spill] sm:$0xff]  ;;  %v12756_v55 = vld [vmem:[#allocation74_spill] sm:$0xff] }
 0x6ac   :  { %v3112_v3 = vperm.slane %v9635_v41, %v8304_v11  ;;  %v3051_v56 = vsel %vm11995_vm4, %v3050_v52, %v3049_v53  ;;  %v3054_v38 = vperm.slane %v12750_v37, %v8326_v25  ;;  %v3110_v46 = vperm.slane %v12751_v16, %v8298_v22  ;;  %v12753_v41 = vld [vmem:[#allocation190_spill] sm:$0xff] }
 0x6ad   :  { %v3052_v26 = vperm.slane %v12752_v30, %v8320_v13  ;;  %v3137_v44 = vperm.slane %v9737_v0, %v8277_v5  ;;  %v3080_v32 = vsel %vm11996_vm3, %v3079_v54, %v3078_v2  ;;  %v3083_v52 = vperm.slane %v12753_v41, %v8320_v13 }
 0x6ae   :  { %v12754_v53 = vperm.slane %v12727_v8, %v8320_v13  ;;  %v3111_v43 = vsel %vm11996_vm3, %v3110_v46, %v3109_v63  ;;  %v12757_v8 = vld [vmem:[#allocation195_spill] sm:$0xff]  ;;  %v12758_v63 = vld [vmem:[#allocation64_spill] sm:$0xff]  ;;  %vm12765_vm11 = vcmask 654912   ;;  %vm12770_vm8 = vcmask 720512  }
 0x6af   :  { %v9739_v12 = vpop.permute.xlu0 %2870  ;;  %v3053_v0 = vsel %vm1732_vm5, %v3052_v26, %v3051_v56  ;;  %v3113_v54 = vsel %vm11995_vm4, %v3112_v3, %v3111_v43  ;;  %v3114_v16 = vperm.slane %v12757_v8, %v8320_v13  ;;  %v3085_v56 = vperm.slane %v12758_v63, %v8326_v25  ;;  %v12759_v3 = vld [vmem:[#allocation57_spill] sm:$0xff]  ;;  %vm12768_vm15 = vmmov %vm12765_vm11 }
 0x6b0   :  { %v9749_v48 = vpop.permute.xlu1 %2864  ;;  %v3022_v61 = vsel %vm1732_vm5, %v12754_v53, %v3020_v18  ;;  %v3055_v18 = vsel %vm1736_vm6, %v3054_v38, %v3053_v0  ;;  %v3029_v46 = vperm.slane %v12759_v3, %v8370_v27 }
 0x6b1   :  { %v2895_v41 = vpop.permute.xlu2 %2894  ;;  %v3115_v38 = vsel %vm1732_vm5, %v3114_v16, %v3113_v54  ;;  %v12767_v16 = vld [vmem:[#allocation75_spill] sm:$0xff] }
 0x6b7   :  { %v9802_v14 = vpop.permute.xlu0 %2879 }
 0x6b8   :  { %v2874_v40 = vpop.permute.xlu1 %2873  ;;  %v3139_v53 = vperm.slane %v9802_v14, %v8292_v10  ;;  %v12760_v14 = vperm.slane %v12738_v9, %v8335_v4  ;;  %v12763_v9 = vld [vmem:[#allocation192_spill] sm:$0xff] }
 0x6b9   :  { %v3135_v58 = vperm.slane %v2874_v40, %v8274_v23  ;;  %v3134_v40 = vperm.slane %v9739_v12, %v8267_v62  ;;  %v3089_v0 = vperm.slane %v12763_v9, %v8358_v19 }
 0x6bb   :  { %v3136_v12 = vsel %vm1712_vm0, %v3135_v58, %v3134_v40  ;;  %v12755_v58 = vld [vmem:[#allocation132_spill] sm:$0xff]  ;;  %v3081_v40 = vperm.slane %v12756_v55, %v8304_v11  ;;  %v12761_v55 = vld [vmem:[#allocation66_spill] sm:$0xff] }
 0x6bc   :  { %v3025_v6 = vperm.slane %v12755_v58, %v8335_v4  ;;  %v3138_v2 = vsel %vm1716_vm1, %v3137_v44, %v3136_v12  ;;  %v3024_v12 = vsel %vm1736_vm6, %v3023_v50, %v3022_v61  ;;  %v3057_v58 = vsel %vm1740_vm7, %v12760_v14, %v3055_v18  ;;  %v12762_v61 = vld [vmem:[#allocation77_spill] sm:$0xff] }
 0x6bd   :  { %v3082_v30 = vsel %vm11995_vm4, %v3081_v40, %v3080_v32  ;;  %v3118_v32 = vperm.slane %v9671_v60, %v8335_v4  ;;  %v3060_v40 = vperm.slane %v12761_v55, %v8370_v27  ;;  %v3116_v50 = vperm.slane %v9631_v51, %v8326_v25  ;;  %v12766_v51 = vld [vmem:[#allocation140_spill] sm:$0xff] }
 0x6be   :  { %v3084_v26 = vsel %vm1732_vm5, %v3083_v52, %v3082_v30  ;;  %v3026_v44 = vsel %vm1740_vm7, %v3025_v6, %v3024_v12  ;;  %v3058_v6 = vperm.slane %v12762_v61, %v8358_v19  ;;  %v3143_v60 = vperm.slane %v9817_v28, %v8304_v11 }
 0x6bf   :  { %v2889_v42 = vpop.permute.xlu0 %2888  ;;  %v3086_v43 = vsel %vm1736_vm6, %v3085_v56, %v3084_v26  ;;  %v3087_v18 = vperm.slane %v12767_v16, %v8335_v4  ;;  %v3117_v30 = vsel %vm1736_vm6, %v3116_v50, %v3115_v38  ;;  %v12771_v38 = vld [vmem:[#allocation71_spill] sm:$0xff]  ;;  %v12781_v16 = vld [vmem:[#allocation194_spill] sm:$0xff] }
 0x6c0   :  { %v2883_v29 = vpop.permute.xlu1 %2882  ;;  %v3119_v63 = vsel %vm1740_vm7, %v3118_v32, %v3117_v30  ;;  %v3068_v14 = vperm.slane %v12771_v38, %v12712_v20 }
 0x6c1   :  { %v3141_v37 = vperm.slane %v2883_v29, %v8298_v22  ;;  %v3140_v29 = vsel %vm1720_vm2, %v3139_v53, %v3138_v2  ;;  %v12764_v2 = vperm.slane %v12728_v1, %v8358_v19  ;;  %v3059_v53 = vsel %vm12768_vm15, %v3058_v6, %v3057_v58  ;;  %v12769_v1 = vld [vmem:[#allocation198_spill] sm:$0xff]  ;;  %v12772_v58 = vld [vmem:[#allocation172_spill] sm:$0xff] }
 0x6c2   :  { %v3120_v12 = vperm.slane %v12769_v1, %v8358_v19  ;;  %v3061_v26 = vsel %vm12770_vm8, %v3060_v40, %v3059_v53  ;;  %v3091_v55 = vperm.slane %v12772_v58, %v8370_v27  ;;  %v3124_v40 = vperm.slane %v9708_v45, %v8379_v17  ;;  %v12785_v53 = vld [vmem:[#allocation191_spill] sm:$0xff] }
 0x6c3   :  { %v3142_v52 = vsel %vm11996_vm3, %v3141_v37, %v3140_v29  ;;  %v3028_v8 = vsel %vm12765_vm11, %v12764_v2, %v3026_v44  ;;  %v3031_v37 = vperm.slane %v12766_v51, %v8379_v17  ;;  %v3088_v44 = vsel %vm1740_vm7, %v3087_v18, %v3086_v43  ;;  %vm12773_vm11 = vmmov %vm12770_vm8 }
 0x6c4   :  { %v3144_v56 = vsel %vm11995_vm4, %v3143_v60, %v3142_v52  ;;  %v3145_v29 = vperm.slane %v2889_v42, %v8320_v13  ;;  %v3030_v32 = vsel %vm12773_vm11, %v3029_v46, %v3028_v8  ;;  %v3090_v50 = vsel %vm12768_vm15, %v3089_v0, %v3088_v44  ;;  %vm12775_vm3 = vmmov %vm12768_vm15  ;;  %v12776_v42 = vld [vmem:[#allocation58_spill] sm:$0xff]  ;;  %v2904_v46 = vpop.permute.xlu2 %2903  ;;  %v12779_v8 = vld [vmem:[#allocation67_spill] sm:$0xff] }
 0x6c5   :  { %vm12774_vm4 = vcmask 786112   ;;  %v3121_v61 = vsel %vm12775_vm3, %v3120_v12, %v3119_v63  ;;  %v3064_v60 = vperm.slane %v12776_v42, %v8386_v31  ;;  %v12777_v43 = vperm.slane %v12740_v15, %v8379_v17  ;;  %vm12780_vm3 = vmmov %vm12773_vm11  ;;  %v12782_v15 = vld [vmem:[#allocation62_spill] sm:$0xff] }
 0x6c6   :  { %v3032_v52 = vsel %vm12774_vm4, %v3031_v37, %v3030_v32  ;;  %v3146_v6 = vsel %vm1732_vm5, %v3145_v29, %v3144_v56  ;;  %vm12778_vm8 = vmmov %vm12774_vm4  ;;  %v3122_v0 = vperm.slane %v9665_v33, %v8370_v27  ;;  %v3066_v51 = vperm.slane %v12779_v8, %v8423_v57  ;;  %v12790_v32 = vld [vmem:[#allocation20_spill] sm:$0xff] }
 0x6c7   :  { %v2898_v54 = vpop.permute.xlu0 %2897  ;;  %v3063_v9 = vsel %vm12778_vm8, %v12777_v43, %v3061_v26  ;;  %v3149_v45 = vperm.slane %v2895_v41, %v8335_v4  ;;  %v3092_v37 = vsel %vm12780_vm3, %v3091_v55, %v3090_v50  ;;  %v3095_v18 = vperm.slane %v12781_v16, %v8386_v31  ;;  %vm12786_vm11 = vmmov %vm12780_vm3  ;;  %v12787_v41 = vld [vmem:[#allocation68_spill] sm:$0xff]  ;;  %v12797_v16 = vld [vmem:[#allocation193_spill] sm:$0xff] }
 0x6c8   :  { %v2892_v28 = vpop.permute.xlu1 %2891  ;;  %v3035_v30 = vperm.slane %v12782_v15, %v8423_v57  ;;  %vm12784_vm4 = vcmask 851712   ;;  %v3093_v63 = vperm.slane %v12785_v53, %v8379_v17  ;;  %v3123_v56 = vsel %vm12786_vm11, %v3122_v0, %v3121_v61  ;;  %vm12789_vm3 = vmmov %vm12778_vm8  ;;  %v12801_v53 = vld [vmem:[#allocation199_spill] sm:$0xff] }
 0x6c9   :  { %v3147_v3 = vperm.slane %v2892_v28, %v8326_v25  ;;  %v12783_v28 = vperm.slane %v12730_v7, %v8386_v31  ;;  %v3037_v1 = vperm.slane %v12787_v41, %v12712_v20  ;;  %vm12788_vm15 = vmmov %vm12784_vm4  ;;  %v3125_v26 = vsel %vm12778_vm8, %v3124_v40, %v3123_v56 }
 0x6ca   :  { %v3065_v12 = vsel %vm12788_vm15, %v3064_v60, %v3063_v9  ;;  %v3126_v7 = vperm.slane %v9645_v36, %v8386_v31  ;;  %v3094_v38 = vsel %vm12789_vm3, %v3093_v63, %v3092_v37  ;;  %v3151_v58 = vperm.slane %v2898_v54, %v8358_v19  ;;  %vm12792_vm11 = vmmov %vm12784_vm4 }
 0x6cb   :  { %v3148_v2 = vsel %vm1736_vm6, %v3147_v3, %v3146_v6  ;;  %v3034_v33 = vsel %vm12784_vm4, %v12783_v28, %v3032_v52  ;;  %v3008_v50 = vperm.slane %v12790_v32, %v12716_v21  ;;  %v3067_v61 = vsel %vm1760_vm12, %v3066_v51, %v3065_v12  ;;  %v12791_v6 = vld [vmem:[#allocation176_spill] sm:$0xff] }
 0x6cc   :  { %v3150_v44 = vsel %vm1740_vm7, %v3149_v45, %v3148_v2  ;;  %v3036_v52 = vsel %vm1760_vm12, %v3035_v30, %v3034_v33  ;;  %v3096_v40 = vsel %vm12784_vm4, %v3095_v18, %v3094_v38  ;;  %v3097_v42 = vperm.slane %v12791_v6, %v8423_v57  ;;  %v12795_v45 = vld [vmem:[#allocation196_spill] sm:$0xff]  ;;  %v2913_v30 = vpop.permute.xlu2 %2912 }
 0x6cd   :  { %v3127_v36 = vsel %vm12792_vm11, %v3126_v7, %v3125_v26  ;;  %v3130_v60 = vperm.slane %v9749_v48, %v12712_v20  ;;  %vm12793_vm15 = vcmask 654912   ;;  %v3007_v43 = vsel %vm1764_vm13, %v3006_v47, %v9831_v49  ;;  %v12796_v49 = vld [vmem:[#allocation167_spill] sm:$0xff] }
 0x6ce   :  { %v3152_v54 = vsel %vm12793_vm15, %v3151_v58, %v3150_v44  ;;  %v3038_v9 = vsel %vm1764_vm13, %v3037_v1, %v3036_v52  ;;  %v3128_v0 = vperm.slane %v9700_v24, %v8423_v57  ;;  %vm12794_vm8 = vcmask 720512  }
 0x6cf   :  { %v2907_v3 = vpop.permute.xlu0 %2906  ;;  %v3069_v8 = vsel %vm1764_vm13, %v3068_v14, %v3067_v61  ;;  %v3155_v51 = vperm.slane %v2904_v46, %v8379_v17  ;;  %v3098_v48 = vsel %vm1760_vm12, %v3097_v42, %v3096_v40  ;;  %v3101_v37 = vperm.slane %v12795_v45, %v12716_v21  ;;  %v12811_v45 = vld [vmem:[#allocation131_spill] sm:$0xff] }
 0x6d0   :  { %v2901_v29 = vpop.permute.xlu1 %2900  ;;  %v3009_v59 = vsel %vm1768_vm14, %v3008_v50, %v3007_v43  ;;  %v3070_v47 = vperm.slane %v12796_v49, %v12716_v21  ;;  %v3099_v18 = vperm.slane %v12797_v16, %v12712_v20  ;;  %v3129_v24 = vsel %vm1760_vm12, %v3128_v0, %v3127_v36  ;;  %v12808_v43 = vld [vmem:[#allocation127_spill] sm:$0xff]  ;;  %v12809_v0 = vld [vmem:[#allocation125_spill] sm:$0xff] }
 0x6d1   :  { %v3153_v55 = vperm.slane %v2901_v29, %v8370_v27  ;;  %vm12798_vm3 = vcmask 1041409   ;;  %v12799_v46 = vperm.slane %v12733_v35, %v12716_v21  ;;  %v3131_v28 = vsel %vm1764_vm13, %v3130_v60, %v3129_v24  ;;  %v12807_v60 = vld [vmem:[#allocation138_spill] sm:$0xff] }
 0x6d2   :  { %v3165_v14 = vsel %vm12798_vm3, %v9774_v39, %v9746_v34  ;;  %vm12800_vm4 = vcmask 786112   ;;  %v3132_v63 = vperm.slane %v12801_v53, %v12716_v21  ;;  %v3100_v56 = vsel %vm1764_vm13, %v3099_v18, %v3098_v48  ;;  %v12814_v18 = vld [vmem:[#allocation130_spill] sm:$0xff]  ;;  %v12818_v53 = vld [vmem:[#allocation157_spill] sm:$0xff] }
 0x6d3   :  { %v3154_v2 = vsel %vm12794_vm8, %v3153_v55, %v3152_v54  ;;  %v3040_v15 = vsel %vm1768_vm14, %v12799_v46, %v3038_v9  ;;  %v3157_v41 = vperm.slane %v2907_v3, %v8386_v31  ;;  %v3071_v34 = vsel %vm1768_vm14, %v3070_v47, %v3069_v8  ;;  %v12813_v47 = vld [vmem:[#allocation128_spill] sm:$0xff] }
 0x6d4   :  { %v3156_v33 = vsel %vm12800_vm4, %v3155_v51, %v3154_v2  ;;  %vm12802_vm11 = vcmask 1042434   ;;  %v3102_v35 = vsel %vm1768_vm14, %v3101_v37, %v3100_v56  ;;  %v3161_v44 = vperm.slane %v2913_v30, %v12712_v20  ;;  %v12810_v51 = vld [vmem:[#allocation148_spill] sm:$0xff]  ;;  %v12819_v56 = vld [vmem:[#allocation141_spill] sm:$0xff] }
 0x6d5   :  { %v3166_v39 = vsel %vm12802_vm11, %v3009_v59, %v3165_v14  ;;  %vm12803_vm15 = vcmask 851712   ;;  %v3133_v7 = vsel %vm1768_vm14, %v3132_v63, %v3131_v28  ;;  %vm12804_vm8 = vcmask 1045509   ;;  %v12812_v59 = vld [vmem:[#allocation154_spill] sm:$0xff]  ;;  %v12815_v14 = vld [vmem:[#allocation147_spill] sm:$0xff] }
 0x6d6   :  { %v3158_v29 = vsel %vm12803_vm15, %v3157_v41, %v3156_v33  ;;  %v3167_v38 = vsel %vm1991_vm9, %v3040_v15, %v3166_v39  ;;  %vm12805_vm3 = vcmask 1046534   ;;  %vm12806_vm4 = vcmask 1047559   ;;  %v12816_v15 = vld [vmem:[#allocation124_spill] sm:$0xff]  ;;  %v12817_v28 = vld [vmem:[#allocation142_spill] sm:$0xff] }
 0x6d7   :  { %v2916_v1 = vpop.permute.xlu0 %2915  ;;  %v3168_v55 = vsel %vm1993_vm10, %v3071_v34, %v3167_v38  ;;  %v12821_v34 = vld [vmem:[#allocation133_spill] sm:$0xff]  ;;  %vm4602_vm11 = vcmask 261120   ;;  %vm12858_vm15 = vcmask 326912  }
 0x6d8   :  { %v2910_v12 = vpop.permute.xlu1 %2909  ;;  %v3163_v3 = vperm.slane %v2916_v1, %v12716_v21  ;;  %v3169_v50 = vsel %vm12804_vm8, %v3102_v35, %v3168_v55  ;;  %v12820_v1 = vld [vmem:[#allocation151_spill] sm:$0xff]  ;;  %v12822_v35 = vld [vmem:[#allocation161_spill] sm:$0xff]  ;;  %vm12860_vm8 = vcmask 392512  }
 0x6d9   :  { %v3159_v26 = vperm.slane %v2910_v12, %v8423_v57  ;;  %v3170_v61 = vsel %vm12805_vm3, %v3133_v7, %v3169_v50  ;;  %v12824_v7 = vld [vmem:[#allocation144_spill] sm:$0xff]  ;;  %vm12867_vm3 = vcmask 654912  }
 0x6db   :  { %v3160_v58 = vsel %vm1760_vm12, %v3159_v26, %v3158_v29 }
 0x6dc   :  { %v3162_v32 = vsel %vm1764_vm13, %v3161_v44, %v3160_v58  ;;  %v12823_v44 = vld [vmem:[#allocation137_spill] sm:$0xff]  ;;  %v12825_v58 = vld [vmem:[#allocation150_spill] sm:$0xff] }
 0x6dd   :  { %v3164_v52 = vsel %vm1768_vm14, %v3163_v3, %v3162_v32  ;;  %v12826_v32 = vld [vmem:[#allocation155_spill] sm:$0xff] }
 0x6de   :  { %v3171_v40 = vsel %vm12806_vm4, %v3164_v52, %v3170_v61  ;;  %v12827_v52 = vld [vmem:[#allocation145_spill] sm:$0xff]  ;;  %vm12868_vm4 = vcmask 720512  }
 0x6df   :  { %3173 = vadd.xlane.f32.xlu1 %v3171_v40  ;;  %v12828_v40 = vld [vmem:[#allocation146_spill] sm:$0xff] }
 0x752   :  { %v3174_v6 = vpop.xlane.xlu1 %3173 }
 0x753   :  { %6634 = vrcp.f32 %v3174_v6 }
 0x759   :  { %v10031_v42 = vpop.eup %6634 }
 0x75a   :  { %v3177_v36 = vperm.slane %v10031_v42, 0  ;;  %v10038_v8 = vperm.slane %v10031_v42, 1  ;;  %v10061_v3 = vperm.slane %v10031_v42, 2 }
 0x75c   :  { %v3204_v54 = vmul.f32 %v12807_v60, %v3177_v36  ;;  %v3194_v9 = vmul.f32 %v12808_v43, %v3177_v36  ;;  %v3193_v2 = vmul.f32 %v12809_v0, %v3177_v36  ;;  %v3211_v48 = vmul.f32 %v12810_v51, %v10038_v8  ;;  %v12829_v60 = vld [vmem:[#allocation149_spill] sm:$0xff]  ;;  %v12830_v43 = vld [vmem:[#allocation160_spill] sm:$0xff]  ;;  %v12831_v0 = vld [vmem:[#allocation158_spill] sm:$0xff] }
 0x75d   :  { %v3196_v37 = vmul.f32 %v12811_v45, %v3177_v36  ;;  %v3195_v49 = vmul.f32 %v12812_v59, %v3177_v36  ;;  %v3214_v16 = vmul.f32 %v12813_v47, %v10038_v8  ;;  %v3198_v24 = vmul.f32 %v12814_v18, %v3177_v36  ;;  %v12832_v51 = vld [vmem:[#allocation153_spill] sm:$0xff]  ;;  %v12833_v45 = vld [vmem:[#allocation162_spill] sm:$0xff]  ;;  %v12834_v59 = vld [vmem:[#allocation163_spill] sm:$0xff] }
 0x75e   :  { %3483 = vperm.xlu1 %6117, %v3204_v54   ;;  %3453 = vperm.xlu0 %6118, %v3194_v9   ;;  %v3197_v46 = vmul.f32 %v12815_v14, %v3177_v36  ;;  %v3217_v30 = vmul.f32 %v12816_v15, %v10038_v8  ;;  %v3200_v33 = vmul.f32 %v12817_v28, %v3177_v36 }
 0x75f   :  { %3450 = vperm.xlu2 %6116, %v3193_v2   ;;  %v3199_v63 = vmul.f32 %v12818_v53, %v3177_v36  ;;  %v3220_v41 = vmul.f32 %v12819_v56, %v10038_v8  ;;  %v3202_v12 = vmul.f32 %v12820_v1, %v3177_v36  ;;  %v3201_v39 = vmul.f32 %v12821_v34, %v3177_v36  ;;  %v12840_v53 = vld [vmem:[#allocation178_spill] sm:$0xff]  ;;  %v12841_v56 = vld [vmem:[#allocation164_spill] sm:$0xff]  ;;  %v12842_v1 = vld [vmem:[#allocation187_spill] sm:$0xff] }
 0x760   :  { %v3223_v26 = vmul.f32 %v12822_v35, %v10038_v8  ;;  %v3205_v29 = vmul.f32 %v12823_v44, %v3177_v36  ;;  %v3203_v38 = vmul.f32 %v12824_v7, %v3177_v36  ;;  %v3226_v55 = vmul.f32 %v12825_v58, %v10061_v3 }
 0x761   :  { %v3207_v50 = vmul.f32 %v12826_v32, %v3177_v36  ;;  %v3206_v61 = vmul.f32 %v12827_v52, %v3177_v36  ;;  %v3229_v6 = vmul.f32 %v12828_v40, %v10061_v3  ;;  %v3209_v54 = vmul.f32 %v12829_v60, %v10038_v8 }
 0x762   :  { %v3208_v9 = vmul.f32 %v12830_v43, %v3177_v36  ;;  %v3232_v2 = vmul.f32 %v12831_v0, %v10061_v3  ;;  %v12835_v36 = vld [vmem:[#allocation156_spill] sm:$0xff] }
 0x763   :  { %v3215_v47 = vmul.f32 %v12835_v36, %v10038_v8  ;;  %v10130_v36 = vperm.slane %v10031_v42, 6 }
 0x766   :  { %3504 = vperm.xlu1 %6117, %v3211_v48   ;;  %3459 = vperm.xlu0 %6118, %v3196_v37   ;;  %v3212_v48 = vmul.f32 %v12832_v51, %v10038_v8  ;;  %v3210_v37 = vmul.f32 %v12833_v45, %v10038_v8  ;;  %v12852_v45 = vld [vmem:[#allocation168_spill] sm:$0xff] }
 0x767   :  { %3456 = vperm.xlu2 %6116, %v3195_v49   ;;  %v3235_v49 = vmul.f32 %v12834_v59, %v10061_v3 }
 0x76e   :  { %3513 = vperm.xlu1 %6117, %v3214_v16   ;;  %3465 = vperm.xlu0 %6118, %v3198_v24   ;;  %v12836_v16 = vld [vmem:[#allocation179_spill] sm:$0xff]  ;;  %v12837_v24 = vld [vmem:[#allocation186_spill] sm:$0xff] }
 0x76f   :  { %3462 = vperm.xlu2 %6116, %v3197_v46   ;;  %v3213_v18 = vmul.f32 %v12836_v16, %v10038_v8  ;;  %v3238_v14 = vmul.f32 %v12837_v24, %v10061_v3  ;;  %v12838_v46 = vld [vmem:[#allocation169_spill] sm:$0xff] }
 0x770   :  { %v3218_v15 = vmul.f32 %v12838_v46, %v10038_v8 }
 0x776   :  { %3522 = vperm.xlu1 %6117, %v3217_v30   ;;  %3471 = vperm.xlu0 %6118, %v3200_v33   ;;  %v12839_v30 = vld [vmem:[#allocation184_spill] sm:$0xff]  ;;  %v10091_v33 = vperm.slane %v10031_v42, 3 }
 0x777   :  { %3468 = vperm.xlu2 %6116, %v3199_v63   ;;  %v3216_v28 = vmul.f32 %v12839_v30, %v10038_v8 }
 0x778   :  { %v3241_v63 = vmul.f32 %v12840_v53, %v10091_v33 }
 0x77e   :  { %3531 = vperm.xlu1 %6117, %v3220_v41   ;;  %3477 = vperm.xlu0 %6118, %v3202_v12   ;;  %v3221_v41 = vmul.f32 %v12841_v56, %v10038_v8  ;;  %v3219_v12 = vmul.f32 %v12842_v1, %v10038_v8  ;;  %v12853_v1 = vld [vmem:[#allocation32_spill] sm:$0xff] }
 0x77f   :  { %3474 = vperm.xlu2 %6116, %v3201_v39   ;;  %v12843_v39 = vld [vmem:[#allocation175_spill] sm:$0xff] }
 0x780   :  { %v3244_v35 = vmul.f32 %v12843_v39, %v10091_v33 }
 0x786   :  { %3540 = vperm.xlu1 %6117, %v3223_v26   ;;  %3486 = vperm.xlu0 %6118, %v3205_v29   ;;  %v12844_v26 = vld [vmem:[#allocation165_spill] sm:$0xff]  ;;  %v12845_v29 = vld [vmem:[#allocation159_spill] sm:$0xff] }
 0x787   :  { %3480 = vperm.xlu2 %6116, %v3203_v38   ;;  %v3224_v44 = vmul.f32 %v12844_v26, %v10038_v8  ;;  %v3222_v7 = vmul.f32 %v12845_v29, %v10038_v8  ;;  %v10106_v38 = vperm.slane %v10031_v42, 4  ;;  %v10115_v8 = vperm.slane %v10031_v42, 5  ;;  %v12855_v29 = vld [vmem:[#allocation182_spill] sm:$0xff] }
 0x78e   :  { %3549 = vperm.xlu1 %6117, %v3226_v55   ;;  %3492 = vperm.xlu0 %6118, %v3207_v50   ;;  %v12846_v55 = vld [vmem:[#allocation99_spill] sm:$0xff] }
 0x78f   :  { %3489 = vperm.xlu2 %6116, %v3206_v61   ;;  %v3257_v32 = vmul.f32 %v12846_v55, %v10106_v38  ;;  %v12847_v50 = vld [vmem:[#allocation171_spill] sm:$0xff]  ;;  %v12848_v61 = vld [vmem:[#allocation185_spill] sm:$0xff] }
 0x790   :  { %v3227_v52 = vmul.f32 %v12847_v50, %v10061_v3  ;;  %v3225_v40 = vmul.f32 %v12848_v61, %v10061_v3 }
 0x796   :  { %3558 = vperm.xlu1 %6117, %v3229_v6   ;;  %3498 = vperm.xlu0 %6118, %v3209_v54   ;;  %v5778_v6 = vld [vmem:[%s12849_s26] sm:$0xff]   ;;  %v6033_v54 = vld [vmem:[%s12849_s26 + $0x8] sm:$0xff]  }
 0x797   :  { %3495 = vperm.xlu2 %6116, %v3208_v9   ;;  %v5779_v43 = vunpack.c.l.bf16 %v5778_v6  ;;  %v12850_v9 = vld [vmem:[#allocation117_spill] sm:$0xff]  ;;  %v5780_v59 = vunpack.c.h.bf16 %v5778_v6 }
 0x798   :  { %v3274_v0 = vmul.f32 %v12850_v9, %v10115_v8 }
 0x79e   :  { %3567 = vperm.xlu1 %6117, %v3232_v2   ;;  %3507 = vperm.xlu0 %6118, %v3212_v48   ;;  %v12851_v2 = vld [vmem:[#allocation180_spill] sm:$0xff]  ;;  %v5783_v48 = vunpack.c.l.bf16 %v6033_v54 }
 0x79f   :  { %3501 = vperm.xlu2 %6116, %v3210_v37   ;;  %v3230_v51 = vmul.f32 %v12851_v2, %v10061_v3  ;;  %v3228_v37 = vmul.f32 %v12852_v45, %v10061_v3  ;;  %v12857_v45 = vld [vmem:[#allocation183_spill] sm:$0xff] }
 0x7a6   :  { %3576 = vperm.xlu1 %6117, %v3235_v49   ;;  %3516 = vperm.xlu0 %6118, %v3215_v47  }
 0x7a7   :  { %3510 = vperm.xlu2 %6116, %v3213_v18  }
 0x7ae   :  { %3585 = vperm.xlu1 %6117, %v3238_v14   ;;  %3525 = vperm.xlu0 %6118, %v3218_v15  }
 0x7af   :  { %3519 = vperm.xlu2 %6116, %v3216_v28   ;;  %v6034_v28 = vld [vmem:[%s12849_s26 + $0x10] sm:$0xff]  }
 0x7b6   :  { %3594 = vperm.xlu1 %6117, %v3241_v63   ;;  %3534 = vperm.xlu0 %6118, %v3221_v41  }
 0x7b7   :  { %3528 = vperm.xlu2 %6116, %v3219_v12   ;;  %v3290_v12 = vmul.f32 %v12853_v1, %v10130_v36 }
 0x7b9   :  { %v3451_v34 = vpop.permute.xlu2 %3450 }
 0x7ba   :  { %v4474_v49 = vmul.f32 %v5779_v43, %v3451_v34  ;;  %v3833_v18 = vperm.slane %v3451_v34, %v8267_v62  ;;  %v12854_v34 = vld [vmem:[#allocation166_spill] sm:$0xff] }
 0x7bb   :  { %v3233_v39 = vmul.f32 %v12854_v34, %v10061_v3 }
 0x7bc   :  { %v4603_v53 = vsel %vm4602_vm11, %v4474_v49, 0.0 }
 0x7be   :  { %3603 = vperm.xlu1 %6117, %v3244_v35   ;;  %3543 = vperm.xlu0 %6118, %v3224_v44   ;;  %v5787_v44 = vunpack.c.l.bf16 %v6034_v28 }
 0x7bf   :  { %3537 = vperm.xlu2 %6116, %v3222_v7   ;;  %v3231_v7 = vmul.f32 %v12855_v29, %v10061_v3 }
 0x7c1   :  { %v3457_v58 = vpop.permute.xlu2 %3456 }
 0x7c2   :  { %v4476_v24 = vmul.f32 %v5783_v48, %v3457_v58  ;;  %v3836_v30 = vperm.slane %v3457_v58, %v8277_v5  ;;  %v5784_v58 = vunpack.c.h.bf16 %v6033_v54  ;;  %v6035_v54 = vld [vmem:[%s12849_s26 + $0x18] sm:$0xff]  }
 0x7c4   :  { %v4606_v26 = vsel %vm4602_vm11, %v4476_v24, 0.0  ;;  %v5788_v24 = vunpack.c.h.bf16 %v6034_v28 }
 0x7c6   :  { %3642 = vperm.xlu1 %6117, %v3257_v32   ;;  %3552 = vperm.xlu0 %6118, %v3227_v52   ;;  %v10152_v32 = vperm.slane %v10031_v42, 7 }
 0x7c7   :  { %3546 = vperm.xlu2 %6116, %v3225_v40  }
 0x7c9   :  { %v3463_v60 = vpop.permute.xlu2 %3462 }
 0x7ca   :  { %v4478_v61 = vmul.f32 %v5787_v44, %v3463_v60  ;;  %v3840_v9 = vperm.slane %v3463_v60, %v8298_v22  ;;  %v5791_v60 = vunpack.c.l.bf16 %v6035_v54  ;;  %v12862_v44 = vld [vmem:[#allocation89_spill] sm:$0xff] }
 0x7cb   :  { %v3239_v29 = vmul.f32 %v12862_v44, %v10061_v3 }
 0x7cc   :  { %v4610_v49 = vsel %vm4602_vm11, %v4478_v61, 0.0  ;;  %v5792_v61 = vunpack.c.h.bf16 %v6035_v54  ;;  %v6037_v54 = vld [vmem:[%s12849_s26 + $0x28] sm:$0xff]  }
 0x7ce   :  { %3693 = vperm.xlu1 %6117, %v3274_v0   ;;  %3561 = vperm.xlu0 %6118, %v3230_v51   ;;  %v12856_v51 = vld [vmem:[#allocation52_spill] sm:$0xff] }
 0x7cf   :  { %3555 = vperm.xlu2 %6116, %v3228_v37   ;;  %v3306_v48 = vmul.f32 %v12856_v51, %v10152_v32  ;;  %v3236_v37 = vmul.f32 %v12857_v45, %v10061_v3 }
 0x7d0   :  { %v10132_v47 = vpop.permute.xlu1 %3483  ;;  %v3454_v16 = vpop.permute.xlu0 %3453 }
 0x7d1   :  { %v3834_v14 = vperm.slane %v3454_v16, %v8274_v23  ;;  %v4475_v46 = vmul.f32 %v5780_v59, %v3454_v16  ;;  %v3469_v15 = vpop.permute.xlu2 %3468  ;;  %v12859_v16 = vld [vmem:[#allocation189_spill] sm:$0xff] }
 0x7d2   :  { %v3844_v1 = vperm.slane %v3469_v15, %v8320_v13 }
 0x7d3   :  { %v3835_v63 = vsel %vm1712_vm0, %v3834_v14, %v3833_v18  ;;  %v4604_v56 = vsel %vm4602_vm11, %v4475_v46, 0.0  ;;  %v3234_v18 = vmul.f32 %v12859_v16, %v10061_v3  ;;  %v12865_v16 = vld [vmem:[#allocation102_spill] sm:$0xff] }
 0x7d4   :  { %v4605_v41 = vadd.f32 %v4604_v56, %v4603_v53  ;;  %v3837_v35 = vsel %vm1716_vm1, %v3836_v30, %v3835_v63  ;;  %v4480_v53 = vmul.f32 %v5791_v60, %v3469_v15 }
 0x7d6   :  { %3741 = vperm.xlu1 %6117, %v3290_v12   ;;  %3570 = vperm.xlu0 %6118, %v3233_v39   ;;  %v4607_v55 = vadd.f32 %v4606_v26, %v4605_v41  ;;  %v6036_v12 = vld [vmem:[%s12849_s26 + $0x20] sm:$0xff]  }
 0x7d7   :  { %3564 = vperm.xlu2 %6116, %v3231_v7   ;;  %v5795_v15 = vunpack.c.l.bf16 %v6036_v12 }
 0x7d8   :  { %v10154_v50 = vpop.permute.xlu1 %3504  ;;  %v3460_v52 = vpop.permute.xlu0 %3459 }
 0x7d9   :  { %v3838_v40 = vperm.slane %v3460_v52, %v8292_v10  ;;  %v4477_v6 = vmul.f32 %v5784_v58, %v3460_v52  ;;  %v3475_v43 = vpop.permute.xlu2 %3474  ;;  %v4614_v58 = vsel %vm4602_vm11, %v4480_v53, 0.0 }
 0x7db   :  { %v3839_v0 = vsel %vm1720_vm2, %v3838_v40, %v3837_v35  ;;  %v4608_v2 = vsel %vm4602_vm11, %v4477_v6, 0.0  ;;  %v12861_v35 = vld [vmem:[#allocation12_spill] sm:$0xff] }
 0x7dc   :  { %v4609_v42 = vadd.f32 %v4608_v2, %v4607_v55  ;;  %v3841_v59 = vsel %vm12858_vm15, %v3840_v9, %v3839_v0  ;;  %v3276_v26 = vmul.f32 %v12861_v35, %v10115_v8  ;;  %v12863_v55 = vld [vmem:[#allocation81_spill] sm:$0xff]  ;;  %v4482_v0 = vmul.f32 %v5795_v15, %v3475_v43 }
 0x7dd   :  { %v3237_v52 = vmul.f32 %v12863_v55, %v10061_v3  ;;  %vm12872_vm15 = vcmask 786112  }
 0x7de   :  { %3789 = vperm.xlu1 %6117, %v3306_v48   ;;  %3579 = vperm.xlu0 %6118, %v3236_v37   ;;  %v4611_v14 = vadd.f32 %v4610_v49, %v4609_v42  ;;  %v3848_v48 = vperm.slane %v3475_v43, %v8335_v4  ;;  %v12864_v49 = vld [vmem:[#allocation112_spill] sm:$0xff]  ;;  %v5799_v43 = vunpack.c.l.bf16 %v6037_v54 }
 0x7df   :  { %3573 = vperm.xlu2 %6116, %v3234_v18   ;;  %v3292_v60 = vmul.f32 %v12864_v49, %v10130_v36  ;;  %v3242_v18 = vmul.f32 %v12865_v16, %v10091_v33 }
 0x7e0   :  { %v10171_v46 = vpop.permute.xlu1 %3513  ;;  %v3466_v30 = vpop.permute.xlu0 %3465 }
 0x7e1   :  { %v3842_v63 = vperm.slane %v3466_v30, %v8304_v11  ;;  %v4479_v56 = vmul.f32 %v5788_v24, %v3466_v30  ;;  %v3481_v41 = vpop.permute.xlu2 %3480  ;;  %v12866_v30 = vld [vmem:[#allocation79_spill] sm:$0xff] }
 0x7e2   :  { %v3240_v53 = vmul.f32 %v12866_v30, %v10061_v3  ;;  %v4484_v35 = vmul.f32 %v5799_v43, %v3481_v41  ;;  %v3852_v3 = vperm.slane %v3481_v41, %v8370_v27  ;;  %v6039_v30 = vld [vmem:[%s12849_s26 + $0x38] sm:$0xff]  }
 0x7e3   :  { %v3843_v28 = vsel %vm12860_vm8, %v3842_v63, %v3841_v59  ;;  %v4612_v34 = vsel %vm4602_vm11, %v4479_v56, 0.0  ;;  %v5796_v63 = vunpack.c.h.bf16 %v6036_v12  ;;  %vm12873_vm8 = vcmask 851712  }
 0x7e4   :  { %v4613_v39 = vadd.f32 %v4612_v34, %v4611_v14  ;;  %v3845_v7 = vsel %vm1732_vm5, %v3844_v1, %v3843_v28  ;;  %v4618_v14 = vsel %vm4602_vm11, %v4482_v0, 0.0  ;;  %v5800_v1 = vunpack.c.h.bf16 %v6037_v54  ;;  %v6038_v28 = vld [vmem:[%s12849_s26 + $0x30] sm:$0xff]   ;;  %v12870_v0 = vld [vmem:[#allocation85_spill] sm:$0xff] }
 0x7e5   :  { %v5804_v12 = vunpack.c.h.bf16 %v6038_v28  ;;  %v4622_v41 = vsel %vm4602_vm11, %v4484_v35, 0.0 }
 0x7e6   :  { %3699 = vperm.xlu1 %6117, %v3276_v26   ;;  %3588 = vperm.xlu0 %6118, %v3239_v29   ;;  %v4615_v40 = vadd.f32 %v4614_v58, %v4613_v39  ;;  %v4485_v58 = vmul.f32 %v5800_v1, %v10132_v47  ;;  %v12874_v1 = vld [vmem:[#allocation33_spill] sm:$0xff] }
 0x7e7   :  { %3582 = vperm.xlu2 %6116, %v3237_v52  }
 0x7e8   :  { %v10188_v6 = vpop.permute.xlu1 %3522  ;;  %v3472_v9 = vpop.permute.xlu0 %3471  ;;  %v4624_v54 = vsel %vm4602_vm11, %v4485_v58, 0.0 }
 0x7e9   :  { %v3846_v2 = vperm.slane %v3472_v9, %v8326_v25  ;;  %v4481_v42 = vmul.f32 %v5792_v61, %v3472_v9  ;;  %v3490_v51 = vpop.permute.xlu2 %3489 }
 0x7ea   :  { %v4487_v16 = vmul.f32 %v5804_v12, %v3490_v51  ;;  %v3858_v43 = vperm.slane %v3490_v51, %v8423_v57  ;;  %v5808_v51 = vunpack.c.h.bf16 %v6039_v30 }
 0x7eb   :  { %v3847_v45 = vsel %vm1736_vm6, %v3846_v2, %v3845_v7  ;;  %v4616_v37 = vsel %vm4602_vm11, %v4481_v42, 0.0  ;;  %v3854_v7 = vperm.slane %v10132_v47, %v8379_v17  ;;  %v3245_v2 = vmul.f32 %v12870_v0, %v10091_v33  ;;  %v12871_v42 = vld [vmem:[#allocation83_spill] sm:$0xff] }
 0x7ec   :  { %v4617_v59 = vadd.f32 %v4616_v37, %v4615_v40  ;;  %v3849_v24 = vsel %vm1740_vm7, %v3848_v48, %v3847_v45  ;;  %v12869_v40 = vld [vmem:[#allocation78_spill] sm:$0xff]  ;;  %v3243_v48 = vmul.f32 %v12871_v42, %v10091_v33  ;;  %v5803_v45 = vunpack.c.l.bf16 %v6038_v28 }
 0x7ed   :  { %v3262_v9 = vmul.f32 %v12869_v40, %v10106_v38  ;;  %v3278_v28 = vmul.f32 %v12874_v1, %v10115_v8 }
 0x7ee   :  { %3747 = vperm.xlu1 %6117, %v3292_v60   ;;  %3597 = vperm.xlu0 %6118, %v3242_v18   ;;  %v4619_v56 = vadd.f32 %v4618_v14, %v4617_v59 }
 0x7ef   :  { %3591 = vperm.xlu2 %6116, %v3240_v53  }
 0x7f0   :  { %v10208_v34 = vpop.permute.xlu1 %3531  ;;  %v3478_v39 = vpop.permute.xlu0 %3477 }
 0x7f1   :  { %v3850_v26 = vperm.slane %v3478_v39, %v8358_v19  ;;  %v4483_v44 = vmul.f32 %v5796_v63, %v3478_v39  ;;  %v3496_v29 = vpop.permute.xlu2 %3495  ;;  %v12875_v39 = vld [vmem:[#allocation98_spill] sm:$0xff] }
 0x7f2   :  { %v3258_v35 = vmul.f32 %v12875_v39, %v10106_v38 }
 0x7f3   :  { %v3851_v15 = vsel %vm12867_vm3, %v3850_v26, %v3849_v24  ;;  %v4620_v55 = vsel %vm4602_vm11, %v4483_v44, 0.0  ;;  %v4628_v44 = vsel %vm4602_vm11, %v4487_v16, 0.0  ;;  %vm12884_vm3 = vcmask 326912  }
 0x7f4   :  { %v3853_v52 = vsel %vm12868_vm4, %v3852_v3, %v3851_v15  ;;  %v4621_v61 = vadd.f32 %v4620_v55, %v4619_v56  ;;  %v12876_v3 = vld [vmem:[#allocation111_spill] sm:$0xff]  ;;  %v6040_v15 = vld [vmem:[%s12849_s26 + $0x40] sm:$0xff]   ;;  %vm12887_vm4 = vcmask 392512  }
 0x7f5   :  { %v3855_v47 = vsel %vm12872_vm15, %v3854_v7, %v3853_v52  ;;  %v3246_v12 = vmul.f32 %v12876_v3, %v10091_v33  ;;  %v5807_v7 = vunpack.c.l.bf16 %v6039_v30  ;;  %v5812_v42 = vunpack.c.h.bf16 %v6040_v15 }
 0x7f6   :  { %v4623_v37 = vadd.f32 %v4622_v41, %v4621_v61  ;;  %3657 = vperm.xlu1 %6117, %v3262_v9   ;;  %3606 = vperm.xlu0 %6118, %v3245_v2   ;;  %v4489_v61 = vmul.f32 %v5808_v51, %v3496_v29  ;;  %v6041_v2 = vld [vmem:[%s12849_s26 + $0x48] sm:$0xff]   ;;  %v3862_v41 = vperm.slane %v3496_v29, %v12716_v21  ;;  %v12879_v29 = vld [vmem:[#allocation118_spill] sm:$0xff]  ;;  %v5811_v30 = vunpack.c.l.bf16 %v6040_v15 }
 0x7f7   :  { %3600 = vperm.xlu2 %6116, %v3243_v48   ;;  %v3867_v51 = vperm.slane %v10154_v50, %v8277_v5  ;;  %vm12894_vm15 = vcmask 654912  }
 0x7f8   :  { %v10227_v59 = vpop.permute.xlu1 %3540  ;;  %v3487_v49 = vpop.permute.xlu0 %3486  ;;  %v4625_v60 = vadd.f32 %v4624_v54, %v4623_v37  ;;  %v12877_v54 = vld [vmem:[#allocation135_spill] sm:$0xff] }
 0x7f9   :  { %v3856_v18 = vperm.slane %v3487_v49, %v8386_v31  ;;  %v4486_v24 = vmul.f32 %v5803_v45, %v3487_v49  ;;  %v3502_v14 = vpop.permute.xlu2 %3501  ;;  %v3294_v49 = vmul.f32 %v12877_v54, %v10130_v36 }
 0x7fa   :  { %v3865_v39 = vperm.slane %v3502_v14, %v8274_v23 }
 0x7fb   :  { %v3857_v53 = vsel %vm12873_vm8, %v3856_v18, %v3855_v47  ;;  %v4626_v63 = vsel %vm4602_vm11, %v4486_v24, 0.0  ;;  %v5815_v18 = vunpack.c.l.bf16 %v6041_v2  ;;  %v4632_v24 = vsel %vm4602_vm11, %v4489_v61, 0.0  ;;  %v12881_v61 = vld [vmem:[#allocation119_spill] sm:$0xff] }
 0x7fc   :  { %v4627_v56 = vadd.f32 %v4626_v63, %v4625_v60  ;;  %v3859_v26 = vsel %vm1760_vm12, %v3858_v43, %v3857_v53  ;;  %v12878_v60 = vld [vmem:[#allocation134_spill] sm:$0xff]  ;;  %v3273_v43 = vmul.f32 %v12879_v29, %v10115_v8  ;;  %v4491_v63 = vmul.f32 %v5812_v42, %v3502_v14  ;;  %v12880_v14 = vld [vmem:[#allocation48_spill] sm:$0xff] }
 0x7fd   :  { %v3259_v16 = vmul.f32 %v12878_v60, %v10106_v38  ;;  %v12882_v42 = vld [vmem:[#allocation110_spill] sm:$0xff]  ;;  %vm12895_vm8 = vcmask 720512  }
 0x7fe   :  { %3705 = vperm.xlu1 %6117, %v3278_v28   ;;  %3645 = vperm.xlu0 %6118, %v3258_v35   ;;  %v4629_v58 = vadd.f32 %v4628_v44, %v4627_v56  ;;  %v4492_v28 = vmul.f32 %v5815_v18, %v10154_v50  ;;  %v4641_v3 = vsel %vm4602_vm11, %v4491_v63, 0.0 }
 0x7ff   :  { %3609 = vperm.xlu2 %6116, %v3246_v12  }
 0x800   :  { %v10247_v55 = vpop.permute.xlu1 %3549  ;;  %v3493_v52 = vpop.permute.xlu0 %3492  ;;  %v4643_v50 = vsel %vm4602_vm11, %v4492_v28, 0.0 }
 0x801   :  { %v3860_v40 = vperm.slane %v3493_v52, %v12712_v20  ;;  %v4488_v9 = vmul.f32 %v5807_v7, %v3493_v52  ;;  %v3511_v0 = vpop.permute.xlu2 %3510  ;;  %v3310_v52 = vmul.f32 %v12880_v14, %v10152_v32 }
 0x803   :  { %v3861_v48 = vsel %vm1764_vm13, %v3860_v40, %v3859_v26  ;;  %v4630_v45 = vsel %vm4602_vm11, %v4488_v9, 0.0  ;;  %v3275_v40 = vmul.f32 %v12881_v61, %v10115_v8 }
 0x804   :  { %v10257_v47 = vsel %vm1768_vm14, %v3862_v41, %v3861_v48  ;;  %v4631_v37 = vadd.f32 %v4630_v45, %v4629_v58  ;;  %v6042_v58 = vld [vmem:[%s12849_s26 + $0x50] sm:$0xff]   ;;  %v3289_v48 = vmul.f32 %v12882_v42, %v10130_v36  ;;  %v5816_v45 = vunpack.c.h.bf16 %v6041_v2  ;;  %v6043_v2 = vld [vmem:[%s12849_s26 + $0x58] sm:$0xff]  }
 0x805   :  { %v5819_v41 = vunpack.c.l.bf16 %v6042_v58  ;;  %v5820_v54 = vunpack.c.h.bf16 %v6042_v58  ;;  %v5823_v14 = vunpack.c.l.bf16 %v6043_v2 }
 0x806   :  { %v10266_v53 = vadd.f32 %v4632_v24, %v4631_v37  ;;  %3753 = vperm.xlu1 %6117, %v3294_v49   ;;  %3648 = vperm.xlu0 %6118, %v3259_v16  }
 0x807   :  { %3690 = vperm.xlu2 %6116, %v3273_v43   ;;  %v4494_v16 = vmul.f32 %v5819_v41, %v3511_v0  ;;  %v3873_v43 = vperm.slane %v10171_v46, %v8304_v11  ;;  %v4495_v63 = vmul.f32 %v5820_v54, %v10171_v46  ;;  %v6048_v41 = vld [vmem:[%s12849_s26 + $0x80] sm:$0xff]  }
 0x808   :  { %v10268_v56 = vpop.permute.xlu1 %3558  ;;  %v3499_v1 = vpop.permute.xlu0 %3498 }
 0x809   :  { %v3864_v35 = vperm.slane %v3499_v1, %v8267_v62  ;;  %v4490_v26 = vmul.f32 %v5811_v30, %v3499_v1  ;;  %v10273_v44 = vpop.permute.xlu2 %3519  ;;  %v3871_v30 = vperm.slane %v3511_v0, %v8298_v22  ;;  %v4647_v58 = vsel %vm4602_vm11, %v4494_v16, 0.0 }
 0x80b   :  { %v3866_v12 = vsel %vm1712_vm0, %v3865_v39, %v3864_v35  ;;  %v4640_v7 = vsel %vm4602_vm11, %v4490_v26, 0.0  ;;  %v12883_v39 = vld [vmem:[#allocation94_spill] sm:$0xff] }
 0x80c   :  { %v4642_v15 = vadd.f32 %v4641_v3, %v4640_v7  ;;  %v3868_v9 = vsel %vm1716_vm1, %v3867_v51, %v3866_v12  ;;  %v3249_v35 = vmul.f32 %v12883_v39, %v10091_v33  ;;  %v6044_v26 = vld [vmem:[%s12849_s26 + $0x60] sm:$0xff]   ;;  %v12885_v3 = vld [vmem:[#allocation8_spill] sm:$0xff] }
 0x80d   :  { %v3260_v12 = vmul.f32 %v12885_v3, %v10106_v38  ;;  %v12886_v7 = vld [vmem:[#allocation46_spill] sm:$0xff] }
 0x80e   :  { %3801 = vperm.xlu1 %6117, %v3310_v52   ;;  %3696 = vperm.xlu0 %6118, %v3275_v40   ;;  %v4644_v37 = vadd.f32 %v4643_v50, %v4642_v15  ;;  %v3305_v46 = vmul.f32 %v12886_v7, %v10152_v32  ;;  %v5824_v15 = vunpack.c.h.bf16 %v6043_v2  ;;  %v4649_v40 = vsel %vm4602_vm11, %v4495_v63, 0.0  ;;  %v6045_v50 = vld [vmem:[%s12849_s26 + $0x68] sm:$0xff]  }
 0x80f   :  { %3738 = vperm.xlu2 %6116, %v3289_v48  }
 0x810   :  { %v10291_v49 = vpop.permute.xlu1 %3567  ;;  %v3508_v60 = vpop.permute.xlu0 %3507 }
 0x811   :  { %v3869_v18 = vperm.slane %v3508_v60, %v8292_v10  ;;  %v4493_v24 = vmul.f32 %v5816_v45, %v3508_v60  ;;  %v10294_v29 = vpop.permute.xlu2 %3528 }
 0x813   :  { %v3870_v1 = vsel %vm1720_vm2, %v3869_v18, %v3868_v9  ;;  %v4645_v28 = vsel %vm4602_vm11, %v4493_v24, 0.0  ;;  %v5827_v9 = vunpack.c.l.bf16 %v6044_v26  ;;  %v3879_v18 = vperm.slane %v10188_v6, %v8335_v4 }
 0x814   :  { %v3872_v51 = vsel %vm12884_vm3, %v3871_v30, %v3870_v1  ;;  %v4646_v0 = vadd.f32 %v4645_v28, %v4644_v37  ;;  %v4497_v37 = vmul.f32 %v5824_v15, %v10273_v44  ;;  %v5832_v24 = vunpack.c.h.bf16 %v6045_v50  ;;  %v12888_v28 = vld [vmem:[#allocation105_spill] sm:$0xff] }
 0x815   :  { %v3874_v52 = vsel %vm12887_vm4, %v3873_v43, %v3872_v51  ;;  %v5844_v43 = vunpack.c.h.bf16 %v6048_v41  ;;  %v3877_v30 = vperm.slane %v10273_v44, %v8326_v25  ;;  %v4498_v2 = vmul.f32 %v5827_v9, %v10188_v6 }
 0x816   :  { %v4648_v61 = vadd.f32 %v4647_v58, %v4646_v0  ;;  %3618 = vperm.xlu1 %6117, %v3249_v35   ;;  %3651 = vperm.xlu0 %6118, %v3260_v12   ;;  %v3265_v39 = vmul.f32 %v12888_v28, %v10106_v38  ;;  %v12889_v0 = vld [vmem:[#allocation42_spill] sm:$0xff]  ;;  %v4653_v44 = vsel %vm4602_vm11, %v4497_v37, 0.0  ;;  %v5828_v6 = vunpack.c.h.bf16 %v6044_v26  ;;  %v6046_v26 = vld [vmem:[%s12849_s26 + $0x70] sm:$0xff]  }
 0x817   :  { %3786 = vperm.xlu2 %6116, %v3305_v46   ;;  %v3307_v3 = vmul.f32 %v12889_v0, %v10152_v32  ;;  %v12890_v12 = vld [vmem:[#allocation34_spill] sm:$0xff]  ;;  %v5831_v46 = vunpack.c.l.bf16 %v6045_v50  ;;  %v3896_v28 = vperm.slane %v10247_v55, %v8274_v23  ;;  %vm12896_vm3 = vcmask 786112  }
 0x818   :  { %v10324_v42 = vpop.permute.xlu1 %3576  ;;  %v3517_v48 = vpop.permute.xlu0 %3516  ;;  %v4650_v45 = vadd.f32 %v4649_v40, %v4648_v61  ;;  %v3291_v7 = vmul.f32 %v12890_v12, %v10130_v36  ;;  %v4507_v61 = vmul.f32 %v5844_v43, %v10247_v55  ;;  %v12891_v40 = vld [vmem:[#allocation39_spill] sm:$0xff]  ;;  %v4501_v43 = vmul.f32 %v5832_v24, %v10208_v34  ;;  %v6047_v12 = vld [vmem:[%s12849_s26 + $0x78] sm:$0xff]  }
 0x819   :  { %v3875_v54 = vperm.slane %v3517_v48, %v8320_v13  ;;  %v4496_v60 = vmul.f32 %v5823_v14, %v3517_v48  ;;  %v10328_v16 = vpop.permute.xlu2 %3537  ;;  %v5843_v14 = vunpack.c.l.bf16 %v6048_v41  ;;  %v3281_v9 = vmul.f32 %v12891_v40, %v10115_v8  ;;  %v12892_v41 = vld [vmem:[#allocation93_spill] sm:$0xff] }
 0x81a   :  { %v3885_v48 = vperm.slane %v10208_v34, %v8379_v17  ;;  %v4678_v0 = vsel %vm4602_vm11, %v4507_v61, 0.0  ;;  %v5839_v61 = vunpack.c.l.bf16 %v6047_v12  ;;  %v4634_v40 = vrot.slane %v10266_v53, 4 }
 0x81b   :  { %v3876_v63 = vsel %vm1732_vm5, %v3875_v54, %v3874_v52  ;;  %v4651_v1 = vsel %vm4602_vm11, %v4496_v60, 0.0  ;;  %v4655_v52 = vsel %vm4602_vm11, %v4498_v2, 0.0  ;;  %v3277_v54 = vmul.f32 %v12892_v41, %v10115_v8  ;;  %v12893_v60 = vld [vmem:[#allocation100_spill] sm:$0xff] }
 0x81c   :  { %v3878_v35 = vsel %vm1736_vm6, %v3877_v30, %v3876_v63  ;;  %v4652_v51 = vadd.f32 %v4651_v1, %v4650_v45  ;;  %v4500_v30 = vmul.f32 %v5831_v46, %v10294_v29  ;;  %vm12898_vm4 = vcmask 851712  }
 0x81d   :  { %v3880_v58 = vsel %vm1740_vm7, %v3879_v18, %v3878_v35  ;;  %v3261_v18 = vmul.f32 %v12893_v60, %v10106_v38 }
 0x81e   :  { %v4654_v15 = vadd.f32 %v4653_v44, %v4652_v51  ;;  %3666 = vperm.xlu1 %6117, %v3265_v39   ;;  %3792 = vperm.xlu0 %6118, %v3307_v3   ;;  %v3883_v39 = vperm.slane %v10294_v29, %v8370_v27  ;;  %v5836_v3 = vunpack.c.h.bf16 %v6046_v26  ;;  %v4659_v46 = vsel %vm4602_vm11, %v4500_v30, 0.0 }
 0x81f   :  { %3744 = vperm.xlu2 %6116, %v3291_v7  }
 0x820   :  { %v10355_v50 = vpop.permute.xlu1 %3585  ;;  %v3526_v45 = vpop.permute.xlu0 %3525  ;;  %v4656_v37 = vadd.f32 %v4655_v52, %v4654_v15  ;;  %v5835_v15 = vunpack.c.l.bf16 %v6046_v26  ;;  %v4661_v52 = vsel %vm4602_vm11, %v4501_v43, 0.0  ;;  %v4503_v60 = vmul.f32 %v5836_v3, %v10328_v16  ;;  %v12900_v3 = vld [vmem:[#allocation56_spill] sm:$0xff] }
 0x821   :  { %v3881_v2 = vperm.slane %v3526_v45, %v8358_v19  ;;  %v4499_v63 = vmul.f32 %v5828_v6, %v3526_v45  ;;  %v3547_v1 = vpop.permute.xlu2 %3546  ;;  %v4504_v43 = vmul.f32 %v5839_v61, %v10227_v59 }
 0x822   :  { %v3895_v35 = vperm.slane %v3547_v1, %v8267_v62  ;;  %v4506_v51 = vmul.f32 %v5843_v14, %v3547_v1 }
 0x823   :  { %v3882_v34 = vsel %vm12894_vm15, %v3881_v2, %v3880_v58  ;;  %v4657_v24 = vsel %vm4602_vm11, %v4499_v63, 0.0  ;;  %vm12902_vm15 = vcmask 1041409  }
 0x824   :  { %v3884_v7 = vsel %vm12895_vm8, %v3883_v39, %v3882_v34  ;;  %v4658_v55 = vadd.f32 %v4657_v24, %v4656_v37  ;;  %v10377_v44 = vsel %vm1712_vm0, %v3896_v28, %v3895_v35  ;;  %v4677_v29 = vsel %vm4602_vm11, %v4506_v51, 0.0  ;;  %v12899_v51 = vld [vmem:[#allocation38_spill] sm:$0xff] }
 0x825   :  { %v10381_v6 = vadd.f32 %v4678_v0, %v4677_v29  ;;  %v3886_v58 = vsel %vm12896_vm3, %v3885_v48, %v3884_v7  ;;  %v12897_v48 = vld [vmem:[#allocation44_spill] sm:$0xff]  ;;  %v4635_v28 = vadd.f32 %v4634_v40, %v10266_v53  ;;  %v4665_v0 = vsel %vm4602_vm11, %v4503_v60, 0.0 }
 0x826   :  { %v4660_v14 = vadd.f32 %v4659_v46, %v4658_v55  ;;  %3714 = vperm.xlu1 %6117, %v3281_v9   ;;  %3702 = vperm.xlu0 %6118, %v3277_v54   ;;  %v3889_v9 = vperm.slane %v10328_v16, %v8423_v57  ;;  %v3297_v54 = vmul.f32 %v12897_v48, %v10130_v36  ;;  %v5840_v24 = vunpack.c.h.bf16 %v6047_v12  ;;  %v6049_v12 = vld [vmem:[%s12849_s26 + $0x88] sm:$0xff]  }
 0x827   :  { %3654 = vperm.xlu2 %6116, %v3261_v18   ;;  %v3891_v18 = vperm.slane %v10227_v59, %v12712_v20  ;;  %v3293_v16 = vmul.f32 %v12899_v51, %v10130_v36  ;;  %v3308_v34 = vmul.f32 %v12900_v3, %v10152_v32  ;;  %v4667_v55 = vsel %vm4602_vm11, %v4504_v43, 0.0  ;;  %v12903_v48 = vld [vmem:[#allocation63_spill] sm:$0xff]  ;;  %v12904_v43 = vld [vmem:[#allocation181_spill] sm:$0xff] }
 0x828   :  { %v10386_v45 = vpop.permute.xlu1 %3594  ;;  %v3535_v37 = vpop.permute.xlu0 %3534  ;;  %v4662_v41 = vadd.f32 %v4661_v52, %v4660_v14  ;;  %v4636_v53 = vrot.slane %v4635_v28, 2  ;;  %vm12908_vm8 = vcmask 326912   ;;  %vm12912_vm3 = vcmask 392512  }
 0x829   :  { %v3887_v30 = vperm.slane %v3535_v37, %v8386_v31  ;;  %v4502_v26 = vmul.f32 %v5835_v15, %v3535_v37  ;;  %v10390_v2 = vpop.permute.xlu2 %3555  ;;  %v12901_v37 = vld [vmem:[#allocation54_spill] sm:$0xff] }
 0x82a   :  { %v4637_v60 = vadd.f32 %v4636_v53, %v4635_v28 }
 0x82b   :  { %v3888_v63 = vsel %vm12898_vm4, %v3887_v30, %v3886_v58  ;;  %v4663_v1 = vsel %vm4602_vm11, %v4502_v26, 0.0  ;;  %v6050_v30 = vld [vmem:[%s12849_s26 + $0x90] sm:$0xff]   ;;  %vm12913_vm4 = vmmov %vm12902_vm15 }
 0x82c   :  { %v3890_v39 = vsel %vm1760_vm12, %v3889_v9, %v3888_v63  ;;  %v4664_v35 = vadd.f32 %v4663_v1, %v4662_v41  ;;  %v3313_v41 = vmul.f32 %v12901_v37, %v10152_v32  ;;  %v3247_v63 = vmul.f32 %v12904_v43, %v10091_v33 }
 0x82d   :  { %v3892_v59 = vsel %vm1764_vm13, %v3891_v18, %v3890_v39  ;;  %v5848_v18 = vunpack.c.h.bf16 %v6049_v12  ;;  %v5847_v1 = vunpack.c.l.bf16 %v6049_v12  ;;  %v5851_v28 = vunpack.c.l.bf16 %v6050_v30 }
 0x82e   :  { %v4666_v7 = vadd.f32 %v4665_v0, %v4664_v35  ;;  %3762 = vperm.xlu1 %6117, %v3297_v54   ;;  %3750 = vperm.xlu0 %6118, %v3293_v16   ;;  %v3309_v54 = vmul.f32 %v12903_v48, %v10152_v32  ;;  %v4638_v35 = vrot.slane %v4637_v60, 1  ;;  %v3902_v12 = vperm.slane %v10268_v56, %v8298_v22 }
 0x82f   :  { %3795 = vperm.xlu2 %6116, %v3308_v34   ;;  %v4509_v0 = vmul.f32 %v5848_v18, %v10390_v2 }
 0x830   :  { %v10410_v29 = vpop.permute.xlu1 %3603  ;;  %v3544_v46 = vpop.permute.xlu0 %3543  ;;  %v4668_v15 = vadd.f32 %v4667_v55, %v4666_v7  ;;  %v3900_v55 = vperm.slane %v10390_v2, %v8292_v10  ;;  %v6051_v2 = vld [vmem:[%s12849_s26 + $0x98] sm:$0xff]  }
 0x831   :  { %v3893_v58 = vperm.slane %v3544_v46, %v12716_v21  ;;  %v4505_v14 = vmul.f32 %v5840_v24, %v3544_v46  ;;  %v10413_v52 = vpop.permute.xlu2 %3564  ;;  %v12906_v46 = vld [vmem:[#allocation84_spill] sm:$0xff]  ;;  %v4682_v18 = vsel %vm4602_vm11, %v4509_v0, 0.0  ;;  %v5855_v43 = vunpack.c.l.bf16 %v6051_v2 }
 0x833   :  { %v3894_v61 = vsel %vm1768_vm14, %v3893_v58, %v3892_v59  ;;  %v4669_v40 = vsel %vm4602_vm11, %v4505_v14, 0.0  ;;  %v12905_v59 = vld [vmem:[#allocation91_spill] sm:$0xff]  ;;  %v12907_v58 = vld [vmem:[#allocation101_spill] sm:$0xff]  ;;  %v4512_v0 = vmul.f32 %v5855_v43, %v10413_v52 }
 0x834   :  { %v10427_v26 = vsel %vm12902_vm15, %v3894_v61, %v10257_v47  ;;  %v4670_v9 = vadd.f32 %v4669_v40, %v4668_v15  ;;  %v3252_v7 = vmul.f32 %v12905_v59, %v10091_v33  ;;  %v3248_v15 = vmul.f32 %v12906_v46, %v10091_v33  ;;  %v12909_v59 = vld [vmem:[#allocation88_spill] sm:$0xff]  ;;  %v6052_v46 = vld [vmem:[%s12849_s26 + $0xa0] sm:$0xff]  }
 0x835   :  { %v3263_v14 = vmul.f32 %v12907_v58, %v10106_v38  ;;  %v4510_v61 = vmul.f32 %v5851_v28, %v10268_v56  ;;  %v5860_v43 = vunpack.c.h.bf16 %v6052_v46  ;;  %vm12915_vm15 = vcmask 654912  }
 0x836   :  { %v4671_v39 = vrot.slane %v4670_v9, 4  ;;  %3810 = vperm.xlu1 %6117, %v3313_v41   ;;  %3798 = vperm.xlu0 %6118, %v3309_v54   ;;  %v4639_v41 = vadd.f32 %v4638_v35, %v4637_v60 }
 0x837   :  { %3612 = vperm.xlu2 %6116, %v3247_v63   ;;  %v5852_v63 = vunpack.c.h.bf16 %v6050_v30  ;;  %v4684_v60 = vsel %vm4602_vm11, %v4510_v61, 0.0  ;;  %v3908_v61 = vperm.slane %v10291_v49, %v8326_v25 }
 0x838   :  { %v4672_v51 = vadd.f32 %v4671_v39, %v4670_v9  ;;  %v10433_v16 = vpop.permute.xlu1 %3642  ;;  %v3553_v47 = vpop.permute.xlu0 %3552  ;;  %v5856_v39 = vunpack.c.h.bf16 %v6051_v2  ;;  %v10461_v28 = vpack.c.bf16 %v4639_v41, %v4639_v41  ;;  %v6053_v2 = vld [vmem:[%s12849_s26 + $0xa8] sm:$0xff]  }
 0x839   :  { %v3898_v3 = vperm.slane %v3553_v47, %v8277_v5  ;;  %v4508_v34 = vmul.f32 %v5847_v1, %v3553_v47  ;;  %v10437_v24 = vpop.permute.xlu2 %3573 }
 0x83a   :  { %v4673_v53 = vrot.slane %v4672_v51, 2 }
 0x83b   :  { %v3899_v40 = vsel %vm1716_vm1, %v3898_v3, %v10377_v44  ;;  %v4680_v37 = vsel %vm4602_vm11, %v4508_v34, 0.0 }
 0x83c   :  { %v4674_v9 = vadd.f32 %v4673_v53, %v4672_v51  ;;  %v3901_v48 = vsel %vm1720_vm2, %v3900_v55, %v3899_v40  ;;  %v4681_v54 = vadd.f32 %v4680_v37, %v10381_v6  ;;  %v3906_v53 = vperm.slane %v10413_v52, %v8320_v13 }
 0x83d   :  { %v3903_v56 = vsel %vm12908_vm8, %v3902_v12, %v3901_v48  ;;  %v4513_v40 = vmul.f32 %v5856_v39, %v10291_v49  ;;  %v5353_v52 = vunpack.c.l.b16 %v10461_v28  ;;  %vm12918_vm8 = vcmask 720512  }
 0x83e   :  { %v4675_v1 = vrot.slane %v4674_v9, 1  ;;  %v4683_v44 = vadd.f32 %v4682_v18, %v4681_v54  ;;  %3627 = vperm.xlu1 %6117, %v3252_v7   ;;  %3615 = vperm.xlu0 %6118, %v3248_v15   ;;  %v3268_v7 = vmul.f32 %v12909_v59, %v10106_v38  ;;  %v12910_v15 = vld [vmem:[#allocation107_spill] sm:$0xff]  ;;  %v4688_v18 = vsel %vm4602_vm11, %v4512_v0, 0.0 }
 0x83f   :  { %3660 = vperm.xlu2 %6116, %v3263_v14   ;;  %v3264_v58 = vmul.f32 %v12910_v15, %v10106_v38  ;;  %v12911_v14 = vld [vmem:[#allocation18_spill] sm:$0xff]  ;;  %v3912_v59 = vperm.slane %v10437_v24, %v8358_v19 }
 0x840   :  { %v4676_v35 = vadd.f32 %v4675_v1, %v4674_v9  ;;  %v10463_v51 = vpop.permute.xlu1 %3693  ;;  %v3562_v6 = vpop.permute.xlu0 %3561  ;;  %v4685_v47 = vadd.f32 %v4684_v60, %v4683_v44  ;;  %v3279_v12 = vmul.f32 %v12911_v14, %v10115_v8  ;;  %v4690_v44 = vsel %vm4602_vm11, %v4513_v40, 0.0 }
 0x841   :  { %v3904_v30 = vperm.slane %v3562_v6, %v8304_v11  ;;  %v4511_v3 = vmul.f32 %v5852_v63, %v3562_v6  ;;  %v10467_v34 = vpop.permute.xlu2 %3582  ;;  %v5859_v63 = vunpack.c.l.bf16 %v6052_v46  ;;  %v5863_v60 = vunpack.c.l.bf16 %v6053_v2 }
 0x842   :  { %v10471_v55 = vpack.c.bf16 %v4676_v35, %v4676_v35  ;;  %v3914_v46 = vperm.slane %v10324_v42, %v8370_v27 }
 0x843   :  { %v3905_v37 = vsel %vm12912_vm3, %v3904_v30, %v3903_v56  ;;  %v4686_v41 = vsel %vm4602_vm11, %v4511_v3, 0.0  ;;  %v4516_v15 = vmul.f32 %v5863_v60, %v10324_v42  ;;  %vm12920_vm3 = vcmask 786112  }
 0x844   :  { %v5354_v9 = vunpack.c.l.b16 %v10471_v55  ;;  %v3907_v48 = vsel %vm1732_vm5, %v3906_v53, %v3905_v37  ;;  %v4687_v54 = vadd.f32 %v4686_v41, %v4685_v47  ;;  %v4515_v47 = vmul.f32 %v5860_v43, %v10437_v24  ;;  %v12916_v24 = vld [vmem:[#allocation95_spill] sm:$0xff] }
 0x845   :  { %v3909_v49 = vsel %vm1736_vm6, %v3908_v61, %v3907_v48  ;;  %v3280_v37 = vmul.f32 %v12916_v24, %v10115_v8  ;;  %v12917_v41 = vld [vmem:[#allocation27_spill] sm:$0xff]  ;;  %v5864_v48 = vunpack.c.h.bf16 %v6053_v2  ;;  %v4696_v43 = vsel %vm4602_vm11, %v4516_v15, 0.0  ;;  %v6056_v24 = vld [vmem:[%s12849_s26 + $0xc0] sm:$0xff]  }
 0x846   :  { %v10496_v56 = vsel %vm12913_vm4, %v5354_v9, %v5353_v52  ;;  %v4689_v1 = vadd.f32 %v4688_v18, %v4687_v54  ;;  %3675 = vperm.xlu1 %6117, %v3268_v7   ;;  %3663 = vperm.xlu0 %6118, %v3264_v58   ;;  %v12914_v7 = vld [vmem:[#allocation17_spill] sm:$0xff]  ;;  %v3295_v52 = vmul.f32 %v12917_v41, %v10130_v36  ;;  %v4694_v9 = vsel %vm4602_vm11, %v4515_v47, 0.0 }
 0x847   :  { %3708 = vperm.xlu2 %6116, %v3279_v12   ;;  %v3284_v53 = vmul.f32 %v12914_v7, %v10115_v8  ;;  %v6054_v12 = vld [vmem:[%s12849_s26 + $0xb0] sm:$0xff]   ;;  %v3918_v2 = vperm.slane %v10467_v34, %v8386_v31  ;;  %v3920_v7 = vperm.slane %v10355_v50, %v8423_v57  ;;  %vm12921_vm4 = vcmask 851712  }
 0x848   :  { %v10499_v39 = vpop.permute.xlu1 %3741  ;;  %v3571_v35 = vpop.permute.xlu0 %3570  ;;  %v4691_v6 = vadd.f32 %v4690_v44, %v4689_v1  ;;  %v5867_v42 = vunpack.c.l.bf16 %v6054_v12 }
 0x849   :  { %v3910_v0 = vperm.slane %v3571_v35, %v8335_v4  ;;  %v4514_v30 = vmul.f32 %v5859_v63, %v3571_v35  ;;  %v10503_v3 = vpop.permute.xlu2 %3591  ;;  %v5868_v63 = vunpack.c.h.bf16 %v6054_v12 }
 0x84a   :  { %v4518_v60 = vmul.f32 %v5867_v42, %v10467_v34  ;;  %v12922_v34 = vld [vmem:[#allocation136_spill] sm:$0xff] }
 0x84b   :  { %v3911_v58 = vsel %vm1740_vm7, %v3910_v0, %v3909_v49  ;;  %v4692_v14 = vsel %vm4602_vm11, %v4514_v30, 0.0  ;;  %v6055_v0 = vld [vmem:[%s12849_s26 + $0xb8] sm:$0xff]   ;;  %v12919_v30 = vld [vmem:[#allocation43_spill] sm:$0xff]  ;;  %v3296_v12 = vmul.f32 %v12922_v34, %v10130_v36 }
 0x84c   :  { %v3913_v61 = vsel %vm12915_vm15, %v3912_v59, %v3911_v58  ;;  %v4693_v40 = vadd.f32 %v4692_v14, %v4691_v6  ;;  %v3300_v59 = vmul.f32 %v12919_v30, %v10130_v36  ;;  %v5871_v41 = vunpack.c.l.bf16 %v6055_v0 }
 0x84d   :  { %v3915_v54 = vsel %vm12918_vm8, %v3914_v46, %v3913_v61  ;;  %v12923_v61 = vld [vmem:[#allocation80_spill] sm:$0xff]  ;;  %vm12932_vm15 = vcmask 326912   ;;  %vm12934_vm8 = vcmask 1042434  }
 0x84e   :  { %v4695_v18 = vadd.f32 %v4694_v9, %v4693_v40  ;;  %3723 = vperm.xlu1 %6117, %v3284_v53   ;;  %3711 = vperm.xlu0 %6118, %v3280_v37   ;;  %v4519_v53 = vmul.f32 %v5868_v63, %v10355_v50  ;;  %v3311_v40 = vmul.f32 %v12923_v61, %v10152_v32  ;;  %v4700_v37 = vsel %vm4602_vm11, %v4518_v60, 0.0 }
 0x84f   :  { %3756 = vperm.xlu2 %6116, %v3295_v52   ;;  %v5872_v50 = vunpack.c.h.bf16 %v6055_v0 }
 0x850   :  { %v10525_v49 = vpop.permute.xlu1 %3789  ;;  %v3580_v1 = vpop.permute.xlu0 %3579  ;;  %v4697_v44 = vadd.f32 %v4696_v43, %v4695_v18  ;;  %v4702_v42 = vsel %vm4602_vm11, %v4519_v53, 0.0 }
 0x851   :  { %v3916_v35 = vperm.slane %v3580_v1, %v8379_v17  ;;  %v4517_v6 = vmul.f32 %v5864_v48, %v3580_v1  ;;  %v10529_v47 = vpop.permute.xlu2 %3600  ;;  %v5875_v48 = vunpack.c.l.bf16 %v6056_v24  ;;  %v4521_v1 = vmul.f32 %v5872_v50, %v10503_v3 }
 0x852   :  { %v5876_v50 = vunpack.c.h.bf16 %v6056_v24  ;;  %v3926_v24 = vperm.slane %v10386_v45, %v8267_v62 }
 0x853   :  { %v3917_v46 = vsel %vm12920_vm3, %v3916_v35, %v3915_v54  ;;  %v4698_v15 = vsel %vm4602_vm11, %v4517_v6, 0.0  ;;  %v6072_v54 = vld [vmem:[%s12849_s26 + $0x140] sm:$0xff]   ;;  %v3924_v6 = vperm.slane %v10503_v3, %v12716_v21  ;;  %v4522_v53 = vmul.f32 %v5875_v48, %v10386_v45 }
 0x854   :  { %v3919_v58 = vsel %vm12921_vm4, %v3918_v2, %v3917_v46  ;;  %v4699_v14 = vadd.f32 %v4698_v15, %v4697_v44  ;;  %v5940_v2 = vunpack.c.h.bf16 %v6072_v54  ;;  %v6057_v46 = vld [vmem:[%s12849_s26 + $0xc8] sm:$0xff]   ;;  %v10576_v15 = vld [vmem:[%s12849_s26 + $0x180] sm:$0xff]   ;;  %v3929_v45 = vperm.slane %v10529_v47, %v8277_v5 }
 0x855   :  { %v3921_v52 = vsel %vm1760_vm12, %v3920_v7, %v3919_v58  ;;  %v5879_v61 = vunpack.c.l.bf16 %v6057_v46  ;;  %v12928_v48 = vld [vmem:[#allocation114_spill] sm:$0xff]  ;;  %vm12938_vm3 = vcmask 392512  }
 0x856   :  { %v4701_v9 = vadd.f32 %v4700_v37, %v4699_v14  ;;  %3771 = vperm.xlu1 %6117, %v3300_v59   ;;  %3759 = vperm.xlu0 %6118, %v3296_v12   ;;  %v12924_v59 = vld [vmem:[#allocation37_spill] sm:$0xff]  ;;  %v4706_v12 = vsel %vm4602_vm11, %v4521_v1, 0.0  ;;  %v5972_v1 = vunpack.c.h.bf16 %v10576_v15  ;;  %vm12949_vm4 = vmmov %vm12938_vm3 }
 0x857   :  { %3804 = vperm.xlu2 %6116, %v3311_v40   ;;  %v3316_v7 = vmul.f32 %v12924_v59, %v10152_v32  ;;  %v12925_v14 = vld [vmem:[#allocation69_spill] sm:$0xff]  ;;  %v12926_v40 = vld [vmem:[#allocation152_spill] sm:$0xff] }
 0x858   :  { %v10557_v18 = vpop.permute.xlu1 %3699  ;;  %v3589_v43 = vpop.permute.xlu0 %3588  ;;  %v4703_v63 = vadd.f32 %v4702_v42, %v4701_v9  ;;  %v3312_v34 = vmul.f32 %v12925_v14, %v10152_v32  ;;  %v3250_v37 = vmul.f32 %v12926_v40, %v10091_v33  ;;  %v12927_v9 = vld [vmem:[#allocation123_spill] sm:$0xff] }
 0x859   :  { %v3922_v44 = vperm.slane %v3589_v43, %v12712_v20  ;;  %v4520_v60 = vmul.f32 %v5871_v41, %v3589_v43  ;;  %v10561_v35 = vpop.permute.xlu2 %3609  ;;  %v3255_v42 = vmul.f32 %v12927_v9, %v10091_v33  ;;  %v3251_v43 = vmul.f32 %v12928_v48, %v10091_v33 }
 0x85b   :  { %v3923_v0 = vsel %vm1764_vm13, %v3922_v44, %v3921_v52  ;;  %v4704_v30 = vsel %vm4602_vm11, %v4520_v60, 0.0  ;;  %v5939_v52 = vunpack.c.l.bf16 %v6072_v54  ;;  %v4555_v44 = vmul.f32 %v5940_v2, %v10463_v51  ;;  %v12929_v60 = vld [vmem:[#allocation16_spill] sm:$0xff] }
 0x85c   :  { %v10579_v3 = vsel %vm1768_vm14, %v3924_v6, %v3923_v0  ;;  %v4705_v58 = vadd.f32 %v4704_v30, %v4703_v63  ;;  %v5880_v63 = vunpack.c.h.bf16 %v6057_v46  ;;  %v3266_v6 = vmul.f32 %v12929_v60, %v10106_v38 }
 0x85d   :  { %v4714_v54 = vsel %vm4602_vm11, %v4522_v53, 0.0  ;;  %v3931_v0 = vperm.slane %v10410_v29, %v8292_v10  ;;  %v3989_v2 = vperm.slane %v10463_v51, %v8274_v23  ;;  %v4524_v46 = vmul.f32 %v5879_v61, %v10529_v47 }
 0x85e   :  { %v4707_v41 = vadd.f32 %v4706_v12, %v4705_v58  ;;  %3819 = vperm.xlu1 %6117, %v3316_v7   ;;  %3807 = vperm.xlu0 %6118, %v3312_v34   ;;  %v4789_v9 = vsel %vm4602_vm11, %v4555_v44, 0.0 }
 0x85f   :  { %3621 = vperm.xlu2 %6116, %v3250_v37   ;;  %v4525_v37 = vmul.f32 %v5880_v63, %v10410_v29 }
 0x860   :  { %v4708_v30 = vrot.slane %v4707_v41, 4  ;;  %v10599_v59 = vpop.permute.xlu1 %3747  ;;  %v3598_v7 = vpop.permute.xlu0 %3597 }
 0x861   :  { %v3927_v58 = vperm.slane %v3598_v7, %v8274_v23  ;;  %v4523_v14 = vmul.f32 %v5876_v50, %v3598_v7  ;;  %v3691_v34 = vpop.permute.xlu2 %3690  ;;  %v6058_v50 = vld [vmem:[%s12849_s26 + $0xd0] sm:$0xff]  }
 0x862   :  { %v4709_v53 = vadd.f32 %v4708_v30, %v4707_v41  ;;  %v3988_v12 = vperm.slane %v3691_v34, %v8267_v62  ;;  %v4554_v40 = vmul.f32 %v5939_v52, %v3691_v34  ;;  %v4717_v52 = vsel %vm4602_vm11, %v4524_v46, 0.0  ;;  %v6088_v30 = vld [vmem:[%s12849_s26 + $0x1c0] sm:$0xff]  }
 0x863   :  { %v3928_v48 = vsel %vm1712_vm0, %v3927_v58, %v3926_v24  ;;  %v4715_v51 = vsel %vm4602_vm11, %v4523_v14, 0.0  ;;  %v5883_v63 = vunpack.c.l.bf16 %v6058_v50  ;;  %v6064_v24 = vld [vmem:[%s12849_s26 + $0x100] sm:$0xff]   ;;  %v4719_v46 = vsel %vm4602_vm11, %v4525_v37, 0.0 }
 0x864   :  { %v4710_v61 = vrot.slane %v4709_v53, 2  ;;  %v3930_v60 = vsel %vm1716_vm1, %v3929_v45, %v3928_v48  ;;  %v4716_v47 = vadd.f32 %v4715_v51, %v4714_v54  ;;  %v10617_v41 = vsel %vm1712_vm0, %v3989_v2, %v3988_v12 }
 0x865   :  { %v4788_v29 = vsel %vm4602_vm11, %v4554_v40, 0.0  ;;  %v3932_v44 = vsel %vm1720_vm2, %v3931_v0, %v3930_v60  ;;  %v5971_v2 = vunpack.c.l.bf16 %v10576_v15  ;;  %v4571_v0 = vmul.f32 %v5972_v1, %v10499_v39  ;;  %v12930_v40 = vld [vmem:[#allocation86_spill] sm:$0xff] }
 0x866   :  { %v4711_v7 = vadd.f32 %v4710_v61, %v4709_v53  ;;  %v4718_v54 = vadd.f32 %v4717_v52, %v4716_v47  ;;  %v10628_v58 = vadd.f32 %v4789_v9, %v4788_v29  ;;  %3636 = vperm.xlu1 %6117, %v3255_v42   ;;  %3624 = vperm.xlu0 %6118, %v3251_v43   ;;  %v12931_v9 = vld [vmem:[#allocation22_spill] sm:$0xff]  ;;  %v5907_v42 = vunpack.c.l.bf16 %v6064_v24 }
 0x867   :  { %3669 = vperm.xlu2 %6116, %v3266_v6   ;;  %v3271_v53 = vmul.f32 %v12930_v40, %v10106_v38  ;;  %v3267_v48 = vmul.f32 %v12931_v9, %v10106_v38  ;;  %v6004_v43 = vunpack.c.h.bf16 %v6088_v30  ;;  %v4020_v1 = vperm.slane %v10499_v39, %v8274_v23 }
 0x868   :  { %v4712_v14 = vrot.slane %v4711_v7, 1  ;;  %v10633_v34 = vpop.permute.xlu1 %3657  ;;  %v3607_v45 = vpop.permute.xlu0 %3606  ;;  %v4720_v12 = vadd.f32 %v4719_v46, %v4718_v54  ;;  %v4826_v47 = vsel %vm4602_vm11, %v4571_v0, 0.0  ;;  %v5884_v52 = vunpack.c.h.bf16 %v6058_v50 }
 0x869   :  { %v3933_v15 = vperm.slane %v3607_v45, %v8298_v22  ;;  %v4526_v51 = vmul.f32 %v5883_v63, %v3607_v45  ;;  %v3739_v37 = vpop.permute.xlu2 %3738  ;;  %v4538_v39 = vmul.f32 %v5907_v42, %v10433_v16  ;;  %v5908_v9 = vunpack.c.h.bf16 %v6064_v24 }
 0x86a   :  { %v4713_v6 = vadd.f32 %v4712_v14, %v4711_v7  ;;  %v4019_v61 = vperm.slane %v3739_v37, %v8267_v62  ;;  %v4570_v60 = vmul.f32 %v5971_v2, %v3739_v37  ;;  %v12933_v14 = vld [vmem:[#allocation41_spill] sm:$0xff]  ;;  %v4587_v0 = vmul.f32 %v6004_v43, %v10525_v49  ;;  %v12936_v37 = vld [vmem:[#allocation126_spill] sm:$0xff] }
 0x86b   :  { %v3934_v29 = vsel %vm12932_vm15, %v3933_v15, %v3932_v44  ;;  %v4721_v54 = vsel %vm4602_vm11, %v4526_v51, 0.0  ;;  %v3282_v2 = vmul.f32 %v12933_v14, %v10115_v8  ;;  %v6003_v44 = vunpack.c.l.bf16 %v6088_v30 }
 0x86c   :  { %v10646_v46 = vpack.c.bf16 %v4713_v6, %v4713_v6  ;;  %v4722_v40 = vadd.f32 %v4721_v54, %v4720_v12  ;;  %v4021_v63 = vsel %vm1712_vm0, %v4020_v1, %v4019_v61  ;;  %v4825_v45 = vsel %vm4602_vm11, %v4570_v60, 0.0  ;;  %v12937_v1 = vld [vmem:[#allocation10_spill] sm:$0xff]  ;;  %v10678_v54 = vld [vmem:[%s12849_s26 + $0x108] sm:$0xff]  }
 0x86d   :  { %v4827_v7 = vadd.f32 %v4826_v47, %v4825_v45  ;;  %v4527_v12 = vmul.f32 %v5884_v52, %v10561_v35  ;;  %v3287_v24 = vmul.f32 %v12936_v37, %v10115_v8  ;;  %v3957_v30 = vperm.slane %v10433_v16, %v8267_v62 }
 0x86e   :  { %v5355_v50 = vunpack.c.l.b16 %v10646_v46  ;;  %3684 = vperm.xlu1 %6117, %v3271_v53   ;;  %3672 = vperm.xlu0 %6118, %v3267_v48   ;;  %v3283_v53 = vmul.f32 %v12937_v1, %v10115_v8  ;;  %v4751_v48 = vsel %vm4602_vm11, %v4538_v39, 0.0  ;;  %v3935_v60 = vperm.slane %v10561_v35, %v8304_v11 }
 0x86f   :  { %3717 = vperm.xlu2 %6116, %v3282_v2   ;;  %v4863_v16 = vsel %vm4602_vm11, %v4587_v0, 0.0  ;;  %v4723_v45 = vsel %vm4602_vm11, %v4527_v12, 0.0  ;;  %v6081_v2 = vld [vmem:[%s12849_s26 + $0x188] sm:$0xff]   ;;  %v5911_v0 = vunpack.c.l.bf16 %v10678_v54 }
 0x870   :  { %v10658_v15 = vsel %vm12934_vm8, %v5355_v50, %v10496_v56  ;;  %v10660_v42 = vpop.permute.xlu1 %3705  ;;  %v3646_v51 = vpop.permute.xlu0 %3645  ;;  %v4051_v56 = vperm.slane %v10525_v49, %v8274_v23  ;;  %v10689_v35 = vsel %vm12938_vm3, %v3935_v60, %v3934_v29  ;;  %v12939_v50 = vld [vmem:[#allocation121_spill] sm:$0xff]  ;;  %v10699_v12 = vadd.f32 %v4723_v45, %v4722_v40 }
 0x871   :  { %12935 = vst [vmem:[#allocation108_spill] sm:$0xff] %v10658_v15  ;;  %v3958_v43 = vperm.slane %v3646_v51, %v8274_v23  ;;  %v4539_v6 = vmul.f32 %v5908_v9, %v3646_v51  ;;  %v3787_v61 = vpop.permute.xlu2 %3786  ;;  %v5975_v51 = vunpack.c.l.bf16 %v6081_v2  ;;  %v12941_v60 = vld [vmem:[#allocation65_spill] sm:$0xff] }
 0x872   :  { %v4050_v47 = vperm.slane %v3787_v61, %v8267_v62  ;;  %v4586_v52 = vmul.f32 %v6003_v44, %v3787_v61  ;;  %v3298_v44 = vmul.f32 %v12939_v50, %v10130_v36 }
 0x873   :  { %v3959_v39 = vsel %vm1712_vm0, %v3958_v43, %v3957_v30  ;;  %v4752_v14 = vsel %vm4602_vm11, %v4539_v6, 0.0  ;;  %v6073_v43 = vld [vmem:[%s12849_s26 + $0x148] sm:$0xff]  }
 0x874   :  { %v4753_v23 = vadd.f32 %v4752_v14, %v4751_v48  ;;  %v10685_v49 = vsel %vm1712_vm0, %v4051_v56, %v4050_v47  ;;  %v4862_v62 = vsel %vm4602_vm11, %v4586_v52, 0.0  ;;  %v3299_v47 = vmul.f32 %v12941_v60, %v10130_v36  ;;  %v12945_v60 = vld [vmem:[#allocation177_spill] sm:$0xff]  ;;  %vm12946_vm0 = vmmov %vm12932_vm15 }
 0x875   :  { %v10694_v9 = vadd.f32 %v4863_v16, %v4862_v62  ;;  %v5976_v52 = vunpack.c.h.bf16 %v6081_v2  ;;  %v5944_v62 = vunpack.c.h.bf16 %v6073_v43  ;;  %vm12956_vm15 = vmmov %vm12946_vm0 }
 0x876   :  { %3732 = vperm.xlu1 %6117, %v3287_v24   ;;  %3720 = vperm.xlu0 %6118, %v3283_v53   ;;  %v12940_v53 = vld [vmem:[#allocation73_spill] sm:$0xff] }
 0x877   :  { %3765 = vperm.xlu2 %6116, %v3298_v44   ;;  %v3303_v56 = vmul.f32 %v12940_v53, %v10130_v36  ;;  %v12942_v44 = vld [vmem:[#allocation61_spill] sm:$0xff]  ;;  %v12944_v53 = vld [vmem:[#allocation70_spill] sm:$0xff] }
 0x878   :  { %v10701_v37 = vpop.permute.xlu1 %3753  ;;  %v3649_v29 = vpop.permute.xlu0 %3648 }
 0x879   :  { %v3960_v1 = vperm.slane %v3649_v29, %v8277_v5  ;;  %v4540_v30 = vmul.f32 %v5911_v0, %v3649_v29  ;;  %v3745_v48 = vpop.permute.xlu2 %3744  ;;  %v3314_v0 = vmul.f32 %v12942_v44, %v10152_v32 }
 0x87a   :  { %v4022_v6 = vperm.slane %v3745_v48, %v8277_v5  ;;  %v4572_v61 = vmul.f32 %v5975_v51, %v3745_v48  ;;  %v4573_v51 = vmul.f32 %v5976_v52, %v10599_v59  ;;  %v4024_v48 = vperm.slane %v10599_v59, %v8292_v10 }
 0x87b   :  { %v3961_v40 = vsel %vm1716_vm1, %v3960_v1, %v3959_v39  ;;  %v4754_v24 = vsel %vm4602_vm11, %v4540_v30, 0.0  ;;  %v5943_v39 = vunpack.c.l.bf16 %v6073_v43  ;;  %v12943_v43 = vld [vmem:[#allocation21_spill] sm:$0xff] }
 0x87c   :  { %v4755_v16 = vadd.f32 %v4754_v24, %v4753_v23  ;;  %v4023_v45 = vsel %vm1716_vm1, %v4022_v6, %v4021_v63  ;;  %v4828_v14 = vsel %vm4602_vm11, %v4572_v61, 0.0  ;;  %v4557_v23 = vmul.f32 %v5944_v62, %v10557_v18 }
 0x87d   :  { %v4829_v50 = vadd.f32 %v4828_v14, %v4827_v7  ;;  %v3993_v7 = vperm.slane %v10557_v18, %v8292_v10  ;;  %v3304_v6 = vmul.f32 %v12943_v43, %v10130_v36  ;;  %v4830_v52 = vsel %vm4602_vm11, %v4573_v51, 0.0  ;;  %v6066_v18 = vld [vmem:[%s12849_s26 + $0x110] sm:$0xff]  }
 0x87e   :  { %3780 = vperm.xlu1 %6117, %v3303_v56   ;;  %3768 = vperm.xlu0 %6118, %v3299_v47   ;;  %v3315_v56 = vmul.f32 %v12944_v53, %v10152_v32  ;;  %v3253_v47 = vmul.f32 %v12945_v60, %v10091_v33  ;;  %v4793_v62 = vsel %vm4602_vm11, %v4557_v23, 0.0  ;;  %v5915_v44 = vunpack.c.l.bf16 %v6066_v18 }
 0x87f   :  { %3813 = vperm.xlu2 %6116, %v3314_v0   ;;  %v5912_v0 = vunpack.c.h.bf16 %v10678_v54  ;;  %v6089_v54 = vld [vmem:[%s12849_s26 + $0x1c8] sm:$0xff]  }
 0x880   :  { %v10719_v29 = vpop.permute.xlu1 %3801  ;;  %v3697_v1 = vpop.permute.xlu0 %3696 }
 0x881   :  { %v3991_v63 = vperm.slane %v3697_v1, %v8277_v5  ;;  %v4556_v2 = vmul.f32 %v5943_v39, %v3697_v1  ;;  %v3655_v30 = vpop.permute.xlu2 %3654  ;;  %v10749_v39 = vadd.f32 %v4830_v52, %v4829_v50  ;;  %v5916_v1 = vunpack.c.h.bf16 %v6066_v18 }
 0x882   :  { %v3966_v50 = vperm.slane %v10633_v34, %v8304_v11  ;;  %v6008_v18 = vunpack.c.h.bf16 %v6089_v54 }
 0x883   :  { %v3992_v61 = vsel %vm1716_vm1, %v3991_v63, %v10617_v41  ;;  %v4791_v24 = vsel %vm4602_vm11, %v4556_v2, 0.0  ;;  %v10745_v41 = vsel %vm1720_vm2, %v4024_v48, %v4023_v45  ;;  %v4542_v63 = vmul.f32 %v5915_v44, %v3655_v30 }
 0x884   :  { %v4792_v59 = vadd.f32 %v4791_v24, %v10628_v58  ;;  %v10742_v14 = vsel %vm1720_vm2, %v3993_v7, %v3992_v61  ;;  %v3964_v48 = vperm.slane %v3655_v30, %v8298_v22  ;;  %v4543_v43 = vmul.f32 %v5916_v1, %v10633_v34  ;;  %v10768_v24 = vld [vmem:[%s12849_s26 + $0xd8] sm:$0xff]  }
 0x885   :  { %v4758_v34 = vsel %vm4602_vm11, %v4542_v63, 0.0  ;;  %v5887_v44 = vunpack.c.l.bf16 %v10768_v24  ;;  %v6074_v63 = vld [vmem:[%s12849_s26 + $0x150] sm:$0xff]  }
 0x886   :  { %3783 = vperm.xlu1 %6117, %v3304_v6   ;;  %3816 = vperm.xlu0 %6118, %v3315_v56   ;;  %v10751_v51 = vadd.f32 %v4793_v62, %v4792_v59  ;;  %v12947_v56 = vld [vmem:[#allocation92_spill] sm:$0xff] }
 0x887   :  { %3630 = vperm.xlu2 %6116, %v3253_v47   ;;  %v3254_v60 = vmul.f32 %v12947_v56, %v10091_v33  ;;  %v12948_v47 = vld [vmem:[#allocation109_spill] sm:$0xff] }
 0x888   :  { %v3652_v58 = vpop.permute.xlu0 %3651  ;;  %v10755_v23 = vpop.permute.xlu1 %3618  ;;  %v3269_v52 = vmul.f32 %v12948_v47, %v10106_v38 }
 0x889   :  { %v3962_v2 = vperm.slane %v3652_v58, %v8292_v10  ;;  %v4541_v7 = vmul.f32 %v5912_v0, %v3652_v58  ;;  %v3796_v45 = vpop.permute.xlu2 %3795  ;;  %v4760_v0 = vsel %vm4602_vm11, %v4543_v43, 0.0 }
 0x88a   :  { %v4589_v58 = vmul.f32 %v6008_v18, %v3796_v45 }
 0x88b   :  { %v3963_v6 = vsel %vm1720_vm2, %v3962_v2, %v3961_v40  ;;  %v4756_v61 = vsel %vm4602_vm11, %v4541_v7, 0.0  ;;  %v6007_v40 = vunpack.c.l.bf16 %v6089_v54  ;;  %v4055_v54 = vperm.slane %v3796_v45, %v8292_v10 }
 0x88c   :  { %v3965_v30 = vsel %vm12946_vm0, %v3964_v48, %v3963_v6  ;;  %v4757_v53 = vadd.f32 %v4756_v61, %v4755_v16  ;;  %v4867_v18 = vsel %vm4602_vm11, %v4589_v58, 0.0  ;;  %v3997_v58 = vperm.slane %v10660_v42, %v8304_v11 }
 0x88d   :  { %v3967_v59 = vsel %vm12949_vm4, %v3966_v50, %v3965_v30  ;;  %v12950_v30 = vld [vmem:[#allocation116_spill] sm:$0xff] }
 0x88e   :  { %v4759_v62 = vadd.f32 %v4758_v34, %v4757_v53  ;;  %3633 = vperm.xlu0 %6118, %v3254_v60   ;;  %v3270_v53 = vmul.f32 %v12950_v30, %v10106_v38  ;;  %v10795_v60 = vld [vmem:[%s12849_s26 + $0x118] sm:$0xff]   ;;  %v5948_v34 = vunpack.c.h.bf16 %v6074_v63 }
 0x88f   :  { %3678 = vperm.xlu2 %6116, %v3269_v52  }
 0x890   :  { %v3793_v16 = vpop.permute.xlu0 %3792  ;;  %v4761_v1 = vadd.f32 %v4760_v0, %v4759_v62  ;;  %v10797_v10 = vpop.permute.xlu1 %3666  ;;  %v5947_v62 = vunpack.c.l.bf16 %v6074_v63  ;;  %v4559_v0 = vmul.f32 %v5948_v34, %v10660_v42  ;;  %v10833_v42 = vld [vmem:[%s12849_s26 + $0x158] sm:$0xff]  }
 0x891   :  { %v4053_v2 = vperm.slane %v3793_v16, %v8277_v5  ;;  %v4588_v7 = vmul.f32 %v6007_v40, %v3793_v16  ;;  %v3613_v48 = vpop.permute.xlu2 %3612  ;;  %v12951_v5 = vld [vmem:[#allocation23_spill] sm:$0xff] }
 0x892   :  { %v3937_v50 = vperm.slane %v3613_v48, %v8320_v13  ;;  %v4528_v6 = vmul.f32 %v5887_v44, %v3613_v48  ;;  %v3285_v56 = vmul.f32 %v12951_v5, %v10115_v8  ;;  %v5919_v44 = vunpack.c.l.bf16 %v10795_v60 }
 0x893   :  { %v4054_v43 = vsel %vm1716_vm1, %v4053_v2, %v10685_v49  ;;  %v4865_v61 = vsel %vm4602_vm11, %v4588_v7, 0.0  ;;  %vm12952_vm1 = vmmov %vm12946_vm0 }
 0x894   :  { %v4866_v45 = vadd.f32 %v4865_v61, %v10694_v9  ;;  %v10802_v49 = vsel %vm1732_vm5, %v3937_v50, %v10689_v35  ;;  %v4725_v47 = vsel %vm4602_vm11, %v4528_v6, 0.0  ;;  %v10806_v52 = vsel %vm1720_vm2, %v4055_v54, %v4054_v43  ;;  %v12953_v6 = vld [vmem:[#allocation104_spill] sm:$0xff]  ;;  %v12954_v61 = vld [vmem:[#allocation15_spill] sm:$0xff]  ;;  %vm12955_vm2 = vmmov %vm12938_vm3 }
 0x895   :  { %v10810_v40 = vadd.f32 %v4725_v47, %v10699_v12  ;;  %v6082_v12 = vld [vmem:[%s12849_s26 + $0x190] sm:$0xff]   ;;  %v3286_v43 = vmul.f32 %v12953_v6, %v10115_v8  ;;  %v3301_v30 = vmul.f32 %v12954_v61, %v10130_v36  ;;  %v12958_v6 = vld [vmem:[#allocation170_spill] sm:$0xff]  ;;  %vm12959_vm8 = vmmov %vm12955_vm2 }
 0x896   :  { %3681 = vperm.xlu0 %6118, %v3270_v53   ;;  %v10813_v9 = vadd.f32 %v4867_v18, %v4866_v45  ;;  %v4797_v45 = vsel %vm4602_vm11, %v4559_v0, 0.0  ;;  %v5980_v47 = vunpack.c.h.bf16 %v6082_v12  ;;  %v5979_v18 = vunpack.c.l.bf16 %v6082_v12  ;;  %vm12960_vm3 = vmmov %vm12946_vm0 }
 0x897   :  { %3726 = vperm.xlu2 %6116, %v3285_v56   ;;  %v4028_v0 = vperm.slane %v10701_v37, %v8304_v11  ;;  %vm12963_vm0 = vmmov %vm12955_vm2 }
 0x898   :  { %v3703_v35 = vpop.permute.xlu0 %3702 }
 0x899   :  { %v3995_v16 = vperm.slane %v3703_v35, %v8298_v22  ;;  %v4558_v2 = vmul.f32 %v5947_v62, %v3703_v35  ;;  %v3661_v7 = vpop.permute.xlu2 %3660  ;;  %v10844_v62 = vpop.permute.xlu1 %3714 }
 0x89a   :  { %v3968_v48 = vperm.slane %v3661_v7, %v8320_v13  ;;  %v4544_v63 = vmul.f32 %v5919_v44, %v3661_v7  ;;  %v5951_v44 = vunpack.c.l.bf16 %v10833_v42 }
 0x89b   :  { %v3996_v54 = vsel %vm12952_vm1, %v3995_v16, %v10742_v14  ;;  %v4795_v50 = vsel %vm4602_vm11, %v4558_v2, 0.0 }
 0x89c   :  { %v4796_v53 = vadd.f32 %v4795_v50, %v10751_v51  ;;  %v10837_v5 = vsel %vm1732_vm5, %v3968_v48, %v3967_v59  ;;  %v4762_v14 = vsel %vm4602_vm11, %v4544_v63, 0.0  ;;  %v3998_v56 = vsel %vm12955_vm2, %v3997_v58, %v3996_v54  ;;  %v12957_v54 = vld [vmem:[#allocation47_spill] sm:$0xff] }
 0x89d   :  { %v10842_v34 = vadd.f32 %v4762_v14, %v4761_v1  ;;  %v4575_v59 = vmul.f32 %v5980_v47, %v10701_v37  ;;  %v6090_v1 = vld [vmem:[%s12849_s26 + $0x1d0] sm:$0xff]   ;;  %v3302_v50 = vmul.f32 %v12957_v54, %v10130_v36  ;;  %v10865_v37 = vld [vmem:[%s12849_s26 + $0x198] sm:$0xff]  }
 0x89e   :  { %3729 = vperm.xlu0 %6118, %v3286_v43   ;;  %v4798_v35 = vadd.f32 %v4797_v45, %v4796_v53  ;;  %v3317_v43 = vmul.f32 %v12958_v6, %v10152_v32  ;;  %v6012_v36 = vunpack.c.h.bf16 %v6090_v1  ;;  %v6011_v47 = vunpack.c.l.bf16 %v6090_v1 }
 0x89f   :  { %3774 = vperm.xlu2 %6116, %v3301_v30   ;;  %v4834_v14 = vsel %vm4602_vm11, %v4575_v59, 0.0  ;;  %v4059_v59 = vperm.slane %v10719_v29, %v8304_v11  ;;  %v10897_v11 = vld [vmem:[%s12849_s26 + $0x1d8] sm:$0xff]  }
 0x8a0   :  { %v3751_v51 = vpop.permute.xlu0 %3750 }
 0x8a1   :  { %v4026_v16 = vperm.slane %v3751_v51, %v8298_v22  ;;  %v4574_v2 = vmul.f32 %v5979_v18, %v3751_v51  ;;  %v3709_v7 = vpop.permute.xlu2 %3708  ;;  %v5983_v18 = vunpack.c.l.bf16 %v10865_v37  ;;  %v10877_v51 = vpop.permute.xlu1 %3762 }
 0x8a2   :  { %v3999_v58 = vperm.slane %v3709_v7, %v8320_v13  ;;  %v4560_v12 = vmul.f32 %v5951_v44, %v3709_v7 }
 0x8a3   :  { %v4027_v48 = vsel %vm12956_vm15, %v4026_v16, %v10745_v41  ;;  %v4832_v63 = vsel %vm4602_vm11, %v4574_v2, 0.0  ;;  %vm12975_vm15 = vcmask 1041409  }
 0x8a4   :  { %v4833_v61 = vadd.f32 %v4832_v63, %v10749_v39  ;;  %v10869_v30 = vsel %vm1732_vm5, %v3999_v58, %v3998_v56  ;;  %v4799_v41 = vsel %vm4602_vm11, %v4560_v12, 0.0  ;;  %v4029_v53 = vsel %vm12959_vm8, %v4028_v0, %v4027_v48  ;;  %v12961_v48 = vld [vmem:[#allocation174_spill] sm:$0xff]  ;;  %v12962_v63 = vld [vmem:[#allocation173_spill] sm:$0xff] }
 0x8a5   :  { %v10874_v45 = vadd.f32 %v4799_v41, %v4798_v35  ;;  %v4591_v56 = vmul.f32 %v6012_v36, %v10719_v29  ;;  %v6060_v35 = vld [vmem:[%s12849_s26 + $0xe0] sm:$0xff]   ;;  %v3256_v54 = vmul.f32 %v12962_v63, %v10091_v33  ;;  %v5888_v33 = vunpack.c.h.bf16 %v10768_v24 }
 0x8a6   :  { %3777 = vperm.xlu0 %6118, %v3302_v50   ;;  %v4835_v44 = vadd.f32 %v4834_v14, %v4833_v61  ;;  %v5891_v61 = vunpack.c.l.bf16 %v6060_v35  ;;  %v6015_v14 = vunpack.c.l.bf16 %v10897_v11 }
 0x8a7   :  { %3822 = vperm.xlu2 %6116, %v3317_v43   ;;  %v4871_v43 = vsel %vm4602_vm11, %v4591_v56, 0.0  ;;  %v3941_v56 = vperm.slane %v10755_v23, %v8335_v4 }
 0x8a8   :  { %v3799_v39 = vpop.permute.xlu0 %3798 }
 0x8a9   :  { %v4057_v16 = vperm.slane %v3799_v39, %v8298_v22  ;;  %v4590_v2 = vmul.f32 %v6011_v47, %v3799_v39  ;;  %v3757_v7 = vpop.permute.xlu2 %3756  ;;  %v3318_v22 = vmul.f32 %v12961_v48, %v10152_v32  ;;  %v10917_v24 = vpop.permute.xlu1 %3810 }
 0x8aa   :  { %v4030_v0 = vperm.slane %v3757_v7, %v8320_v13  ;;  %v4576_v1 = vmul.f32 %v5983_v18, %v3757_v7 }
 0x8ab   :  { %v4058_v58 = vsel %vm12960_vm3, %v4057_v16, %v10806_v52  ;;  %v4869_v12 = vsel %vm4602_vm11, %v4590_v2, 0.0 }
 0x8ac   :  { %v4870_v29 = vadd.f32 %v4869_v12, %v10813_v9  ;;  %v10901_v50 = vsel %vm1732_vm5, %v4030_v0, %v4029_v53  ;;  %v4836_v52 = vsel %vm4602_vm11, %v4576_v1, 0.0  ;;  %v4060_v6 = vsel %vm12963_vm0, %v4059_v59, %v4058_v58  ;;  %v12964_v0 = vld [vmem:[#allocation28_spill] sm:$0xff]  ;;  %v12965_v58 = vld [vmem:[#allocation25_spill] sm:$0xff] }
 0x8ad   :  { %v10906_v41 = vadd.f32 %v4836_v52, %v4835_v44  ;;  %v4530_v53 = vmul.f32 %v5891_v61, %v10755_v23  ;;  %v6068_v44 = vld [vmem:[%s12849_s26 + $0x120] sm:$0xff]   ;;  %v3288_v1 = vmul.f32 %v12964_v0, %v10115_v8  ;;  %v3272_v23 = vmul.f32 %v12965_v58, %v10106_v38 }
 0x8ae   :  { %3825 = vperm.xlu0 %6118, %v3318_v22   ;;  %v4872_v36 = vadd.f32 %v4871_v43, %v4870_v29  ;;  %v5920_v29 = vunpack.c.h.bf16 %v10795_v60  ;;  %v5892_v8 = vunpack.c.h.bf16 %v6060_v35  ;;  %vm12979_vm0 = vcmask 1042434  }
 0x8af   :  { %3639 = vperm.xlu2 %6116, %v3256_v54   ;;  %v4729_v63 = vsel %vm4602_vm11, %v4530_v53, 0.0  ;;  %v12966_v53 = vld [vmem:[#allocation72_spill] sm:$0xff] }
 0x8b0   :  { %v3616_v9 = vpop.permute.xlu0 %3615 }
 0x8b1   :  { %v3939_v47 = vperm.slane %v3616_v9, %v8326_v25  ;;  %v4529_v18 = vmul.f32 %v5888_v33, %v3616_v9  ;;  %v3805_v39 = vpop.permute.xlu2 %3804  ;;  %v3972_v33 = vperm.slane %v10797_v10, %v8335_v4 }
 0x8b2   :  { %v4061_v16 = vperm.slane %v3805_v39, %v8320_v13  ;;  %v4592_v2 = vmul.f32 %v6015_v14, %v3805_v39  ;;  %v6076_v14 = vld [vmem:[%s12849_s26 + $0x160] sm:$0xff]  }
 0x8b3   :  { %v3940_v7 = vsel %vm1736_vm6, %v3939_v47, %v10802_v49  ;;  %v4727_v59 = vsel %vm4602_vm11, %v4529_v18, 0.0  ;;  %v5923_v49 = vunpack.c.l.bf16 %v6068_v44  ;;  %v3320_v47 = vmul.f32 %v12966_v53, %v10152_v32  ;;  %v12967_v18 = vld [vmem:[#allocation139_spill] sm:$0xff] }
 0x8b4   :  { %v4728_v12 = vadd.f32 %v4727_v59, %v10810_v40  ;;  %v10929_v48 = vsel %vm1732_vm5, %v4061_v16, %v4060_v6  ;;  %v4873_v22 = vsel %vm4602_vm11, %v4592_v2, 0.0  ;;  %v3942_v13 = vsel %vm1740_vm7, %v3941_v56, %v3940_v7  ;;  %v10952_v56 = vpop.permute.xlu1 %3627 }
 0x8b5   :  { %v10934_v54 = vadd.f32 %v4873_v22, %v4872_v36  ;;  %v4546_v40 = vmul.f32 %v5923_v49, %v10797_v10  ;;  %v3319_v39 = vmul.f32 %v12967_v18, %v10152_v32  ;;  %vm12968_vm5 = vcmask 654912   ;;  %v10971_v49 = vld [vmem:[%s12849_s26 + $0x1a0] sm:$0xff]  }
 0x8b6   :  { %3735 = vperm.xlu0 %6118, %v3288_v1   ;;  %v4730_v52 = vadd.f32 %v4729_v63, %v4728_v12  ;;  %v5955_v59 = vunpack.c.l.bf16 %v6076_v14  ;;  %v5952_v1 = vunpack.c.h.bf16 %v10833_v42  ;;  %v5924_v32 = vunpack.c.h.bf16 %v6068_v44  ;;  %vm12969_vm4 = vmmov %vm12968_vm5 }
 0x8b7   :  { %3687 = vperm.xlu2 %6116, %v3272_v23   ;;  %v4003_v63 = vperm.slane %v10844_v62, %v8335_v4  ;;  %v4034_v18 = vperm.slane %v10877_v51, %v8335_v4  ;;  %vm12970_vm1 = vmmov %vm12969_vm4 }
 0x8b8   :  { %v3664_v38 = vpop.permute.xlu0 %3663  ;;  %vm12971_vm2 = vmmov %vm12970_vm1 }
 0x8b9   :  { %v3970_v6 = vperm.slane %v3664_v38, %v8326_v25  ;;  %v4545_v43 = vmul.f32 %v5920_v29, %v3664_v38  ;;  %v3622_v61 = vpop.permute.xlu2 %3621 }
 0x8ba   :  { %v3943_v60 = vperm.slane %v3622_v61, %v8358_v19  ;;  %v4531_v36 = vmul.f32 %v5892_v8, %v3622_v61 }
 0x8bb   :  { %v3971_v35 = vsel %vm1736_vm6, %v3970_v6, %v10837_v5  ;;  %v4764_v9 = vsel %vm4602_vm11, %v4545_v43, 0.0  ;;  %v4766_v5 = vsel %vm4602_vm11, %v4546_v40, 0.0  ;;  %v5987_v43 = vunpack.c.l.bf16 %v10971_v49 }
 0x8bc   :  { %v4765_v10 = vadd.f32 %v4764_v9, %v10842_v34  ;;  %v10956_v16 = vsel %vm12968_vm5, %v3943_v60, %v3942_v13  ;;  %v4731_v2 = vsel %vm4602_vm11, %v4531_v36, 0.0  ;;  %v3973_v7 = vsel %vm1740_vm7, %v3972_v33, %v3971_v35  ;;  %vm12981_vm5 = vmmov %vm12979_vm0 }
 0x8bd   :  { %v10961_v0 = vadd.f32 %v4731_v2, %v4730_v52  ;;  %v4562_v34 = vmul.f32 %v5955_v59, %v10844_v62  ;;  %v5984_v33 = vunpack.c.h.bf16 %v10865_v37  ;;  %v5956_v60 = vunpack.c.h.bf16 %v6076_v14 }
 0x8be   :  { %3831 = vperm.xlu0 %6118, %v3320_v47   ;;  %v4767_v58 = vadd.f32 %v4766_v5, %v4765_v10  ;;  %v4578_v35 = vmul.f32 %v5987_v43, %v10877_v51 }
 0x8bf   :  { %3828 = vperm.xlu2 %6116, %v3319_v39   ;;  %v4803_v6 = vsel %vm4602_vm11, %v4562_v34, 0.0  ;;  %v10997_v39 = vld [vmem:[%s12849_s26 + $0x1e0] sm:$0xff]  }
 0x8c0   :  { %v3712_v23 = vpop.permute.xlu0 %3711 }
 0x8c1   :  { %v4001_v12 = vperm.slane %v3712_v23, %v8326_v25  ;;  %v4561_v22 = vmul.f32 %v5952_v1, %v3712_v23  ;;  %v3670_v13 = vpop.permute.xlu2 %3669  ;;  %v4840_v1 = vsel %vm4602_vm11, %v4578_v35, 0.0  ;;  %v6016_v23 = vunpack.c.h.bf16 %v10897_v11 }
 0x8c2   :  { %v3974_v42 = vperm.slane %v3670_v13, %v8358_v19  ;;  %v4547_v44 = vmul.f32 %v5924_v32, %v3670_v13  ;;  %v6019_v32 = vunpack.c.l.bf16 %v10997_v39 }
 0x8c3   :  { %v4002_v29 = vsel %vm1736_vm6, %v4001_v12, %v10869_v30  ;;  %v4801_v8 = vsel %vm4602_vm11, %v4561_v22, 0.0  ;;  %v10988_v30 = vpop.permute.xlu1 %3675 }
 0x8c4   :  { %v4802_v52 = vadd.f32 %v4801_v8, %v10874_v45  ;;  %v10979_v38 = vsel %vm12969_vm4, %v3974_v42, %v3973_v7  ;;  %v4768_v62 = vsel %vm4602_vm11, %v4547_v44, 0.0  ;;  %v4004_v40 = vsel %vm1740_vm7, %v4003_v63, %v4002_v29  ;;  %v6061_v8 = vld [vmem:[%s12849_s26 + $0xe8] sm:$0xff]  }
 0x8c5   :  { %v10985_v61 = vadd.f32 %v4768_v62, %v4767_v58  ;;  %v4065_v42 = vperm.slane %v10917_v24, %v8335_v4  ;;  %v4927_v4 = vperm.slane %v10471_v55, 0  ;;  %vm12982_vm4 = vcmask 851712  }
 0x8c6   :  { %v4804_v36 = vadd.f32 %v4803_v6, %v4802_v52  ;;  %v4926_v6 = vperm.slane %v10461_v28, 0  ;;  %v6069_v28 = vld [vmem:[%s12849_s26 + $0x128] sm:$0xff]  }
 0x8c8   :  { %v3760_v45 = vpop.permute.xlu0 %3759  ;;  %v4934_v55 = vunpack.c.l.b16 %v4926_v6 }
 0x8c9   :  { %v4032_v9 = vperm.slane %v3760_v45, %v8326_v25  ;;  %v4577_v53 = vmul.f32 %v5984_v33, %v3760_v45  ;;  %v3718_v47 = vpop.permute.xlu2 %3717  ;;  %v4935_v33 = vunpack.c.l.b16 %v4927_v4  ;;  %v3947_v45 = vperm.slane %v10952_v56, %v8379_v17 }
 0x8ca   :  { %v4005_v37 = vperm.slane %v3718_v47, %v8358_v19  ;;  %v4563_v10 = vmul.f32 %v5956_v60, %v3718_v47 }
 0x8cb   :  { %v4033_v14 = vsel %vm1736_vm6, %v4032_v9, %v10901_v50  ;;  %v4838_v2 = vsel %vm4602_vm11, %v4577_v53, 0.0  ;;  %v11014_v50 = vpop.permute.xlu1 %3723 }
 0x8cc   :  { %v4839_v7 = vadd.f32 %v4838_v2, %v10906_v41  ;;  %v4006_v5 = vsel %vm12970_vm1, %v4005_v37, %v4004_v40  ;;  %v4805_v59 = vsel %vm4602_vm11, %v4563_v10, 0.0  ;;  %v4035_v51 = vsel %vm1740_vm7, %v4034_v18, %v4033_v14 }
 0x8cd   :  { %v11009_v58 = vadd.f32 %v4805_v59, %v4804_v36  ;;  %v4594_v41 = vmul.f32 %v6019_v32, %v10917_v24  ;;  %v5895_v40 = vunpack.c.l.bf16 %v6061_v8  ;;  %v5927_v37 = vunpack.c.l.bf16 %v6069_v28 }
 0x8ce   :  { %v11012_v34 = vadd.f32 %v4840_v1, %v4839_v7  ;;  %v11062_v10 = vsel %vm12975_vm15, %v4935_v33, %v4934_v55 }
 0x8cf   :  { %v4877_v24 = vsel %vm4602_vm11, %v4594_v41, 0.0 }
 0x8d0   :  { %v3808_v12 = vpop.permute.xlu0 %3807 }
 0x8d1   :  { %v4063_v22 = vperm.slane %v3808_v12, %v8326_v25  ;;  %v4593_v13 = vmul.f32 %v6016_v23, %v3808_v12  ;;  %v11018_v63 = vpop.permute.xlu2 %3765 }
 0x8d2   :  { %v4036_v44 = vperm.slane %v11018_v63, %v8358_v19 }
 0x8d3   :  { %v4064_v11 = vsel %vm1736_vm6, %v4063_v22, %v10929_v48  ;;  %v4875_v29 = vsel %vm4602_vm11, %v4593_v13, 0.0  ;;  %v11047_v35 = vpop.permute.xlu1 %3771  ;;  %vm12973_vm6 = vcmask 720512  }
 0x8d4   :  { %v4876_v25 = vadd.f32 %v4875_v29, %v10934_v54  ;;  %v11032_v52 = vsel %vm12971_vm2, %v4036_v44, %v4035_v51  ;;  %v11035_v62 = vsel %vm1740_vm7, %v4065_v42, %v4064_v11  ;;  %12972 = vst [vmem:[#allocation120_spill] sm:$0xff] %v11047_v35  ;;  %vm12974_vm7 = vcmask 786112   ;;  %vm12976_vm8 = vmmov %vm12973_vm6  ;;  %v11100_v42 = vld [vmem:[%s12849_s26 + $0x168] sm:$0xff]  }
 0x8d5   :  { %vm12978_vm3 = vmmov %vm12973_vm6  ;;  %v5896_v44 = vunpack.c.h.bf16 %v6061_v8  ;;  %v5928_v11 = vunpack.c.h.bf16 %v6069_v28  ;;  %v11119_v8 = vld [vmem:[%s12849_s26 + $0x1e8] sm:$0xff]  }
 0x8d6   :  { %v11039_v48 = vadd.f32 %v4877_v24, %v4876_v25  ;;  %v6024_v55 = vunpack.c.h.bf16 %v11119_v8  ;;  %vm12984_vm2 = vmmov %vm12974_vm7 }
 0x8d7   :  { %v4533_v6 = vmul.f32 %v5896_v44, %v10952_v56  ;;  %v4549_v33 = vmul.f32 %v5928_v11, %v10988_v30  ;;  %v6070_v44 = vld [vmem:[%s12849_s26 + $0x130] sm:$0xff]   ;;  %v11159_v11 = vld [vmem:[%s12849_s26 + $0x1b8] sm:$0xff]   ;;  %vm12990_vm15 = vmmov %vm12978_vm3 }
 0x8d8   :  { %v3625_v43 = vpop.permute.xlu0 %3624 }
 0x8d9   :  { %v3945_v60 = vperm.slane %v3625_v43, %v8370_v27  ;;  %v4532_v54 = vmul.f32 %v5895_v40, %v3625_v43  ;;  %v11043_v36 = vpop.permute.xlu2 %3813  ;;  %v4928_v40 = vperm.slane %v10646_v46, 0  ;;  %v11138_v46 = vld [vmem:[%s12849_s26 + $0x138] sm:$0xff]  }
 0x8db   :  { %v3946_v9 = vsel %vm12973_vm6, %v3945_v60, %v10956_v16  ;;  %v4733_v53 = vsel %vm4602_vm11, %v4532_v54, 0.0  ;;  %v11072_v51 = vpop.permute.xlu1 %3819  ;;  %v5988_v60 = vunpack.c.h.bf16 %v10971_v49  ;;  %v11130_v54 = vld [vmem:[%s12849_s26 + $0xf8] sm:$0xff]   ;;  %v4735_v49 = vsel %vm4602_vm11, %v4533_v6, 0.0  ;;  %vm12985_vm6 = vmmov %vm12982_vm4 }
 0x8dc   :  { %v11056_v47 = vadd.f32 %v4733_v53, %v10961_v0  ;;  %v11059_v18 = vsel %vm12974_vm7, %v3947_v45, %v3946_v9  ;;  %12977 = vst [vmem:[#allocation19_spill] sm:$0xff] %v11072_v51  ;;  %v4936_v53 = vunpack.c.l.b16 %v4928_v40  ;;  %v5903_v28 = vunpack.c.l.bf16 %v11130_v54  ;;  %vm12989_vm7 = vmmov %vm12984_vm2 }
 0x8e0   :  { %v3673_v14 = vpop.permute.xlu0 %3672 }
 0x8e1   :  { %v3976_v2 = vperm.slane %v3673_v14, %v8370_v27  ;;  %v4548_v16 = vmul.f32 %v5927_v37, %v3673_v14  ;;  %v11065_v7 = vpop.permute.xlu2 %3630  ;;  %v11146_v14 = vld [vmem:[%s12849_s26 + $0x178] sm:$0xff]  }
 0x8e3   :  { %v11069_v59 = vsel %vm12976_vm8, %v3976_v2, %v10979_v38  ;;  %v4770_v0 = vsel %vm4602_vm11, %v4548_v16, 0.0  ;;  %v11089_v38 = vsel %vm12979_vm0, %v10579_v3, %v10427_v26  ;;  %v11091_v22 = vpop.permute.xlu1 %3636  ;;  %v6062_v26 = vld [vmem:[%s12849_s26 + $0xf0] sm:$0xff]   ;;  %v5960_v3 = vunpack.c.h.bf16 %v11100_v42  ;;  %vm12991_vm8 = vmmov %vm12982_vm4 }
 0x8e4   :  { %v11075_v1 = vadd.f32 %v4770_v0, %v10985_v61  ;;  %v5899_v43 = vunpack.c.l.bf16 %v6062_v26  ;;  %v5900_v56 = vunpack.c.h.bf16 %v6062_v26  ;;  %v4772_v16 = vsel %vm4602_vm11, %v4549_v33, 0.0  ;;  %vm12995_vm0 = vmmov %vm12984_vm2 }
 0x8e5   :  { %v4565_v45 = vmul.f32 %v5960_v3, %v11014_v50  ;;  %v4579_v0 = vmul.f32 %v5988_v60, %v11018_v63  ;;  %v5935_v63 = vunpack.c.l.bf16 %v11138_v46  ;;  %v5931_v2 = vunpack.c.l.bf16 %v6070_v44 }
 0x8e6   :  { %v4534_v37 = vmul.f32 %v5899_v43, %v11065_v7 }
 0x8e7   :  { %v11164_v3 = vsel %vm4602_vm11, %v4565_v45, 0.0 }
 0x8e8   :  { %v11077_v32 = vpop.permute.xlu0 %3720  ;;  %v4737_v26 = vsel %vm4602_vm11, %v4534_v37, 0.0  ;;  %v4536_v37 = vmul.f32 %v5903_v28, %v11091_v22 }
 0x8e9   :  { %v4007_v23 = vperm.slane %v11077_v32, %v8370_v27  ;;  %v11081_v12 = vpop.permute.xlu2 %3678 }
 0x8ea   :  { %v4550_v28 = vmul.f32 %v5931_v2, %v11081_v12 }
 0x8eb   :  { %v11084_v41 = vsel %vm12978_vm3, %v4007_v23, %v4006_v5  ;;  %v11105_v5 = vld [vmem:[%s12849_s26 + $0x1a8] sm:$0xff]   ;;  %v11111_v29 = vpop.permute.xlu1 %3684  ;;  %v6020_v23 = vunpack.c.h.bf16 %v10997_v39 }
 0x8ec   :  { %v5992_v4 = vunpack.c.h.bf16 %v11105_v5 }
 0x8ee   :  { %v4581_v9 = vmul.f32 %v5992_v4, %v11047_v35  ;;  %v4597_v4 = vmul.f32 %v6024_v55, %v11072_v51  ;;  %v5959_v55 = vunpack.c.l.bf16 %v11100_v42  ;;  %v4736_v35 = vadd.f32 %v4735_v49, %v11056_v47  ;;  %v11194_v42 = vld [vmem:[%s12849_s26 + $0x170] sm:$0xff]  }
 0x8ef   :  { %v5932_v49 = vunpack.c.h.bf16 %v6070_v44  ;;  %v5904_v51 = vunpack.c.h.bf16 %v11130_v54 }
 0x8f0   :  { %v11093_v13 = vpop.permute.xlu0 %3768  ;;  %v11171_v6 = vsel %vm4602_vm11, %v4581_v9, 0.0  ;;  %v4842_v9 = vsel %vm4602_vm11, %v4579_v0, 0.0  ;;  %v11188_v43 = vsel %vm4602_vm11, %v4597_v4, 0.0  ;;  %v4595_v0 = vmul.f32 %v6020_v23, %v11043_v36 }
 0x8f1   :  { %v11095_v61 = vpop.permute.xlu2 %3726  ;;  %12980 = vst [vmem:[#allocation188_spill] sm:$0xff] %v11188_v43  ;;  %v4738_v47 = vadd.f32 %v4737_v26, %v4736_v35  ;;  %v11204_v4 = vadd.f32 %v4842_v9, %v11012_v34  ;;  %v5991_v43 = vunpack.c.l.bf16 %v11105_v5  ;;  %v5963_v23 = vunpack.c.l.bf16 %v11194_v42 }
 0x8f2   :  { %v6000_v35 = vunpack.c.h.bf16 %v11159_v11  ;;  %v4741_v34 = vsel %vm4602_vm11, %v4536_v37, 0.0  ;;  %v4879_v54 = vsel %vm4602_vm11, %v4595_v0, 0.0  ;;  %v6023_v26 = vunpack.c.l.bf16 %v11119_v8 }
 0x8f3   :  { %v11177_v45 = vpop.permute.xlu1 %3732 }
 0x8f8   :  { %v11113_v25 = vpop.permute.xlu0 %3816 }
 0x8f9   :  { %v11121_v24 = vpop.permute.xlu2 %3774 }
 0x8fb   :  { %v11234_v0 = vpop.permute.xlu1 %3780 }
 0x900   :  { %v3634_v39 = vpop.permute.xlu0 %3633 }
 0x901   :  { %v4535_v33 = vmul.f32 %v5900_v56, %v3634_v39  ;;  %v11174_v60 = vpop.permute.xlu2 %3822  ;;  %v3949_v56 = vperm.slane %v11065_v7, %v8386_v31  ;;  %v3951_v15 = vperm.slane %v3634_v39, %v8423_v57  ;;  %v11201_v7 = vsel %vm12981_vm5, %v4936_v53, %v11062_v10  ;;  %vm12996_vm5 = vmmov %vm12982_vm4 }
 0x902   :  { %v3953_v10 = vperm.slane %v11091_v22, %v12712_v20  ;;  %v4067_v53 = vperm.slane %v11043_v36, %v8358_v19  ;;  %v4774_v22 = vsel %vm4602_vm11, %v4550_v28, 0.0  ;;  %v4564_v19 = vmul.f32 %v5959_v55, %v11077_v32  ;;  %v11231_v36 = vld [vmem:[%s12849_s26 + $0x1b0] sm:$0xff]  }
 0x903   :  { %v4739_v40 = vsel %vm4602_vm11, %v4535_v33, 0.0  ;;  %v3950_v39 = vsel %vm12982_vm4, %v3949_v56, %v11059_v18  ;;  %v4552_v18 = vmul.f32 %v5935_v63, %v11111_v29  ;;  %vm12999_vm4 = vmmov %vm12995_vm0 }
 0x904   :  { %v4740_v44 = vadd.f32 %v4739_v40, %v4738_v47  ;;  %v3952_v5 = vsel %vm1760_vm12, %v3951_v15, %v3950_v39  ;;  %v4773_v40 = vadd.f32 %v4772_v16, %v11075_v1  ;;  %v3980_v15 = vperm.slane %v11081_v12, %v8386_v31 }
 0x905   :  { %v3954_v8 = vsel %vm1764_vm13, %v3953_v10, %v3952_v5  ;;  %v4580_v12 = vmul.f32 %v5991_v43, %v11093_v13  ;;  %v11245_v28 = vsel %vm12970_vm1, %v4067_v53, %v11035_v62  ;;  %v12983_v39 = vperm.slane %v10988_v30, %v8379_v17  ;;  %v11256_v43 = vld [vmem:[%s12849_s26 + $0x1f0] sm:$0xff]   ;;  %vm13003_vm1 = vmmov %vm12996_vm5 }
 0x906   :  { %v4742_v63 = vadd.f32 %v4741_v34, %v4740_v44  ;;  %v4775_v55 = vadd.f32 %v4774_v22, %v4773_v40  ;;  %v5995_v10 = vunpack.c.l.bf16 %v11231_v36  ;;  %v4807_v34 = vsel %vm4602_vm11, %v4564_v19, 0.0 }
 0x907   :  { %v3979_v44 = vsel %vm12984_vm2, %v12983_v39, %v11069_v59  ;;  %v3984_v30 = vperm.slane %v11111_v29, %v12712_v20  ;;  %v12986_v59 = vunpack.c.l.bf16 %v11146_v14  ;;  %v4844_v22 = vsel %vm4602_vm11, %v4580_v12, 0.0 }
 0x908   :  { %v3682_v2 = vpop.permute.xlu0 %3681  ;;  %v3981_v62 = vsel %vm12985_vm6, %v3980_v15, %v3979_v44  ;;  %v4808_v29 = vadd.f32 %v4807_v34, %v11009_v58  ;;  %v5996_v39 = vunpack.c.h.bf16 %v11231_v36  ;;  %v12987_v44 = vunpack.c.l.bf16 %v11159_v11 }
 0x909   :  { %v4551_v33 = vmul.f32 %v5932_v49, %v3682_v2  ;;  %v3640_v9 = vpop.permute.xlu2 %3639  ;;  %v3982_v1 = vperm.slane %v3682_v2, %v8423_v57  ;;  %v4880_v2 = vadd.f32 %v4879_v54, %v11039_v48  ;;  %v4015_v48 = vperm.slane %v11177_v45, %v12712_v20 }
 0x90a   :  { %v3955_v56 = vperm.slane %v3640_v9, %v12716_v21  ;;  %v4537_v37 = vmul.f32 %v5904_v51, %v3640_v9  ;;  %v4810_v34 = vadd.f32 %v11164_v3, %v4808_v29  ;;  %vm5036_vm2 = vcmask 1043456  }
 0x90b   :  { %v4776_v16 = vsel %vm4602_vm11, %v4551_v33, 0.0  ;;  %v4568_v33 = vmul.f32 %v12986_v59, %v11177_v45  ;;  %v3983_v9 = vsel %vm1760_vm12, %v3982_v1, %v3981_v62  ;;  %v11298_v62 = vpop.permute.xlu1 %3783  ;;  %v4038_v59 = vperm.slane %v11093_v13, %v8370_v27 }
 0x90c   :  { %v3956_v51 = vsel %vm1768_vm14, %v3955_v56, %v3954_v8  ;;  %v4743_v32 = vsel %vm4602_vm11, %v4537_v37, 0.0  ;;  %v4777_v53 = vadd.f32 %v4776_v16, %v4775_v55  ;;  %v6027_v56 = vunpack.c.l.bf16 %v11256_v43 }
 0x90d   :  { %v4083_v47 = vsel %vm1991_vm9, %v3956_v51, %v11089_v38  ;;  %v4744_v49 = vadd.f32 %v4743_v32, %v4742_v63  ;;  %v5936_v38 = vunpack.c.h.bf16 %v11138_v46  ;;  %v4778_v46 = vsel %vm4602_vm11, %v4552_v18, 0.0 }
 0x90e   :  { %v4582_v8 = vmul.f32 %v5995_v10, %v11121_v24  ;;  %v3985_v1 = vsel %vm1764_vm13, %v3984_v30, %v3983_v9  ;;  %v4779_v18 = vadd.f32 %v4778_v46, %v4777_v53  ;;  %v11280_v16 = vsel %vm4602_vm11, %v4568_v33, 0.0 }
 0x90f   :  { %v4745_v5 = vrot.slane %v4744_v49, 4  ;;  %v4845_v51 = vadd.f32 %v4844_v22, %v11204_v4  ;;  %v4584_v10 = vmul.f32 %v12987_v44, %v11234_v0  ;;  %v4046_v53 = vperm.slane %v11234_v0, %v12712_v20 }
 0x910   :  { %v11268_v40 = vpop.permute.xlu0 %3729  ;;  %v4848_v36 = vsel %vm4602_vm11, %v4582_v8, 0.0  ;;  %v4585_v33 = vmul.f32 %v6000_v35, %v11298_v62  ;;  %v4069_v13 = vperm.slane %v11113_v25, %v8370_v27  ;;  %v4039_v11 = vsel %vm12990_vm15, %v4038_v59, %v11032_v52 }
 0x911   :  { %v4746_v37 = vadd.f32 %v4745_v5, %v4744_v49  ;;  %v3688_v19 = vpop.permute.xlu2 %3687  ;;  %v4847_v3 = vadd.f32 %v11171_v6, %v4845_v51  ;;  %v4042_v27 = vperm.slane %v11121_v24, %v8386_v31  ;;  %v4598_v52 = vmul.f32 %v6027_v56, %v11174_v60 }
 0x912   :  { %v3986_v54 = vperm.slane %v3688_v19, %v12716_v21  ;;  %v4553_v15 = vmul.f32 %v5936_v38, %v3688_v19  ;;  %v12988_v38 = vperm.slane %v11014_v50, %v8379_v17  ;;  %v4011_v50 = vperm.slane %v11095_v61, %v8386_v31 }
 0x913   :  { %v4747_v63 = vrot.slane %v4746_v37, 2  ;;  %v4849_v29 = vadd.f32 %v4848_v36, %v4847_v3  ;;  %v4048_v56 = vperm.slane %v11298_v62, %v12716_v21  ;;  %vm5370_vm15 = vcmask 257024  }
 0x914   :  { %v3987_v32 = vsel %vm1768_vm14, %v3986_v54, %v3985_v1  ;;  %v4780_v55 = vsel %vm4602_vm11, %v4553_v15, 0.0  ;;  %v4010_v4 = vsel %vm12989_vm7, %v12988_v38, %v11084_v41  ;;  %v4566_v41 = vmul.f32 %v5963_v23, %v11095_v61 }
 0x915   :  { %v4748_v12 = vadd.f32 %v4747_v63, %v4746_v37  ;;  %v11286_v58 = vsel %vm1993_vm10, %v3987_v32, %v4083_v47  ;;  %v4781_v49 = vadd.f32 %v4780_v55, %v4779_v18  ;;  %v4596_v47 = vmul.f32 %v6023_v26, %v11113_v25  ;;  %v12992_v55 = vld [vmem:[#allocation108_spill] sm:$0xff] }
 0x916   :  { %v4852_v37 = vsel %vm4602_vm11, %v4584_v10, 0.0  ;;  %v5964_v61 = vunpack.c.h.bf16 %v11194_v42  ;;  %v4012_v35 = vsel %vm12991_vm8, %v4011_v50, %v4010_v4  ;;  %v4811_v15 = vsel %vm4602_vm11, %v4566_v41, 0.0  ;;  %v12993_v10 = vld [vmem:[#allocation120_spill] sm:$0xff] }
 0x917   :  { %v4749_v5 = vrot.slane %v4748_v12, 1  ;;  %v4782_v30 = vrot.slane %v4781_v49, 4  ;;  %v4881_v19 = vsel %vm4602_vm11, %v4596_v47, 0.0  ;;  %v4854_v63 = vsel %vm4602_vm11, %v4585_v33, 0.0  ;;  %v13000_v50 = vld [vmem:[#allocation188_spill] sm:$0xff] }
 0x918   :  { %v3778_v26 = vpop.permute.xlu0 %3777  ;;  %v4070_v42 = vsel %vm12978_vm3, %v4069_v13, %v11245_v28  ;;  %v4882_v18 = vadd.f32 %v4881_v19, %v4880_v2  ;;  %v4812_v44 = vadd.f32 %v4811_v15, %v4810_v34  ;;  %v12994_v24 = vperm.slane %v12993_v10, %v8379_v17  ;;  %v12997_v34 = vld [vmem:[#allocation19_spill] sm:$0xff]  ;;  %v5573_v19 = vld [vmem:[%s11700_s8 + $0x18] sm:$0xf] }
 0x919   :  { %v4750_v9 = vadd.f32 %v4749_v5, %v4748_v12  ;;  %v4783_v46 = vadd.f32 %v4782_v30, %v4781_v49  ;;  %v4583_v22 = vmul.f32 %v5996_v39, %v3778_v26  ;;  %v4567_v49 = vmul.f32 %v5964_v61, %v11268_v40 }
 0x91a   :  { %v4041_v38 = vsel %vm12995_vm0, %v12994_v24, %v4039_v11  ;;  %v4013_v28 = vperm.slane %v11268_v40, %v8423_v57  ;;  %v4044_v5 = vperm.slane %v3778_v26, %v8423_v57  ;;  %v12998_v30 = vperm.slane %v12997_v34, %v8379_v17  ;;  %v5575_v11 = vld [vmem:[%s11700_s8 + $0x24] sm:$0xf0] }
 0x91b   :  { %v4902_v54 = vpack.c.bf16 %v4750_v9, %v4750_v9  ;;  %v4784_v6 = vrot.slane %v4783_v46, 2  ;;  %v4850_v23 = vsel %vm4602_vm11, %v4583_v22, 0.0  ;;  %v4043_v47 = vsel %vm12996_vm5, %v4042_v27, %v4041_v38  ;;  %v5742_v27 = vld [vmem:[%s11700_s8 + $0x28] sm:$0xf0]  ;;  %v5569_v24 = vld [vmem:[%s11700_s8 + $0x8] sm:$0xf] }
 0x91c   :  { %v4851_v8 = vadd.f32 %v4850_v23, %v4849_v29  ;;  %v11350_v59 = vsel %vm12999_vm4, %v12998_v30, %v4070_v42  ;;  %v4884_v41 = vadd.f32 %v13000_v50, %v4882_v18  ;;  %v4885_v33 = vsel %vm4602_vm11, %v4598_v52, 0.0  ;;  %v5741_v29 = vld [vmem:[%s11700_s8 + $0x20] sm:$0xf0]  ;;  %v5738_v52 = vld [vmem:[%s11700_s8 + $0x8] sm:$0xf0] }
 0x91d   :  { %v5356_v25 = vunpack.c.l.b16 %v4902_v54  ;;  %v4785_v1 = vadd.f32 %v4784_v6, %v4783_v46  ;;  %v4929_v51 = vperm.slane %v4902_v54, 0  ;;  %v4813_v9 = vsel %vm4602_vm11, %v4567_v49, 0.0  ;;  %v5739_v38 = vld [vmem:[%s11700_s8 + $0x10] sm:$0xf0] }
 0x91e   :  { %v4853_v32 = vadd.f32 %v4852_v37, %v4851_v8  ;;  %v6028_v22 = vunpack.c.h.bf16 %v11256_v43  ;;  %v4073_v26 = vperm.slane %v11174_v60, %v8386_v31  ;;  %v4014_v37 = vsel %vm1760_vm12, %v4013_v28, %v4012_v35  ;;  %v5740_v43 = vld [vmem:[%s11700_s8 + $0x1c] sm:$0xf]  ;;  %v5581_v35 = vld [vmem:[%s11700_s8 + $0x20] sm:$0xf]  ;;  %v3829_v28 = vpop.permute.xlu2 %3828 }
 0x91f   :  { %v5363_v12 = vsel %vm1991_vm9, %v5356_v25, %v12992_v55  ;;  %v4786_v39 = vrot.slane %v4785_v1, 1  ;;  %v4937_v40 = vunpack.c.l.b16 %v4929_v51  ;;  %v5968_v13 = vunpack.c.h.bf16 %v11146_v14  ;;  %v11373_v14 = vld [vmem:[%s12849_s26 + $0x1f8] sm:$0xff]   ;;  %v5561_v25 = vld [vmem:[%s11700_s8] sm:$0xf]  ;;  %v5737_v55 = vld [vmem:[%s11700_s8 + $0x4] sm:$0xf] }
 0x920   :  { %v4855_v2 = vadd.f32 %v4854_v63, %v4853_v32  ;;  %v11340_v4 = vpop.permute.xlu0 %3825  ;;  %v4045_v6 = vsel %vm1760_vm12, %v4044_v5, %v4043_v47  ;;  %v5574_v23 = vor.u32 %v5741_v29, %v5573_v19  ;;  %v4814_v15 = vadd.f32 %v4813_v9, %v4812_v44 }
 0x921   :  { %v4787_v36 = vadd.f32 %v4786_v39, %v4785_v1  ;;  %v5578_v63 = vor.u32 %v5740_v43, %v5575_v11  ;;  %v4944_v1 = vsel %vm1991_vm9, %v4937_v40, %v11201_v7  ;;  %v4599_v51 = vmul.f32 %v6028_v22, %v11340_v4  ;;  %v5563_v7 = vld [vmem:[%s11700_s8 + $0xc] sm:$0xf0] }
 0x922   :  { %v4856_v3 = vrot.slane %v4855_v2, 4  ;;  %4991 = vmatpush.bf16.msra.mxu1 %v5574_v23  ;;  %v5582_v32 = vor.u32 %v5742_v27, %v5581_v35  ;;  %v6031_v49 = vunpack.c.l.bf16 %v11373_v14  ;;  %v5562_v44 = vor.u32 %v5738_v52, %v5561_v25 }
 0x923   :  { %v4903_v46 = vpack.c.bf16 %v4787_v36, %v4787_v36  ;;  %5004 = vmatpush.bf16.msra.mxu2 %v5578_v63  ;;  %v5566_v10 = vor.u32 %v5737_v55, %v5563_v7  ;;  %v4886_v36 = vadd.f32 %v4885_v33, %v4884_v41  ;;  %v4075_v5 = vperm.slane %v11340_v4, %v8423_v57  ;;  %v4909_v63 = vld [vmem:[%s11699_s7 + $0x8] sm:$0xf] }
 0x924   :  { %v4857_v17 = vadd.f32 %v4856_v3, %v4855_v2  ;;  %5017 = vmatpush.bf16.msra.mxu3 %v5582_v32  ;;  %v4016_v34 = vsel %vm1764_vm13, %v4015_v48, %v4014_v37  ;;  %v4816_v30 = vadd.f32 %v11280_v16, %v4814_v15  ;;  %v4887_v40 = vsel %vm4602_vm11, %v4599_v51, 0.0  ;;  %v4908_v16 = vld [vmem:[%s11699_s7] sm:$0xff] }
 0x925   :  { %v4930_v54 = vperm.slane %v4903_v46, 0  ;;  %v5357_v61 = vunpack.c.l.b16 %v4903_v46  ;;  %v4600_v4 = vmul.f32 %v6031_v49, %v3829_v28  ;;  %vm13001_vm9 = vcmask 1045509  }
 0x926   :  { %v4858_v8 = vrot.slane %v4857_v17, 2  ;;  %4992 = vmatpush.bf16.msra.mxu1 %v5562_v44  ;;  %v6032_v41 = vunpack.c.h.bf16 %v11373_v14  ;;  %v5026_v46 = vunpack.c.l.b16 %v4908_v16  ;;  %v5027_v22 = vunpack.c.h.b16 %v4908_v16  ;;  %vm13007_vm6 = vmmov %vm13001_vm9 }
 0x927   :  { %v4938_v42 = vunpack.c.l.b16 %v4930_v54  ;;  %v11390_v18 = vsel %vm1993_vm10, %v5357_v61, %v5363_v12  ;;  %v4047_v12 = vsel %vm1764_vm13, %v4046_v53, %v4045_v6  ;;  %v5570_v53 = vor.u32 %v5739_v38, %v5569_v24  ;;  %5005 = vmatpush.bf16.msra.mxu2 %v5566_v10 }
 0x928   :  { %v3736_v39 = vpop.permute.xlu0 %3735  ;;  %v4859_v50 = vadd.f32 %v4858_v8, %v4857_v17  ;;  %v4049_v57 = vsel %vm1768_vm14, %v4048_v56, %v4047_v12  ;;  %v4074_v62 = vsel %vm13003_vm1, %v4073_v26, %v11350_v59  ;;  %v5030_v19 = vpack.c.b16 %v5027_v22, %v5027_v22 }
 0x929   :  { %v4017_v2 = vperm.slane %v3736_v39, %v12716_v21  ;;  %v4569_v0 = vmul.f32 %v5968_v13, %v3736_v39  ;;  %v11415_v47 = vsel %vm1993_vm10, %v4938_v42, %v4944_v1  ;;  %vm13002_vm10 = vcmask 1046534   ;;  %5018 = vmatpush.bf16.msra.mxu3 %v5570_v53 }
 0x92a   :  { %v4860_v37 = vrot.slane %v4859_v50, 1  ;;  %v4076_v17 = vsel %vm1760_vm12, %v4075_v5, %v4074_v62  ;;  %v5029_v13 = vpack.c.b16 %v5026_v46, %v5026_v46  ;;  %v4077_v29 = vperm.slane %v3829_v28, %v12712_v20  ;;  %vm13008_vm7 = vmmov %vm13002_vm10  ;;  %v5663_v46 = vld [vmem:[%s11702_s10 + $0x90] sm:$0xf] }
 0x92b   :  { %v4018_v3 = vsel %vm1768_vm14, %v4017_v2, %v4016_v34  ;;  %v4817_v9 = vsel %vm4602_vm11, %v4569_v0, 0.0  ;;  %v4889_v43 = vsel %vm4602_vm11, %v4600_v4, 0.0  ;;  %v5041_v60 = vsel %vm5036_vm2, %v5030_v19, 0  ;;  %v5677_v4 = vld [vmem:[%s11702_s10 + $0xb4] sm:$0xf0] }
 0x92c   :  { %v4085_v45 = vsel %vm13001_vm9, %v4018_v3, %v11286_v58  ;;  %v4818_v48 = vadd.f32 %v4817_v9, %v4816_v30  ;;  %v4888_v58 = vadd.f32 %v4887_v40, %v4886_v36  ;;  %v5038_v31 = vsel %vm5036_vm2, %v5029_v13, 0  ;;  %5066 = vmatpush.bf16.msrb.mxu2 %v5041_v60  ;;  %v5675_v3 = vld [vmem:[%s11702_s10 + $0xa8] sm:$0xf]  ;;  %v5764_v9 = vld [vmem:[%s11702_s10 + $0xac] sm:$0xf] }
 0x92d   :  { %v4086_v33 = vsel %vm13002_vm10, %v4049_v57, %v4085_v45  ;;  %v4078_v26 = vsel %vm1764_vm13, %v4077_v29, %v4076_v17  ;;  %5053 = vmatpush.bf16.msrb.mxu1 %v5038_v31  ;;  %v4861_v35 = vadd.f32 %v4860_v37, %v4859_v50  ;;  %vm13004_vm12 = vcmask 1047559   ;;  %vm13005_vm13 = vmmov %vm13001_vm9  ;;  %v5683_v45 = vld [vmem:[%s11702_s10 + $0xb0] sm:$0xf]  ;;  %v5665_v17 = vld [vmem:[%s11702_s10 + $0x9c] sm:$0xf0] }
 0x92e   :  { %v4819_v56 = vrot.slane %v4818_v48, 4  ;;  %v4890_v23 = vadd.f32 %v4889_v43, %v4888_v58  ;;  %v5028_v1 = vunpack.c.l.b16 %v4909_v63  ;;  %vm13009_vm8 = vmmov %vm13004_vm12  ;;  %v5680_v62 = vor.u32 %v5764_v9, %v5677_v4  ;;  %v5762_v58 = vld [vmem:[%s11702_s10 + $0x98] sm:$0xf0]  ;;  %v5671_v13 = vld [vmem:[%s11702_s10 + $0x98] sm:$0xf] }
 0x92f   :  { %v4905_v42 = vpack.c.bf16 %v4861_v35, %v4861_v35  ;;  %vm13010_vm3 = vmmov %vm13009_vm8  ;;  %v5763_v19 = vld [vmem:[%s11702_s10 + $0xa0] sm:$0xf0]  ;;  %v5664_v29 = vor.u32 %v5762_v58, %v5663_v46  ;;  %v5653_v31 = vld [vmem:[%s11702_s10 + $0x84] sm:$0xf0]  ;;  %vm5032_vm0 = vcmask 64512  }
 0x930   :  { %v4820_v54 = vadd.f32 %v4819_v56, %v4818_v48  ;;  %v3832_v61 = vpop.permute.xlu0 %3831  ;;  %v5031_v52 = vpack.c.b16 %v5028_v1, %v5028_v1  ;;  %v5766_v48 = vld [vmem:[%s11702_s10 + $0xb8] sm:$0xf0]  ;;  %v5761_v56 = vld [vmem:[%s11702_s10 + $0x94] sm:$0xf]  ;;  %v5659_v60 = vld [vmem:[%s11702_s10 + $0x80] sm:$0xf] }
 0x931   :  { %v4079_v6 = vperm.slane %v3832_v61, %v12716_v21  ;;  %v4601_v14 = vmul.f32 %v6032_v41, %v3832_v61  ;;  %v4932_v49 = vperm.slane %v4905_v42, 0  ;;  %v5359_v24 = vunpack.c.l.b16 %v4905_v42  ;;  %v5759_v61 = vld [vmem:[%s11702_s10 + $0x80] sm:$0xf0]  ;;  %v5757_v63 = vld [vmem:[%s11702_s10 + $0x70] sm:$0xf0]  ;;  %v5776_v58 = vld [vmem:[%s11705_s13 + $0x8] sm:$0xff] }
 0x932   :  { %v4821_v59 = vrot.slane %v4820_v54, 2  ;;  %v5044_v12 = vsel %vm5036_vm2, %v5031_v52, 0  ;;  %v5684_v37 = vor.u32 %v5766_v48, %v5683_v45  ;;  %v5668_v43 = vor.u32 %v5761_v56, %v5665_v17  ;;  %v5755_v35 = vld [vmem:[%s11702_s10 + $0x64] sm:$0xf]  ;;  %v5627_v1 = vld [vmem:[%s11702_s10 + $0x48] sm:$0xf] }
 0x933   :  { %v4080_v11 = vsel %vm1768_vm14, %v4079_v6, %v4078_v26  ;;  %v4891_v20 = vsel %vm4602_vm11, %v4601_v14, 0.0  ;;  %5079 = vmatpush.bf16.msrb.mxu3 %v5044_v12  ;;  %v4940_v0 = vunpack.c.l.b16 %v4932_v49  ;;  %vm13006_vm14 = vmmov %vm13002_vm10  ;;  %v5758_v6 = vld [vmem:[%s11702_s10 + $0x7c] sm:$0xf]  ;;  %v5672_v14 = vor.u32 %v5763_v19, %v5671_v13  ;;  %v5753_v42 = vld [vmem:[%s11702_s10 + $0x50] sm:$0xf0] }
 0x934   :  { %v4822_v15 = vadd.f32 %v4821_v59, %v4820_v54  ;;  %v4087_v8 = vsel %vm13004_vm12, %v4080_v11, %v4086_v33  ;;  %v4892_v21 = vadd.f32 %v4891_v20, %v4890_v23  ;;  %v5651_v54 = vld [vmem:[%s11702_s10 + $0x78] sm:$0xf]  ;;  %v5760_v59 = vld [vmem:[%s11702_s10 + $0x88] sm:$0xf0]  ;;  %v5656_v23 = vor.u32 %v5758_v6, %v5653_v31  ;;  %v5639_v11 = vld [vmem:[%s11702_s10 + $0x60] sm:$0xf] }
 0x935   :  { %4089 = vst [vmem:[%s11710_s18] sm:$0xff] %v4087_v8  ;;  %v5652_v26 = vor.u32 %v5759_v61, %v5651_v54  ;;  %v5756_v20 = vld [vmem:[%s11702_s10 + $0x68] sm:$0xf0]  ;;  %v5641_v8 = vld [vmem:[%s11702_s10 + $0x6c] sm:$0xf0]  ;;  %v5629_v52 = vld [vmem:[%s11702_s10 + $0x54] sm:$0xf0]  ;;  %v5628_v49 = vor.u32 %v5753_v42, %v5627_v1 }
 0x936   :  { %v4823_v27 = vrot.slane %v4822_v15, 1  ;;  %v4893_v25 = vrot.slane %v4892_v21, 4  ;;  %v4907_v12 = vld [vmem:[%s13011_s27] sm:$0xf]  ;;  %v5744_v4 = vld [vmem:[%s11702_s10 + $0x8] sm:$0xf0] }
 0x937   :  { %v5743_v45 = vld [vmem:[%s11702_s10 + $0x4] sm:$0xf] }
 0x938   :  { %v4824_v51 = vadd.f32 %v4823_v27, %v4822_v15  ;;  %v4894_v32 = vadd.f32 %v4893_v25, %v4892_v21  ;;  %v5660_v15 = vor.u32 %v5760_v59, %v5659_v60  ;;  %v5647_v21 = vld [vmem:[%s11702_s10 + $0x68] sm:$0xf]  ;;  %v5640_v27 = vor.u32 %v5756_v20, %v5639_v11  ;;  %v5775_v56 = vld [vmem:[%s11705_s13] sm:$0xff] }
 0x939   :  { %v5644_v25 = vor.u32 %v5755_v35, %v5641_v8  ;;  %v11636_v59 = vld [vmem:[%s11701_s9] sm:$0x7] }
 0x93a   :  { %v4904_v55 = vpack.c.bf16 %v4824_v51, %v4824_v51  ;;  %v4895_v7 = vrot.slane %v4894_v32, 2  ;;  %v5752_v51 = vld [vmem:[%s11702_s10 + $0x4c] sm:$0xf]  ;;  %v5087_v11 = vperm.slane %v11636_v59, 0  ;;  %v5088_v1 = vperm.slane %v11636_v59, 1 }
 0x93c   :  { %v4931_v39 = vperm.slane %v4904_v55, 0  ;;  %v5358_v44 = vunpack.c.l.b16 %v4904_v55  ;;  %v4896_v10 = vadd.f32 %v4895_v7, %v4894_v32  ;;  %v5648_v32 = vor.u32 %v5757_v63, %v5647_v21  ;;  %v5635_v55 = vld [vmem:[%s11702_s10 + $0x50] sm:$0xf]  ;;  %v5754_v7 = vld [vmem:[%s11702_s10 + $0x58] sm:$0xf0] }
 0x93e   :  { %v5365_v38 = vsel %vm13005_vm13, %v5358_v44, %v11390_v18  ;;  %v4897_v28 = vrot.slane %v4896_v10, 1  ;;  %v4939_v2 = vunpack.c.l.b16 %v4931_v39  ;;  %v5765_v18 = vld [vmem:[%s11702_s10 + $0xb0] sm:$0xf0]  ;;  %v5632_v39 = vor.u32 %v5752_v51, %v5629_v52  ;;  %v5615_v44 = vld [vmem:[%s11702_s10 + $0x30] sm:$0xf] }
 0x93f   :  { %v5366_v53 = vsel %vm13006_vm14, %v5359_v24, %v5365_v38  ;;  %v5676_v33 = vor.u32 %v5765_v18, %v5675_v3  ;;  %v5749_v24 = vld [vmem:[%s11702_s10 + $0x34] sm:$0xf]  ;;  %v5636_v38 = vor.u32 %v5754_v7, %v5635_v55  ;;  %v5611_v3 = vld [vmem:[%s11702_s10 + $0x20] sm:$0xf]  ;;  %v5748_v18 = vld [vmem:[%s11702_s10 + $0x28] sm:$0xf0] }
 0x940   :  { %v4898_v36 = vadd.f32 %v4897_v28, %v4896_v10  ;;  %v4946_v5 = vsel %vm13007_vm6, %v4939_v2, %v11415_v47  ;;  %v5750_v10 = vld [vmem:[%s11702_s10 + $0x38] sm:$0xf0]  ;;  %v5617_v28 = vld [vmem:[%s11702_s10 + $0x3c] sm:$0xf0]  ;;  %v5623_v2 = vld [vmem:[%s11702_s10 + $0x38] sm:$0xf]  ;;  %v5612_v48 = vor.u32 %v5748_v18, %v5611_v3 }
 0x941   :  { %v4947_v34 = vsel %vm13008_vm7, %v4940_v0, %v4946_v5  ;;  %v5751_v0 = vld [vmem:[%s11702_s10 + $0x40] sm:$0xf0]  ;;  %v5603_v5 = vld [vmem:[%s11702_s10 + $0x18] sm:$0xf]  ;;  %v5772_v3 = vld [vmem:[%s11704_s12 + $0x28] sm:$0xff] }
 0x942   :  { %v4906_v30 = vpack.c.bf16 %v4898_v36, %v4898_v36  ;;  %v5620_v36 = vor.u32 %v5749_v24, %v5617_v28  ;;  %v5774_v28 = vld [vmem:[%s11704_s12 + $0x38] sm:$0xff] }
 0x943   :  { %5471 = vmatpush.bf16.msrb.mxu0 %v5774_v28 }
 0x944   :  { %v5360_v50 = vunpack.c.l.b16 %v4906_v30  ;;  %v4933_v40 = vperm.slane %v4906_v30, 0  ;;  %v5746_v30 = vld [vmem:[%s11702_s10 + $0x1c] sm:$0xf] }
 0x946   :  { %v4941_v57 = vunpack.c.l.b16 %v4933_v40  ;;  %v5367_v47 = vsel %vm13009_vm8, %v5360_v50, %v5366_v53  ;;  %v5616_v53 = vor.u32 %v5750_v10, %v5615_v44  ;;  %v5624_v50 = vor.u32 %v5751_v0, %v5623_v2  ;;  %v5605_v40 = vld [vmem:[%s11702_s10 + $0x24] sm:$0xf0]  ;;  %v5485_v2 = vld [vmem:[%s11706_s14] sm:$0xf] }
 0x947   :  { %v5368_v16 = vpack.c.b16 %v5367_v47, %v5367_v47  ;;  %v5591_v47 = vld [vmem:[%s11702_s10] sm:$0xf] }
 0x948   :  { %v4948_v41 = vsel %vm13010_vm3, %v4941_v57, %v4947_v34  ;;  %v5747_v34 = vld [vmem:[%s11702_s10 + $0x20] sm:$0xf0]  ;;  %v5608_v57 = vor.u32 %v5746_v30, %v5605_v40  ;;  %v5592_v46 = vor.u32 %v5744_v4, %v5591_v47 }
 0x949   :  { %v4949_v22 = vpack.c.b16 %v4948_v41, %v4948_v41  ;;  %5371 = vst.msk [vmem:[#allocation3] sm:$0xf] %vm5370_vm15, %v5368_v16  ;;  %v5604_v9 = vor.u32 %v5747_v34, %v5603_v5  ;;  %v5593_v16 = vld [vmem:[%s11702_s10 + $0xc] sm:$0xf0]  ;;  %v5599_v41 = vld [vmem:[%s11702_s10 + $0x8] sm:$0xf] }
 0x94a   :  { %v5484_v34 = vld [vmem:[%s13011_s27] sm:$0xf] }
 0x94b   :  { %5583 = vmatmul.msk.bf16.vlgmr.msra.gmra.mxu1 %vm4602_vm11, %v4949_v22  ;;  %5584 = vmatmul.msk.bf16.vlgmr.msra.gmra.mxu2 %vm4602_vm11, %v4949_v22 }
 0x94c   :  { %5585 = vmatmul.msk.bf16.vlgmr.msra.gmra.mxu3 %vm4602_vm11, %v4949_v22  ;;  %5264 = vmatpush.bf16.msra.mxu1 %v5676_v33  ;;  %v5745_v33 = vld [vmem:[%s11702_s10 + $0x10] sm:$0xf0]  ;;  %v5596_v22 = vor.u32 %v5743_v45, %v5593_v16  ;;  %v5089_v45 = vperm.slane %v11636_v59, 2 }
 0x94d   :  { %5277 = vmatpush.bf16.msra.mxu2 %v5680_v62  ;;  %5290 = vmatpush.bf16.msra.mxu3 %v5684_v37  ;;  %v5600_v62 = vor.u32 %v5745_v33, %v5599_v41  ;;  %v13012_v37 = vld [vmem:[#allocation7_spill] sm:$0xff] }
 0x950   :  { %5265 = vmatpush.bf16.msra.mxu1 %v5664_v29  ;;  %v5389_v17 = vld [vmem:[#allocation3] sm:$0xf] }
 0x951   :  { %5278 = vmatpush.bf16.msra.mxu2 %v5668_v43  ;;  %5291 = vmatpush.bf16.msra.mxu3 %v5672_v14 }
 0x954   :  { %5266 = vmatpush.bf16.msra.mxu1 %v5652_v26  ;;  %v5128_v26 = vld [vmem:[%s11703_s11] sm:$0x7] }
 0x955   :  { %5279 = vmatpush.bf16.msra.mxu2 %v5656_v23  ;;  %5292 = vmatpush.bf16.msra.mxu3 %v5660_v15  ;;  %v5130_v20 = vperm.slane %v5128_v26, 0  ;;  %v5131_v42 = vperm.slane %v5128_v26, 1  ;;  %v5132_v18 = vperm.slane %v5128_v26, 2 }
 0x958   :  { %5267 = vmatpush.bf16.msra.mxu1 %v5640_v27 }
 0x959   :  { %5280 = vmatpush.bf16.msra.mxu2 %v5644_v25  ;;  %5293 = vmatpush.bf16.msra.mxu3 %v5648_v32 }
 0x95b   :  { %5586 = vmatmul.msk.bf16.vlgmr.msrb.gmra.mxu1 %vm5032_vm0, %v4907_v12  ;;  %5587 = vmatmul.msk.bf16.vlgmr.msrb.gmra.mxu2 %vm5032_vm0, %v4907_v12 }
 0x95c   :  { %5588 = vmatmul.msk.bf16.vlgmr.msrb.gmra.mxu3 %vm5032_vm0, %v4907_v12  ;;  %5268 = vmatpush.bf16.msra.mxu1 %v5628_v49 }
 0x95d   :  { %5281 = vmatpush.bf16.msra.mxu2 %v5632_v39  ;;  %5294 = vmatpush.bf16.msra.mxu3 %v5636_v38 }
 0x960   :  { %5269 = vmatpush.bf16.msra.mxu1 %v5616_v53  ;;  %v5773_v53 = vld [vmem:[%s11704_s12 + $0x30] sm:$0xff] }
 0x961   :  { %5282 = vmatpush.bf16.msra.mxu2 %v5620_v36  ;;  %5295 = vmatpush.bf16.msra.mxu3 %v5624_v50  ;;  %v5492_v36 = vsel %vm5036_vm2, %v5485_v2, 0 }
 0x962   :  { %5472 = vmatpush.bf16.msrb.mxu0 %v5773_v53 }
 0x964   :  { %5270 = vmatpush.bf16.msra.mxu1 %v5604_v9 }
 0x965   :  { %5283 = vmatpush.bf16.msra.mxu2 %v5608_v57  ;;  %5296 = vmatpush.bf16.msra.mxu3 %v5612_v48  ;;  %v5771_v48 = vld [vmem:[%s11704_s12 + $0x20] sm:$0xff] }
 0x966   :  { %5473 = vmatpush.bf16.msrb.mxu0 %v5772_v3 }
 0x968   :  { %5271 = vmatpush.bf16.msra.mxu1 %v5592_v46 }
 0x969   :  { %5284 = vmatpush.bf16.msra.mxu2 %v5596_v22  ;;  %5297 = vmatpush.bf16.msra.mxu3 %v5600_v62 }
 0x96a   :  { %5474 = vmatpush.bf16.msrb.mxu0 %v5771_v48 }
 0x96b   :  { %5272 = vmatmul.bf16.vlgmr.msra.gmra.mxu1 %v13012_v37 }
 0x96c   :  { %5285 = vmatmul.bf16.vlgmr.msra.gmra.mxu2 %v13012_v37  ;;  %5298 = vmatmul.bf16.vlgmr.msra.gmra.mxu3 %v13012_v37 }
 0x96d   :  { %5416 = vmatpush.bf16.msrb.mxu2 %v5776_v58  ;;  %5501 = vmatpush.bf16.msrb.mxu1 %v5492_v36 }
 0x971   :  { %5417 = vmatpush.bf16.msrb.mxu2 %v5775_v56 }
 0x97b   :  { %5728 = vmatmul.msk.bf16.vlgmr.msrb.gmra.mxu1 %vm5032_vm0, %v5484_v34 }
 0x97c   :  { %5695 = vmatmul.msk.bf16.vlgmr.msrb.gmra.mxu2 %vm4602_vm11, %v5389_v17 }
 0x9c8   :  { %v4994_v13 = vpop.f32.mrf.mxu1 }
 0x9ce   :  { %v5007_v19 = vpop.f32.mrf.mxu2 }
 0x9cf   :  { %v11631_v29 = vpop.f32.mrf.mxu3 }
 0x9d0   :  { %v4996_v43 = vpop.f32.mrf.mxu1 }
 0x9d6   :  { %v5009_v54 = vpop.f32.mrf.mxu2 }
 0x9d7   :  { %v5022_v61 = vpop.f32.mrf.mxu3 }
 0x9d8   :  { %v5055_v6 = vpop.f32.mrf.mxu1 }
 0x9d9   :  { %v5056_v23 = vadd.f32 %v5055_v6, %v4994_v13  ;;  %v5770_v13 = vld [vmem:[%s11704_s12 + $0x18] sm:$0xff] }
 0x9da   :  { %5475 = vmatpush.bf16.msrb.mxu0 %v5770_v13 }
 0x9db   :  { %v5093_v21 = vadd.f32 %v5087_v11, %v5056_v23  ;;  %v5768_v23 = vld [vmem:[%s11704_s12 + $0x8] sm:$0xff] }
 0x9de   :  { %v5068_v14 = vpop.f32.mrf.mxu2 }
 0x9df   :  { %v5081_v31 = vpop.f32.mrf.mxu3  ;;  %v5069_v25 = vadd.f32 %v5068_v14, %v5007_v19 }
 0x9e0   :  { %v5057_v60 = vpop.f32.mrf.mxu1  ;;  %v5082_v41 = vadd.f32 %v5081_v31, %v11631_v29  ;;  %v5769_v31 = vld [vmem:[%s11704_s12 + $0x10] sm:$0xff] }
 0x9e1   :  { %v5094_v55 = vadd.f32 %v5088_v1, %v5069_v25  ;;  %5476 = vmatpush.bf16.msrb.mxu0 %v5769_v31 }
 0x9e2   :  { %v5095_v19 = vadd.f32 %v5089_v45, %v5082_v41 }
 0x9e5   :  { %5477 = vmatpush.bf16.msrb.mxu0 %v5768_v23 }
 0x9e6   :  { %v5070_v35 = vpop.f32.mrf.mxu2 }
 0x9e7   :  { %v5083_v15 = vpop.f32.mrf.mxu3 }
 0x9e8   :  { %v5273_v8 = vpop.f32.mrf.mxu1  ;;  %v6647_v15 = vld [vmem:[%s12002_s22] sm:$0xff] }
 0x9e9   :  { %v5274_v63 = vadd.f32 %v5273_v8, %v5130_v20 }
 0x9eb   :  { %v5303_v27 = vadd.f32 %v5274_v63, %v5093_v21  ;;  %v5767_v21 = vld [vmem:[%s11704_s12] sm:$0xff] }
 0x9ec   :  { %5478 = vmatpush.bf16.msrb.mxu0 %v5767_v21 }
 0x9ed   :  { %v5685_v51 = vmul.f32 -1.442695, %v5303_v27 }
 0x9ef   :  { %6636 = vpow2.f32 %v5685_v51  ;;  %v5286_v32 = vpop.f32.mrf.mxu2  ;;  %v5299_v52 = vpop.f32.mrf.mxu3 }
 0x9f0   :  { %v5287_v7 = vadd.f32 %v5286_v32, %v5131_v42  ;;  %v5275_v12 = vpop.f32.mrf.mxu1  ;;  %v5300_v33 = vadd.f32 %v5299_v52, %v5132_v18  ;;  %v6121_v52 = vld [vmem:[%s11707_s15] ss:$0 sm:$0xff] }
 0x9f2   :  { %v5323_v49 = vadd.f32 %v5287_v7, %v5094_v55 }
 0x9f4   :  { %v5686_v39 = vmul.f32 -1.442695, %v5323_v49 }
 0x9f5   :  { %v6637_v44 = vpop.eup %6636 }
 0x9f6   :  { %v5307_v10 = vadd.f32 1.0, %v6637_v44  ;;  %6638 = vpow2.f32 %v5686_v39 }
 0x9f7   :  { %v5288_v24 = vpop.f32.mrf.mxu2  ;;  %v5301_v38 = vpop.f32.mrf.mxu3 }
 0x9f8   :  { %6640 = vrcp.f32 %v5307_v10  ;;  %v5319_v57 = vand.u32 2147483648, %v5307_v10  ;;  %v5317_v4 = vand.u32 2147483647, %v5307_v10  ;;  %vm5313_vm5 = vweird.f32 %v5307_v10  ;;  %v5503_v1 = vpop.f32.mrf.mxu1 }
 0x9fa   :  { %v5320_v62 = vor.u32 1.1754944e-38, %v5319_v57  ;;  %vm5318_vm9 = vcmp.eq.f32.partialorder %v5317_v4, 8.507059e+37 }
 0x9fc   :  { %v6639_v0 = vpop.eup %6638 }
 0x9fd   :  { %v5327_v5 = vadd.f32 1.0, %v6639_v0 }
 0x9fe   :  { %v6641_v30 = vpop.eup %6640 }
 0x9ff   :  { %6642 = vrcp.f32 %v5327_v5  ;;  %v5309_v50 = vmul.f32 %v6641_v30, %v5307_v10  ;;  %v11656_v40 = vpop.f32.mrf.mxu2  ;;  %vm5314_vm11 = vweird.f32 %v6641_v30  ;;  %v5339_v43 = vand.u32 2147483648, %v5327_v5 }
 0xa00   :  { %vm5315_vm4 = vmor %vm5313_vm5, %vm5314_vm11  ;;  %v5337_v61 = vand.u32 2147483647, %v5327_v5  ;;  %vm5333_vm1 = vweird.f32 %v5327_v5  ;;  %v5505_v42 = vpop.f32.mrf.mxu1 }
 0xa01   :  { %v5310_v9 = vsub.f32 1.0, %v5309_v50  ;;  %v5340_v60 = vor.u32 1.1754944e-38, %v5339_v43 }
 0xa02   :  { %vm5338_vm12 = vcmp.eq.f32.partialorder %v5337_v61, 8.507059e+37 }
 0xa03   :  { %v5311_v47 = vmul.f32 %v6641_v30, %v5310_v9 }
 0xa05   :  { %v6643_v16 = vpop.eup %6642  ;;  %v5312_v46 = vadd.f32 %v6641_v30, %v5311_v47 }
 0xa06   :  { %v5329_v22 = vmul.f32 %v6643_v16, %v5327_v5  ;;  %vm5334_vm10 = vweird.f32 %v6643_v16 }
 0xa07   :  { %v5316_v58 = vsel %vm5315_vm4, %v6641_v30, %v5312_v46  ;;  %v5421_v56 = vpop.f32.mrf.mxu2  ;;  %vm5335_vm2 = vmor %vm5333_vm1, %vm5334_vm10 }
 0xa08   :  { %v5330_v37 = vsub.f32 1.0, %v5329_v22  ;;  %v5321_v17 = vsel %vm5318_vm9, %v5320_v62, %v5316_v58 }
 0xa09   :  { %v5343_v54 = vmul.f32 %v5321_v17, %v5300_v33 }
 0xa0a   :  { %v5331_v29 = vmul.f32 %v6643_v16, %v5330_v37 }
 0xa0b   :  { %v5344_v6 = vadd.f32 %v5343_v54, %v5095_v19 }
 0xa0c   :  { %v5332_v14 = vadd.f32 %v6643_v16, %v5331_v29 }
 0xa0d   :  { %6644 = vtanh.f32 %v5344_v6 }
 0xa0e   :  { %v5336_v59 = vsel %vm5335_vm2, %v6643_v16, %v5332_v14 }
 0xa0f   :  { %v5341_v26 = vsel %vm5338_vm12, %v5340_v60, %v5336_v59 }
 0xa10   :  { %v5346_v11 = vsub.f32 1.0, %v5341_v26  ;;  %v5348_v8 = vmul.f32 %v6647_v15, %v5341_v26 }
 0xa13   :  { %v6645_v20 = vpop.eup %6644 }
 0xa14   :  { %v5347_v35 = vmul.f32 %v6645_v20, %v5346_v11 }
 0xa16   :  { %v5349_v63 = vadd.f32 %v5348_v8, %v5347_v35 }
 0xa18   :  { %5350 = vst [vmem:[%s11709_s17] sm:$0xff] %v5349_v63  ;;  %v5351_v27 = vpack.c.bf16 %v5349_v63, %v5349_v63 }
 0xa1a   :  { %5352 = vst [vmem:[#allocation2] sm:$0xf] %v5351_v27 }
 0xa21   :  { %v5372_v25 = vld [vmem:[#allocation2] sm:$0xf] }
 0xa22   :  { %5479 = vmatmul.bf16.vlgmr.msrb.gmra.mxu0 %v5372_v25 }
 0xa9f   :  { %v5480_v51 = vpop.f32.mrf.mxu0 }
 0xaa0   :  { %v5481_v32 = vadd.f32 %v5480_v51, %v11656_v40 }
 0xaa2   :  { %v5507_v55 = vadd.f32 %v5503_v1, %v5481_v32 }
 0xaa4   :  { %v5512_v7 = vadd.f32 %v6121_v52, %v5507_v55 }
 0xaa6   :  { %5513 = vst [vmem:[%s11708_s16] sm:$0xff] %v5512_v7 }
 0xaa7   :  { %v5482_v12 = vpop.f32.mrf.mxu0 }
 0xaa8   :  { %5526 = vsyncpa [#allocation5], 1 }

</bundles_post_ra>
